<compile_context>
chip_gen: v7x
topology: tpu7x:2x2x1
jax: 0.10.0
libtpu: 0.0.40
codegen_flags: <defaults>
</compile_context>

<pallas_src>
import functools

import numpy as np
import jax
import jax.numpy as jnp
from jax import lax
from jax.experimental import pallas as pl
from jax.experimental.pallas import tpu as pltpu


# MXU input dtype: bf16 inputs + f32 accumulation roughly doubles MXU
# throughput on v6e/v7x and halves activation bytes; all element-wise /
# transcendental math and all accumulations stay in f32 (v5e has no bf16 VPU).
_MXU_DTYPE = jnp.bfloat16


# ----------------------------------------------------------------------------
# Shared math (traced inside the Pallas kernel AND used by the pure-JAX ref).
# ----------------------------------------------------------------------------
def _mm(x, w):
    """(B, T, Cin) @ (Cin, Cout) -> (B, T, Cout); bf16 MXU, f32 accumulation."""
    b, t, cin = x.shape
    y = jnp.dot(x.reshape(b * t, cin).astype(_MXU_DTYPE),
                w.astype(_MXU_DTYPE),
                preferred_element_type=jnp.float32)
    return y.reshape(b, t, w.shape[-1])


def _shifted(x, d):
    """Return (x[t-d], x[t+d]) along axis 1, zeros beyond the ends.

    One zero-pad per dilated conv (the filter+gate fusion already halved the
    number of these).  pltpu.roll could remove the remaining pad copy (edge
    values are discarded anyway); kept concatenate-based for robustness.
    """
    b, n, ch = x.shape
    z = jnp.zeros((b, d, ch), x.dtype)
    xpad = jnp.concatenate([z, x, z], axis=1)
    return xpad[:, 0:n, :], xpad[:, 2 * d:2 * d + n, :]


def _dconv3(x, w3, d):
    """'same'-padded dilated conv (K=3) as 3 shifted matmuls (no bias)."""
    xm, xp = _shifted(x, d)
    return _mm(xm, w3[0]) + _mm(x, w3[1]) + _mm(xp, w3[2])


def _wavenet_skip(in_a, c_a, fused, dilations, valid=None):
    """Front conv + gated residual stack; returns the skip accumulator.

    `valid` is a 0/1 time mask (broadcastable) that re-imposes the module's
    per-layer "same" zero padding at the *global* sequence boundaries when
    running on a halo'd tile; pass None when running on the full sequence.
    """
    front_w, front_b, fg_w, fg_b, cond_w, rs_w, rs_b = fused[:7]
    R = front_w.shape[-1]
    G = fg_w.shape[-1] // 2
    S = rs_w.shape[-1] - R
    inv_sqrt2 = np.float32(np.sqrt(0.5))

    # Wavenet.front_conv: Conv(k=3, d=1, non-causal) + ReLU
    h = jax.nn.relu(_dconv3(in_a, front_w, 1) + front_b)
    if valid is not None:
        h = h * valid

    # All 2L conditioning 1x1 convs hoisted into one lane-dense matmul.
    cond = _mm(c_a, cond_w)                               # (B, T, 2*G*L)

    skip = jnp.zeros(h.shape[:2] + (S,), jnp.float32)
    for l, d in enumerate(dilations):
        # filter+gate dilated convs fused (Cout = 2G); conv + conditioning
        # biases folded into a single per-layer bias.
        pre = (_dconv3(h, fg_w[l], d)
               + cond[..., 2 * G * l:2 * G * (l + 1)] + fg_b[l])
        gated = jnp.tanh(pre[..., :G]) * jax.nn.sigmoid(pre[..., G:])
        # res + skip 1x1 convs fused into one matmul (Cout = R + S).
        rs = _mm(gated, rs_w[l]) + rs_b[l]
        h = (h + rs[..., :R]) * inv_sqrt2
        if valid is not None:
            h = h * valid
        skip = skip + rs[..., R:]
    return skip


def _final_head(skip, fused):
    """Wavenet.final_conv: ReLU -> 1x1 conv -> ReLU -> ZeroConv1d (scale folded)."""
    final_w, final_b, zw, zb = fused[7:]
    net = jax.nn.relu(skip)
    net = jax.nn.relu(_mm(net, final_w) + final_b)
    return _mm(net, zw) + zb


def _fuse_params(params):
    """Fold the PyTorch-style parameter list into MXU-friendly fused weights."""
    (front_w, front_b, filt_w, filt_b, gate_w, gate_b,
     filt_c_w, filt_c_b, gate_c_w, gate_c_b,
     res_w, res_b, skip_w, skip_b,
     final_w, final_b, zero_w, zero_b, zero_scale) = params
    L = filt_w.shape[0]
    fg_w = jnp.concatenate([filt_w, gate_w], axis=-1)                        # (L,3,R,2G)
    fg_b = jnp.concatenate([filt_b + filt_c_b, gate_b + gate_c_b], axis=-1)  # (L,1,1,2G)
    cond_w = jnp.concatenate(
        [jnp.concatenate([filt_c_w[l], gate_c_w[l]], axis=-1) for l in range(L)],
        axis=-1)                                                             # (cin/2, 2GL)
    rs_w = jnp.concatenate([res_w, skip_w], axis=-1)                         # (L,G,R+S)
    rs_b = jnp.concatenate([res_b, skip_b], axis=-1)                         # (L,1,1,R+S)
    zscale = jnp.exp(zero_scale * 3.0)                                       # (1,1,2*half)
    zw_eff = zero_w * zscale[0]
    zb_eff = zero_b * zscale
    md = _MXU_DTYPE
    return (front_w.astype(md), front_b,
            fg_w.astype(md), fg_b,
            cond_w.astype(md),
            rs_w.astype(md), rs_b,
            final_w.astype(md), final_b,
            zw_eff.astype(md), zb_eff)


# ----------------------------------------------------------------------------
# Pallas kernel (one T-tile per grid step).
# ----------------------------------------------------------------------------
def _make_kernel(*, tile_t, halo, win, t_real, half, dilations):
    def kernel(ina_ref, ca_ref, inb_ref,
               fw_ref, fb_ref, fgw_ref, fgb_ref, cw_ref,
               rsw_ref, rsb_ref, finw_ref, finb_ref, zw_ref, zb_ref,
               out_ref, ld_ref):
        i = pl.program_id(0)
        in_a = ina_ref[0]                    # (B, win, half)   halo'd window
        c_a = ca_ref[0]                      # (B, win, cin/2)  halo'd window
        in_b = inb_ref[...]                  # (B, half, tile_t) NCW, lane-dense

        # 0/1 mask of window positions inside the real sequence [0, T).
        # Positions outside must be zeroed before every dilated conv to match
        # per-layer "same" zero padding at the sequence ends; interior tiles
        # get an all-ones mask (multiplying by 1.0 is exact).
        pos = lax.broadcasted_iota(jnp.int32, (1, win, 1), 1) + (
            i * tile_t - halo)
        valid = jnp.logical_and(pos >= 0, pos < t_real).astype(jnp.float32)

        fused = (fw_ref[...], fb_ref[...], fgw_ref[...], fgb_ref[...],
                 cw_ref[...], rsw_ref[...], rsb_ref[...],
                 finw_ref[...], finb_ref[...], zw_ref[...], zb_ref[...])

        skip = _wavenet_skip(in_a, c_a, fused, dilations, valid)
        # Only the central tile_t positions are exact (halo = receptive field);
        # run the 1x1 head on that slice only.
        skip_c = skip[:, halo:halo + tile_t, :]
        net = _final_head(skip_c, fused)                # (B, tile_t, 2*half)

        # Affine coupling in NCW layout so the store is lane-dense
        # (last dim = tile_t, multiple of 128) instead of a 2-wide masked store.
        net_ncw = jnp.transpose(net, (0, 2, 1))         # (B, 2*half, tile_t)
        log_s = net_ncw[:, :half, :]
        t = net_ncw[:, half:, :]
        out_ref[...] = ((in_b - t) * jnp.exp(-log_s)).astype(out_ref.dtype)

        # Per-tile partial logdet (right-padding positions masked out).  The
        # tiny cross-tile sum happens in the wrapper, which keeps every grid
        # step independent ("parallel" grid -> megacore sharding on v7x).
        valid_c = valid[:, halo:halo + tile_t, :]
        ld = -jnp.sum(net[..., :half] * valid_c)
        ld_ref[...] = jnp.full((1, 8, 128), ld, dtype=jnp.float32)

    return kernel


# ----------------------------------------------------------------------------
# Wrapper: layout staging, halo'd windows, pallas_call.
# ----------------------------------------------------------------------------
@functools.partial(jax.jit, static_argnames=("dilations", "tile_t"))
def affine_coupling_forward(x, c, params, dilations, tile_t=256):
    """x: (B, in_channel, T), c: (B, cin_channel, T)  [PyTorch NCW layout]."""
    B, Cx, T = x.shape
    half = Cx // 2
    c_half = c.shape[1] // 2
    L = len(dilations)

    assert tile_t % 128 == 0, "tile_t must be a multiple of 128 (lane width)"
    halo = 1 + sum(dilations)          # receptive-field half-width (K=3 convs)
    halo = ((halo + 7) // 8) * 8       # keep slices sublane(8)-aligned
    n_tiles = pl.cdiv(T, tile_t)
    t_pad = n_tiles * tile_t
    win = tile_t + 2 * halo

    fused = _fuse_params(params)

    # ---- halo'd, channels-last windows for the conv inputs (built once; each
    #      tile is then a single contiguous DMA, auto double-buffered) --------
    in_a_cl = jnp.transpose(x[:, :half, :], (0, 2, 1)).astype(jnp.float32)
    c_a_cl = jnp.transpose(c[:, :c_half, :], (0, 2, 1)).astype(jnp.float32)
    pad_cfg = ((0, 0), (halo, halo + t_pad - T), (0, 0))
    in_a_p = jnp.pad(in_a_cl, pad_cfg)
    c_a_p = jnp.pad(c_a_cl, pad_cfg)
    idx = (jnp.arange(n_tiles, dtype=jnp.int32)[:, None] * tile_t
           + jnp.arange(win, dtype=jnp.int32)[None, :])
    in_a_win = jnp.transpose(in_a_p[:, idx, :], (1, 0, 2, 3))  # (n,B,win,half)
    c_a_win = jnp.transpose(c_a_p[:, idx, :], (1, 0, 2, 3))    # (n,B,win,c/2)

    # in_b / out stay in NCW so the kernel's loads and stores are lane-dense.
    in_b_ncw = jnp.pad(x[:, half:, :].astype(jnp.float32),
                       ((0, 0), (0, 0), (0, t_pad - T)))

    kernel = _make_kernel(tile_t=tile_t, halo=halo, win=win, t_real=T,
                          half=half, dilations=dilations)

    def _const(nd):
        return lambda i, _nd=nd: (0,) * _nd

    in_specs = [
        pl.BlockSpec((1, B, win, half), lambda i: (i, 0, 0, 0)),
        pl.BlockSpec((1, B, win, c_half), lambda i: (i, 0, 0, 0)),
        pl.BlockSpec((B, half, tile_t), lambda i: (0, 0, i)),
    ] + [pl.BlockSpec(p.shape, _const(p.ndim)) for p in fused]

    out_specs = (
        pl.BlockSpec((B, half, tile_t), lambda i: (0, 0, i)),
        pl.BlockSpec((1, 8, 128), lambda i: (i, 0, 0)),
    )
    out_shape = (
        jax.ShapeDtypeStruct((B, half, t_pad), jnp.float32),
        jax.ShapeDtypeStruct((n_tiles, 8, 128), jnp.float32),
    )

    # advisory cost estimate so XLA schedules around the custom call sensibly
    R = params[0].shape[-1]
    G = params[2].shape[-1]
    S = params[12].shape[-1]
    per_pos_flops = 2 * (3 * half * R
                         + L * (3 * R * 2 * G + G * (R + S))
                         + c_half * 2 * G * L
                         + S * S + S * 2 * half)
    cost = pl.CostEstimate(
        flops=int(B * t_pad * per_pos_flops),
        transcendentals=int(B * t_pad * (2 * G * L + 2 * half)),
        bytes_accessed=int(sum(a.size * a.dtype.itemsize
                               for a in (in_a_win, c_a_win, in_b_ncw, *fused))
                           + B * half * t_pad * 4 + n_tiles * 8 * 128 * 4),
    )

    out_ncw, ld_blocks = pl.pallas_call(
        kernel,
        grid=(n_tiles,),
        in_specs=in_specs,
        out_specs=out_specs,
        out_shape=out_shape,
        compiler_params=pltpu.CompilerParams(
            dimension_semantics=("parallel",),
            vmem_limit_bytes=48 * 1024 * 1024,
        ),
        cost_estimate=cost,
    )(in_a_win, c_a_win, in_b_ncw, *fused)

    # in_a passthrough is done here (not written by the kernel).
    out = jnp.concatenate(
        [x[:, :half, :].astype(jnp.float32), out_ncw[:, :, :T]], axis=1)
    logdet = jnp.sum(ld_blocks[:, 0, 0])
    return out, logdet


# ----------------------------------------------------------------------------
# Pure-JAX reference (full-sequence, per-layer zero padding; same fused math
# and same bf16 MXU casts as the kernel).
# ----------------------------------------------------------------------------
def _reference_forward(x, c, params, dilations):
    B, Cx, T = x.shape
    half = Cx // 2
    c_half = c.shape[1] // 2
    fused = _fuse_params(params)
    in_a = jnp.transpose(x[:, :half, :], (0, 2, 1)).astype(jnp.float32)
    in_b = jnp.transpose(x[:, half:, :], (0, 2, 1)).astype(jnp.float32)
    c_a = jnp.transpose(c[:, :c_half, :], (0, 2, 1)).astype(jnp.float32)
    skip = _wavenet_skip(in_a, c_a, fused, dilations, valid=None)
    net = _final_head(skip, fused)
    log_s = net[..., :half]
    t = net[..., half:]
    out_b = (in_b - t) * jnp.exp(-log_s)
    out = jnp.concatenate(
        [x[:, :half, :].astype(jnp.float32), jnp.transpose(out_b, (0, 2, 1))],
        axis=1)
    return out, jnp.sum(-log_s)


# ----------------------------------------------------------------------------
# Deterministic parameter init (shapes follow the PyTorch module __init__).
# ----------------------------------------------------------------------------
def init_params(key, in_channel, cin_channel, filter_size, num_layer):
    half = in_channel // 2
    cin_half = cin_channel // 2
    R = G = S = filter_size
    L = num_layer
    keys = iter(jax.random.split(key, 32))

    def w(shape, fan_in):
        return jax.random.normal(next(keys), shape, jnp.float32) * np.float32(
            np.sqrt(2.0 / fan_in))

    params = [
        # front conv (k=3): (K, Cin, Cout), bias (1,1,Cout)
        w((3, half, R), 3 * half), jnp.zeros((1, 1, R), jnp.float32),
        # per-layer stacked filter/gate dilated convs (k=3)
        w((L, 3, R, G), 3 * R), jnp.zeros((L, 1, 1, G), jnp.float32),
        w((L, 3, R, G), 3 * R), jnp.zeros((L, 1, 1, G), jnp.float32),
        # per-layer 1x1 conditioning convs
        w((L, cin_half, G), cin_half), jnp.zeros((L, 1, 1, G), jnp.float32),
        w((L, cin_half, G), cin_half), jnp.zeros((L, 1, 1, G), jnp.float32),
        # per-layer res / skip 1x1 convs
        w((L, G, R), G), jnp.zeros((L, 1, 1, R), jnp.float32),
        w((L, G, S), G), jnp.zeros((L, 1, 1, S), jnp.float32),
        # final 1x1 conv
        w((S, S), S), jnp.zeros((1, 1, S), jnp.float32),
        # ZeroConv1d: small non-zero init (PyTorch zero-inits these; see header)
        0.01 * jax.random.normal(next(keys), (S, in_channel), jnp.float32),
        jnp.zeros((1, 1, in_channel), jnp.float32),
        jnp.zeros((1, 1, in_channel), jnp.float32),  # scale parameter
    ]
    return params


# ----------------------------------------------------------------------------
if __name__ == "__main__":
    in_channel, cin_channel = 4, 8
    filter_size, num_layer = 32, 3   # hidden channels are 32 in this demo; real
    # WaveGlow-style configs (256) fill the 128-wide lanes much better.
    B, T = 2, 512
    dilations = tuple(2 ** n for n in range(num_layer))
    half = in_channel // 2

    key = jax.random.PRNGKey(0)
    kx, kc, kp = jax.random.split(key, 3)
    x = jax.random.normal(kx, (B, in_channel, T), jnp.float32)
    c = jax.random.normal(kc, (B, cin_channel, T), jnp.float32)
    params = init_params(kp, in_channel, cin_channel, filter_size, num_layer)

    out, logdet = affine_coupling_forward(x, c, params, dilations=dilations,
                                          tile_t=128)
    jax.block_until_ready((out, logdet))

    # pure-JAX reference (same fused math, full-sequence padding)
    ref_out, ref_logdet = _reference_forward(x, c, params, dilations)

    np.testing.assert_allclose(np.asarray(out), np.asarray(ref_out),
                               rtol=1e-3, atol=1e-3)
    np.testing.assert_allclose(float(logdet), float(ref_logdet),
                               rtol=5e-3, atol=5e-3)
    assert out.shape == (B, in_channel, T)
    # first half of channels must pass through unchanged
    np.testing.assert_allclose(np.asarray(out[:, :half, :]),
                               np.asarray(x[:, :half, :]))

    print("KERNEL_OK")
</pallas_src>

<mosaic_0001>
module attributes {stable_mosaic.version = 11 : i64} {
  func.func @kernel(%arg0: i32, %arg1: memref<1x2x144x2xf32, #tpu.memory_space<vmem>>, %arg2: memref<1x2x144x4xf32, #tpu.memory_space<vmem>>, %arg3: memref<2x2x128xf32, #tpu.memory_space<vmem>>, %arg4: memref<3x2x32xbf16, #tpu.memory_space<vmem>>, %arg5: memref<1x1x32xf32, #tpu.memory_space<vmem>>, %arg6: memref<3x3x32x64xbf16, #tpu.memory_space<vmem>>, %arg7: memref<3x1x1x64xf32, #tpu.memory_space<vmem>>, %arg8: memref<4x192xbf16, #tpu.memory_space<vmem>>, %arg9: memref<3x32x64xbf16, #tpu.memory_space<vmem>>, %arg10: memref<3x1x1x64xf32, #tpu.memory_space<vmem>>, %arg11: memref<32x32xbf16, #tpu.memory_space<vmem>>, %arg12: memref<1x1x32xf32, #tpu.memory_space<vmem>>, %arg13: memref<32x4xbf16, #tpu.memory_space<vmem>>, %arg14: memref<1x1x4xf32, #tpu.memory_space<vmem>>, %arg15: memref<2x2x128xf32, #tpu.memory_space<vmem>>, %arg16: memref<1x8x128xf32, #tpu.memory_space<vmem>>) attributes {dimension_semantics = [#tpu.dimension_semantics<parallel>], iteration_bounds = array<i64: 4>, scalar_prefetch = 0 : i64, scratch_operands = 0 : i64, tpu.core_type = #tpu.core_type<tc>, window_params = [{transform_indices = @transform_0, window_bounds = array<i64: 1, 2, 144, 2>}, {transform_indices = @transform_1, window_bounds = array<i64: 1, 2, 144, 4>}, {transform_indices = @transform_2, window_bounds = array<i64: 2, 2, 128>}, {pipeline_mode = #tpu.pipeline_mode<synchronous>, transform_indices = @transform_3, window_bounds = array<i64: 3, 2, 32>}, {pipeline_mode = #tpu.pipeline_mode<synchronous>, transform_indices = @transform_4, window_bounds = array<i64: 1, 1, 32>}, {pipeline_mode = #tpu.pipeline_mode<synchronous>, transform_indices = @transform_5, window_bounds = array<i64: 3, 3, 32, 64>}, {pipeline_mode = #tpu.pipeline_mode<synchronous>, transform_indices = @transform_6, window_bounds = array<i64: 3, 1, 1, 64>}, {pipeline_mode = #tpu.pipeline_mode<synchronous>, transform_indices = @transform_7, window_bounds = array<i64: 4, 192>}, {pipeline_mode = #tpu.pipeline_mode<synchronous>, transform_indices = @transform_8, window_bounds = array<i64: 3, 32, 64>}, {pipeline_mode = #tpu.pipeline_mode<synchronous>, transform_indices = @transform_9, window_bounds = array<i64: 3, 1, 1, 64>}, {pipeline_mode = #tpu.pipeline_mode<synchronous>, transform_indices = @transform_10, window_bounds = array<i64: 32, 32>}, {pipeline_mode = #tpu.pipeline_mode<synchronous>, transform_indices = @transform_11, window_bounds = array<i64: 1, 1, 32>}, {pipeline_mode = #tpu.pipeline_mode<synchronous>, transform_indices = @transform_12, window_bounds = array<i64: 32, 4>}, {pipeline_mode = #tpu.pipeline_mode<synchronous>, transform_indices = @transform_13, window_bounds = array<i64: 1, 1, 4>}, {transform_indices = @transform_14, window_bounds = array<i64: 2, 2, 128>}, {transform_indices = @transform_15, window_bounds = array<i64: 1, 8, 128>}]} {
    %c0 = arith.constant 0 : index
    %c0_0 = arith.constant 0 : index
    %c0_1 = arith.constant 0 : index
    %c0_2 = arith.constant 0 : index
    %0 = vector.load %arg1[%c0, %c0_0, %c0_1, %c0_2] : memref<1x2x144x2xf32, #tpu.memory_space<vmem>>, vector<1x2x144x2xf32>
    %1 = vector.shape_cast %0 : vector<1x2x144x2xf32> to vector<2x144x2xf32>
    %c0_3 = arith.constant 0 : index
    %c0_4 = arith.constant 0 : index
    %c0_5 = arith.constant 0 : index
    %c0_6 = arith.constant 0 : index
    %2 = vector.load %arg2[%c0_3, %c0_4, %c0_5, %c0_6] : memref<1x2x144x4xf32, #tpu.memory_space<vmem>>, vector<1x2x144x4xf32>
    %3 = vector.shape_cast %2 : vector<1x2x144x4xf32> to vector<2x144x4xf32>
    %c0_7 = arith.constant 0 : index
    %c0_8 = arith.constant 0 : index
    %c0_9 = arith.constant 0 : index
    %4 = vector.load %arg3[%c0_7, %c0_8, %c0_9] : memref<2x2x128xf32, #tpu.memory_space<vmem>>, vector<2x2x128xf32>
    %5 = tpu.iota {dimensions = array<i32: 1>} : vector<1x144x1xi32>
    %c128_i32 = arith.constant 128 : i32
    %6 = arith.muli %arg0, %c128_i32 : i32
    %c8_i32 = arith.constant 8 : i32
    %7 = arith.subi %6, %c8_i32 : i32
    %8 = vector.broadcast %7 : i32 to vector<1x144x1xi32>
    %9 = arith.addi %5, %8 : vector<1x144x1xi32>
    %c0_i32 = arith.constant 0 : i32
    %10 = vector.broadcast %c0_i32 : i32 to vector<1x144x1xi32>
    %11 = arith.cmpi sge, %9, %10 : vector<1x144x1xi32>
    %c512_i32 = arith.constant 512 : i32
    %12 = vector.broadcast %c512_i32 : i32 to vector<1x144x1xi32>
    %13 = arith.cmpi slt, %9, %12 : vector<1x144x1xi32>
    %14 = arith.andi %11, %13 : vector<1x144x1xi1>
    %15 = arith.extui %14 : vector<1x144x1xi1> to vector<1x144x1xi32>
    %16 = arith.sitofp %15 : vector<1x144x1xi32> to vector<1x144x1xf32>
    %c0_10 = arith.constant 0 : index
    %c0_11 = arith.constant 0 : index
    %c0_12 = arith.constant 0 : index
    %17 = vector.load %arg4[%c0_10, %c0_11, %c0_12] : memref<3x2x32xbf16, #tpu.memory_space<vmem>>, vector<3x2x32xbf16>
    %c0_13 = arith.constant 0 : index
    %c0_14 = arith.constant 0 : index
    %c0_15 = arith.constant 0 : index
    %18 = vector.load %arg5[%c0_13, %c0_14, %c0_15] : memref<1x1x32xf32, #tpu.memory_space<vmem>>, vector<1x1x32xf32>
    %c0_16 = arith.constant 0 : index
    %c0_17 = arith.constant 0 : index
    %c0_18 = arith.constant 0 : index
    %c0_19 = arith.constant 0 : index
    %19 = vector.load %arg6[%c0_16, %c0_17, %c0_18, %c0_19] : memref<3x3x32x64xbf16, #tpu.memory_space<vmem>>, vector<3x3x32x64xbf16>
    %c0_20 = arith.constant 0 : index
    %c0_21 = arith.constant 0 : index
    %c0_22 = arith.constant 0 : index
    %c0_23 = arith.constant 0 : index
    %20 = vector.load %arg7[%c0_20, %c0_21, %c0_22, %c0_23] : memref<3x1x1x64xf32, #tpu.memory_space<vmem>>, vector<3x1x1x64xf32>
    %c0_24 = arith.constant 0 : index
    %c0_25 = arith.constant 0 : index
    %21 = vector.load %arg8[%c0_24, %c0_25] : memref<4x192xbf16, #tpu.memory_space<vmem>>, vector<4x192xbf16>
    %c0_26 = arith.constant 0 : index
    %c0_27 = arith.constant 0 : index
    %c0_28 = arith.constant 0 : index
    %22 = vector.load %arg9[%c0_26, %c0_27, %c0_28] : memref<3x32x64xbf16, #tpu.memory_space<vmem>>, vector<3x32x64xbf16>
    %c0_29 = arith.constant 0 : index
    %c0_30 = arith.constant 0 : index
    %c0_31 = arith.constant 0 : index
    %c0_32 = arith.constant 0 : index
    %23 = vector.load %arg10[%c0_29, %c0_30, %c0_31, %c0_32] : memref<3x1x1x64xf32, #tpu.memory_space<vmem>>, vector<3x1x1x64xf32>
    %c0_33 = arith.constant 0 : index
    %c0_34 = arith.constant 0 : index
    %24 = vector.load %arg11[%c0_33, %c0_34] : memref<32x32xbf16, #tpu.memory_space<vmem>>, vector<32x32xbf16>
    %c0_35 = arith.constant 0 : index
    %c0_36 = arith.constant 0 : index
    %c0_37 = arith.constant 0 : index
    %25 = vector.load %arg12[%c0_35, %c0_36, %c0_37] : memref<1x1x32xf32, #tpu.memory_space<vmem>>, vector<1x1x32xf32>
    %c0_38 = arith.constant 0 : index
    %c0_39 = arith.constant 0 : index
    %26 = vector.load %arg13[%c0_38, %c0_39] : memref<32x4xbf16, #tpu.memory_space<vmem>>, vector<32x4xbf16>
    %c0_40 = arith.constant 0 : index
    %c0_41 = arith.constant 0 : index
    %c0_42 = arith.constant 0 : index
    %27 = vector.load %arg14[%c0_40, %c0_41, %c0_42] : memref<1x1x4xf32, #tpu.memory_space<vmem>>, vector<1x1x4xf32>
    %cst = arith.constant 0.000000e+00 : f32
    %28 = vector.broadcast %cst : f32 to vector<2x1x2xf32>
    %29 = tpu.concatenate %28, %1, %28 in 1 : vector<2x1x2xf32>, vector<2x144x2xf32>, vector<2x1x2xf32> -> vector<2x146x2xf32>
    %30 = vector.extract_strided_slice %29 {offsets = [0, 0, 0], sizes = [2, 144, 2], strides = [1, 1, 1]} : vector<2x146x2xf32> to vector<2x144x2xf32>
    %31 = vector.extract_strided_slice %29 {offsets = [0, 2, 0], sizes = [2, 144, 2], strides = [1, 1, 1]} : vector<2x146x2xf32> to vector<2x144x2xf32>
    %32 = vector.extract_strided_slice %17 {offsets = [0, 0, 0], sizes = [1, 2, 32], strides = [1, 1, 1]} : vector<3x2x32xbf16> to vector<1x2x32xbf16>
    %33 = vector.shape_cast %32 : vector<1x2x32xbf16> to vector<2x32xbf16>
    %34 = vector.shape_cast %30 : vector<2x144x2xf32> to vector<288x2xf32>
    %35 = arith.truncf %34 : vector<288x2xf32> to vector<288x2xbf16>
    %cst_43 = arith.constant dense<0.000000e+00> : vector<288x32xf32>
    %36 = tpu.matmul %35, %33, %cst_43 {dimension_numbers = #tpu.dot_dimension_numbers<[1], [0], [0], [1], [0, 0, 1, 1], [], []>} : vector<288x2xbf16>, vector<2x32xbf16>, vector<288x32xf32> -> vector<288x32xf32>
    %37 = vector.shape_cast %36 : vector<288x32xf32> to vector<2x144x32xf32>
    %38 = vector.extract_strided_slice %17 {offsets = [1, 0, 0], sizes = [1, 2, 32], strides = [1, 1, 1]} : vector<3x2x32xbf16> to vector<1x2x32xbf16>
    %39 = vector.shape_cast %38 : vector<1x2x32xbf16> to vector<2x32xbf16>
    %40 = vector.shape_cast %1 : vector<2x144x2xf32> to vector<288x2xf32>
    %41 = arith.truncf %40 : vector<288x2xf32> to vector<288x2xbf16>
    %cst_44 = arith.constant dense<0.000000e+00> : vector<288x32xf32>
    %42 = tpu.matmul %41, %39, %cst_44 {dimension_numbers = #tpu.dot_dimension_numbers<[1], [0], [0], [1], [0, 0, 1, 1], [], []>} : vector<288x2xbf16>, vector<2x32xbf16>, vector<288x32xf32> -> vector<288x32xf32>
    %43 = vector.shape_cast %42 : vector<288x32xf32> to vector<2x144x32xf32>
    %44 = arith.addf %37, %43 : vector<2x144x32xf32>
    %45 = vector.extract_strided_slice %17 {offsets = [2, 0, 0], sizes = [1, 2, 32], strides = [1, 1, 1]} : vector<3x2x32xbf16> to vector<1x2x32xbf16>
    %46 = vector.shape_cast %45 : vector<1x2x32xbf16> to vector<2x32xbf16>
    %47 = vector.shape_cast %31 : vector<2x144x2xf32> to vector<288x2xf32>
    %48 = arith.truncf %47 : vector<288x2xf32> to vector<288x2xbf16>
    %cst_45 = arith.constant dense<0.000000e+00> : vector<288x32xf32>
    %49 = tpu.matmul %48, %46, %cst_45 {dimension_numbers = #tpu.dot_dimension_numbers<[1], [0], [0], [1], [0, 0, 1, 1], [], []>} : vector<288x2xbf16>, vector<2x32xbf16>, vector<288x32xf32> -> vector<288x32xf32>
    %50 = vector.shape_cast %49 : vector<288x32xf32> to vector<2x144x32xf32>
    %51 = arith.addf %44, %50 : vector<2x144x32xf32>
    %52 = vector.broadcast %18 : vector<1x1x32xf32> to vector<2x144x32xf32>
    %53 = arith.addf %51, %52 : vector<2x144x32xf32>
    %cst_46 = arith.constant 0.000000e+00 : f32
    %54 = vector.broadcast %cst_46 : f32 to vector<2x144x32xf32>
    %55 = arith.maximumf %53, %54 : vector<2x144x32xf32>
    %56 = vector.broadcast %16 : vector<1x144x1xf32> to vector<2x144x32xf32>
    %57 = arith.mulf %55, %56 : vector<2x144x32xf32>
    %58 = vector.shape_cast %3 : vector<2x144x4xf32> to vector<288x4xf32>
    %59 = arith.truncf %58 : vector<288x4xf32> to vector<288x4xbf16>
    %cst_47 = arith.constant dense<0.000000e+00> : vector<288x192xf32>
    %60 = tpu.matmul %59, %21, %cst_47 {dimension_numbers = #tpu.dot_dimension_numbers<[1], [0], [0], [1], [0, 0, 1, 1], [], []>} : vector<288x4xbf16>, vector<4x192xbf16>, vector<288x192xf32> -> vector<288x192xf32>
    %61 = vector.shape_cast %60 : vector<288x192xf32> to vector<2x144x192xf32>
    %cst_48 = arith.constant 0.000000e+00 : f32
    %62 = vector.broadcast %cst_48 : f32 to vector<2x144x32xf32>
    %63 = vector.extract_strided_slice %19 {offsets = [0, 0, 0, 0], sizes = [1, 3, 32, 64], strides = [1, 1, 1, 1]} : vector<3x3x32x64xbf16> to vector<1x3x32x64xbf16>
    %64 = vector.shape_cast %63 : vector<1x3x32x64xbf16> to vector<3x32x64xbf16>
    %cst_49 = arith.constant 0.000000e+00 : f32
    %65 = vector.broadcast %cst_49 : f32 to vector<2x1x32xf32>
    %66 = tpu.concatenate %65, %57, %65 in 1 : vector<2x1x32xf32>, vector<2x144x32xf32>, vector<2x1x32xf32> -> vector<2x146x32xf32>
    %67 = vector.extract_strided_slice %66 {offsets = [0, 0, 0], sizes = [2, 144, 32], strides = [1, 1, 1]} : vector<2x146x32xf32> to vector<2x144x32xf32>
    %68 = vector.extract_strided_slice %66 {offsets = [0, 2, 0], sizes = [2, 144, 32], strides = [1, 1, 1]} : vector<2x146x32xf32> to vector<2x144x32xf32>
    %69 = vector.extract_strided_slice %64 {offsets = [0, 0, 0], sizes = [1, 32, 64], strides = [1, 1, 1]} : vector<3x32x64xbf16> to vector<1x32x64xbf16>
    %70 = vector.shape_cast %69 : vector<1x32x64xbf16> to vector<32x64xbf16>
    %71 = vector.shape_cast %67 : vector<2x144x32xf32> to vector<288x32xf32>
    %72 = arith.truncf %71 : vector<288x32xf32> to vector<288x32xbf16>
    %cst_50 = arith.constant dense<0.000000e+00> : vector<288x64xf32>
    %73 = tpu.matmul %72, %70, %cst_50 {dimension_numbers = #tpu.dot_dimension_numbers<[1], [0], [0], [1], [0, 0, 1, 1], [], []>} : vector<288x32xbf16>, vector<32x64xbf16>, vector<288x64xf32> -> vector<288x64xf32>
    %74 = vector.shape_cast %73 : vector<288x64xf32> to vector<2x144x64xf32>
    %75 = vector.extract_strided_slice %64 {offsets = [1, 0, 0], sizes = [1, 32, 64], strides = [1, 1, 1]} : vector<3x32x64xbf16> to vector<1x32x64xbf16>
    %76 = vector.shape_cast %75 : vector<1x32x64xbf16> to vector<32x64xbf16>
    %77 = vector.shape_cast %57 : vector<2x144x32xf32> to vector<288x32xf32>
    %78 = arith.truncf %77 : vector<288x32xf32> to vector<288x32xbf16>
    %cst_51 = arith.constant dense<0.000000e+00> : vector<288x64xf32>
    %79 = tpu.matmul %78, %76, %cst_51 {dimension_numbers = #tpu.dot_dimension_numbers<[1], [0], [0], [1], [0, 0, 1, 1], [], []>} : vector<288x32xbf16>, vector<32x64xbf16>, vector<288x64xf32> -> vector<288x64xf32>
    %80 = vector.shape_cast %79 : vector<288x64xf32> to vector<2x144x64xf32>
    %81 = arith.addf %74, %80 : vector<2x144x64xf32>
    %82 = vector.extract_strided_slice %64 {offsets = [2, 0, 0], sizes = [1, 32, 64], strides = [1, 1, 1]} : vector<3x32x64xbf16> to vector<1x32x64xbf16>
    %83 = vector.shape_cast %82 : vector<1x32x64xbf16> to vector<32x64xbf16>
    %84 = vector.shape_cast %68 : vector<2x144x32xf32> to vector<288x32xf32>
    %85 = arith.truncf %84 : vector<288x32xf32> to vector<288x32xbf16>
    %cst_52 = arith.constant dense<0.000000e+00> : vector<288x64xf32>
    %86 = tpu.matmul %85, %83, %cst_52 {dimension_numbers = #tpu.dot_dimension_numbers<[1], [0], [0], [1], [0, 0, 1, 1], [], []>} : vector<288x32xbf16>, vector<32x64xbf16>, vector<288x64xf32> -> vector<288x64xf32>
    %87 = vector.shape_cast %86 : vector<288x64xf32> to vector<2x144x64xf32>
    %88 = arith.addf %81, %87 : vector<2x144x64xf32>
    %89 = vector.extract_strided_slice %61 {offsets = [0, 0, 0], sizes = [2, 144, 64], strides = [1, 1, 1]} : vector<2x144x192xf32> to vector<2x144x64xf32>
    %90 = arith.addf %88, %89 : vector<2x144x64xf32>
    %91 = vector.extract_strided_slice %20 {offsets = [0, 0, 0, 0], sizes = [1, 1, 1, 64], strides = [1, 1, 1, 1]} : vector<3x1x1x64xf32> to vector<1x1x1x64xf32>
    %92 = vector.shape_cast %91 : vector<1x1x1x64xf32> to vector<1x1x64xf32>
    %93 = vector.broadcast %92 : vector<1x1x64xf32> to vector<2x144x64xf32>
    %94 = arith.addf %90, %93 : vector<2x144x64xf32>
    %95 = vector.extract_strided_slice %94 {offsets = [0, 0, 0], sizes = [2, 144, 32], strides = [1, 1, 1]} : vector<2x144x64xf32> to vector<2x144x32xf32>
    %96 = math.tanh %95 : vector<2x144x32xf32>
    %97 = vector.extract_strided_slice %94 {offsets = [0, 0, 32], sizes = [2, 144, 32], strides = [1, 1, 1]} : vector<2x144x64xf32> to vector<2x144x32xf32>
    %98 = arith.negf %97 : vector<2x144x32xf32>
    %99 = math.exp %98 : vector<2x144x32xf32>
    %cst_53 = arith.constant 1.000000e+00 : f32
    %100 = vector.broadcast %cst_53 : f32 to vector<2x144x32xf32>
    %101 = arith.addf %100, %99 : vector<2x144x32xf32>
    %102 = arith.divf %100, %101 : vector<2x144x32xf32>
    %103 = arith.mulf %96, %102 : vector<2x144x32xf32>
    %104 = vector.extract_strided_slice %22 {offsets = [0, 0, 0], sizes = [1, 32, 64], strides = [1, 1, 1]} : vector<3x32x64xbf16> to vector<1x32x64xbf16>
    %105 = vector.shape_cast %104 : vector<1x32x64xbf16> to vector<32x64xbf16>
    %106 = vector.shape_cast %103 : vector<2x144x32xf32> to vector<288x32xf32>
    %107 = arith.truncf %106 : vector<288x32xf32> to vector<288x32xbf16>
    %cst_54 = arith.constant dense<0.000000e+00> : vector<288x64xf32>
    %108 = tpu.matmul %107, %105, %cst_54 {dimension_numbers = #tpu.dot_dimension_numbers<[1], [0], [0], [1], [0, 0, 1, 1], [], []>} : vector<288x32xbf16>, vector<32x64xbf16>, vector<288x64xf32> -> vector<288x64xf32>
    %109 = vector.shape_cast %108 : vector<288x64xf32> to vector<2x144x64xf32>
    %110 = vector.extract_strided_slice %23 {offsets = [0, 0, 0, 0], sizes = [1, 1, 1, 64], strides = [1, 1, 1, 1]} : vector<3x1x1x64xf32> to vector<1x1x1x64xf32>
    %111 = vector.shape_cast %110 : vector<1x1x1x64xf32> to vector<1x1x64xf32>
    %112 = vector.broadcast %111 : vector<1x1x64xf32> to vector<2x144x64xf32>
    %113 = arith.addf %109, %112 : vector<2x144x64xf32>
    %114 = vector.extract_strided_slice %113 {offsets = [0, 0, 0], sizes = [2, 144, 32], strides = [1, 1, 1]} : vector<2x144x64xf32> to vector<2x144x32xf32>
    %115 = arith.addf %57, %114 : vector<2x144x32xf32>
    %cst_55 = arith.constant 0.707106769 : f32
    %116 = vector.broadcast %cst_55 : f32 to vector<2x144x32xf32>
    %117 = arith.mulf %115, %116 : vector<2x144x32xf32>
    %118 = vector.broadcast %16 : vector<1x144x1xf32> to vector<2x144x32xf32>
    %119 = arith.mulf %117, %118 : vector<2x144x32xf32>
    %120 = vector.extract_strided_slice %113 {offsets = [0, 0, 32], sizes = [2, 144, 32], strides = [1, 1, 1]} : vector<2x144x64xf32> to vector<2x144x32xf32>
    %121 = arith.addf %62, %120 : vector<2x144x32xf32>
    %122 = vector.extract_strided_slice %19 {offsets = [1, 0, 0, 0], sizes = [1, 3, 32, 64], strides = [1, 1, 1, 1]} : vector<3x3x32x64xbf16> to vector<1x3x32x64xbf16>
    %123 = vector.shape_cast %122 : vector<1x3x32x64xbf16> to vector<3x32x64xbf16>
    %cst_56 = arith.constant 0.000000e+00 : f32
    %124 = vector.broadcast %cst_56 : f32 to vector<2x2x32xf32>
    %125 = tpu.concatenate %124, %119, %124 in 1 : vector<2x2x32xf32>, vector<2x144x32xf32>, vector<2x2x32xf32> -> vector<2x148x32xf32>
    %126 = vector.extract_strided_slice %125 {offsets = [0, 0, 0], sizes = [2, 144, 32], strides = [1, 1, 1]} : vector<2x148x32xf32> to vector<2x144x32xf32>
    %127 = vector.extract_strided_slice %125 {offsets = [0, 4, 0], sizes = [2, 144, 32], strides = [1, 1, 1]} : vector<2x148x32xf32> to vector<2x144x32xf32>
    %128 = vector.extract_strided_slice %123 {offsets = [0, 0, 0], sizes = [1, 32, 64], strides = [1, 1, 1]} : vector<3x32x64xbf16> to vector<1x32x64xbf16>
    %129 = vector.shape_cast %128 : vector<1x32x64xbf16> to vector<32x64xbf16>
    %130 = vector.shape_cast %126 : vector<2x144x32xf32> to vector<288x32xf32>
    %131 = arith.truncf %130 : vector<288x32xf32> to vector<288x32xbf16>
    %cst_57 = arith.constant dense<0.000000e+00> : vector<288x64xf32>
    %132 = tpu.matmul %131, %129, %cst_57 {dimension_numbers = #tpu.dot_dimension_numbers<[1], [0], [0], [1], [0, 0, 1, 1], [], []>} : vector<288x32xbf16>, vector<32x64xbf16>, vector<288x64xf32> -> vector<288x64xf32>
    %133 = vector.shape_cast %132 : vector<288x64xf32> to vector<2x144x64xf32>
    %134 = vector.extract_strided_slice %123 {offsets = [1, 0, 0], sizes = [1, 32, 64], strides = [1, 1, 1]} : vector<3x32x64xbf16> to vector<1x32x64xbf16>
    %135 = vector.shape_cast %134 : vector<1x32x64xbf16> to vector<32x64xbf16>
    %136 = vector.shape_cast %119 : vector<2x144x32xf32> to vector<288x32xf32>
    %137 = arith.truncf %136 : vector<288x32xf32> to vector<288x32xbf16>
    %cst_58 = arith.constant dense<0.000000e+00> : vector<288x64xf32>
    %138 = tpu.matmul %137, %135, %cst_58 {dimension_numbers = #tpu.dot_dimension_numbers<[1], [0], [0], [1], [0, 0, 1, 1], [], []>} : vector<288x32xbf16>, vector<32x64xbf16>, vector<288x64xf32> -> vector<288x64xf32>
    %139 = vector.shape_cast %138 : vector<288x64xf32> to vector<2x144x64xf32>
    %140 = arith.addf %133, %139 : vector<2x144x64xf32>
    %141 = vector.extract_strided_slice %123 {offsets = [2, 0, 0], sizes = [1, 32, 64], strides = [1, 1, 1]} : vector<3x32x64xbf16> to vector<1x32x64xbf16>
    %142 = vector.shape_cast %141 : vector<1x32x64xbf16> to vector<32x64xbf16>
    %143 = vector.shape_cast %127 : vector<2x144x32xf32> to vector<288x32xf32>
    %144 = arith.truncf %143 : vector<288x32xf32> to vector<288x32xbf16>
    %cst_59 = arith.constant dense<0.000000e+00> : vector<288x64xf32>
    %145 = tpu.matmul %144, %142, %cst_59 {dimension_numbers = #tpu.dot_dimension_numbers<[1], [0], [0], [1], [0, 0, 1, 1], [], []>} : vector<288x32xbf16>, vector<32x64xbf16>, vector<288x64xf32> -> vector<288x64xf32>
    %146 = vector.shape_cast %145 : vector<288x64xf32> to vector<2x144x64xf32>
    %147 = arith.addf %140, %146 : vector<2x144x64xf32>
    %148 = vector.extract_strided_slice %61 {offsets = [0, 0, 64], sizes = [2, 144, 64], strides = [1, 1, 1]} : vector<2x144x192xf32> to vector<2x144x64xf32>
    %149 = arith.addf %147, %148 : vector<2x144x64xf32>
    %150 = vector.extract_strided_slice %20 {offsets = [1, 0, 0, 0], sizes = [1, 1, 1, 64], strides = [1, 1, 1, 1]} : vector<3x1x1x64xf32> to vector<1x1x1x64xf32>
    %151 = vector.shape_cast %150 : vector<1x1x1x64xf32> to vector<1x1x64xf32>
    %152 = vector.broadcast %151 : vector<1x1x64xf32> to vector<2x144x64xf32>
    %153 = arith.addf %149, %152 : vector<2x144x64xf32>
    %154 = vector.extract_strided_slice %153 {offsets = [0, 0, 0], sizes = [2, 144, 32], strides = [1, 1, 1]} : vector<2x144x64xf32> to vector<2x144x32xf32>
    %155 = math.tanh %154 : vector<2x144x32xf32>
    %156 = vector.extract_strided_slice %153 {offsets = [0, 0, 32], sizes = [2, 144, 32], strides = [1, 1, 1]} : vector<2x144x64xf32> to vector<2x144x32xf32>
    %157 = arith.negf %156 : vector<2x144x32xf32>
    %158 = math.exp %157 : vector<2x144x32xf32>
    %cst_60 = arith.constant 1.000000e+00 : f32
    %159 = vector.broadcast %cst_60 : f32 to vector<2x144x32xf32>
    %160 = arith.addf %159, %158 : vector<2x144x32xf32>
    %161 = arith.divf %159, %160 : vector<2x144x32xf32>
    %162 = arith.mulf %155, %161 : vector<2x144x32xf32>
    %163 = vector.extract_strided_slice %22 {offsets = [1, 0, 0], sizes = [1, 32, 64], strides = [1, 1, 1]} : vector<3x32x64xbf16> to vector<1x32x64xbf16>
    %164 = vector.shape_cast %163 : vector<1x32x64xbf16> to vector<32x64xbf16>
    %165 = vector.shape_cast %162 : vector<2x144x32xf32> to vector<288x32xf32>
    %166 = arith.truncf %165 : vector<288x32xf32> to vector<288x32xbf16>
    %cst_61 = arith.constant dense<0.000000e+00> : vector<288x64xf32>
    %167 = tpu.matmul %166, %164, %cst_61 {dimension_numbers = #tpu.dot_dimension_numbers<[1], [0], [0], [1], [0, 0, 1, 1], [], []>} : vector<288x32xbf16>, vector<32x64xbf16>, vector<288x64xf32> -> vector<288x64xf32>
    %168 = vector.shape_cast %167 : vector<288x64xf32> to vector<2x144x64xf32>
    %169 = vector.extract_strided_slice %23 {offsets = [1, 0, 0, 0], sizes = [1, 1, 1, 64], strides = [1, 1, 1, 1]} : vector<3x1x1x64xf32> to vector<1x1x1x64xf32>
    %170 = vector.shape_cast %169 : vector<1x1x1x64xf32> to vector<1x1x64xf32>
    %171 = vector.broadcast %170 : vector<1x1x64xf32> to vector<2x144x64xf32>
    %172 = arith.addf %168, %171 : vector<2x144x64xf32>
    %173 = vector.extract_strided_slice %172 {offsets = [0, 0, 0], sizes = [2, 144, 32], strides = [1, 1, 1]} : vector<2x144x64xf32> to vector<2x144x32xf32>
    %174 = arith.addf %119, %173 : vector<2x144x32xf32>
    %cst_62 = arith.constant 0.707106769 : f32
    %175 = vector.broadcast %cst_62 : f32 to vector<2x144x32xf32>
    %176 = arith.mulf %174, %175 : vector<2x144x32xf32>
    %177 = vector.broadcast %16 : vector<1x144x1xf32> to vector<2x144x32xf32>
    %178 = arith.mulf %176, %177 : vector<2x144x32xf32>
    %179 = vector.extract_strided_slice %172 {offsets = [0, 0, 32], sizes = [2, 144, 32], strides = [1, 1, 1]} : vector<2x144x64xf32> to vector<2x144x32xf32>
    %180 = arith.addf %121, %179 : vector<2x144x32xf32>
    %181 = vector.extract_strided_slice %19 {offsets = [2, 0, 0, 0], sizes = [1, 3, 32, 64], strides = [1, 1, 1, 1]} : vector<3x3x32x64xbf16> to vector<1x3x32x64xbf16>
    %182 = vector.shape_cast %181 : vector<1x3x32x64xbf16> to vector<3x32x64xbf16>
    %cst_63 = arith.constant 0.000000e+00 : f32
    %183 = vector.broadcast %cst_63 : f32 to vector<2x4x32xf32>
    %184 = tpu.concatenate %183, %178, %183 in 1 : vector<2x4x32xf32>, vector<2x144x32xf32>, vector<2x4x32xf32> -> vector<2x152x32xf32>
    %185 = vector.extract_strided_slice %184 {offsets = [0, 0, 0], sizes = [2, 144, 32], strides = [1, 1, 1]} : vector<2x152x32xf32> to vector<2x144x32xf32>
    %186 = vector.extract_strided_slice %184 {offsets = [0, 8, 0], sizes = [2, 144, 32], strides = [1, 1, 1]} : vector<2x152x32xf32> to vector<2x144x32xf32>
    %187 = vector.extract_strided_slice %182 {offsets = [0, 0, 0], sizes = [1, 32, 64], strides = [1, 1, 1]} : vector<3x32x64xbf16> to vector<1x32x64xbf16>
    %188 = vector.shape_cast %187 : vector<1x32x64xbf16> to vector<32x64xbf16>
    %189 = vector.shape_cast %185 : vector<2x144x32xf32> to vector<288x32xf32>
    %190 = arith.truncf %189 : vector<288x32xf32> to vector<288x32xbf16>
    %cst_64 = arith.constant dense<0.000000e+00> : vector<288x64xf32>
    %191 = tpu.matmul %190, %188, %cst_64 {dimension_numbers = #tpu.dot_dimension_numbers<[1], [0], [0], [1], [0, 0, 1, 1], [], []>} : vector<288x32xbf16>, vector<32x64xbf16>, vector<288x64xf32> -> vector<288x64xf32>
    %192 = vector.shape_cast %191 : vector<288x64xf32> to vector<2x144x64xf32>
    %193 = vector.extract_strided_slice %182 {offsets = [1, 0, 0], sizes = [1, 32, 64], strides = [1, 1, 1]} : vector<3x32x64xbf16> to vector<1x32x64xbf16>
    %194 = vector.shape_cast %193 : vector<1x32x64xbf16> to vector<32x64xbf16>
    %195 = vector.shape_cast %178 : vector<2x144x32xf32> to vector<288x32xf32>
    %196 = arith.truncf %195 : vector<288x32xf32> to vector<288x32xbf16>
    %cst_65 = arith.constant dense<0.000000e+00> : vector<288x64xf32>
    %197 = tpu.matmul %196, %194, %cst_65 {dimension_numbers = #tpu.dot_dimension_numbers<[1], [0], [0], [1], [0, 0, 1, 1], [], []>} : vector<288x32xbf16>, vector<32x64xbf16>, vector<288x64xf32> -> vector<288x64xf32>
    %198 = vector.shape_cast %197 : vector<288x64xf32> to vector<2x144x64xf32>
    %199 = arith.addf %192, %198 : vector<2x144x64xf32>
    %200 = vector.extract_strided_slice %182 {offsets = [2, 0, 0], sizes = [1, 32, 64], strides = [1, 1, 1]} : vector<3x32x64xbf16> to vector<1x32x64xbf16>
    %201 = vector.shape_cast %200 : vector<1x32x64xbf16> to vector<32x64xbf16>
    %202 = vector.shape_cast %186 : vector<2x144x32xf32> to vector<288x32xf32>
    %203 = arith.truncf %202 : vector<288x32xf32> to vector<288x32xbf16>
    %cst_66 = arith.constant dense<0.000000e+00> : vector<288x64xf32>
    %204 = tpu.matmul %203, %201, %cst_66 {dimension_numbers = #tpu.dot_dimension_numbers<[1], [0], [0], [1], [0, 0, 1, 1], [], []>} : vector<288x32xbf16>, vector<32x64xbf16>, vector<288x64xf32> -> vector<288x64xf32>
    %205 = vector.shape_cast %204 : vector<288x64xf32> to vector<2x144x64xf32>
    %206 = arith.addf %199, %205 : vector<2x144x64xf32>
    %207 = vector.extract_strided_slice %61 {offsets = [0, 0, 128], sizes = [2, 144, 64], strides = [1, 1, 1]} : vector<2x144x192xf32> to vector<2x144x64xf32>
    %208 = arith.addf %206, %207 : vector<2x144x64xf32>
    %209 = vector.extract_strided_slice %20 {offsets = [2, 0, 0, 0], sizes = [1, 1, 1, 64], strides = [1, 1, 1, 1]} : vector<3x1x1x64xf32> to vector<1x1x1x64xf32>
    %210 = vector.shape_cast %209 : vector<1x1x1x64xf32> to vector<1x1x64xf32>
    %211 = vector.broadcast %210 : vector<1x1x64xf32> to vector<2x144x64xf32>
    %212 = arith.addf %208, %211 : vector<2x144x64xf32>
    %213 = vector.extract_strided_slice %212 {offsets = [0, 0, 0], sizes = [2, 144, 32], strides = [1, 1, 1]} : vector<2x144x64xf32> to vector<2x144x32xf32>
    %214 = math.tanh %213 : vector<2x144x32xf32>
    %215 = vector.extract_strided_slice %212 {offsets = [0, 0, 32], sizes = [2, 144, 32], strides = [1, 1, 1]} : vector<2x144x64xf32> to vector<2x144x32xf32>
    %216 = arith.negf %215 : vector<2x144x32xf32>
    %217 = math.exp %216 : vector<2x144x32xf32>
    %cst_67 = arith.constant 1.000000e+00 : f32
    %218 = vector.broadcast %cst_67 : f32 to vector<2x144x32xf32>
    %219 = arith.addf %218, %217 : vector<2x144x32xf32>
    %220 = arith.divf %218, %219 : vector<2x144x32xf32>
    %221 = arith.mulf %214, %220 : vector<2x144x32xf32>
    %222 = vector.extract_strided_slice %22 {offsets = [2, 0, 0], sizes = [1, 32, 64], strides = [1, 1, 1]} : vector<3x32x64xbf16> to vector<1x32x64xbf16>
    %223 = vector.shape_cast %222 : vector<1x32x64xbf16> to vector<32x64xbf16>
    %224 = vector.shape_cast %221 : vector<2x144x32xf32> to vector<288x32xf32>
    %225 = arith.truncf %224 : vector<288x32xf32> to vector<288x32xbf16>
    %cst_68 = arith.constant dense<0.000000e+00> : vector<288x64xf32>
    %226 = tpu.matmul %225, %223, %cst_68 {dimension_numbers = #tpu.dot_dimension_numbers<[1], [0], [0], [1], [0, 0, 1, 1], [], []>} : vector<288x32xbf16>, vector<32x64xbf16>, vector<288x64xf32> -> vector<288x64xf32>
    %227 = vector.shape_cast %226 : vector<288x64xf32> to vector<2x144x64xf32>
    %228 = vector.extract_strided_slice %23 {offsets = [2, 0, 0, 0], sizes = [1, 1, 1, 64], strides = [1, 1, 1, 1]} : vector<3x1x1x64xf32> to vector<1x1x1x64xf32>
    %229 = vector.shape_cast %228 : vector<1x1x1x64xf32> to vector<1x1x64xf32>
    %230 = vector.broadcast %229 : vector<1x1x64xf32> to vector<2x144x64xf32>
    %231 = arith.addf %227, %230 : vector<2x144x64xf32>
    %232 = vector.extract_strided_slice %231 {offsets = [0, 0, 32], sizes = [2, 144, 32], strides = [1, 1, 1]} : vector<2x144x64xf32> to vector<2x144x32xf32>
    %233 = arith.addf %180, %232 : vector<2x144x32xf32>
    %234 = vector.extract_strided_slice %233 {offsets = [0, 8, 0], sizes = [2, 128, 32], strides = [1, 1, 1]} : vector<2x144x32xf32> to vector<2x128x32xf32>
    %cst_69 = arith.constant 0.000000e+00 : f32
    %235 = vector.broadcast %cst_69 : f32 to vector<2x128x32xf32>
    %236 = arith.maximumf %234, %235 : vector<2x128x32xf32>
    %237 = vector.shape_cast %236 : vector<2x128x32xf32> to vector<256x32xf32>
    %238 = arith.truncf %237 : vector<256x32xf32> to vector<256x32xbf16>
    %cst_70 = arith.constant dense<0.000000e+00> : vector<256x32xf32>
    %239 = tpu.matmul %238, %24, %cst_70 {dimension_numbers = #tpu.dot_dimension_numbers<[1], [0], [0], [1], [0, 0, 1, 1], [], []>} : vector<256x32xbf16>, vector<32x32xbf16>, vector<256x32xf32> -> vector<256x32xf32>
    %240 = vector.shape_cast %239 : vector<256x32xf32> to vector<2x128x32xf32>
    %241 = vector.broadcast %25 : vector<1x1x32xf32> to vector<2x128x32xf32>
    %242 = arith.addf %240, %241 : vector<2x128x32xf32>
    %cst_71 = arith.constant 0.000000e+00 : f32
    %243 = vector.broadcast %cst_71 : f32 to vector<2x128x32xf32>
    %244 = arith.maximumf %242, %243 : vector<2x128x32xf32>
    %245 = vector.shape_cast %244 : vector<2x128x32xf32> to vector<256x32xf32>
    %246 = arith.truncf %245 : vector<256x32xf32> to vector<256x32xbf16>
    %cst_72 = arith.constant dense<0.000000e+00> : vector<256x4xf32>
    %247 = tpu.matmul %246, %26, %cst_72 {dimension_numbers = #tpu.dot_dimension_numbers<[1], [0], [0], [1], [0, 0, 1, 1], [], []>} : vector<256x32xbf16>, vector<32x4xbf16>, vector<256x4xf32> -> vector<256x4xf32>
    %248 = vector.shape_cast %247 : vector<256x4xf32> to vector<2x128x4xf32>
    %249 = vector.broadcast %27 : vector<1x1x4xf32> to vector<2x128x4xf32>
    %250 = arith.addf %248, %249 : vector<2x128x4xf32>
    %251 = tpu.transpose %250, [0, 2, 1] : vector<2x128x4xf32> -> vector<2x4x128xf32>
    %252 = vector.extract_strided_slice %251 {offsets = [0, 0, 0], sizes = [2, 2, 128], strides = [1, 1, 1]} : vector<2x4x128xf32> to vector<2x2x128xf32>
    %253 = vector.extract_strided_slice %251 {offsets = [0, 2, 0], sizes = [2, 2, 128], strides = [1, 1, 1]} : vector<2x4x128xf32> to vector<2x2x128xf32>
    %254 = arith.subf %4, %253 : vector<2x2x128xf32>
    %cst_73 = arith.constant 0.000000e+00 : f32
    %255 = vector.broadcast %cst_73 : f32 to vector<2x2x128xf32>
    %256 = arith.subf %255, %252 : vector<2x2x128xf32>
    %257 = math.exp %256 : vector<2x2x128xf32>
    %258 = arith.mulf %254, %257 : vector<2x2x128xf32>
    %c0_74 = arith.constant 0 : index
    %c0_75 = arith.constant 0 : index
    %c0_76 = arith.constant 0 : index
    %259 = vector.load %arg15[%c0_74, %c0_75, %c0_76] : memref<2x2x128xf32, #tpu.memory_space<vmem>>, vector<2x2x128xf32>
    tpu.vector_store %arg15[%c0_74, %c0_75, %c0_76], %258 {strides = array<i32>} : memref<2x2x128xf32, #tpu.memory_space<vmem>>, vector<2x2x128xf32>,
    %260 = vector.extract_strided_slice %16 {offsets = [0, 8, 0], sizes = [1, 128, 1], strides = [1, 1, 1]} : vector<1x144x1xf32> to vector<1x128x1xf32>
    %261 = vector.extract_strided_slice %250 {offsets = [0, 0, 0], sizes = [2, 128, 2], strides = [1, 1, 1]} : vector<2x128x4xf32> to vector<2x128x2xf32>
    %262 = vector.broadcast %260 : vector<1x128x1xf32> to vector<2x128x2xf32>
    %263 = arith.mulf %261, %262 : vector<2x128x2xf32>
    %264 = vector.shape_cast %263 : vector<2x128x2xf32> to vector<1x2x128x2xf32>
    %cst_77 = arith.constant dense<0.000000e+00> : vector<1xf32>
    %265 = vector.multi_reduction <add>, %264, %cst_77 [1, 2, 3] : vector<1x2x128x2xf32> to vector<1xf32>
    %266 = vector.shape_cast %265 : vector<1xf32> to vector<1x1x1x1xf32>
    %267 = vector.extract %266[0, 0, 0, 0] : f32 from vector<1x1x1x1xf32>
    %cst_78 = arith.constant 0.000000e+00 : f32
    %268 = arith.subf %cst_78, %267 : f32
    %269 = vector.broadcast %268 : f32 to vector<1x8x128xf32>
    %c0_79 = arith.constant 0 : index
    %c0_80 = arith.constant 0 : index
    %c0_81 = arith.constant 0 : index
    %270 = vector.load %arg16[%c0_79, %c0_80, %c0_81] : memref<1x8x128xf32, #tpu.memory_space<vmem>>, vector<1x8x128xf32>
    tpu.vector_store %arg16[%c0_79, %c0_80, %c0_81], %269 {strides = array<i32>} : memref<1x8x128xf32, #tpu.memory_space<vmem>>, vector<1x8x128xf32>,
    return
  }
  func.func @transform_0(%arg0: i32) -> (i32, i32, i32, i32) {
    %c0_i32 = arith.constant 0 : i32
    %c0_i32_0 = arith.constant 0 : i32
    %c0_i32_1 = arith.constant 0 : i32
    %c0_i32_2 = arith.constant 0 : i32
    return %arg0, %c0_i32, %c0_i32_0, %c0_i32_1 : i32, i32, i32, i32
  }
  func.func @transform_1(%arg0: i32) -> (i32, i32, i32, i32) {
    %c0_i32 = arith.constant 0 : i32
    %c0_i32_0 = arith.constant 0 : i32
    %c0_i32_1 = arith.constant 0 : i32
    %c0_i32_2 = arith.constant 0 : i32
    return %arg0, %c0_i32, %c0_i32_0, %c0_i32_1 : i32, i32, i32, i32
  }
  func.func @transform_2(%arg0: i32) -> (i32, i32, i32) {
    %c0_i32 = arith.constant 0 : i32
    %c0_i32_0 = arith.constant 0 : i32
    %c0_i32_1 = arith.constant 0 : i32
    return %c0_i32, %c0_i32_0, %arg0 : i32, i32, i32
  }
  func.func @transform_3(%arg0: i32) -> (i32, i32, i32) {
    %c0_i32 = arith.constant 0 : i32
    %c0_i32_0 = arith.constant 0 : i32
    %c0_i32_1 = arith.constant 0 : i32
    %c0_i32_2 = arith.constant 0 : i32
    return %c0_i32, %c0_i32_0, %c0_i32_1 : i32, i32, i32
  }
  func.func @transform_4(%arg0: i32) -> (i32, i32, i32) {
    %c0_i32 = arith.constant 0 : i32
    %c0_i32_0 = arith.constant 0 : i32
    %c0_i32_1 = arith.constant 0 : i32
    %c0_i32_2 = arith.constant 0 : i32
    return %c0_i32, %c0_i32_0, %c0_i32_1 : i32, i32, i32
  }
  func.func @transform_5(%arg0: i32) -> (i32, i32, i32, i32) {
    %c0_i32 = arith.constant 0 : i32
    %c0_i32_0 = arith.constant 0 : i32
    %c0_i32_1 = arith.constant 0 : i32
    %c0_i32_2 = arith.constant 0 : i32
    %c0_i32_3 = arith.constant 0 : i32
    return %c0_i32, %c0_i32_0, %c0_i32_1, %c0_i32_2 : i32, i32, i32, i32
  }
  func.func @transform_6(%arg0: i32) -> (i32, i32, i32, i32) {
    %c0_i32 = arith.constant 0 : i32
    %c0_i32_0 = arith.constant 0 : i32
    %c0_i32_1 = arith.constant 0 : i32
    %c0_i32_2 = arith.constant 0 : i32
    %c0_i32_3 = arith.constant 0 : i32
    return %c0_i32, %c0_i32_0, %c0_i32_1, %c0_i32_2 : i32, i32, i32, i32
  }
  func.func @transform_7(%arg0: i32) -> (i32, i32) {
    %c0_i32 = arith.constant 0 : i32
    %c0_i32_0 = arith.constant 0 : i32
    %c0_i32_1 = arith.constant 0 : i32
    return %c0_i32, %c0_i32_0 : i32, i32
  }
  func.func @transform_8(%arg0: i32) -> (i32, i32, i32) {
    %c0_i32 = arith.constant 0 : i32
    %c0_i32_0 = arith.constant 0 : i32
    %c0_i32_1 = arith.constant 0 : i32
    %c0_i32_2 = arith.constant 0 : i32
    return %c0_i32, %c0_i32_0, %c0_i32_1 : i32, i32, i32
  }
  func.func @transform_9(%arg0: i32) -> (i32, i32, i32, i32) {
    %c0_i32 = arith.constant 0 : i32
    %c0_i32_0 = arith.constant 0 : i32
    %c0_i32_1 = arith.constant 0 : i32
    %c0_i32_2 = arith.constant 0 : i32
    %c0_i32_3 = arith.constant 0 : i32
    return %c0_i32, %c0_i32_0, %c0_i32_1, %c0_i32_2 : i32, i32, i32, i32
  }
  func.func @transform_10(%arg0: i32) -> (i32, i32) {
    %c0_i32 = arith.constant 0 : i32
    %c0_i32_0 = arith.constant 0 : i32
    %c0_i32_1 = arith.constant 0 : i32
    return %c0_i32, %c0_i32_0 : i32, i32
  }
  func.func @transform_11(%arg0: i32) -> (i32, i32, i32) {
    %c0_i32 = arith.constant 0 : i32
    %c0_i32_0 = arith.constant 0 : i32
    %c0_i32_1 = arith.constant 0 : i32
    %c0_i32_2 = arith.constant 0 : i32
    return %c0_i32, %c0_i32_0, %c0_i32_1 : i32, i32, i32
  }
  func.func @transform_12(%arg0: i32) -> (i32, i32) {
    %c0_i32 = arith.constant 0 : i32
    %c0_i32_0 = arith.constant 0 : i32
    %c0_i32_1 = arith.constant 0 : i32
    return %c0_i32, %c0_i32_0 : i32, i32
  }
  func.func @transform_13(%arg0: i32) -> (i32, i32, i32) {
    %c0_i32 = arith.constant 0 : i32
    %c0_i32_0 = arith.constant 0 : i32
    %c0_i32_1 = arith.constant 0 : i32
    %c0_i32_2 = arith.constant 0 : i32
    return %c0_i32, %c0_i32_0, %c0_i32_1 : i32, i32, i32
  }
  func.func @transform_14(%arg0: i32) -> (i32, i32, i32) {
    %c0_i32 = arith.constant 0 : i32
    %c0_i32_0 = arith.constant 0 : i32
    %c0_i32_1 = arith.constant 0 : i32
    return %c0_i32, %c0_i32_0, %arg0 : i32, i32, i32
  }
  func.func @transform_15(%arg0: i32) -> (i32, i32, i32) {
    %c0_i32 = arith.constant 0 : i32
    %c0_i32_0 = arith.constant 0 : i32
    %c0_i32_1 = arith.constant 0 : i32
    return %arg0, %c0_i32, %c0_i32_0 : i32, i32, i32
  }
}

</mosaic_0001>

<bundles_post_ra>
// kernel: affine_coupling_forward.1
= control target key start
LH: loop header
LB: loop body
LE: loop exit
PB: predicated region body
PF: predicated region fallthrough
CT: control target
= control target key end

     0   :  { %s12107_s18 = smov 0   ;;  %s12109_s19 = smov 0   ;;  %s16625_s0 = inlined_call_operand.vmem [shape: f32[4,2,144,2], index: 0, kind: input, shape index: {}]   ;;  %s16626_s1 = inlined_call_operand.vmem [shape: f32[4,2,144,4], index: 1, kind: input, shape index: {}]   ;;  %s16627_s2 = inlined_call_operand.vmem [shape: f32[2,2,512], index: 2, kind: input, shape index: {}]   ;;  %s16628_s3 = inlined_call_operand.vmem [shape: bf16[3,2,32], index: 3, kind: input, shape index: {}]   ;;  %s16629_s4 = inlined_call_operand.vmem [shape: f32[1,1,32], index: 4, kind: input, shape index: {}]   ;;  %s16630_s5 = inlined_call_operand.vmem [shape: bf16[3,3,32,64], index: 5, kind: input, shape index: {}]   ;;  %s16631_s6 = inlined_call_operand.vmem [shape: f32[3,1,1,64], index: 6, kind: input, shape index: {}]   ;;  %s16632_s7 = inlined_call_operand.vmem [shape: bf16[4,192], index: 7, kind: input, shape index: {}]   ;;  %s16633_s8 = inlined_call_operand.vmem [shape: bf16[3,32,64], index: 8, kind: input, shape index: {}]   ;;  %s16634_s9 = inlined_call_operand.vmem [shape: f32[3,1,1,64], index: 9, kind: input, shape index: {}]   ;;  %s16635_s10 = inlined_call_operand.vmem [shape: bf16[32,32], index: 10, kind: input, shape index: {}]   ;;  %s16636_s11 = inlined_call_operand.vmem [shape: f32[1,1,32], index: 11, kind: input, shape index: {}]   ;;  %s16637_s12 = inlined_call_operand.vmem [shape: bf16[32,4], index: 12, kind: input, shape index: {}]   ;;  %s16638_s13 = inlined_call_operand.vmem [shape: f32[1,1,4], index: 13, kind: input, shape index: {}]   ;;  %s16639_s14 = inlined_call_operand.vmem [shape: f32[2,2,512], index: 14, kind: output, shape index: {0}]   ;;  %s16640_s15 = inlined_call_operand.vmem [shape: f32[4,8,128], index: 15, kind: output, shape index: {1}]  }
   0x1   :  { %s12111_s20 = smov 0  }
   0x2 LB: > { %s12120_s21 = sadd.s32 4294967295, %s12021_s20   ;;  %s12122_s22 = sadd.s32 1, %s12021_s20   ;;  %s12021_s20 = sphi %s12111_s20, %s17942_s20   ;;  %s12017_s19 = sphi %s12109_s19, %s17941_s19   ;;  %s12013_s18 = sphi %s12107_s18, %s17940_s18  }
   0x3   : > { %s82_s23 = ssub.s32 %s12021_s20, %s12122_s22  ;;  %s85_s24 = sadd.s32 1, %s12017_s19 }
   0x4   : > { %p83_p0 = scmp.eq.s32.totalorder %s82_s23, 0  ;;  %p92_p1 = scmp.ne.s32.totalorder %s12017_s19, %s12013_s18 }
   0x5   : > { %p93_p2 = scmp.eq.s32.totalorder %s12021_s20, 0  ;;  %p353_p3 = scmp.eq.s32.totalorder %s12120_s21, 3 }
   0x6   : > { %s12130_s25 = scalar_select %p83_p0, %s12017_s19, %s85_s24  }
   0x7   : > { %p94_p4 = por %p93_p2, %p92_p1  ;;  %p12132_p5 = por %p353_p3, %p92_p1 }
   0x8   : > { %16981 = sst [smem:[#allocation4_spill]] %s12130_s25  ;;  %p9495_p6 = scmp.ge.s32.totalorder %s12021_s20, 4 }
   0xa   : > { %434 = sbr.rel (%p9495_p6) target bundleno = 24 (0x18), region = 60 }
  0x11   : > { %453 = sbr.rel (!%p94_p4) target bundleno = 24 (0x18), region = 72  ;;  %s455_s27 = sand.u32 (%p94_p4), 1, %s12017_s19  }
  0x12   : > { %s9497_s28 = sshll.u32 (%p94_p4), %s12021_s20, 1  ;;  %s9496_s29 = sshll.u32 (%p94_p4), %s455_s27, 2 }
  0x13   : > { %s459_s17 = scalar_lea.vmem (%p94_p4), %s16627_s2, %s9497_s28  ;;  %s457_s23 = scalar_lea.vmem (%p94_p4), [#allocation2], %s9496_s29 }
  0x14   : > { %v475_v0 = vld [vmem:[%s459_s17] sm:$0x3] (%p94_p4)  ;;  %v477_v1 = vld [vmem:[%s459_s17 + $0x8] sm:$0x3] (%p94_p4) }
  0x15   : > { %476 = vst [vmem:[%s457_s23] sm:$0x3] (%p94_p4), %v475_v0  ;;  %478 = vst [vmem:[%s457_s23 + $0x2] sm:$0x3] (%p94_p4), %v477_v1 }
  0x18 PF: > { %p9498_p7 = scmp.ge.s32.totalorder %s12021_s20, 1  ;;  %p496_p8 = scmp.lt.s32.totalorder %s12021_s20, 5 }
  0x1a   : > { %p497_p9 = pnand %p9498_p7, %p496_p8 }
  0x1c   : > { %500 = sbr.rel (%p497_p9) target bundleno = 3537 (0xdd1), region = 106 }
  0x23   : > { %v782_v2 = vld [vmem:[%s16628_s3] sm:$0x1]  ;;  %vm16663_vm0 = vcmask 1040384   ;;  %p563_p10 = scmp.lt.s32.totalorder %s12120_s21, 3  ;;  %v783_v4 = vld [vmem:[%s16628_s3 + $0x1] sm:$0x1] }
  0x24   : > { %11284 = vmatprep.subr.msk.bf16.mxu0 %vm16663_vm0, %v782_v2  ;;  %v1074_v3 = vsel %vm16663_vm0, %v782_v2, 0  ;;  %11285 = vmatprep.subr.msk.bf16.mxu1 %vm16663_vm0, %v782_v2  ;;  %vm16660_vm1 = vcmask 15360   ;;  %vm16662_vm2 = vcmask 1045504   ;;  %v1326_v21 = vsel %vm16663_vm0, %v783_v4, 0  ;;  %v12224_v40 = vld [vmem:[%s16628_s3 + $0x2] sm:$0x1] }
  0x25   : > { %10329 = vmatpush3.bf16.msra.mxu0 %v1074_v3  ;;  %s12151_s20 = scalar_select %p563_p10, %s12120_s21, 3  ;;  %10995 = vmatpush3.bf16.msra.mxu1 %v1074_v3  ;;  %vm16661_vm3 = vcmask 1041408   ;;  %vm2085_vm4 = vcmask 31744  }
  0x26   : > { %11286 = vmatprep.subr.msk.bf16.mxu0 %vm16663_vm0, %v783_v4  ;;  %s9504_s28 = sshll.u32 %s12120_s21, 7  ;;  %s12025_s24 = smov 96  }
  0x27   : > { %s11288_s25 = smul.u32 288, %s12151_s20  ;;  %s9505_s29 = sadd.s32 4294967288, %s9504_s28 }
  0x28   : > { %s12026_s27 = smov 64   ;;  %s503_s17 = sand.u32 1, %s12013_s18  }
  0x29   : > { %s12160_s16 = scalar_lea.vmem %s16625_s0, %s11288_s25  ;;  %s12616_s30 = scalar_lea.vmem %s16626_s1, %s11288_s25 }
  0x2a   : > { %v12163_v5 = vld [vmem:[%s12160_s16] sm:$0xff]  ;;  %v12166_v6 = vld [vmem:[%s12160_s16 + $0x8] sm:$0xff]  ;;  %v12169_v7 = vld [vmem:[%s12160_s16 + $0x10] sm:$0xff]  ;;  %s16582_s23 = sshll.u32 %s503_s17, 2  ;;  %s9503_s18 = sshll.u32 %s12151_s20, 3 }
  0x2b   : > { %v888_v8 = vrot.slane %v12163_v5, 7  ;;  %v889_v9 = vrot.slane %v12166_v6, 7  ;;  %v891_v10 = vrot.slane %v12169_v7, 7  ;;  %v12175_v11 = vld [vmem:[%s12160_s16 + $0x18] sm:$0xff]  ;;  %v12178_v12 = vld [vmem:[%s12160_s16 + $0x20] sm:$0xff]  ;;  %v12181_v13 = vld [vmem:[%s12160_s16 + $0x28] sm:$0xff]  ;;  %s576_s25 = scalar_lea.vmem %s16640_s15, %s9503_s18 }
  0x2c   : > { %v893_v14 = vrot.slane %v12175_v11, 7  ;;  %v895_v15 = vrot.slane %v12178_v12, 7  ;;  %v897_v16 = vrot.slane %v12181_v13, 7  ;;  %v12187_v17 = vld [vmem:[%s12160_s16 + $0x30] sm:$0xff]  ;;  %v12194_v26 = vld [vmem:[%s12160_s16 + $0x38] sm:$0xff]  ;;  %v12205_v31 = vld [vmem:[%s12160_s16 + $0x40] sm:$0xff] }
  0x2d   : > { %v890_v18 = vsel %vm16663_vm0, %v888_v8, %v889_v9  ;;  %v892_v19 = vsel %vm16663_vm0, %v889_v9, %v891_v10  ;;  %v996_v20 = vsel %vm16663_vm0, 0.0, %v888_v8  ;;  %v899_v30 = vrot.slane %v12187_v17, 7  ;;  %v12208_v32 = vld [vmem:[%s12160_s16 + $0x48] sm:$0xff]  ;;  %v12245_v47 = vld [vmem:[%s12160_s16 + $0x50] sm:$0xff]  ;;  %v12248_v48 = vld [vmem:[%s12160_s16 + $0x58] sm:$0xff]  ;;  %s16589_s28 = scalar_lea.vmem [#allocation3], %s16582_s23 }
  0x2e   : > { %v1000_v22 = vpack.c.bf16 %v890_v18, %v996_v20  ;;  %v1546_v23 = vrot.slane %v996_v20, 2  ;;  %v1547_v24 = vrot.slane %v890_v18, 2  ;;  %v1549_v25 = vrot.slane %v892_v19, 2  ;;  %v12261_v52 = vld [vmem:[%s12160_s16 + $0x60] sm:$0xff]  ;;  %v12264_v53 = vld [vmem:[%s12160_s16 + $0x68] sm:$0xff]  ;;  %v12273_v58 = vld [vmem:[%s12160_s16 + $0x70] sm:$0xff] }
  0x2f   : > { %v894_v27 = vsel %vm16663_vm0, %v891_v10, %v893_v14  ;;  %v12198_v28 = vsel %vm16663_vm0, %v893_v14, %v895_v15  ;;  %v12201_v29 = vsel %vm16663_vm0, %v895_v15, %v897_v16  ;;  %v901_v39 = vrot.slane %v12194_v26, 7  ;;  %v12276_v59 = vld [vmem:[%s12160_s16 + $0x78] sm:$0xff]  ;;  %v12281_v62 = vld [vmem:[%s12160_s16 + $0x80] sm:$0xff]  ;;  %v12284_v63 = vld [vmem:[%s12160_s16 + $0x90] sm:$0xff]  ;;  %s9992_s17 = sshll.u32 (%p12132_p5), %s12120_s21, 1 }
  0x30   : > { %10330 = vmatprep.mubr.msk.bf16.mxu0 %vm16660_vm1, %v1000_v22  ;;  %v12212_v33 = vsel %vm16662_vm2, %v1546_v23, %v1547_v24  ;;  %v12215_v34 = vsel %vm16662_vm2, %v1547_v24, %v1549_v25  ;;  %v1001_v35 = vpack.c.bf16 %v894_v27, %v892_v19  ;;  %v1551_v36 = vrot.slane %v894_v27, 2  ;;  %v12289_v2 = vld [vmem:[%s12160_s16 + $0x88] sm:$0xff]  ;;  %v12292_v3 = vld [vmem:[%s12160_s16 + $0x98] sm:$0xff]  ;;  %v12304_v14 = vld [vmem:[%s12160_s16 + $0xa0] sm:$0xff]  ;;  %s9349_s20 = scalar_lea.vmem (%p12132_p5), %s16639_s14, %s9992_s17 }
  0x31   : > { %v1002_v37 = vpack.c.bf16 %v12201_v29, %v12198_v28  ;;  %v16641_v38 = vrot.slane %v12198_v28, 2  ;;  %v903_v42 = vrot.slane %v12205_v31, 7  ;;  %v905_v43 = vrot.slane %v12208_v32, 7  ;;  %v12307_v15 = vld [vmem:[%s12160_s16 + $0xa8] sm:$0xff]  ;;  %v12325_v27 = vld [vmem:[%s12160_s16 + $0xb0] sm:$0xff]  ;;  %v12366_v1 = vld [vmem:[%s12160_s16 + $0xc0] sm:$0xff] }
  0x32   : > { %10331 = vmatmul.mubr.msk.bf16.vlgmr.msra.gmra.mrb[0].mxu0 %vm16660_vm1, %v1001_v35  ;;  %v12228_v41 = vsel %vm16662_vm2, %v1549_v25, %v1551_v36  ;;  %v12239_v45 = vsel %vm16663_vm0, %v897_v16, %v899_v30  ;;  %v12242_v46 = vsel %vm16663_vm0, %v899_v30, %v901_v39  ;;  %v907_v55 = vrot.slane %v12245_v47, 7  ;;  %16985 = vst [vmem:[#allocation7_spill] sm:$0xff] %v12325_v27  ;;  %v12328_v30 = vld [vmem:[%s12160_s16 + $0xb8] sm:$0xff]  ;;  %v12382_v0 = vld [vmem:[%s12160_s16 + $0xd0] sm:$0xff] }
  0x33   : > { %16983 = vst [vmem:[#allocation5_spill] sm:$0xff] %v12228_v41  ;;  %10367 = vmatpush3.bf16.msra.mxu0 %v1326_v21  ;;  %10334 = vmatprep.mubr.msk.bf16.mxu0 %vm16660_vm1, %v1002_v37  ;;  %v12236_v44 = vsel %vm16662_vm2, %v1551_v36, %v16641_v38  ;;  %v12253_v50 = vsel %vm16663_vm0, %v901_v39, %v903_v42  ;;  %v909_v56 = vrot.slane %v12248_v48, 7  ;;  %v911_v60 = vrot.slane %v12261_v52, 7 }
  0x34   : > { %16984 = vst [vmem:[#allocation6_spill] sm:$0xff] %v12236_v44  ;;  %11287 = vmatprep.subr.msk.bf16.mxu0 %vm16663_vm0, %v12224_v40  ;;  %v12258_v51 = vsel %vm16663_vm0, %v903_v42, %v905_v43  ;;  %v1003_v54 = vpack.c.bf16 %v12242_v46, %v12239_v45  ;;  %v913_v61 = vrot.slane %v12264_v53, 7  ;;  %v1559_v4 = vrot.slane %v12242_v46, 2  ;;  %16986 = vst [vmem:[#allocation8_spill] sm:$0xff] %v12328_v30 }
  0x35   : > { %v1004_v57 = vpack.c.bf16 %v12258_v51, %v12253_v50  ;;  %v1561_v8 = vrot.slane %v12253_v50, 2  ;;  %v12298_v9 = vsel %vm16663_vm0, %v905_v43, %v907_v55  ;;  %v12301_v10 = vsel %vm16663_vm0, %v907_v55, %v909_v56  ;;  %16987 = vst [vmem:[#allocation9_spill] sm:$0xff] %v12366_v1 }
  0x36   : > { %v1563_v16 = vrot.slane %v12258_v51, 2  ;;  %v12313_v19 = vsel %vm16663_vm0, %v909_v56, %v911_v60  ;;  %v12316_v20 = vsel %vm16663_vm0, %v911_v60, %v913_v61  ;;  %v915_v21 = vrot.slane %v12273_v58, 7 }
  0x37   : > { %v917_v22 = vrot.slane %v12276_v59, 7  ;;  %v1005_v23 = vpack.c.bf16 %v12301_v10, %v12298_v9  ;;  %v919_v24 = vrot.slane %v12281_v62, 7  ;;  %v923_v25 = vrot.slane %v12284_v63, 7 }
  0x38   : > { %v1567_v35 = vrot.slane %v12301_v10, 2  ;;  %v1569_v36 = vrot.slane %v12313_v19, 2  ;;  %v921_v37 = vrot.slane %v12289_v2, 7  ;;  %v924_v39 = vrot.slane %v12292_v3, 7 }
  0x39   : > { %v1006_v42 = vpack.c.bf16 %v12316_v20, %v12313_v19  ;;  %v926_v43 = vrot.slane %v12304_v14, 7  ;;  %v928_v46 = vrot.slane %v12307_v15, 7  ;;  %v916_v50 = vsel %vm16663_vm0, %v913_v61, %v915_v21 }
  0x3a   : > { %10335 = vmatmul.mubr.msk.bf16.gmra.mrb[4].mxu0 %vm16660_vm1, %v1003_v54  ;;  %v1571_v51 = vrot.slane %v12316_v20, 2  ;;  %v918_v54 = vsel %vm16663_vm0, %v915_v21, %v917_v22  ;;  %v920_v55 = vsel %vm16663_vm0, %v917_v22, %v919_v24  ;;  %v12343_v56 = vsel %vm16663_vm0, 0.0, %v923_v25 }
  0x3b   : > { %10338 = vmatprep.mubr.msk.bf16.mxu0 %vm16660_vm1, %v1004_v57  ;;  %v12347_v57 = vsel %vm16663_vm0, %v919_v24, %v921_v37  ;;  %v12350_v60 = vsel %vm16663_vm0, %v923_v25, %v924_v39  ;;  %v930_v61 = vrot.slane %v12325_v27, 7  ;;  %v932_v10 = vrot.slane %v12328_v30, 7 }
  0x3c   : > { %v12356_v19 = vsel %vm16663_vm0, %v924_v39, %v926_v43  ;;  %v12359_v20 = vsel %vm16663_vm0, %v926_v43, %v928_v46  ;;  %v1007_v21 = vpack.c.bf16 %v918_v54, %v916_v50  ;;  %v1573_v22 = vrot.slane %v916_v50, 2 }
  0x3d   : > { %v1008_v24 = vpack.c.bf16 %v12347_v57, %v920_v55  ;;  %v1577_v25 = vrot.slane %v920_v55, 2  ;;  %v1579_v49 = vrot.slane %v12347_v57, 2  ;;  %v1009_v18 = vpack.c.bf16 %v12350_v60, %v12343_v56 }
  0x3e   : > { %v1583_v39 = vrot.slane %v12343_v56, 2  ;;  %v1010_v43 = vpack.c.bf16 %v12359_v20, %v12356_v19  ;;  %v12373_v50 = vsel %vm16663_vm0, %v928_v46, %v930_v61  ;;  %v1588_v55 = vrot.slane %v12359_v20, 2 }
  0x3f   : > { %v12378_v57 = vsel %vm16663_vm0, %v930_v61, %v932_v10  ;;  %v1590_v38 = vrot.slane %v12373_v50, 2  ;;  %v16988_v46 = vrot.slane %v12201_v29, 2  ;;  %v16990_v61 = vrot.slane %v12239_v45, 2 }
  0x40   : > { %v1592_v56 = vrot.slane %v12378_v57, 2  ;;  %v12408_v41 = vsel %vm16662_vm2, %v1559_v4, %v1561_v8  ;;  %v938_v29 = vrot.slane %v12382_v0, 7  ;;  %v12457_v45 = vsel %vm16662_vm2, %v1577_v25, %v1579_v49 }
  0x41   : > { %v16991_v44 = vmov %v16988_v46  ;;  %v16992_v27 = vmov %v16990_v61  ;;  %16996 = vst [vmem:[#allocation11_spill] sm:$0xff] %v12457_v45 }
  0x42   : > { %10339 = vmatmul.mubr.msk.bf16.gmra.mrb[8].mxu0 %vm16660_vm1, %v1005_v23  ;;  %v1575_v23 = vrot.slane %v918_v54, 2  ;;  %v1586_v54 = vrot.slane %v12356_v19, 2  ;;  %v16989_v19 = vrot.slane %v12198_v28, 2  ;;  %v12400_v30 = vsel %vm16662_vm2, %v16991_v44, %v16990_v61 }
  0x43   : > { %10342 = vmatprep.mubr.msk.bf16.mxu0 %vm16660_vm1, %v1006_v42  ;;  %v1584_v42 = vrot.slane %v12350_v60, 2  ;;  %v934_v60 = vrot.slane %v12366_v1, 7  ;;  %v12405_v1 = vsel %vm16662_vm2, %v16992_v27, %v1559_v4  ;;  %v12411_v28 = vsel %vm16662_vm2, %v1561_v8, %v1563_v16 }
  0x44   : > { %v12393_v20 = vsel %vm16662_vm2, %v16989_v19, %v16988_v46  ;;  %v12415_v46 = vld [vmem:[%s12160_s16 + $0xd8] sm:$0xff]  ;;  %v16993_v27 = vrot.slane %v12298_v9, 2  ;;  %v12437_v44 = vsel %vm16662_vm2, %v1567_v35, %v1569_v36 }
  0x45   : > { %v940_v8 = vrot.slane %v12415_v46, 7 }
  0x46   : > { %v12425_v4 = vsel %vm16662_vm2, %v1563_v16, %v16993_v27  ;;  %v16994_v19 = vmov %v16993_v27  ;;  %v12442_v16 = vsel %vm16662_vm2, %v1569_v36, %v1571_v51  ;;  %v12448_v27 = vsel %vm16662_vm2, %v1573_v22, %v1575_v23 }
  0x47   : > { %v12434_v61 = vsel %vm16662_vm2, %v16994_v19, %v1567_v35  ;;  %16995 = vst [vmem:[#allocation10_spill] sm:$0xff] %v12442_v16  ;;  %v12453_v35 = vsel %vm16662_vm2, %v1575_v23, %v1577_v25  ;;  %v998_v19 = vsel %vm16663_vm0, %v921_v37, 0.0  ;;  %v12470_v23 = vsel %vm16662_vm2, %v1586_v54, %v1588_v55  ;;  %v12477_v16 = vld [vmem:[%s12160_s16 + $0xc8] sm:$0xff] }
  0x48   : > { %16999 = vst [vmem:[#allocation14_spill] sm:$0xff] %v12470_v23  ;;  %v12473_v37 = vsel %vm16662_vm2, %v1588_v55, %v1590_v38  ;;  %v935_v25 = vsel %vm16663_vm0, %v932_v10, %v934_v60  ;;  %v936_v36 = vrot.slane %v12477_v16, 7 }
  0x49   : > { %17000 = vst [vmem:[#allocation15_spill] sm:$0xff] %v12473_v37  ;;  %v1594_v55 = vrot.slane %v935_v25, 2 }
  0x4a   : > { %10343 = vmatmul.mubr.msk.bf16.gmra.mrb[12].mxu0 %vm16660_vm1, %v1007_v21  ;;  %v1581_v21 = vrot.slane %v998_v19, 2  ;;  %v12480_v19 = vld [vmem:[%s12160_s16 + $0xe0] sm:$0xff]  ;;  %v937_v23 = vsel %vm16663_vm0, %v934_v60, %v936_v36  ;;  %v939_v10 = vsel %vm16663_vm0, %v936_v36, %v938_v29 }
  0x4b   : > { %10346 = vmatprep.mubr.msk.bf16.mxu0 %vm16660_vm1, %v1008_v24  ;;  %v12445_v24 = vsel %vm16662_vm2, %v1571_v51, %v1573_v22  ;;  %v12462_v51 = vsel %vm16662_vm2, %v1583_v39, %v1584_v42  ;;  %v12465_v22 = vsel %vm16662_vm2, %v1584_v42, %v1586_v54  ;;  %v12488_v54 = vsel %vm16662_vm2, %v1590_v38, %v1592_v56 }
  0x4c   : > { %16997 = vst [vmem:[#allocation12_spill] sm:$0xff] %v12462_v51  ;;  %16998 = vst [vmem:[#allocation13_spill] sm:$0xff] %v12465_v22  ;;  %v12483_v39 = vsel %vm16662_vm2, %v1579_v49, %v1581_v21  ;;  %v942_v9 = vrot.slane %v12480_v19, 7  ;;  %v1011_v49 = vpack.c.bf16 %v12378_v57, %v12373_v50  ;;  %v12498_v21 = vsel %vm16662_vm2, %v1592_v56, %v1594_v55  ;;  %v12507_v51 = vld [vmem:[%s12160_s16 + $0xe8] sm:$0xff]  ;;  %v12513_v50 = vld [vmem:[%s12160_s16 + $0xf8] sm:$0xff] }
  0x4d   : > { %17001 = vst [vmem:[#allocation16_spill] sm:$0xff] %v12483_v39  ;;  %17002 = vst [vmem:[#allocation17_spill] sm:$0xff] %v12488_v54  ;;  %v941_v38 = vsel %vm16663_vm0, %v938_v29, %v940_v8  ;;  %v1012_v57 = vpack.c.bf16 %v937_v23, %v935_v25  ;;  %v1596_v56 = vrot.slane %v937_v23, 2  ;;  %v1598_v22 = vrot.slane %v939_v10, 2  ;;  %v12560_v39 = vld [vmem:[%s12160_s16 + $0x110] sm:$0xff] }
  0x4e   : > { %17003 = vst [vmem:[#allocation18_spill] sm:$0xff] %v12498_v21  ;;  %v1600_v37 = vrot.slane %v941_v38, 2  ;;  %v1013_v45 = vpack.c.bf16 %v941_v38, %v939_v10  ;;  %v948_v60 = vrot.slane %v12513_v50, 7  ;;  %v943_v29 = vsel %vm16663_vm0, %v940_v8, %v942_v9  ;;  %v12532_v38 = vld [vmem:[%s12160_s16 + $0x100] sm:$0xff] }
  0x4f   : > { %10354 = vmatprep.mubr.msk.bf16.mxu1 %vm16660_vm1, %v1012_v57  ;;  %v12521_v36 = vsel %vm16662_vm2, %v1594_v55, %v1596_v56  ;;  %v12524_v54 = vsel %vm16662_vm2, %v1596_v56, %v1598_v22  ;;  %v1602_v25 = vrot.slane %v943_v29, 2  ;;  %v1253_v10 = vpack.c.bf16 %v12166_v6, %v12163_v5  ;;  %v12542_v56 = vld [vmem:[%s12160_s16 + $0x118] sm:$0xff] }
  0x50   : > { %17004 = vst [vmem:[#allocation19_spill] sm:$0xff] %v12521_v36  ;;  %17005 = vst [vmem:[#allocation20_spill] sm:$0xff] %v12524_v54  ;;  %v12527_v23 = vsel %vm16662_vm2, %v1598_v22, %v1600_v37  ;;  %10355 = vmatmul.mubr.msk.bf16.vlgmr.msra.gmra.mrb[0].mxu1 %vm16660_vm1, %v1013_v45  ;;  %v950_v55 = vrot.slane %v12532_v38, 7  ;;  %v956_v5 = vrot.slane %v12542_v56, 7  ;;  %v1254_v22 = vpack.c.bf16 %v12175_v11, %v12169_v7 }
  0x51   : > { %17006 = vst [vmem:[#allocation21_spill] sm:$0xff] %v12527_v23  ;;  %v12539_v57 = vsel %vm16662_vm2, %v1600_v37, %v1602_v25  ;;  %v12555_v23 = vld [vmem:[%s12160_s16 + $0x108] sm:$0xff]  ;;  %v954_v7 = vrot.slane %v12560_v39, 7 }
  0x52   : > { %10347 = vmatmul.mubr.msk.bf16.gmra.mrb[16].mxu0 %vm16660_vm1, %v1009_v18  ;;  %v12510_v18 = vld [vmem:[%s12160_s16 + $0xf0] sm:$0xff]  ;;  %17007 = vst [vmem:[#allocation22_spill] sm:$0xff] %v12539_v57  ;;  %v951_v57 = vsel %vm16663_vm0, %v948_v60, %v950_v55  ;;  %v999_v11 = vsel %vm16663_vm0, %v956_v5, 0.0 }
  0x53   : > { %10350 = vmatprep.mubr.msk.bf16.mxu0 %vm16660_vm1, %v1010_v43  ;;  %v944_v43 = vrot.slane %v12507_v51, 7  ;;  %v946_v42 = vrot.slane %v12510_v18, 7 }
  0x55   : > { %v945_v6 = vsel %vm16663_vm0, %v942_v9, %v944_v43  ;;  %v947_v45 = vsel %vm16663_vm0, %v944_v43, %v946_v42  ;;  %v949_v8 = vsel %vm16663_vm0, %v946_v42, %v948_v60  ;;  %v952_v9 = vrot.slane %v12555_v23, 7 }
  0x56   : > { %v1014_v37 = vpack.c.bf16 %v945_v6, %v943_v29  ;;  %v1604_v36 = vrot.slane %v945_v6, 2  ;;  %v1015_v54 = vpack.c.bf16 %v949_v8, %v947_v45  ;;  %v1606_v21 = vrot.slane %v947_v45, 2 }
  0x57   : > { %v1610_v29 = vrot.slane %v951_v57, 2  ;;  %v1618_v45 = vrot.slane %v999_v11, 2 }
  0x58   : > { %10358 = vmatprep.mubr.msk.bf16.mxu1 %vm16660_vm1, %v1014_v37  ;;  %v12564_v42 = vsel %vm16662_vm2, %v1602_v25, %v1604_v36  ;;  %v12567_v43 = vsel %vm16662_vm2, %v1604_v36, %v1606_v21  ;;  %v1729_v36 = vsel %vm16663_vm0, %v12224_v40, 0 }
  0x59   : > { %v1670_v60 = vpack.c.bf16 %v12567_v43, %v12564_v42  ;;  %10359 = vmatmul.mubr.msk.bf16.gmra.mrb[4].mxu1 %vm16660_vm1, %v1015_v54  ;;  %v957_v54 = vsel %vm16663_vm0, %v954_v7, %v956_v5  ;;  %v1256_v5 = vpack.c.bf16 %v12194_v26, %v12187_v17  ;;  %v1257_v17 = vpack.c.bf16 %v12208_v32, %v12205_v31  ;;  %v646_v43 = vld [vmem:[%s12616_s30 + $0x100] sm:$0xff] }
  0x5a   : > { %10351 = vmatmul.mubr.msk.bf16.gmra.mrb[20].mxu0 %vm16660_vm1, %v1011_v49  ;;  %v1608_v49 = vrot.slane %v949_v8, 2  ;;  %v1255_v8 = vpack.c.bf16 %v12181_v13, %v12178_v12  ;;  %v9579_v12 = vld.sshfl [vmem:[%s16632_s7] sm:$0x33 pattern:$0x76325410]  ;;  %v955_v13 = vsel %vm16663_vm0, %v952_v9, %v954_v7  ;;  %v1616_v6 = vrot.slane %v957_v54, 2 }
  0x5b   : > { %10368 = vmatprep.mubr.msk.bf16.mxu0 %vm16660_vm1, %v1253_v10  ;;  %v1017_v11 = vpack.c.bf16 %v957_v54, %v955_v13  ;;  %v12023_v31 = vmov 0   ;;  %v617_v54 = vld [vmem:[%s12616_s30 + $0x18] sm:$0xff] }
  0x5c   : > { %v12574_v10 = vsel %vm16662_vm2, %v1606_v21, %v1608_v49  ;;  %v12580_v25 = vsel %vm16662_vm2, %v1608_v49, %v1610_v29  ;;  %v953_v21 = vsel %vm16663_vm0, %v950_v55, %v952_v9  ;;  %v2084_v49 = vcombine.high %v9579_v12, %v9579_v12 }
  0x5d   : > { %v1016_v40 = vpack.c.bf16 %v953_v21, %v951_v57  ;;  %v1612_v37 = vrot.slane %v953_v21, 2  ;;  %v2142_v55 = vsel %vm16661_vm3, %v9579_v12, 0  ;;  %v1258_v21 = vpack.c.bf16 %v12248_v48, %v12245_v47 }
  0x5e   : > { %9580 = vmatprep.subr.msk.bf16.mxu1 %vm16661_vm3, %v2084_v49  ;;  %v1259_v12 = vpack.c.bf16 %v12264_v53, %v12261_v52  ;;  %v1260_v48 = vpack.c.bf16 %v12276_v59, %v12273_v58  ;;  %v1261_v52 = vpack.c.bf16 %v12289_v2, %v12281_v62  ;;  %v618_v53 = vld [vmem:[%s12616_s30 + $0x20] sm:$0xff]  ;;  %v1263_v58 = vpack.c.bf16 %v12307_v15, %v12304_v14  ;;  %v620_v59 = vld [vmem:[%s12616_s30 + $0x30] sm:$0xff]  ;;  %v621_v62 = vld [vmem:[%s12616_s30 + $0x38] sm:$0xff] }
  0x5f   : > { %10362 = vmatprep.mubr.msk.bf16.mxu1 %vm16660_vm1, %v1016_v40  ;;  %v12598_v9 = vsel %vm16662_vm2, %v1610_v29, %v1612_v37  ;;  %2148 = vmatpush1.bf16.msra.mxu1 %v2142_v55  ;;  %v11320_v40 = vld [vmem:[%s16630_s5 + $0x8] sm:$0xff]   ;;  %v2061_v2 = vpack.c.bf16 %v621_v62, %v620_v59  ;;  %v622_v14 = vld [vmem:[%s12616_s30 + $0x40] sm:$0xff] }
  0x60   : > { %v17009_v55 = vld [vmem:[#allocation8_spill] sm:$0xff]  ;;  %v638_v62 = vld [vmem:[%s12616_s30 + $0xc0] sm:$0xff] }
  0x61   : > { %10363 = vmatmul.mubr.msk.bf16.gmra.mrb[8].mxu1 %vm16660_vm1, %v1017_v11  ;;  %v1262_v11 = vpack.c.bf16 %v12292_v3, %v12284_v63  ;;  %v17010_v63 = vld [vmem:[#allocation9_spill] sm:$0xff]  ;;  %v623_v15 = vld [vmem:[%s12616_s30 + $0x48] sm:$0xff] }
  0x62   : > { %10369 = vmatmul.mubr.msk.bf16.vlgmr.msra.gmra.mrb[0].mxu0 %vm16660_vm1, %v1254_v22  ;;  %v1614_v22 = vrot.slane %v955_v13, 2  ;;  %2179 = vmatprep.mubr.bf16.mxu1 %v12023_v31  ;;  %v616_v13 = vld [vmem:[%s12616_s30 + $0x10] sm:$0xff]  ;;  %v1265_v3 = vpack.c.bf16 %v12477_v16, %v17010_v63 }
  0x63   : > { %10405 = vmatpush3.bf16.msra.mxu0 %v1729_v36  ;;  %10372 = vmatprep.mubr.msk.bf16.mxu0 %vm16660_vm1, %v1255_v8  ;;  %v12609_v8 = vsel %vm16662_vm2, %v1616_v6, %v1618_v45  ;;  %v614_v36 = vld [vmem:[%s12616_s30] sm:$0xff]  ;;  %v2059_v47 = vpack.c.bf16 %v617_v54, %v616_v13  ;;  %v624_v16 = vld [vmem:[%s12616_s30 + $0x50] sm:$0xff]  ;;  %v17012_v13 = vld [vmem:[#allocation6_spill] sm:$0xff] }
  0x64   : > { %v12603_v57 = vsel %vm16662_vm2, %v1612_v37, %v1614_v22  ;;  %v12606_v7 = vsel %vm16662_vm2, %v1614_v22, %v1616_v6  ;;  %v615_v6 = vld [vmem:[%s12616_s30 + $0x8] sm:$0xff]  ;;  %v11319_v45 = vld [vmem:[%s16630_s5] sm:$0xff]   ;;  %v17013_v54 = vld [vmem:[#allocation5_spill] sm:$0xff] }
  0x65   : > { %v1672_v26 = vpack.c.bf16 %v12603_v57, %v12598_v9  ;;  %v1673_v29 = vpack.c.bf16 %v12609_v8, %v12606_v7  ;;  %v2058_v32 = vpack.c.bf16 %v615_v6, %v614_v36  ;;  %10442 = vmatprep.subr.bf16.mxu1 %v11319_v45  ;;  %v619_v37 = vld [vmem:[%s12616_s30 + $0x28] sm:$0xff]  ;;  %v17008_v22 = vld [vmem:[#allocation7_spill] sm:$0xff]  ;;  %v1266_v36 = vpack.c.bf16 %v12415_v46, %v12382_v0  ;;  %v649_v9 = vld [vmem:[%s12616_s30 + $0x118] sm:$0xff] }
  0x66   : > { %v2060_v49 = vpack.c.bf16 %v619_v37, %v618_v53  ;;  %v1267_v6 = vpack.c.bf16 %v12507_v51, %v12480_v19  ;;  %v1269_v0 = vpack.c.bf16 %v12555_v23, %v12532_v38  ;;  %v626_v46 = vld [vmem:[%s12616_s30 + $0x60] sm:$0xff]  ;;  %v627_v51 = vld [vmem:[%s12616_s30 + $0x68] sm:$0xff]  ;;  %v17011_v23 = vpack.c.bf16 %v12215_v34, %v12212_v33  ;;  %v632_v34 = vld [vmem:[%s12616_s30 + $0x90] sm:$0xff] }
  0x67   : > { %v2064_v19 = vpack.c.bf16 %v627_v51, %v626_v46  ;;  %v17017_v53 = vpack.c.bf16 %v12425_v4, %v12411_v28  ;;  %v635_v37 = vld [vmem:[%s12616_s30 + $0xa8] sm:$0xff]  ;;  %v636_v4 = vld [vmem:[%s12616_s30 + $0xb0] sm:$0xff]  ;;  %v17037_v51 = vld [vmem:[#allocation22_spill] sm:$0xff] }
  0x68   : > { %v643_v46 = vld [vmem:[%s12616_s30 + $0xe8] sm:$0xff] }
  0x69   : > { %9581 = vmatmul.mubr.msk.bf16.vlgmr.msra.gmra.mrb[12].mxu1 %vm2085_vm4, %v2058_v32 }
  0x6a   : > { %10373 = vmatmul.mubr.msk.bf16.gmra.mrb[4].mxu0 %vm16660_vm1, %v1256_v5  ;;  %10443 = vmatpush3.bf16.msra.mxu1 %v11319_v45  ;;  %v1264_v5 = vpack.c.bf16 %v17009_v55, %v17008_v22  ;;  %v625_v45 = vld [vmem:[%s12616_s30 + $0x58] sm:$0xff]  ;;  %v17025_v22 = vld [vmem:[#allocation13_spill] sm:$0xff]  ;;  %v17026_v55 = vld [vmem:[#allocation12_spill] sm:$0xff] }
  0x6b   : > { %10376 = vmatprep.mubr.msk.bf16.mxu0 %vm16660_vm1, %v1257_v17  ;;  %2189 = vmatprep.mubr.bf16.mxu1 %v12023_v31  ;;  %v2062_v17 = vpack.c.bf16 %v623_v15, %v622_v14  ;;  %v2063_v32 = vpack.c.bf16 %v625_v45, %v624_v16  ;;  %v640_v14 = vld [vmem:[%s12616_s30 + $0xd0] sm:$0xff]  ;;  %v641_v15 = vld [vmem:[%s12616_s30 + $0xd8] sm:$0xff]  ;;  %v17034_v16 = vld [vmem:[#allocation20_spill] sm:$0xff] }
  0x6c   : > { %10444 = vmatprep.subr.bf16.mxu1 %v11320_v40  ;;  %v17035_v45 = vld [vmem:[#allocation19_spill] sm:$0xff] }
  0x6e   : > { %10445 = vmatpush3.bf16.msra.mxu1 %v11320_v40  ;;  %v17014_v40 = vpack.c.bf16 %v17012_v13, %v17013_v54 }
  0x71   : > { %9582 = vmatmul.mubr.msk.bf16.gmra.mrb[16].mxu1 %vm2085_vm4, %v2059_v47  ;;  %v17015_v47 = vpack.c.bf16 %v12400_v30, %v12393_v20  ;;  %v634_v20 = vld [vmem:[%s12616_s30 + $0xa0] sm:$0xff] }
  0x72   : > { %10377 = vmatmul.mubr.msk.bf16.gmra.mrb[8].mxu0 %vm16660_vm1, %v1258_v21  ;;  %2199 = vmatprep.mubr.bf16.mxu1 %v12023_v31  ;;  %v1268_v21 = vpack.c.bf16 %v12513_v50, %v12510_v18  ;;  %v628_v18 = vld [vmem:[%s12616_s30 + $0x70] sm:$0xff]  ;;  %v629_v50 = vld [vmem:[%s12616_s30 + $0x78] sm:$0xff]  ;;  %v2068_v28 = vpack.c.bf16 %v635_v37, %v634_v20 }
  0x73   : > { %10380 = vmatprep.mubr.msk.bf16.mxu0 %vm16660_vm1, %v1259_v12  ;;  %v1270_v12 = vpack.c.bf16 %v12542_v56, %v12560_v39  ;;  %v2065_v38 = vpack.c.bf16 %v629_v50, %v628_v18  ;;  %v630_v39 = vld [vmem:[%s12616_s30 + $0x80] sm:$0xff]  ;;  %v631_v56 = vld [vmem:[%s12616_s30 + $0x88] sm:$0xff]  ;;  %v644_v50 = vld [vmem:[%s12616_s30 + $0xf0] sm:$0xff] }
  0x74   : > { %v2066_v33 = vpack.c.bf16 %v631_v56, %v630_v39 }
  0x79   : > { %9583 = vmatmul.mubr.msk.bf16.gmra.mrb[20].mxu1 %vm2085_vm4, %v2060_v49  ;;  %v17018_v49 = vpack.c.bf16 %v12437_v44, %v12434_v61  ;;  %v17022_v44 = vld [vmem:[#allocation16_spill] sm:$0xff]  ;;  %v17023_v61 = vld [vmem:[#allocation11_spill] sm:$0xff] }
  0x7a   : > { %10381 = vmatmul.mubr.msk.bf16.gmra.mrb[12].mxu0 %vm16660_vm1, %v1260_v48  ;;  %2209 = vmatprep.mubr.bf16.mxu1 %v12023_v31  ;;  %v633_v48 = vld [vmem:[%s12616_s30 + $0x98] sm:$0xff]  ;;  %v17024_v59 = vpack.c.bf16 %v17022_v44, %v17023_v61 }
  0x7b   : > { %10384 = vmatprep.mubr.msk.bf16.mxu0 %vm16660_vm1, %v1261_v52  ;;  %v17016_v52 = vpack.c.bf16 %v12408_v41, %v12405_v1  ;;  %v2067_v30 = vpack.c.bf16 %v633_v48, %v632_v34  ;;  %v17019_v41 = vld [vmem:[#allocation10_spill] sm:$0xff] }
  0x7c   : > { %v17020_v1 = vpack.c.bf16 %v12445_v24, %v17019_v41 }
  0x81   : > { %9584 = vmatmul.mubr.msk.bf16.gmra.mrb[24].mxu1 %vm2085_vm4, %v2061_v2  ;;  %v639_v2 = vld [vmem:[%s12616_s30 + $0xc8] sm:$0xff] }
  0x82   : > { %10385 = vmatmul.mubr.msk.bf16.gmra.mrb[16].mxu0 %vm16660_vm1, %v1262_v11  ;;  %2219 = vmatprep.mubr.bf16.mxu1 %v12023_v31  ;;  %v637_v11 = vld [vmem:[%s12616_s30 + $0xb8] sm:$0xff] }
  0x83   : > { %10388 = vmatprep.mubr.msk.bf16.mxu0 %vm16660_vm1, %v1263_v58  ;;  %v17021_v58 = vpack.c.bf16 %v12453_v35, %v12448_v27  ;;  %v2069_v24 = vpack.c.bf16 %v637_v11, %v636_v4  ;;  %v17028_v27 = vld [vmem:[#allocation15_spill] sm:$0xff]  ;;  %v17029_v35 = vld [vmem:[#allocation14_spill] sm:$0xff] }
  0x84   : > { %v17030_v63 = vpack.c.bf16 %v17028_v27, %v17029_v35 }
  0x89   : > { %9585 = vmatmul.mubr.msk.bf16.gmra.mrb[28].mxu1 %vm2085_vm4, %v2062_v17  ;;  %v17031_v17 = vld [vmem:[#allocation18_spill] sm:$0xff] }
  0x8a   : > { %10389 = vmatmul.mubr.msk.bf16.gmra.mrb[20].mxu0 %vm16660_vm1, %v1264_v5  ;;  %2229 = vmatprep.mubr.bf16.mxu1 %v12023_v31  ;;  %v17027_v5 = vpack.c.bf16 %v17025_v22, %v17026_v55  ;;  %v12884_v55 = vstv %s9505_s29 }
  0x8b   : > { %10392 = vmatprep.mubr.msk.bf16.mxu0 %vm16660_vm1, %v1265_v3  ;;  %v2070_v3 = vpack.c.bf16 %v639_v2, %v638_v62 }
  0x91   : > { %9586 = vmatmul.mubr.msk.bf16.gmra.mrb[32].mxu1 %vm2085_vm4, %v2063_v32  ;;  %v17036_v32 = vpack.c.bf16 %v17034_v16, %v17035_v45 }
  0x92   : > { %10393 = vmatmul.mubr.msk.bf16.gmra.mrb[24].mxu0 %vm16660_vm1, %v1266_v36  ;;  %2239 = vmatprep.mubr.bf16.mxu1 %v12023_v31  ;;  %v17032_v36 = vld [vmem:[#allocation17_spill] sm:$0xff] }
  0x93   : > { %10396 = vmatprep.mubr.msk.bf16.mxu0 %vm16660_vm1, %v1267_v6  ;;  %v17033_v6 = vpack.c.bf16 %v17031_v17, %v17032_v36 }
  0x99   : > { %9587 = vmatmul.mubr.msk.bf16.gmra.mrb[36].mxu1 %vm2085_vm4, %v2064_v19  ;;  %v17038_v19 = vld [vmem:[#allocation21_spill] sm:$0xff] }
  0x9a   : > { %10397 = vmatmul.mubr.msk.bf16.gmra.mrb[28].mxu0 %vm16660_vm1, %v1268_v21  ;;  %2249 = vmatprep.mubr.bf16.mxu1 %v12023_v31  ;;  %v2071_v21 = vpack.c.bf16 %v641_v15, %v640_v14 }
  0x9b   : > { %10400 = vmatprep.mubr.msk.bf16.mxu0 %vm16660_vm1, %v1269_v0  ;;  %v642_v0 = vld [vmem:[%s12616_s30 + $0xe0] sm:$0xff] }
  0x9c   : > { %v2072_v18 = vpack.c.bf16 %v643_v46, %v642_v0 }
  0xa1   : > { %9588 = vmatmul.mubr.msk.bf16.gmra.mrb[40].mxu1 %vm2085_vm4, %v2065_v38  ;;  %v17040_v38 = vpack.c.bf16 %v12580_v25, %v12574_v10  ;;  %v648_v25 = vld [vmem:[%s12616_s30 + $0x110] sm:$0xff] }
  0xa2   : > { %10401 = vmatmul.mubr.msk.bf16.gmra.mrb[32].mxu0 %vm16660_vm1, %v1270_v12  ;;  %2259 = vmatprep.mubr.bf16.mxu1 %v12023_v31  ;;  %v17039_v12 = vpack.c.bf16 %v17037_v51, %v17038_v19  ;;  %v2075_v57 = vpack.c.bf16 %v649_v9, %v648_v25 }
  0xa3   : > { %10406 = vmatprep.mubr.msk.bf16.mxu0 %vm16660_vm1, %v17011_v23  ;;  %v645_v23 = vld [vmem:[%s12616_s30 + $0xf8] sm:$0xff] }
  0xa4   : > { %v2073_v42 = vpack.c.bf16 %v645_v23, %v644_v50 }
  0xa9   : > { %9589 = vmatmul.mubr.msk.bf16.gmra.mrb[44].mxu1 %vm2085_vm4, %v2066_v33 }
  0xaa   : > { %10407 = vmatmul.mubr.msk.bf16.vlgmr.msra.gmra.mrb[0].mxu0 %vm16660_vm1, %v17014_v40  ;;  %2269 = vmatprep.mubr.bf16.mxu1 %v12023_v31 }
  0xab   : > { %10410 = vmatprep.mubr.msk.bf16.mxu0 %vm16660_vm1, %v17015_v47 }
  0xb1   : > { %9590 = vmatmul.mubr.msk.bf16.gmra.mrb[48].mxu1 %vm2085_vm4, %v2067_v30 }
  0xb2   : > { %10411 = vmatmul.mubr.msk.bf16.gmra.mrb[4].mxu0 %vm16660_vm1, %v17016_v52  ;;  %2279 = vmatprep.mubr.bf16.mxu1 %v12023_v31 }
  0xb3   : > { %10414 = vmatprep.mubr.msk.bf16.mxu0 %vm16660_vm1, %v17017_v53 }
  0xb9   : > { %9591 = vmatmul.mubr.msk.bf16.gmra.mrb[52].mxu1 %vm2085_vm4, %v2068_v28 }
  0xba   : > { %10415 = vmatmul.mubr.msk.bf16.gmra.mrb[8].mxu0 %vm16660_vm1, %v17018_v49  ;;  %2289 = vmatprep.mubr.bf16.mxu1 %v12023_v31 }
  0xbb   : > { %10418 = vmatprep.mubr.msk.bf16.mxu0 %vm16660_vm1, %v17020_v1 }
  0xc1   : > { %9592 = vmatmul.mubr.msk.bf16.gmra.mrb[56].mxu1 %vm2085_vm4, %v2069_v24 }
  0xc2   : > { %10419 = vmatmul.mubr.msk.bf16.gmra.mrb[12].mxu0 %vm16660_vm1, %v17021_v58  ;;  %2299 = vmatprep.mubr.bf16.mxu1 %v12023_v31  ;;  %v652_v58 = vlaneseq }
  0xc3   : > { %10422 = vmatprep.mubr.msk.bf16.mxu0 %vm16660_vm1, %v17024_v59 }
  0xc4   : > { %v12873_v61 = vshrl.u32 %v652_v58, 7 }
  0xc6   : > { %v655_v2 = vadd.s32 16, %v12873_v61  ;;  %v654_v27 = vadd.s32 8, %v12873_v61  ;;  %v657_v14 = vadd.s32 32, %v12873_v61  ;;  %v660_v36 = vadd.s32 56, %v12873_v61 }
  0xc7   : > { %v658_v45 = vadd.s32 40, %v12873_v61  ;;  %v663_v0 = vadd.s32 80, %v12873_v61  ;;  %v661_v19 = vadd.s32 64, %v12873_v61 }
  0xc8   : > { %v676_v35 = vadd.s32 %v12884_v55, %v655_v2  ;;  %v675_v16 = vadd.s32 %v12884_v55, %v654_v27  ;;  %v678_v51 = vadd.s32 %v12884_v55, %v657_v14 }
  0xc9   : > { %9593 = vmatmul.mubr.msk.bf16.gmra.mrb[60].mxu1 %vm2085_vm4, %v2070_v3  ;;  %v674_v3 = vadd.s32 %v12884_v55, %v12873_v61  ;;  %v679_v23 = vadd.s32 %v12884_v55, %v658_v45  ;;  %v682_v25 = vadd.s32 %v12884_v55, %v661_v19  ;;  %v12961_v45 = vld [vmem:[%s16629_s4] ss:$0 sm:$0xff]  ;;  %v668_v19 = vadd.s32 120, %v12873_v61 }
  0xca   : > { %10423 = vmatmul.mubr.msk.bf16.gmra.mrb[16].mxu0 %vm16660_vm1, %v17027_v5  ;;  %2309 = vmatprep.mubr.bf16.mxu1 %v12023_v31  ;;  %v656_v5 = vadd.s32 24, %v12873_v61  ;;  %vm694_vm5 = vcmp.ge.s32.totalorder %v676_v35, 0  ;;  %vm712_vm6 = vcmp.lt.s32.totalorder %v676_v35, 512  ;;  %vm693_vm12 = vcmp.ge.s32.totalorder %v675_v16, 0 }
  0xcb   : > { %10426 = vmatprep.mubr.msk.bf16.mxu0 %vm16660_vm1, %v17030_v63  ;;  %v659_v63 = vadd.s32 48, %v12873_v61  ;;  %vm692_vm7 = vcmp.ge.s32.totalorder %v674_v3, 0  ;;  %vm710_vm8 = vcmp.lt.s32.totalorder %v674_v3, 512  ;;  %vm12911_vm11 = vmand %vm694_vm5, %vm712_vm6  ;;  %vm711_vm13 = vcmp.lt.s32.totalorder %v675_v16, 512 }
  0xcc   : > { %v677_v17 = vadd.s32 %v12884_v55, %v656_v5  ;;  %vm12917_vm14 = vmand %vm692_vm7, %vm710_vm8  ;;  %vm696_vm6 = vcmp.ge.s32.totalorder %v678_v51, 0  ;;  %vm715_vm2 = vcmp.lt.s32.totalorder %v679_v23, 512  ;;  %v665_v35 = vadd.s32 96, %v12873_v61 }
  0xcd   : > { %vm12930_vm7 = vmand %vm693_vm12, %vm711_vm13 }
  0xce   : > { %vm695_vm9 = vcmp.ge.s32.totalorder %v677_v17, 0  ;;  %vm713_vm10 = vcmp.lt.s32.totalorder %v677_v17, 512 }
  0xcf   : > { %vm12923_vm5 = vmand %vm695_vm9, %vm713_vm10  ;;  %vm697_vm10 = vcmp.ge.s32.totalorder %v679_v23, 0  ;;  %v686_v23 = vadd.s32 %v12884_v55, %v665_v35 }
  0xd1   : > { %9594 = vmatmul.mubr.msk.bf16.gmra.mrb[64].mxu1 %vm2085_vm4, %v2071_v21  ;;  %v680_v21 = vadd.s32 %v12884_v55, %v659_v63 }
  0xd2   : > { %10427 = vmatmul.mubr.msk.bf16.gmra.mrb[20].mxu0 %vm16660_vm1, %v17033_v6  ;;  %2319 = vmatprep.mubr.bf16.mxu1 %v12023_v31 }
  0xd3   : > { %10430 = vmatprep.mubr.msk.bf16.mxu0 %vm16660_vm1, %v17036_v32  ;;  %vm698_vm15 = vcmp.ge.s32.totalorder %v680_v21, 0 }
  0xd9   : > { %9595 = vmatmul.mubr.msk.bf16.gmra.mrb[68].mxu1 %vm2085_vm4, %v2072_v18  ;;  %v664_v18 = vadd.s32 88, %v12873_v61 }
  0xda   : > { %10431 = vmatmul.mubr.msk.bf16.gmra.mrb[24].mxu0 %vm16660_vm1, %v17039_v12  ;;  %2329 = vmatprep.mubr.bf16.mxu1 %v12023_v31  ;;  %v681_v12 = vadd.s32 %v12884_v55, %v660_v36  ;;  %v16664_v36 = vmov 0.0  }
  0xdb   : > { %10434 = vmatprep.mubr.msk.bf16.mxu0 %vm16660_vm1, %v1670_v60  ;;  %v647_v60 = vld [vmem:[%s12616_s30 + $0x108] sm:$0xff]  ;;  %v685_v58 = vadd.s32 %v12884_v55, %v664_v18  ;;  %v12956_v16 = vsel %vm12911_vm11, 1.0, %v16664_v36  ;;  %vm12976_vm11 = vmand %vm697_vm10, %vm715_vm2  ;;  %v12984_v18 = vsel %vm12923_vm5, 1.0, %v16664_v36 }
  0xdc   : > { %v2074_v10 = vpack.c.bf16 %v647_v60, %v646_v43  ;;  %v684_v43 = vadd.s32 %v12884_v55, %v663_v0  ;;  %v667_v60 = vadd.s32 112, %v12873_v61  ;;  %vm699_vm8 = vcmp.ge.s32.totalorder %v681_v12, 0  ;;  %17078 = vst [vmem:[#allocation30_spill] sm:$0xff] %v12956_v16  ;;  %17084 = vst [vmem:[#allocation32_spill] sm:$0xff] %v12984_v18 }
  0xdd   : > { %vm717_vm3 = vcmp.lt.s32.totalorder %v681_v12, 512  ;;  %v12972_v0 = vsel %vm12917_vm14, 1.0, %v16664_v36  ;;  %vm721_vm13 = vcmp.lt.s32.totalorder %v685_v58, 512 }
  0xde   : > { %vm720_vm0 = vcmp.lt.s32.totalorder %v684_v43, 512  ;;  %v688_v14 = vadd.s32 %v12884_v55, %v667_v60  ;;  %17081 = vst [vmem:[#allocation31_spill] sm:$0xff] %v12972_v0  ;;  %v12997_v60 = vsel %vm12930_vm7, 1.0, %v16664_v36 }
  0xdf   : > { %17088 = vst [vmem:[#allocation33_spill] sm:$0xff] %v12997_v60 }
  0xe0   : > { %vm724_vm10 = vcmp.lt.s32.totalorder %v688_v14, 512 }
  0xe1   : > { %9596 = vmatmul.mubr.msk.bf16.gmra.mrb[72].mxu1 %vm2085_vm4, %v2073_v42 }
  0xe2   : > { %10435 = vmatmul.mubr.msk.bf16.gmra.mrb[28].mxu0 %vm16660_vm1, %v17040_v38  ;;  %2339 = vmatprep.mubr.bf16.mxu1 %v12023_v31  ;;  %v662_v38 = vadd.s32 72, %v12873_v61 }
  0xe3   : > { %10438 = vmatprep.mubr.msk.bf16.mxu0 %vm16660_vm1, %v1672_v26  ;;  %v12819_v26 = vld [vmem:[%s16630_s5 + $0x10] sm:$0xff]  }
  0xe4   : > { %10482 = vmatprep.subr.bf16.mxu1 %v12819_v26  ;;  %v683_v27 = vadd.s32 %v12884_v55, %v662_v38 }
  0xe6   : > { %vm701_vm2 = vcmp.ge.s32.totalorder %v683_v27, 0 }
  0xe9   : > { %9597 = vmatmul.mubr.msk.bf16.gmra.mrb[76].mxu1 %vm2085_vm4, %v2074_v10 }
  0xea   : > { %10439 = vmatmul.mubr.msk.bf16.gmra.mrb[32].mxu0 %vm16660_vm1, %v1673_v29  ;;  %2349 = vmatprep.mubr.bf16.mxu1 %v12023_v31  ;;  %vm714_vm1 = vcmp.lt.s32.totalorder %v678_v51, 512 }
  0xeb   : > { %vm12946_vm12 = vmand %vm696_vm6, %vm714_vm1  ;;  %vm703_vm6 = vcmp.ge.s32.totalorder %v685_v58, 0  ;;  %v666_v58 = vadd.s32 104, %v12873_v61 }
  0xec   : > { %vm12965_vm1 = vmand %vm699_vm8, %vm717_vm3  ;;  %vm17085_vm3 = vcmp.ge.s32.totalorder %v684_v43, 0  ;;  %vm719_vm8 = vcmp.lt.s32.totalorder %v683_v27, 512 }
  0xed   : > { %vm12988_vm14 = vmand %vm17085_vm3, %vm720_vm0  ;;  %vm706_vm0 = vcmp.ge.s32.totalorder %v688_v14, 0  ;;  %vm17115_vm3 = vcmask 1040384  }
  0xee   : > { %vm13023_vm7 = vmand %vm703_vm6, %vm721_vm13  ;;  %vm704_vm13 = vcmp.ge.s32.totalorder %v686_v23, 0 }
  0xf1   : > { %9598 = vmatmul.mubr.msk.bf16.gmra.mrb[80].mxu1 %vm2085_vm4, %v2075_v57  ;;  %vm716_vm4 = vcmp.lt.s32.totalorder %v680_v21, 512  ;;  %v13014_v57 = vsel %vm12946_vm12, 1.0, %v16664_v36  ;;  %v689_v21 = vadd.s32 %v12884_v55, %v668_v19  ;;  %vm13043_vm12 = vmand %vm706_vm0, %vm724_vm10 }
  0xf2   : > { %vm12937_vm9 = vmand %vm698_vm15, %vm716_vm4  ;;  %vm700_vm15 = vcmp.ge.s32.totalorder %v682_v25, 0  ;;  %vm718_vm4 = vcmp.lt.s32.totalorder %v682_v25, 512  ;;  %17092 = vst [vmem:[#allocation35_spill] sm:$0xff] %v13014_v57  ;;  %v13019_v25 = vsel %vm12965_vm1, 1.0, %v16664_v36  ;;  %vm722_vm1 = vcmp.lt.s32.totalorder %v686_v23, 512 }
  0xf3   : > { %vm13001_vm5 = vmand %vm700_vm15, %vm718_vm4  ;;  %v13009_v35 = vsel %vm12937_vm9, 1.0, %v16664_v36  ;;  %17093 = vst [vmem:[#allocation36_spill] sm:$0xff] %v13019_v25  ;;  %vm2538_vm15 = vcmask 261120   ;;  %vm725_vm6 = vcmp.lt.s32.totalorder %v689_v21, 512 }
  0xf4   : > { %17091 = vst [vmem:[#allocation34_spill] sm:$0xff] %v13009_v35  ;;  %vm13032_vm9 = vmand %vm701_vm2, %vm719_vm8 }
  0xf5   : > { %vm740_vm4 = vmand %vm704_vm13, %vm722_vm1 }
  0xf6   : > { %vm17120_vm2 = vmmov %vm17115_vm3 }
  0xf7   : > { %vm17136_vm13 = vmmov %vm17120_vm2 }
  0xf8   : > { %vm17138_vm1 = vmmov %vm17120_vm2 }
 0x123   : > { %v12822_v7 = vpop.f32.mrb[0].mxu1 }
 0x124   : > { %v12824_v8 = vpop.f32.mrb[1].mxu1 }
 0x125   : > { %v12826_v29 = vpop.f32.mrb[2].mxu1 }
 0x126   : > { %v12828_v39 = vpop.f32.mrb[3].mxu1 }
 0x12c   : > { %v12830_v31 = vpop.f32.mrb[4].mxu1 }
 0x12d   : > { %v12832_v56 = vpop.f32.mrb[5].mxu1 }
 0x12e   : > { %v12834_v13 = vpop.f32.mrb[6].mxu1 }
 0x12f   : > { %v12836_v54 = vpop.f32.mrb[7].mxu1 }
 0x134   : > { %v12838_v40 = vpop.f32.mrb[8].mxu1 }
 0x135   : > { %v12840_v47 = vpop.f32.mrb[9].mxu1 }
 0x136   : > { %v12842_v33 = vpop.f32.mrb[10].mxu1 }
 0x137   : > { %v12844_v34 = vpop.f32.mrb[11].mxu1 }
 0x13c   : > { %v12846_v48 = vpop.f32.mrb[12].mxu1 }
 0x13d   : > { %17041 = vst [vmem:[#allocation7_spill] sm:$0xff] %v12846_v48  ;;  %v12848_v52 = vpop.f32.mrb[13].mxu1 }
 0x13e   : > { %17042 = vst [vmem:[#allocation8_spill] sm:$0xff] %v12848_v52  ;;  %v12850_v53 = vpop.f32.mrb[14].mxu1 }
 0x13f   : > { %17043 = vst [vmem:[#allocation9_spill] sm:$0xff] %v12850_v53  ;;  %v12852_v30 = vpop.f32.mrb[15].mxu1 }
 0x140   : > { %17044 = vst [vmem:[#allocation6_spill] sm:$0xff] %v12852_v30 }
 0x144   : > { %v12854_v20 = vpop.f32.mrb[16].mxu1 }
 0x145   : > { %17045 = vst [vmem:[#allocation5_spill] sm:$0xff] %v12854_v20  ;;  %v12856_v37 = vpop.f32.mrb[17].mxu1 }
 0x146   : > { %17046 = vst [vmem:[#allocation10_spill] sm:$0xff] %v12856_v37  ;;  %v12858_v49 = vpop.f32.mrb[18].mxu1 }
 0x147   : > { %17047 = vst [vmem:[#allocation16_spill] sm:$0xff] %v12858_v49  ;;  %v12860_v41 = vpop.f32.mrb[19].mxu1 }
 0x148   : > { %17048 = vst [vmem:[#allocation11_spill] sm:$0xff] %v12860_v41 }
 0x14c   : > { %v12862_v1 = vpop.f32.mrb[20].mxu1 }
 0x14d   : > { %17049 = vst [vmem:[#allocation13_spill] sm:$0xff] %v12862_v1  ;;  %v12864_v28 = vpop.f32.mrb[21].mxu1 }
 0x14e   : > { %17050 = vst [vmem:[#allocation12_spill] sm:$0xff] %v12864_v28  ;;  %v12866_v4 = vpop.f32.mrb[22].mxu1 }
 0x14f   : > { %17051 = vst [vmem:[#allocation15_spill] sm:$0xff] %v12866_v4  ;;  %v12868_v11 = vpop.f32.mrb[23].mxu1 }
 0x150   : > { %17052 = vst [vmem:[#allocation14_spill] sm:$0xff] %v12868_v11 }
 0x154   : > { %v12870_v44 = vpop.f32.mrb[24].mxu1 }
 0x155   : > { %17053 = vst [vmem:[#allocation18_spill] sm:$0xff] %v12870_v44  ;;  %v12875_v59 = vpop.f32.mrb[25].mxu1 }
 0x156   : > { %17054 = vst [vmem:[#allocation17_spill] sm:$0xff] %v12875_v59  ;;  %v12877_v24 = vpop.f32.mrb[26].mxu1 }
 0x157   : > { %17055 = vst [vmem:[#allocation20_spill] sm:$0xff] %v12877_v24  ;;  %v12879_v62 = vpop.f32.mrb[27].mxu1 }
 0x158   : > { %17056 = vst [vmem:[#allocation19_spill] sm:$0xff] %v12879_v62 }
 0x15c   : > { %v12882_v22 = vpop.f32.mrb[28].mxu1 }
 0x15d   : > { %17057 = vst [vmem:[#allocation22_spill] sm:$0xff] %v12882_v22  ;;  %v12893_v15 = vpop.f32.mrb[29].mxu1 }
 0x15e   : > { %17058 = vst [vmem:[#allocation21_spill] sm:$0xff] %v12893_v15  ;;  %v12897_v6 = vpop.f32.mrb[30].mxu1 }
 0x15f   : > { %17059 = vst [vmem:[#allocation23_spill] sm:$0xff] %v12897_v6  ;;  %v12901_v32 = vpop.f32.mrb[31].mxu1 }
 0x160   : > { %17060 = vst [vmem:[#allocation24_spill] sm:$0xff] %v12901_v32 }
 0x164   : > { %v12905_v46 = vpop.f32.mrb[32].mxu1 }
 0x165   : > { %17061 = vst [vmem:[#allocation25_spill] sm:$0xff] %v12905_v46  ;;  %v12928_v9 = vpop.f32.mrb[33].mxu1 }
 0x166   : > { %17068 = vst [vmem:[#allocation26_spill] sm:$0xff] %v12928_v9  ;;  %v12935_v2 = vpop.f32.mrb[34].mxu1 }
 0x167   : > { %17071 = vst [vmem:[#allocation27_spill] sm:$0xff] %v12935_v2  ;;  %v12943_v63 = vpop.f32.mrb[35].mxu1 }
 0x168   : > { %17074 = vst [vmem:[#allocation28_spill] sm:$0xff] %v12943_v63 }
 0x16c   : > { %v12951_v17 = vpop.f32.mrb[36].mxu1 }
 0x16d   : > { %17077 = vst [vmem:[#allocation29_spill] sm:$0xff] %v12951_v17 }
 0x17d   : > { %v10408_v12 = vpop.f32.mrb[0].mxu0 }
 0x17e   : > { %v1952_v38 = vadd.f32 %v10408_v12, %v12961_v45  ;;  %v1765_v42 = vpop.f32.mrb[1].mxu0 }
 0x17f   : > { %v1950_v10 = vadd.f32 %v12961_v45, %v1765_v42  ;;  %v10409_v32 = vpop.f32.mrb[2].mxu0  ;;  %v13027_v42 = vpop.f32.mrb[37].mxu1 }
 0x180   : > { %17096 = vst [vmem:[#allocation37_spill] sm:$0xff] %v13027_v42  ;;  %v1988_v5 = vmax.f32 %v1952_v38, 0.0  ;;  %v1953_v63 = vadd.f32 %v10409_v32, %v12961_v45  ;;  %v1768_v15 = vpop.f32.mrb[3].mxu0  ;;  %v13038_v36 = vpop.f32.mrb[38].mxu1  ;;  %v17104_v42 = vmov 0.0  }
 0x181   : > { %17099 = vst [vmem:[#allocation38_spill] sm:$0xff] %v13038_v36  ;;  %v1986_v9 = vmax.f32 %v1950_v10, 0.0  ;;  %v1951_v11 = vadd.f32 %v12961_v45, %v1768_v15  ;;  %v13047_v27 = vpop.f32.mrb[39].mxu1  ;;  %v13055_v10 = vsel %vm12976_vm11, 1.0, %v17104_v42  ;;  %vm707_vm11 = vcmp.ge.s32.totalorder %v689_v21, 0 }
 0x182   : > { %17102 = vst [vmem:[#allocation39_spill] sm:$0xff] %v13047_v27  ;;  %v13050_v38 = vmul.f32 %v12956_v16, %v1988_v5  ;;  %v1989_v19 = vmax.f32 %v1953_v63, 0.0  ;;  %17105 = vst [vmem:[#allocation41_spill] sm:$0xff] %v13055_v10  ;;  %v13057_v15 = vpop.f32.mrb[40].mxu1  ;;  %v13065_v27 = vsel %vm12988_vm14, 1.0, %v17104_v42  ;;  %v13070_v63 = vsel %vm13001_vm5, 1.0, %v17104_v42 }
 0x183   : > { %17106 = vst [vmem:[#allocation42_spill] sm:$0xff] %v13057_v15  ;;  %v13060_v14 = vmul.f32 %v12972_v0, %v1986_v9  ;;  %v1987_v62 = vmax.f32 %v1951_v11, 0.0  ;;  %17108 = vst [vmem:[#allocation44_spill] sm:$0xff] %v13065_v27  ;;  %v13078_v5 = vsel %vm13023_vm7, 1.0, %v17104_v42  ;;  %v13083_v11 = vsel %vm13032_vm9, 1.0, %v17104_v42 }
 0x184   : > { %17103 = vst [vmem:[#allocation40_spill] sm:$0xff] %v13050_v38  ;;  %17109 = vst [vmem:[#allocation45_spill] sm:$0xff] %v13070_v63  ;;  %v13073_v51 = vmul.f32 %v12984_v18, %v1989_v19  ;;  %v13088_v9 = vsel %vm13043_vm12, 1.0, %v17104_v42  ;;  %v13097_v19 = vadd.s32 %v12884_v55, %v666_v58  ;;  %v2399_v3 = vrot.slane %v13050_v38, 7  ;;  %v13108_v58 = vpop.f32.mrb[41].mxu1 }
 0x185   : > { %17107 = vst [vmem:[#allocation43_spill] sm:$0xff] %v13060_v14  ;;  %17111 = vst [vmem:[#allocation47_spill] sm:$0xff] %v13078_v5  ;;  %v2396_v50 = vrot.slane %v13060_v14, 7  ;;  %v13094_v43 = vmul.f32 %v12997_v60, %v1987_v62  ;;  %v10412_v12 = vpop.f32.mrb[4].mxu0  ;;  %v13106_v52 = vsel %vm740_vm4, 1.0, %v17104_v42  ;;  %v669_v15 = vadd.s32 128, %v12873_v61 }
 0x186   : > { %17110 = vst [vmem:[#allocation46_spill] sm:$0xff] %v13073_v51  ;;  %17112 = vst [vmem:[#allocation48_spill] sm:$0xff] %v13083_v11  ;;  %v2401_v28 = vrot.slane %v13073_v51, 7  ;;  %v1956_v32 = vadd.f32 %v10412_v12, %v12961_v45  ;;  %v1781_v59 = vpop.f32.mrb[5].mxu0  ;;  %v13115_v6 = vpop.f32.mrb[42].mxu1  ;;  %vm705_vm0 = vcmp.ge.s32.totalorder %v13097_v19, 0 }
 0x187   : > { %17113 = vst [vmem:[#allocation49_spill] sm:$0xff] %v13088_v9  ;;  %17114 = vst [vmem:[#allocation50_spill] sm:$0xff] %v13094_v43  ;;  %v2397_v23 = vrot.slane %v13094_v43, 7  ;;  %v1954_v30 = vadd.f32 %v12961_v45, %v1781_v59  ;;  %v10413_v41 = vpop.f32.mrb[6].mxu0  ;;  %v2504_v62 = vsel %vm17115_vm3, 0.0, %v2396_v50  ;;  %vm723_vm10 = vcmp.lt.s32.totalorder %v13097_v19, 512 }
 0x188   : > { %17116 = vst [vmem:[#allocation51_spill] sm:$0xff] %v13106_v52  ;;  %17117 = vst [vmem:[#allocation52_spill] sm:$0xff] %v13108_v58  ;;  %v1992_v36 = vmax.f32 %v1956_v32, 0.0  ;;  %v1957_v12 = vadd.f32 %v10413_v41, %v12961_v45  ;;  %v1784_v17 = vpop.f32.mrb[7].mxu0  ;;  %v3071_v46 = vrot.slane %v2504_v62, 2  ;;  %v13123_v58 = vpop.f32.mrb[43].mxu1 }
 0x189   : > { %vm17118_vm14 = vmmov %vm17115_vm3  ;;  %17119 = vst [vmem:[#allocation53_spill] sm:$0xff] %v13115_v6  ;;  %v13118_v59 = vsel %vm17120_vm2, %v2397_v23, %v2399_v3  ;;  %v1990_v2 = vmax.f32 %v1954_v30, 0.0  ;;  %v1955_v22 = vadd.f32 %v12961_v45, %v1784_v17  ;;  %vm17129_vm7 = vcmask 1045504  }
 0x18a   : > { %v13111_v37 = vsel %vm17118_vm14, %v2399_v3, %v2401_v28  ;;  %vm743_vm8 = vmand %vm707_vm11, %vm725_vm6  ;;  %17121 = vst [vmem:[#allocation54_spill] sm:$0xff] %v13123_v58  ;;  %v13128_v32 = vmul.f32 %v13009_v35, %v1992_v36  ;;  %v1993_v4 = vmax.f32 %v1957_v12, 0.0  ;;  %v13131_v3 = vpop.f32.mrb[44].mxu1  ;;  %v13145_v36 = vadd.s32 %v12884_v55, %v669_v15 }
 0x18b   : > { %v2509_v41 = vpack.c.bf16 %v13111_v37, %v13118_v59  ;;  %vm17123_vm5 = vmmov %vm17120_vm2  ;;  %17124 = vst [vmem:[#allocation56_spill] sm:$0xff] %v13131_v3  ;;  %v13134_v30 = vmul.f32 %v13014_v57, %v1990_v2  ;;  %v1991_v17 = vmax.f32 %v1955_v22, 0.0  ;;  %v13140_v58 = vsel %vm743_vm8, 1.0, %v17104_v42  ;;  %v11322_v2 = vld [vmem:[%s16630_s5 + $0x18] sm:$0xff]   ;;  %v13174_v12 = vpop.f32.mrb[45].mxu1 }
 0x18c   : > { %17122 = vst [vmem:[#allocation55_spill] sm:$0xff] %v13128_v32  ;;  %v2398_v6 = vsel %vm17123_vm5, %v2396_v50, %v2397_v23  ;;  %v13137_v1 = vmul.f32 %v13019_v25, %v1993_v4  ;;  %17127 = vst [vmem:[#allocation59_spill] sm:$0xff] %v13140_v58  ;;  %v3074_v22 = vrot.slane %v13118_v59, 2  ;;  %v670_v23 = vadd.s32 136, %v12873_v61 }
 0x18d   : > { %17125 = vst [vmem:[#allocation57_spill] sm:$0xff] %v13134_v30  ;;  %v2508_v24 = vpack.c.bf16 %v2398_v6, %v2504_v62  ;;  %v3072_v21 = vrot.slane %v2398_v6, 2  ;;  %v2403_v6 = vrot.slane %v13134_v30, 7  ;;  %v13153_v4 = vmul.f32 %v13055_v10, %v1991_v17  ;;  %v10416_v50 = vpop.f32.mrb[8].mxu0  ;;  %vm17131_vm9 = vmmov %vm17129_vm7 }
 0x18e   : > { %17126 = vst [vmem:[#allocation58_spill] sm:$0xff] %v13137_v1  ;;  %v2407_v15 = vrot.slane %v13128_v32, 7  ;;  %v1960_v3 = vadd.f32 %v10416_v50, %v12961_v45  ;;  %v1797_v59 = vpop.f32.mrb[9].mxu0  ;;  %vm17133_vm12 = vmmov %vm17120_vm2  ;;  %vm708_vm6 = vcmp.ge.s32.totalorder %v13145_v36, 0  ;;  %vm726_vm3 = vcmp.lt.s32.totalorder %v13145_v36, 512 }
 0x18f   : > { %17128 = vst [vmem:[#allocation60_spill] sm:$0xff] %v13153_v4  ;;  %10446 = vmatprep.mubr.msk.bf16.mxu1 %vm2538_vm15, %v2508_v24  ;;  %v13158_v62 = vsel %vm17129_vm7, %v3071_v46, %v3072_v21  ;;  %v13165_v17 = vsel %vm17131_vm9, %v3072_v21, %v3074_v22  ;;  %v3076_v24 = vrot.slane %v13111_v37, 2  ;;  %v2405_v44 = vrot.slane %v13153_v4, 7  ;;  %v10417_v46 = vpop.f32.mrb[10].mxu0  ;;  %17134 = vst [vmem:[#allocation63_spill] sm:$0xff] %v13174_v12 }
 0x190   : > { %17130 = vst [vmem:[#allocation61_spill] sm:$0xff] %v13158_v62  ;;  %10447 = vmatmul.mubr.msk.bf16.vlgmr.msra.gmra.mrb[84].mxu1 %vm2538_vm15, %v2509_v41  ;;  %17132 = vst [vmem:[#allocation62_spill] sm:$0xff] %v13165_v17  ;;  %v1958_v61 = vadd.f32 %v12961_v45, %v1797_v59  ;;  %v13172_v53 = vsel %vm17133_vm12, %v2401_v28, %v2403_v6  ;;  %v1996_v50 = vmax.f32 %v1960_v3, 0.0  ;;  %v1800_v49 = vpop.f32.mrb[11].mxu0  ;;  %v17135_v37 = vrot.slane %v13137_v1, 7  ;;  %v13188_v28 = vpop.f32.mrb[46].mxu1 }
 0x191   : > { %10483 = vmatpush3.bf16.msra.mxu1 %v12819_v26  ;;  %v1961_v41 = vadd.f32 %v10417_v46, %v12961_v45  ;;  %v13186_v26 = vld [vmem:[%s16630_s5 + $0x20] sm:$0xff]   ;;  %17137 = vst [vmem:[#allocation64_spill] sm:$0xff] %v13188_v28  ;;  %v1959_v3 = vadd.f32 %v12961_v45, %v1800_v49  ;;  %v13192_v46 = vsel %vm17138_vm1, %v2403_v6, %v2405_v44  ;;  %vm17139_vm4 = vmmov %vm17138_vm1  ;;  %v13197_v12 = vpop.f32.mrb[47].mxu1  ;;  %v17142_v28 = vrot.slane %v13172_v53, 2 }
 0x192   : > { %v13181_v48 = vsel %vm17136_vm13, %v2407_v15, %v17135_v37  ;;  %10484 = vmatprep.subr.bf16.mxu1 %v11322_v2  ;;  %v1994_v59 = vmax.f32 %v1958_v61, 0.0  ;;  %v13195_v21 = vsel %vm17139_vm4, %v2405_v44, %v2407_v15  ;;  %17140 = vst [vmem:[#allocation65_spill] sm:$0xff] %v13197_v12  ;;  %v13200_v37 = vmul.f32 %v13065_v27, %v1996_v50  ;;  %vm17143_vm11 = vmmov %vm17129_vm7  ;;  %v13209_v49 = vpop.f32.mrb[48].mxu1 }
 0x193   : > { %v1997_v20 = vmax.f32 %v1961_v41, 0.0  ;;  %v2510_v32 = vpack.c.bf16 %v13192_v46, %v13172_v53  ;;  %v13207_v61 = vsel %vm17143_vm11, %v3076_v24, %v17142_v28  ;;  %17145 = vst [vmem:[#allocation68_spill] sm:$0xff] %v13209_v49  ;;  %v1995_v44 = vmax.f32 %v1959_v3, 0.0  ;;  %vm17149_vm14 = vmmov %vm17129_vm7 }
 0x194   : > { %17141 = vst [vmem:[#allocation66_spill] sm:$0xff] %v13200_v37  ;;  %17144 = vst [vmem:[#allocation67_spill] sm:$0xff] %v13207_v61  ;;  %v13212_v6 = vmul.f32 %v13070_v63, %v1994_v59  ;;  %v2511_v15 = vpack.c.bf16 %v13181_v48, %v13195_v21  ;;  %v3080_v41 = vrot.slane %v13192_v46, 2  ;;  %v691_v28 = vadd.s32 %v12884_v55, %v670_v23 }
 0x195   : > { %10485 = vmatpush3.bf16.msra.mxu1 %v11322_v2  ;;  %v13218_v50 = vmul.f32 %v13078_v5, %v1997_v20  ;;  %10450 = vmatprep.mubr.msk.bf16.mxu1 %vm2538_vm15, %v2510_v32  ;;  %v13227_v3 = vmul.f32 %v13083_v11, %v1995_v44  ;;  %v10420_v12 = vpop.f32.mrb[12].mxu0  ;;  %v13230_v2 = vsel %vm17149_vm14, %v3074_v22, %v3076_v24  ;;  %v2415_v32 = vrot.slane %v13200_v37, 7  ;;  %vm13248_vm2 = vmand %vm705_vm0, %vm723_vm10 }
 0x196   : > { %17146 = vst [vmem:[#allocation69_spill] sm:$0xff] %v13212_v6  ;;  %10522 = vmatprep.subr.bf16.mxu1 %v13186_v26  ;;  %v2411_v59 = vrot.slane %v13212_v6, 7  ;;  %17150 = vst [vmem:[#allocation72_spill] sm:$0xff] %v13230_v2  ;;  %v1964_v55 = vadd.f32 %v10420_v12, %v12961_v45  ;;  %v1813_v23 = vpop.f32.mrb[13].mxu0  ;;  %v3082_v22 = vrot.slane %v13195_v21, 2  ;;  %v17154_v21 = vrot.slane %v13137_v1, 7 }
 0x197   : > { %17147 = vst [vmem:[#allocation70_spill] sm:$0xff] %v13218_v50  ;;  %17148 = vst [vmem:[#allocation71_spill] sm:$0xff] %v13227_v3  ;;  %v2417_v46 = vrot.slane %v13218_v50, 7  ;;  %v2413_v49 = vrot.slane %v13227_v3, 7  ;;  %v1962_v20 = vadd.f32 %v12961_v45, %v1813_v23  ;;  %v10421_v62 = vpop.f32.mrb[14].mxu0  ;;  %v13284_v36 = vsel %vm13248_vm2, 1.0, %v17104_v42 }
 0x198   : > { %10451 = vmatmul.mubr.msk.bf16.gmra.mrb[88].mxu1 %vm2538_vm15, %v2511_v15  ;;  %v13252_v15 = vpop.f32.mrb[49].mxu1  ;;  %v2000_v44 = vmax.f32 %v1964_v55, 0.0  ;;  %v1965_v2 = vadd.f32 %v10421_v62, %v12961_v45  ;;  %v1816_v61 = vpop.f32.mrb[15].mxu0  ;;  %vm17155_vm8 = vmmov %vm17138_vm1  ;;  %17162 = vst [vmem:[#allocation77_spill] sm:$0xff] %v13284_v36  ;;  %vm709_vm9 = vcmp.ge.s32.totalorder %v691_v28, 0  ;;  %vm727_vm12 = vcmp.lt.s32.totalorder %v691_v28, 512 }
 0x199   : > { %17153 = vst [vmem:[#allocation73_spill] sm:$0xff] %v13252_v15  ;;  %v13258_v24 = vsel %vm17155_vm8, %v17154_v21, %v2411_v59  ;;  %vm17156_vm5 = vmmov %vm17138_vm1  ;;  %v13267_v19 = vpop.f32.mrb[50].mxu1  ;;  %v1998_v15 = vmax.f32 %v1962_v20, 0.0  ;;  %v1963_v55 = vadd.f32 %v12961_v45, %v1816_v61  ;;  %v17167_v12 = vrot.slane %v13172_v53, 2 }
 0x19a   : > { %v13261_v23 = vsel %vm17156_vm5, %v2415_v32, %v2417_v46  ;;  %vm744_vm0 = vmand %vm708_vm6, %vm726_vm3  ;;  %17157 = vst [vmem:[#allocation74_spill] sm:$0xff] %v13267_v19  ;;  %v13276_v21 = vpop.f32.mrb[51].mxu1  ;;  %v13279_v50 = vmul.f32 %v13088_v9, %v2000_v44  ;;  %v2001_v37 = vmax.f32 %v1965_v2, 0.0  ;;  %v3086_v6 = vrot.slane %v13258_v24, 2 }
 0x19b   : > { %vm17158_vm10 = vmmov %vm17138_vm1  ;;  %17160 = vst [vmem:[#allocation75_spill] sm:$0xff] %v13276_v21  ;;  %v13288_v20 = vpop.f32.mrb[52].mxu1  ;;  %v13296_v44 = vsel %vm744_vm0, 1.0, %v17104_v42 }
 0x19c   : > { %v13271_v62 = vsel %vm17158_vm10, %v2411_v59, %v2413_v49  ;;  %vm17159_vm7 = vmmov %vm17138_vm1  ;;  %17161 = vst [vmem:[#allocation76_spill] sm:$0xff] %v13279_v50  ;;  %v13291_v59 = vmul.f32 %v13106_v52, %v1998_v15  ;;  %v13299_v2 = vmul.f32 %v13140_v58, %v2001_v37  ;;  %v17173_v37 = vrot.slane %v13181_v48, 2 }
 0x19d   : > { %v13274_v17 = vsel %vm17159_vm7, %v2413_v49, %v2415_v32  ;;  %v2512_v61 = vpack.c.bf16 %v13271_v62, %v13258_v24  ;;  %17163 = vst [vmem:[#allocation78_spill] sm:$0xff] %v13288_v20  ;;  %v1999_v49 = vmax.f32 %v1963_v55, 0.0  ;;  %17165 = vst [vmem:[#allocation80_spill] sm:$0xff] %v13296_v44  ;;  %v10424_v20 = vpop.f32.mrb[16].mxu0  ;;  %v2423_v3 = vrot.slane %v13279_v50, 7 }
 0x19e   : > { %17164 = vst [vmem:[#allocation79_spill] sm:$0xff] %v13291_v59  ;;  %v2513_v32 = vpack.c.bf16 %v13261_v23, %v13274_v17  ;;  %17166 = vst [vmem:[#allocation81_spill] sm:$0xff] %v13299_v2  ;;  %v2419_v15 = vrot.slane %v13291_v59, 7  ;;  %v2425_v53 = vrot.slane %v13299_v2, 7  ;;  %v1829_v59 = vpop.f32.mrb[17].mxu0  ;;  %v13331_v2 = vpop.f32.mrb[53].mxu1 }
 0x19f   : > { %10454 = vmatprep.mubr.msk.bf16.mxu1 %vm2538_vm15, %v2512_v61  ;;  %vm17168_vm13 = vmmov %vm17143_vm11  ;;  %v13309_v55 = vmul.f32 %v13284_v36, %v1999_v49  ;;  %17176 = vst [vmem:[#allocation86_spill] sm:$0xff] %v13331_v2  ;;  %v13340_v24 = vpop.f32.mrb[54].mxu1 }
 0x1a0   : > { %v13305_v21 = vsel %vm17168_vm13, %v17167_v12, %v3080_v41  ;;  %vm17171_vm1 = vmmov %vm17143_vm11  ;;  %v1968_v12 = vadd.f32 %v10424_v20, %v12961_v45  ;;  %10455 = vmatmul.mubr.msk.bf16.gmra.mrb[92].mxu1 %vm2538_vm15, %v2513_v32  ;;  %17179 = vst [vmem:[#allocation87_spill] sm:$0xff] %v13340_v24 }
 0x1a1   : > { %17169 = vst [vmem:[#allocation82_spill] sm:$0xff] %v13305_v21  ;;  %17170 = vst [vmem:[#allocation83_spill] sm:$0xff] %v13309_v55  ;;  %v13312_v19 = vsel %vm17171_vm1, %v3080_v41, %v3082_v22  ;;  %v2421_v41 = vrot.slane %v13309_v55, 7 }
 0x1a2   : > { %17172 = vst [vmem:[#allocation84_spill] sm:$0xff] %v13312_v19  ;;  %vm17174_vm4 = vmmov %vm17171_vm1  ;;  %v2004_v20 = vmax.f32 %v1968_v12, 0.0  ;;  %v13349_v12 = vpop.f32.mrb[55].mxu1 }
 0x1a3   : > { %v13317_v61 = vsel %vm17174_vm4, %v3082_v22, %v17173_v37  ;;  %v1966_v22 = vadd.f32 %v12961_v45, %v1829_v59  ;;  %v10425_v37 = vpop.f32.mrb[18].mxu0  ;;  %vm745_vm11 = vmand %vm709_vm9, %vm727_vm12  ;;  %17182 = vst [vmem:[#allocation88_spill] sm:$0xff] %v13349_v12  ;;  %v13356_v55 = vpop.f32.mrb[56].mxu1 }
 0x1a4   : > { %17175 = vst [vmem:[#allocation85_spill] sm:$0xff] %v13317_v61  ;;  %v1969_v32 = vadd.f32 %v10425_v37, %v12961_v45  ;;  %v1832_v50 = vpop.f32.mrb[19].mxu0  ;;  %vm17177_vm6 = vmmov %vm17156_vm5  ;;  %v13393_v61 = vpop.f32.mrb[57].mxu1 }
 0x1a5   : > { %v13335_v49 = vsel %vm17177_vm6, %v2417_v46, %v2419_v15  ;;  %vm17178_vm3 = vmmov %vm17156_vm5  ;;  %v2002_v1 = vmax.f32 %v1966_v22, 0.0  ;;  %v1967_v59 = vadd.f32 %v12961_v45, %v1832_v50  ;;  %v13352_v46 = vsel %vm745_vm11, 1.0, %v17104_v42  ;;  %17184 = vst [vmem:[#allocation90_spill] sm:$0xff] %v13356_v55 }
 0x1a6   : > { %v13338_v21 = vsel %vm17178_vm3, %v2423_v3, %v2425_v53  ;;  %vm17180_vm14 = vmmov %vm17178_vm3  ;;  %v2005_v37 = vmax.f32 %v1969_v32, 0.0  ;;  %17183 = vst [vmem:[#allocation89_spill] sm:$0xff] %v13352_v46  ;;  %v13359_v22 = vmul.f32 %v12972_v0, %v2004_v20  ;;  %v17188_v42 = vrot.slane %v13181_v48, 2 }
 0x1a7   : > { %v13344_v28 = vsel %vm17180_vm14, %v2419_v15, %v2421_v41  ;;  %vm17181_vm2 = vmmov %vm17178_vm3  ;;  %v13362_v50 = vmul.f32 %v13296_v44, %v2002_v1  ;;  %v2003_v15 = vmax.f32 %v1967_v59, 0.0  ;;  %v10428_v1 = vpop.f32.mrb[20].mxu0  ;;  %v17192_v0 = vrot.slane %v13271_v62, 2  ;;  %17195 = vst [vmem:[#allocation97_spill] sm:$0xff] %v13393_v61 }
 0x1a8   : > { %v13347_v2 = vsel %vm17181_vm2, %v2421_v41, %v2423_v3  ;;  %v2514_v19 = vpack.c.bf16 %v13344_v28, %v13335_v49  ;;  %17185 = vst [vmem:[#allocation91_spill] sm:$0xff] %v13359_v22  ;;  %v13367_v41 = vmul.f32 %v12997_v60, %v2005_v37  ;;  %vm17189_vm8 = vmmov %vm17171_vm1  ;;  %v1972_v48 = vadd.f32 %v10428_v1, %v12961_v45 }
 0x1a9   : > { %17186 = vst [vmem:[#allocation92_spill] sm:$0xff] %v13362_v50  ;;  %v2515_v3 = vpack.c.bf16 %v13338_v21, %v13347_v2  ;;  %v13373_v32 = vsel %vm17189_vm8, %v17188_v42, %v3086_v6  ;;  %v2427_v20 = vrot.slane %v13362_v50, 7  ;;  %v13377_v12 = vmul.f32 %v13352_v46, %v2003_v15  ;;  %vm17193_vm5 = vmmov %vm17171_vm1  ;;  %v1845_v42 = vpop.f32.mrb[21].mxu0 }
 0x1aa   : > { %17187 = vst [vmem:[#allocation93_spill] sm:$0xff] %v13367_v41  ;;  %10458 = vmatprep.mubr.msk.bf16.mxu1 %vm2538_vm15, %v2514_v19  ;;  %17190 = vst [vmem:[#allocation94_spill] sm:$0xff] %v13373_v32  ;;  %v13384_v37 = vsel %vm17193_vm5, %v3086_v6, %v17192_v0  ;;  %v2432_v19 = vrot.slane %v13367_v41, 7  ;;  %v2431_v60 = vrot.slane %v13359_v22, 7  ;;  %v3090_v15 = vrot.slane %v13274_v17, 2  ;;  %v10429_v55 = vpop.f32.mrb[22].mxu0 }
 0x1ab   : > { %17191 = vst [vmem:[#allocation95_spill] sm:$0xff] %v13377_v12  ;;  %17194 = vst [vmem:[#allocation96_spill] sm:$0xff] %v13384_v37  ;;  %10459 = vmatmul.mubr.msk.bf16.gmra.mrb[96].mxu1 %vm2538_vm15, %v2515_v3  ;;  %v2429_v24 = vrot.slane %v13377_v12, 7  ;;  %v1970_v59 = vadd.f32 %v12961_v45, %v1845_v42  ;;  %v2008_v6 = vmax.f32 %v1972_v48, 0.0  ;;  %v1973_v32 = vadd.f32 %v10429_v55, %v12961_v45  ;;  %v1848_v1 = vpop.f32.mrb[23].mxu0  ;;  %v13400_v41 = vpop.f32.mrb[58].mxu1 }
 0x1ac   : > { %vm17196_vm0 = vmmov %vm17181_vm2  ;;  %17197 = vst [vmem:[#allocation98_spill] sm:$0xff] %v13400_v41  ;;  %v1971_v17 = vadd.f32 %v12961_v45, %v1848_v1  ;;  %v13409_v61 = vpop.f32.mrb[59].mxu1 }
 0x1ad   : > { %v13398_v3 = vsel %vm17196_vm0, %v2425_v53, %v2427_v20  ;;  %v2006_v22 = vmax.f32 %v1970_v59, 0.0  ;;  %vm17198_vm10 = vmmov %vm17196_vm0  ;;  %17200 = vst [vmem:[#allocation99_spill] sm:$0xff] %v13409_v61  ;;  %v13412_v48 = vmul.f32 %v13014_v57, %v2008_v6  ;;  %v2009_v55 = vmax.f32 %v1973_v32, 0.0  ;;  %v13418_v0 = vpop.f32.mrb[60].mxu1 }
 0x1ae   : > { %v13404_v12 = vsel %vm17198_vm10, %v2427_v20, %v2429_v24  ;;  %vm17199_vm7 = vmmov %vm17196_vm0  ;;  %17202 = vst [vmem:[#allocation101_spill] sm:$0xff] %v13418_v0  ;;  %v3094_v20 = vrot.slane %v13335_v49, 2  ;;  %v2007_v41 = vmax.f32 %v1971_v17, 0.0  ;;  %v3096_v6 = vrot.slane %v13344_v28, 2  ;;  %v10432_v17 = vpop.f32.mrb[24].mxu0 }
 0x1af   : > { %v13407_v42 = vsel %vm17199_vm7, %v2431_v60, %v2432_v19  ;;  %17201 = vst [vmem:[#allocation100_spill] sm:$0xff] %v13412_v48  ;;  %v2516_v53 = vpack.c.bf16 %v13404_v12, %v13398_v3  ;;  %v13422_v1 = vmul.f32 %v12956_v16, %v2006_v22  ;;  %vm17204_vm9 = vmmov %vm17196_vm0  ;;  %v13430_v57 = vmul.f32 %v13055_v10, %v2009_v55 }
 0x1b0   : > { %v13425_v61 = vsel %vm17204_vm9, 0.0, %v2431_v60  ;;  %v13437_v22 = vmul.f32 %v12984_v18, %v2007_v41  ;;  %v17207_v60 = vrot.slane %v13271_v62, 2  ;;  %vm17208_vm12 = vmmov %vm17171_vm1  ;;  %v17209_v32 = vrot.slane %v13261_v23, 2  ;;  %v1861_v41 = vpop.f32.mrb[25].mxu0 }
 0x1b1   : > { %17203 = vst [vmem:[#allocation102_spill] sm:$0xff] %v13422_v1  ;;  %17205 = vst [vmem:[#allocation103_spill] sm:$0xff] %v13430_v57  ;;  %10462 = vmatprep.mubr.msk.bf16.mxu1 %vm2538_vm15, %v2516_v53  ;;  %v2517_v59 = vpack.c.bf16 %v13407_v42, %v13425_v61  ;;  %v2434_v49 = vrot.slane %v13422_v1, 7  ;;  %v2438_v53 = vrot.slane %v13412_v48, 7  ;;  %v10996_v16 = vadd.f32 %v10432_v17, %v12822_v7  ;;  %v10433_v0 = vpop.f32.mrb[26].mxu0  ;;  %v13461_v48 = vpop.f32.mrb[61].mxu1 }
 0x1b2   : > { %17206 = vst [vmem:[#allocation104_spill] sm:$0xff] %v13437_v22  ;;  %v13442_v28 = vsel %vm17208_vm12, %v17207_v60, %v3090_v15  ;;  %vm17210_vm13 = vmmov %vm17171_vm1  ;;  %v1864_v17 = vpop.f32.mrb[27].mxu0  ;;  %v13473_v18 = vpop.f32.mrb[62].mxu1 }
 0x1b3   : > { %v13447_v55 = vsel %vm17210_vm13, %v3090_v15, %v17209_v32  ;;  %10463 = vmatmul.mubr.msk.bf16.gmra.mrb[100].mxu1 %vm2538_vm15, %v2517_v59  ;;  %vm17211_vm1 = vmmov %vm17196_vm0  ;;  %v2436_v15 = vrot.slane %v13437_v22, 7  ;;  %v10997_v32 = vadd.f32 %v1861_v41, %v12824_v8  ;;  %17212 = vst [vmem:[#allocation105_spill] sm:$0xff] %v13461_v48  ;;  %v1976_v7 = vadd.f32 %v10996_v16, %v12961_v45  ;;  %v13483_v16 = vpop.f32.mrb[63].mxu1 }
 0x1b4   : > { %v13456_v60 = vsel %vm17211_vm1, %v2429_v24, 0.0  ;;  %v10998_v59 = vadd.f32 %v10433_v0, %v12826_v29  ;;  %vm17213_vm4 = vmmov %vm17196_vm0  ;;  %v17214_v24 = vrot.slane %v13430_v57, 7  ;;  %17216 = vst [vmem:[#allocation106_spill] sm:$0xff] %v13473_v18  ;;  %v10999_v41 = vadd.f32 %v1864_v17, %v12828_v39  ;;  %v13489_v37 = vpop.f32.mrb[64].mxu1 }
 0x1b5   : > { %v13466_v10 = vsel %vm17213_vm4, %v2432_v19, %v2434_v49  ;;  %vm17215_vm11 = vmmov %vm17196_vm0  ;;  %v1974_v8 = vadd.f32 %v10997_v32, %v12961_v45  ;;  %17219 = vst [vmem:[#allocation107_spill] sm:$0xff] %v13483_v16  ;;  %v2012_v19 = vmax.f32 %v1976_v7, 0.0  ;;  %v10436_v39 = vpop.f32.mrb[28].mxu0 }
 0x1b6   : > { %v13471_v62 = vsel %vm17215_vm11, %v2438_v53, %v17214_v24  ;;  %vm17217_vm6 = vmmov %vm17196_vm0  ;;  %v1977_v24 = vadd.f32 %v10998_v59, %v12961_v45  ;;  %17220 = vst [vmem:[#allocation108_spill] sm:$0xff] %v13489_v37  ;;  %v17222_v59 = vrot.slane %v13261_v23, 2  ;;  %v11000_v23 = vadd.f32 %v10436_v39, %v12830_v31  ;;  %v13531_v31 = vpop.f32.mrb[65].mxu1 }
 0x1b7   : > { %v13478_v48 = vsel %vm17217_vm6, %v2434_v49, %v2436_v15  ;;  %vm17218_vm3 = vmmov %vm17196_vm0  ;;  %v2010_v32 = vmax.f32 %v1974_v8, 0.0  ;;  %v1975_v49 = vadd.f32 %v10999_v41, %v12961_v45  ;;  %v13497_v7 = vmul.f32 %v13070_v63, %v2012_v19  ;;  %17230 = vst [vmem:[#allocation113_spill] sm:$0xff] %v13531_v31  ;;  %v13537_v63 = vpop.f32.mrb[66].mxu1 }
 0x1b8   : > { %v13481_v29 = vsel %vm17218_vm3, %v2436_v15, %v2438_v53  ;;  %v2518_v18 = vpack.c.bf16 %v13478_v48, %v13466_v10  ;;  %v2013_v17 = vmax.f32 %v1977_v24, 0.0  ;;  %vm17223_vm14 = vmmov %vm17193_vm5  ;;  %v1877_v24 = vpop.f32.mrb[29].mxu0  ;;  %17231 = vst [vmem:[#allocation114_spill] sm:$0xff] %v13537_v63  ;;  %v13543_v31 = vpop.f32.mrb[67].mxu1 }
 0x1b9   : > { %v2519_v53 = vpack.c.bf16 %v13471_v62, %v13481_v29  ;;  %17221 = vst [vmem:[#allocation109_spill] sm:$0xff] %v13497_v7  ;;  %v13503_v0 = vsel %vm17223_vm14, %v17222_v59, %v3094_v20  ;;  %v13506_v8 = vmul.f32 %v13009_v35, %v2010_v32  ;;  %v2011_v41 = vmax.f32 %v1975_v49, 0.0  ;;  %vm17225_vm2 = vmmov %vm17193_vm5  ;;  %v10437_v19 = vpop.f32.mrb[30].mxu0 }
 0x1ba   : > { %10466 = vmatprep.mubr.msk.bf16.mxu1 %vm2538_vm15, %v2518_v18  ;;  %v13511_v15 = vsel %vm17225_vm2, %v3094_v20, %v3096_v6  ;;  %v13515_v18 = vmul.f32 %v13083_v11, %v2013_v17  ;;  %v17227_v32 = vrot.slane %v13347_v2, 2  ;;  %vm17228_vm8 = vmmov %vm17225_vm2  ;;  %v11001_v16 = vadd.f32 %v1877_v24, %v12832_v56  ;;  %v1880_v11 = vpop.f32.mrb[31].mxu0  ;;  %17232 = vst [vmem:[#allocation115_spill] sm:$0xff] %v13543_v31 }
 0x1bb   : > { %17224 = vst [vmem:[#allocation110_spill] sm:$0xff] %v13506_v8  ;;  %10467 = vmatmul.mubr.msk.bf16.gmra.mrb[104].mxu1 %vm2538_vm15, %v2519_v53  ;;  %v2442_v59 = vrot.slane %v13506_v8, 7  ;;  %v13526_v20 = vmul.f32 %v13019_v25, %v2011_v41  ;;  %v2446_v39 = vrot.slane %v13497_v7, 7  ;;  %v11003_v17 = vadd.f32 %v1880_v11, %v12836_v54  ;;  %vm17234_vm5 = vmmov %vm17196_vm0  ;;  %v13554_v41 = vpop.f32.mrb[68].mxu1 }
 0x1bc   : > { %17226 = vst [vmem:[#allocation111_spill] sm:$0xff] %v13515_v18  ;;  %v13522_v49 = vsel %vm17228_vm8, %v3096_v6, %v17227_v32  ;;  %v2448_v53 = vrot.slane %v13515_v18, 7  ;;  %v1980_v6 = vadd.f32 %v11000_v23, %v12961_v45  ;;  %v11002_v32 = vadd.f32 %v10437_v19, %v12834_v13  ;;  %17235 = vst [vmem:[#allocation116_spill] sm:$0xff] %v13554_v41 }
 0x1bd   : > { %17229 = vst [vmem:[#allocation112_spill] sm:$0xff] %v13526_v20  ;;  %v2444_v56 = vrot.slane %v13526_v20, 7  ;;  %v1978_v24 = vadd.f32 %v11001_v16, %v12961_v45  ;;  %v17233_v23 = vrot.slane %v13430_v57, 7  ;;  %v1979_v16 = vadd.f32 %v11003_v17, %v12961_v45  ;;  %vm17236_vm10 = vmmov %vm17196_vm0 }
 0x1be   : > { %v2016_v25 = vmax.f32 %v1980_v6, 0.0  ;;  %v1981_v35 = vadd.f32 %v11002_v32, %v12961_v45  ;;  %v13552_v19 = vsel %vm17196_vm0, %v2446_v39, %v2448_v53  ;;  %vm17237_vm7 = vmmov %vm17196_vm0  ;;  %v13589_v6 = vpop.f32.mrb[69].mxu1 }
 0x1bf   : > { %v13549_v13 = vsel %vm17234_vm5, %v17233_v23, %v2442_v59  ;;  %v2014_v63 = vmax.f32 %v1978_v24, 0.0  ;;  %v13558_v54 = vsel %vm17236_vm10, %v2442_v59, %v2444_v56  ;;  %v13561_v11 = vsel %vm17237_vm7, %v2444_v56, %v2446_v39  ;;  %v10440_v59 = vpop.f32.mrb[32].mxu0  ;;  %17242 = vst [vmem:[#allocation121_spill] sm:$0xff] %v13589_v6  ;;  %vm17245_vm9 = vmmov %vm17196_vm0 }
 0x1c0   : > { %v13565_v32 = vmul.f32 %v13106_v52, %v2016_v25  ;;  %v2017_v23 = vmax.f32 %v1981_v35, 0.0  ;;  %v2520_v31 = vpack.c.bf16 %v13558_v54, %v13549_v13  ;;  %v2015_v17 = vmax.f32 %v1979_v16, 0.0  ;;  %v1893_v52 = vpop.f32.mrb[33].mxu0  ;;  %vm17246_vm12 = vmmov %vm17196_vm0 }
 0x1c1   : > { %v13571_v24 = vmul.f32 %v13065_v27, %v2014_v63  ;;  %v2521_v39 = vpack.c.bf16 %v13552_v19, %v13561_v11  ;;  %v11004_v35 = vadd.f32 %v10440_v59, %v12838_v40  ;;  %v11005_v41 = vadd.f32 %v1893_v52, %v12840_v47  ;;  %v10441_v56 = vpop.f32.mrb[34].mxu0  ;;  %vm17248_vm13 = vmmov %vm17196_vm0 }
 0x1c2   : > { %17238 = vst [vmem:[#allocation117_spill] sm:$0xff] %v13565_v32  ;;  %v13578_v25 = vmul.f32 %v13284_v36, %v2017_v23  ;;  %10470 = vmatprep.mubr.msk.bf16.mxu1 %vm2538_vm15, %v2520_v31  ;;  %v13584_v16 = vmul.f32 %v13078_v5, %v2015_v17  ;;  %v2454_v23 = vrot.slane %v13565_v32, 7  ;;  %v11006_v59 = vadd.f32 %v10441_v56, %v12842_v33  ;;  %v1896_v36 = vpop.f32.mrb[35].mxu0  ;;  %v13595_v17 = vpop.f32.mrb[70].mxu1  ;;  %vm17249_vm1 = vmmov %vm17196_vm0 }
 0x1c3   : > { %17239 = vst [vmem:[#allocation118_spill] sm:$0xff] %v13571_v24  ;;  %v2450_v63 = vrot.slane %v13571_v24, 7  ;;  %10471 = vmatmul.mubr.msk.bf16.gmra.mrb[108].mxu1 %vm2538_vm15, %v2521_v39  ;;  %v1984_v31 = vadd.f32 %v11004_v35, %v12961_v45  ;;  %17243 = vst [vmem:[#allocation122_spill] sm:$0xff] %v13595_v17  ;;  %v1982_v52 = vadd.f32 %v11005_v41, %v12961_v45  ;;  %v13601_v6 = vpop.f32.mrb[71].mxu1 }
 0x1c4   : > { %17240 = vst [vmem:[#allocation119_spill] sm:$0xff] %v13578_v25  ;;  %17241 = vst [vmem:[#allocation120_spill] sm:$0xff] %v13584_v16  ;;  %v2456_v40 = vrot.slane %v13578_v25, 7  ;;  %v2452_v47 = vrot.slane %v13584_v16, 7  ;;  %v11007_v39 = vadd.f32 %v1896_v36, %v12844_v34  ;;  %v1985_v37 = vadd.f32 %v11006_v59, %v12961_v45  ;;  %v13610_v56 = vpop.f32.mrb[72].mxu1 }
 0x1c5   : > { %17244 = vst [vmem:[#allocation123_spill] sm:$0xff] %v13601_v6  ;;  %v2020_v5 = vmax.f32 %v1984_v31, 0.0  ;;  %v13605_v35 = vsel %vm17245_vm9, %v2448_v53, %v2450_v63  ;;  %17247 = vst [vmem:[#allocation124_spill] sm:$0xff] %v13610_v56  ;;  %v2018_v17 = vmax.f32 %v1982_v52, 0.0  ;;  %v3123_v53 = vrot.slane %v13561_v11, 2 }
 0x1c6   : > { %v13608_v33 = vsel %vm17246_vm12, %v2454_v23, %v2456_v40  ;;  %v1983_v41 = vadd.f32 %v11007_v39, %v12961_v45  ;;  %v13614_v27 = vsel %vm17248_vm13, %v2450_v63, %v2452_v47  ;;  %v13617_v34 = vsel %vm17249_vm1, %v2452_v47, %v2454_v23  ;;  %vm17256_vm4 = vmmov %vm17225_vm2 }
 0x1c7   : > { %v13620_v36 = vmul.f32 %v13296_v44, %v2020_v5  ;;  %v2021_v31 = vmax.f32 %v1985_v37, 0.0  ;;  %v2522_v59 = vpack.c.bf16 %v13614_v27, %v13605_v35  ;;  %v13626_v6 = vmul.f32 %v13088_v9, %v2018_v17  ;;  %vm17260_vm11 = vmmov %vm17225_vm2 }
 0x1c8   : > { %v3125_v45 = vrot.slane %v13552_v19, 2  ;;  %v2019_v52 = vmax.f32 %v1983_v41, 0.0  ;;  %v2523_v63 = vpack.c.bf16 %v13608_v33, %v13617_v34  ;;  %v3127_v5 = vrot.slane %v13605_v35, 2  ;;  %vm17265_vm6 = vmmov %vm17225_vm2 }
 0x1c9   : > { %17250 = vst [vmem:[#allocation125_spill] sm:$0xff] %v13620_v36  ;;  %17251 = vst [vmem:[#allocation126_spill] sm:$0xff] %v13626_v6  ;;  %v13632_v23 = vmul.f32 %v13352_v46, %v2021_v31  ;;  %10474 = vmatprep.mubr.msk.bf16.mxu1 %vm2538_vm15, %v2522_v59  ;;  %v3129_v37 = vrot.slane %v13614_v27, 2  ;;  %v3131_v11 = vrot.slane %v13617_v34, 2  ;;  %v2458_v17 = vrot.slane %v13626_v6, 7  ;;  %v13657_v31 = vpop.f32.mrb[73].mxu1 }
 0x1ca   : > { %v13640_v47 = vmul.f32 %v13140_v58, %v2019_v52  ;;  %v17254_v19 = vrot.slane %v13338_v21, 2  ;;  %v17255_v39 = vrot.slane %v13347_v2, 2  ;;  %v17258_v35 = vrot.slane %v13398_v3, 2  ;;  %17262 = vst [vmem:[#allocation131_spill] sm:$0xff] %v13657_v31  ;;  %v13670_v21 = vpop.f32.mrb[74].mxu1  ;;  %vm17267_vm3 = vmmov %vm17196_vm0 }
 0x1cb   : > { %17252 = vst [vmem:[#allocation127_spill] sm:$0xff] %v13632_v23  ;;  %10475 = vmatmul.mubr.msk.bf16.gmra.mrb[112].mxu1 %vm2538_vm15, %v2523_v63  ;;  %v2462_v59 = vrot.slane %v13620_v36, 7  ;;  %v2464_v52 = vrot.slane %v13632_v23, 7  ;;  %v17263_v2 = vrot.slane %v13404_v12, 2  ;;  %17266 = vst [vmem:[#allocation132_spill] sm:$0xff] %v13670_v21  ;;  %v2459_v31 = vsel %vm17267_vm3, %v2456_v40, %v2458_v17  ;;  %v13682_v58 = vpop.f32.mrb[75].mxu1 }
 0x1cc   : > { %17253 = vst [vmem:[#allocation128_spill] sm:$0xff] %v13640_v47  ;;  %v13648_v41 = vsel %vm17256_vm4, %v17255_v39, %v17254_v19  ;;  %v17259_v27 = vmov %v17254_v19  ;;  %v17264_v19 = vmov %v17258_v35  ;;  %v17268_v46 = vrot.slane %v13456_v60, 2  ;;  %vm17270_vm14 = vmmov %vm17225_vm2 }
 0x1cd   : > { %17257 = vst [vmem:[#allocation129_spill] sm:$0xff] %v13648_v41  ;;  %v13655_v34 = vsel %vm17260_vm11, %v17259_v27, %v17258_v35  ;;  %v13668_v39 = vsel %vm17265_vm6, %v17264_v19, %v17263_v2  ;;  %v2460_v35 = vrot.slane %v13640_v47, 7  ;;  %v3133_v27 = vrot.slane %v13608_v33, 2  ;;  %17271 = vst [vmem:[#allocation133_spill] sm:$0xff] %v13682_v58  ;;  %v13688_v33 = vpop.f32.mrb[76].mxu1 }
 0x1ce   : > { %17261 = vst [vmem:[#allocation130_spill] sm:$0xff] %v13655_v34  ;;  %v17269_v44 = vmov %v17263_v2  ;;  %vm17272_vm2 = vmmov %vm17196_vm0  ;;  %v3135_v2 = vrot.slane %v2459_v31, 2  ;;  %v17275_v41 = vrot.slane %v13407_v42, 2  ;;  %v17276_v34 = vrot.slane %v13425_v61, 2 }
 0x1cf   : > { %v13680_v63 = vsel %vm17270_vm14, %v17269_v44, %v17268_v46  ;;  %v2507_v3 = vsel %vm17272_vm2, %v2464_v52, 0.0  ;;  %vm17273_vm8 = vmmov %vm17196_vm0  ;;  %v2463_v12 = vsel %vm17196_vm0, %v2460_v35, %v2462_v59  ;;  %v17278_v9 = vrot.slane %v13466_v10, 2 }
 0x1d0   : > { %v2465_v19 = vsel %vm17273_vm8, %v2462_v59, %v2464_v52  ;;  %v3143_v40 = vrot.slane %v2507_v3, 2  ;;  %vm17274_vm5 = vmmov %vm17196_vm0  ;;  %v3139_v58 = vrot.slane %v2463_v12, 2  ;;  %v17279_v3 = vmov %v17275_v41 }
 0x1d1   : > { %v2461_v60 = vsel %vm17274_vm5, %v2458_v17, %v2460_v35  ;;  %v3141_v21 = vrot.slane %v2465_v19, 2  ;;  %v2525_v56 = vpack.c.bf16 %v2465_v19, %v2463_v12  ;;  %vm17277_vm10 = vmmov %vm17256_vm4  ;;  %v17281_v59 = vrot.slane %v13478_v48, 2 }
 0x1d2   : > { %v2524_v44 = vpack.c.bf16 %v2461_v60, %v2459_v31  ;;  %v3137_v46 = vrot.slane %v2461_v60, 2  ;;  %v13697_v52 = vsel %vm17277_vm10, %v17276_v34, %v17275_v41  ;;  %vm17280_vm7 = vmmov %vm17256_vm4  ;;  %v17282_v31 = vmov %v17278_v9 }
 0x1d3   : > { %v13704_v17 = vsel %vm17280_vm7, %v17279_v3, %v17278_v9  ;;  %vm17283_vm9 = vmmov %vm17256_vm4  ;;  %v17284_v19 = vrot.slane %v13481_v29, 2  ;;  %v17285_v61 = vmov %v17281_v59  ;;  %v17287_v10 = vrot.slane %v13471_v62, 2  ;;  %v17322_v9 = vld [vmem:[#allocation79_spill] sm:$0xff] }
 0x1d4   : > { %v13711_v35 = vsel %vm17283_vm9, %v17282_v31, %v17281_v59  ;;  %vm17286_vm12 = vmmov %vm17256_vm4  ;;  %10478 = vmatprep.mubr.msk.bf16.mxu1 %vm2538_vm15, %v2524_v44  ;;  %v17290_v48 = vrot.slane %v13549_v13, 2  ;;  %v17293_v59 = vrot.slane %v13558_v54, 2  ;;  %v2771_v13 = vpack.c.bf16 %v13073_v51, %v13050_v38  ;;  %v17319_v44 = vld [vmem:[#allocation71_spill] sm:$0xff] }
 0x1d5   : > { %v13718_v41 = vsel %vm17286_vm12, %v17285_v61, %v17284_v19  ;;  %v17288_v34 = vmov %v17284_v19  ;;  %vm17289_vm13 = vmmov %vm17256_vm4  ;;  %v17291_v12 = vmov %v17287_v10  ;;  %10479 = vmatmul.mubr.msk.bf16.gmra.mrb[116].mxu1 %vm2538_vm15, %v2525_v56  ;;  %v17300_v56 = vpack.c.bf16 %v13094_v43, %v13060_v14  ;;  %v17382_v14 = vld [vmem:[#allocation98_spill] sm:$0xff] }
 0x1d6   : > { %v13730_v60 = vsel %vm17289_vm13, %v17288_v34, %v17287_v10  ;;  %vm17292_vm1 = vmmov %vm17256_vm4  ;;  %v17294_v31 = vmov %v17290_v48  ;;  %v17296_v19 = vmov %v17293_v59  ;;  %v13757_v10 = vpop.f32.mrb[77].mxu1  ;;  %vm17433_vm12 = vcmask 1041408  }
 0x1d7   : > { %v13737_v3 = vsel %vm17292_vm1, %v17291_v12, %v17290_v48  ;;  %vm17295_vm4 = vmmov %vm17292_vm1  ;;  %17299 = vst [vmem:[#allocation134_spill] sm:$0xff] %v13757_v10  ;;  %10486 = vmatprep.mubr.msk.bf16.mxu1 %vm2538_vm15, %v17300_v56 }
 0x1d8   : > { %v13747_v29 = vsel %vm17295_vm4, %v17294_v31, %v17293_v59  ;;  %vm17297_vm11 = vmmov %vm17292_vm1 }
 0x1d9   : > { %v13752_v61 = vsel %vm17297_vm11, %v17296_v19, %v3123_v53  ;;  %vm17298_vm6 = vmmov %vm17292_vm1 }
 0x1da   : > { %v13755_v62 = vsel %vm17298_vm6, %v3123_v53, %v3125_v45  ;;  %vm17301_vm3 = vmmov %vm17292_vm1  ;;  %v13774_v53 = vpop.f32.mrb[78].mxu1 }
 0x1db   : > { %v13766_v34 = vsel %vm17301_vm3, %v3125_v45, %v3127_v5  ;;  %vm17302_vm14 = vmmov %vm17292_vm1  ;;  %17304 = vst [vmem:[#allocation135_spill] sm:$0xff] %v13774_v53  ;;  %v13780_v31 = vpop.f32.mrb[79].mxu1 }
 0x1dc   : > { %v13769_v54 = vsel %vm17302_vm14, %v3127_v5, %v3129_v37  ;;  %vm17303_vm2 = vmmov %vm17292_vm1  ;;  %17305 = vst [vmem:[#allocation136_spill] sm:$0xff] %v13780_v31  ;;  %v17318_v5 = vld [vmem:[#allocation69_spill] sm:$0xff]  ;;  %v17323_v31 = vld [vmem:[#allocation83_spill] sm:$0xff] }
 0x1dd   : > { %v13772_v48 = vsel %vm17303_vm2, %v3129_v37, %v3131_v11  ;;  %vm17306_vm8 = vmmov %vm17292_vm1  ;;  %10487 = vmatmul.mubr.msk.bf16.vlgmr.msra.gmra.mrb[84].mxu1 %vm2538_vm15, %v2771_v13  ;;  %v2774_v13 = vpack.c.bf16 %v17319_v44, %v17318_v5  ;;  %v2776_v10 = vpack.c.bf16 %v17323_v31, %v17322_v9  ;;  %v2780_v31 = vpack.c.bf16 %v13437_v22, %v13422_v1 }
 0x1de   : > { %v13783_v19 = vsel %vm17306_vm8, %v3131_v11, %v3133_v27  ;;  %vm17307_vm5 = vmmov %vm17292_vm1  ;;  %10523 = vmatpush3.bf16.msra.mxu1 %v13186_v26  ;;  %v17320_v26 = vld [vmem:[#allocation66_spill] sm:$0xff] }
 0x1df   : > { %v13786_v45 = vsel %vm17307_vm5, %v3133_v27, %v3135_v2  ;;  %vm17308_vm0 = vmmov %vm17292_vm1  ;;  %vm5141_vm1 = vcmask 1043456  }
 0x1e0   : > { %v13791_v37 = vsel %vm17308_vm0, %v3135_v2, %v3137_v46  ;;  %vm17309_vm10 = vmmov %vm17308_vm0  ;;  %v11324_v2 = vld [vmem:[%s16630_s5 + $0x28] sm:$0xff]  }
 0x1e1   : > { %v13794_v56 = vsel %vm17309_vm10, %v3137_v46, %v3139_v58  ;;  %vm17310_vm7 = vmmov %vm17308_vm0  ;;  %v2772_v46 = vpack.c.bf16 %v13153_v4, %v13134_v30  ;;  %10524 = vmatprep.subr.bf16.mxu1 %v11324_v2  ;;  %v17326_v4 = vld [vmem:[#allocation95_spill] sm:$0xff] }
 0x1e2   : > { %v13797_v12 = vsel %vm17310_vm7, %v3139_v58, %v3141_v21  ;;  %v3197_v59 = vpack.c.bf16 %v13794_v56, %v13791_v37  ;;  %vm17311_vm9 = vmmov %vm17308_vm0  ;;  %v13811_v58 = vpop.f32.mrb[80].mxu1  ;;  %10525 = vmatpush3.bf16.msra.mxu1 %v11324_v2  ;;  %v17316_v37 = vld [vmem:[#allocation55_spill] sm:$0xff]  ;;  %v17317_v56 = vld [vmem:[#allocation58_spill] sm:$0xff]  ;;  %v2778_v44 = vpack.c.bf16 %v17326_v4, %v13362_v50  ;;  %v2782_v4 = vpack.c.bf16 %v13526_v20, %v13506_v8 }
 0x1e3   : > { %v3144_v11 = vsel %vm17311_vm9, %v3141_v21, %v3143_v40  ;;  %17312 = vst [vmem:[#allocation137_spill] sm:$0xff] %v13811_v58  ;;  %10490 = vmatprep.mubr.msk.bf16.mxu1 %vm2538_vm15, %v2772_v46  ;;  %v13815_v21 = vpop.f32.mrb[81].mxu1  ;;  %v17321_v46 = vld [vmem:[#allocation70_spill] sm:$0xff]  ;;  %v17324_v2 = vld [vmem:[#allocation76_spill] sm:$0xff]  ;;  %vm17434_vm13 = vmmov %vm17433_vm12 }
 0x1e4   : > { %v3198_v27 = vpack.c.bf16 %v3144_v11, %v13797_v12  ;;  %17313 = vst [vmem:[#allocation138_spill] sm:$0xff] %v13815_v21  ;;  %v13817_v40 = vpop.f32.mrb[82].mxu1  ;;  %v2773_v11 = vpack.c.bf16 %v17317_v56, %v17316_v37  ;;  %v2775_v42 = vpack.c.bf16 %v17321_v46, %v17320_v26  ;;  %vm17435_vm4 = vmmov %vm17433_vm12 }
 0x1e5   : > { %17314 = vst [vmem:[#allocation139_spill] sm:$0xff] %v13817_v40  ;;  %v13819_v12 = vpop.f32.mrb[83].mxu1  ;;  %vm17437_vm11 = vmmov %vm17435_vm4 }
 0x1e6   : > { %17315 = vst [vmem:[#allocation140_spill] sm:$0xff] %v13819_v12  ;;  %10491 = vmatmul.mubr.msk.bf16.gmra.mrb[88].mxu1 %vm2538_vm15, %v2773_v11  ;;  %v17325_v12 = vld [vmem:[#allocation81_spill] sm:$0xff]  ;;  %v17327_v11 = vld [vmem:[#allocation91_spill] sm:$0xff]  ;;  %vm17452_vm6 = vmmov %vm17435_vm4 }
 0x1e7   : > { %10494 = vmatprep.mubr.msk.bf16.mxu1 %vm2538_vm15, %v2774_v13  ;;  %v2777_v21 = vpack.c.bf16 %v17325_v12, %v17324_v2  ;;  %v17328_v13 = vld [vmem:[#allocation93_spill] sm:$0xff]  ;;  %vm17453_vm3 = vmmov %vm17435_vm4 }
 0x1e8   : > { %v2779_v46 = vpack.c.bf16 %v17328_v13, %v17327_v11  ;;  %vm17454_vm14 = vmmov %vm17453_vm3 }
 0x1e9   : > { %vm17455_vm2 = vmmov %vm17453_vm3 }
 0x1ea   : > { %vm17476_vm8 = vmmov %vm17455_vm2 }
 0x1eb   : > { %vm17478_vm5 = vmmov %vm17455_vm2 }
 0x1ec   : > { %vm17481_vm0 = vmmov %vm17455_vm2 }
 0x1ed   : > { %vm17482_vm10 = vmmov %vm17481_vm0 }
 0x1ee   : > { %10495 = vmatmul.mubr.msk.bf16.gmra.mrb[92].mxu1 %vm2538_vm15, %v2775_v42  ;;  %v17329_v42 = vld [vmem:[#allocation100_spill] sm:$0xff]  ;;  %vm17499_vm7 = vmmov %vm17481_vm0 }
 0x1ef   : > { %10498 = vmatprep.mubr.msk.bf16.mxu1 %vm2538_vm15, %v2776_v10  ;;  %v2781_v10 = vpack.c.bf16 %v13430_v57, %v17329_v42  ;;  %vm17500_vm9 = vmmov %vm17481_vm0 }
 0x1f6   : > { %10499 = vmatmul.mubr.msk.bf16.gmra.mrb[96].mxu1 %vm2538_vm15, %v2777_v21  ;;  %v2784_v21 = vpack.c.bf16 %v13584_v16, %v13571_v24  ;;  %v17331_v16 = vld [vmem:[#allocation61_spill] sm:$0xff]  ;;  %v17334_v24 = vld [vmem:[#allocation72_spill] sm:$0xff] }
 0x1f7   : > { %10502 = vmatprep.mubr.msk.bf16.mxu1 %vm2538_vm15, %v2778_v44  ;;  %v2783_v44 = vpack.c.bf16 %v13515_v18, %v13497_v7  ;;  %v17371_v7 = vld [vmem:[#allocation53_spill] sm:$0xff] }
 0x1fe   : > { %10503 = vmatmul.mubr.msk.bf16.gmra.mrb[100].mxu1 %vm2538_vm15, %v2779_v46  ;;  %v2786_v46 = vpack.c.bf16 %v13640_v47, %v13626_v6  ;;  %v17336_v47 = vld [vmem:[#allocation84_spill] sm:$0xff]  ;;  %v17337_v6 = vld [vmem:[#allocation82_spill] sm:$0xff] }
 0x1ff   : > { %10506 = vmatprep.mubr.msk.bf16.mxu1 %vm2538_vm15, %v2780_v31  ;;  %v2785_v31 = vpack.c.bf16 %v13578_v25, %v13565_v32  ;;  %v17340_v32 = vld [vmem:[#allocation85_spill] sm:$0xff] }
 0x206   : > { %10507 = vmatmul.mubr.msk.bf16.gmra.mrb[104].mxu1 %vm2538_vm15, %v2781_v10  ;;  %v17330_v10 = vld [vmem:[#allocation62_spill] sm:$0xff] }
 0x207   : > { %10510 = vmatprep.mubr.msk.bf16.mxu1 %vm2538_vm15, %v2782_v4  ;;  %v2787_v4 = vpack.c.bf16 %v13632_v23, %v13620_v36 }
 0x20e   : > { %10511 = vmatmul.mubr.msk.bf16.gmra.mrb[108].mxu1 %vm2538_vm15, %v2783_v44  ;;  %v17332_v44 = vpack.c.bf16 %v17330_v10, %v17331_v16 }
 0x20f   : > { %10514 = vmatprep.mubr.msk.bf16.mxu1 %vm2538_vm15, %v2784_v21  ;;  %v17333_v21 = vld [vmem:[#allocation67_spill] sm:$0xff] }
 0x210   : > { %v17335_v25 = vpack.c.bf16 %v17333_v21, %v17334_v24  ;;  %v17344_v24 = vpack.c.bf16 %v13503_v0, %v13447_v55  ;;  %v17350_v55 = vpack.c.bf16 %v13704_v17, %v13697_v52  ;;  %v17351_v0 = vpack.c.bf16 %v13718_v41, %v13711_v35  ;;  %v11325_v52 = vld [vmem:[%s16633_s8] sm:$0xff]   ;;  %v17357_v41 = vld [vmem:[#allocation5_spill] sm:$0xff] }
 0x211   : > { %10562 = vmatprep.subr.bf16.mxu0 %v11325_v52  ;;  %v13938_v17 = vld [vmem:[%s16631_s6] ss:$0 sm:$0xff] }
 0x212   : > { %10563 = vmatpush3.bf16.msra.mxu0 %v11325_v52 }
 0x216   : > { %10515 = vmatmul.mubr.msk.bf16.gmra.mrb[112].mxu1 %vm2538_vm15, %v2785_v31  ;;  %v17338_v31 = vpack.c.bf16 %v17336_v47, %v17337_v6  ;;  %v17345_v6 = vpack.c.bf16 %v13522_v49, %v13511_v15  ;;  %v17347_v47 = vld [vmem:[#allocation129_spill] sm:$0xff]  ;;  %v17352_v15 = vpack.c.bf16 %v13737_v3, %v13730_v60  ;;  %v17353_v49 = vpack.c.bf16 %v13752_v61, %v13747_v29  ;;  %v17358_v29 = vld [vmem:[#allocation7_spill] sm:$0xff] }
 0x217   : > { %10518 = vmatprep.mubr.msk.bf16.mxu1 %vm2538_vm15, %v2786_v46  ;;  %v17339_v46 = vld [vmem:[#allocation94_spill] sm:$0xff] }
 0x218   : > { %v17341_v23 = vpack.c.bf16 %v17339_v46, %v17340_v32 }
 0x21e   : > { %10519 = vmatmul.mubr.msk.bf16.gmra.mrb[116].mxu1 %vm2538_vm15, %v2787_v4  ;;  %v17342_v4 = vld [vmem:[#allocation96_spill] sm:$0xff] }
 0x21f   : > { %10526 = vmatprep.mubr.msk.bf16.mxu1 %vm2538_vm15, %v17332_v44  ;;  %v17343_v16 = vpack.c.bf16 %v13442_v28, %v17342_v4  ;;  %v17349_v28 = vpack.c.bf16 %v13680_v63, %v13668_v39  ;;  %v17355_v63 = vpack.c.bf16 %v13772_v48, %v13769_v54  ;;  %v17356_v39 = vpack.c.bf16 %v13786_v45, %v13783_v19  ;;  %v17359_v54 = vld [vmem:[#allocation16_spill] sm:$0xff]  ;;  %v17360_v45 = vld [vmem:[#allocation9_spill] sm:$0xff] }
 0x226   : > { %10527 = vmatmul.mubr.msk.bf16.vlgmr.msra.gmra.mrb[84].mxu1 %vm2538_vm15, %v17335_v25  ;;  %v17346_v25 = vld [vmem:[#allocation130_spill] sm:$0xff] }
 0x227   : > { %10530 = vmatprep.mubr.msk.bf16.mxu1 %vm2538_vm15, %v17338_v31  ;;  %v17348_v32 = vpack.c.bf16 %v17346_v25, %v17347_v47  ;;  %v17362_v47 = vld [vmem:[#allocation13_spill] sm:$0xff] }
 0x22e   : > { %10531 = vmatmul.mubr.msk.bf16.gmra.mrb[88].mxu1 %vm2538_vm15, %v17341_v23  ;;  %v17354_v23 = vpack.c.bf16 %v13766_v34, %v13755_v62 }
 0x22f   : > { %10534 = vmatprep.mubr.msk.bf16.mxu1 %vm2538_vm15, %v17343_v16 }
 0x236   : > { %10535 = vmatmul.mubr.msk.bf16.gmra.mrb[92].mxu1 %vm2538_vm15, %v17344_v24  ;;  %v17361_v24 = vld [vmem:[#allocation18_spill] sm:$0xff] }
 0x237   : > { %10538 = vmatprep.mubr.msk.bf16.mxu1 %vm2538_vm15, %v17345_v6 }
 0x23e   : > { %10539 = vmatmul.mubr.msk.bf16.gmra.mrb[96].mxu1 %vm2538_vm15, %v17348_v32 }
 0x23f   : > { %10542 = vmatprep.mubr.msk.bf16.mxu1 %vm2538_vm15, %v17349_v28 }
 0x246   : > { %10543 = vmatmul.mubr.msk.bf16.gmra.mrb[100].mxu1 %vm2538_vm15, %v17350_v55 }
 0x247   : > { %10546 = vmatprep.mubr.msk.bf16.mxu1 %vm2538_vm15, %v17351_v0  ;;  %v17363_v0 = vld [vmem:[#allocation20_spill] sm:$0xff] }
 0x24e   : > { %10547 = vmatmul.mubr.msk.bf16.gmra.mrb[104].mxu1 %vm2538_vm15, %v17352_v15 }
 0x24f   : > { %10550 = vmatprep.mubr.msk.bf16.mxu1 %vm2538_vm15, %v17353_v49 }
 0x256   : > { %10551 = vmatmul.mubr.msk.bf16.gmra.mrb[108].mxu1 %vm2538_vm15, %v17354_v23 }
 0x257   : > { %10554 = vmatprep.mubr.msk.bf16.mxu1 %vm2538_vm15, %v17355_v63  ;;  %v17364_v63 = vld [vmem:[#allocation15_spill] sm:$0xff] }
 0x25e   : > { %10555 = vmatmul.mubr.msk.bf16.gmra.mrb[112].mxu1 %vm2538_vm15, %v17356_v39 }
 0x25f   : > { %10558 = vmatprep.mubr.msk.bf16.mxu1 %vm2538_vm15, %v3197_v59 }
 0x266   : > { %10559 = vmatmul.mubr.msk.bf16.gmra.mrb[116].mxu1 %vm2538_vm15, %v3198_v27 }
 0x2f9   : > { %v10528_v35 = vpop.f32.mrb[84].mxu1 }
 0x2fa   : > { %v3480_v60 = vadd.f32 %v10528_v35, %v17357_v41  ;;  %v3299_v3 = vpop.f32.mrb[85].mxu1 }
 0x2fb   : > { %v3478_v61 = vadd.f32 %v3299_v3, %v17358_v29  ;;  %v10529_v62 = vpop.f32.mrb[86].mxu1 }
 0x2fc   : > { %v13943_v34 = vadd.f32 %v13938_v17, %v3480_v60  ;;  %v3481_v48 = vadd.f32 %v10529_v62, %v17359_v54  ;;  %v3302_v59 = vpop.f32.mrb[87].mxu1 }
 0x2fd   : > { %v13947_v19 = vadd.f32 %v13938_v17, %v3478_v61  ;;  %v3479_v27 = vadd.f32 %v3302_v59, %v17360_v45  ;;  %v17365_v59 = vld [vmem:[#allocation25_spill] sm:$0xff] }
 0x2fe   : > { %v9662_v10 = vmul.f32 -1.442695, %v13943_v34  ;;  %v13952_v44 = vadd.f32 %v13938_v17, %v3481_v48 }
 0x2ff   : > { %v9660_v21 = vmul.f32 -1.442695, %v13947_v19  ;;  %v13956_v31 = vadd.f32 %v13938_v17, %v3479_v27 }
 0x300   : > { %11347 = vpow2.f32 %v9662_v10  ;;  %v9663_v46 = vmul.f32 -1.442695, %v13952_v44 }
 0x301   : > { %11349 = vpow2.f32 %v9660_v21  ;;  %v9661_v4 = vmul.f32 -1.442695, %v13956_v31  ;;  %v10532_v16 = vpop.f32.mrb[88].mxu1 }
 0x302   : > { %v3484_v6 = vadd.f32 %v10532_v16, %v17361_v24  ;;  %v3315_v25 = vpop.f32.mrb[89].mxu1  ;;  %11351 = vpow2.f32 %v9663_v46  ;;  %v17366_v16 = vld [vmem:[#allocation22_spill] sm:$0xff] }
 0x303   : > { %v3482_v32 = vadd.f32 %v3315_v25, %v17362_v47  ;;  %v10533_v28 = vpop.f32.mrb[90].mxu1  ;;  %11353 = vpow2.f32 %v9661_v4 }
 0x304   : > { %v13963_v55 = vadd.f32 %v13938_v17, %v3484_v6  ;;  %v3485_v15 = vadd.f32 %v10533_v28, %v17363_v0  ;;  %v3318_v49 = vpop.f32.mrb[91].mxu1  ;;  %v17367_v28 = vld [vmem:[#allocation27_spill] sm:$0xff] }
 0x305   : > { %v13967_v23 = vadd.f32 %v13938_v17, %v3482_v32  ;;  %v3483_v39 = vadd.f32 %v3318_v49, %v17364_v63 }
 0x306   : > { %v9666_v52 = vmul.f32 -1.442695, %v13963_v55  ;;  %v13972_v35 = vadd.f32 %v13938_v17, %v3485_v15 }
 0x307   : > { %v9664_v60 = vmul.f32 -1.442695, %v13967_v23  ;;  %v13976_v3 = vadd.f32 %v13938_v17, %v3483_v39 }
 0x308   : > { %11355 = vpow2.f32 %v9666_v52  ;;  %v9667_v61 = vmul.f32 -1.442695, %v13972_v35 }
 0x309   : > { %11357 = vpow2.f32 %v9664_v60  ;;  %v10536_v62 = vpop.f32.mrb[92].mxu1  ;;  %v9665_v4 = vmul.f32 -1.442695, %v13976_v3  ;;  %v17368_v60 = vld [vmem:[#allocation23_spill] sm:$0xff] }
 0x30a   : > { %v11348_v48 = vpop.eup %11347  ;;  %v3488_v27 = vadd.f32 %v10536_v62, %v17365_v59  ;;  %v3331_v10 = vpop.f32.mrb[93].mxu1  ;;  %11359 = vpow2.f32 %v9667_v61  ;;  %v11326_v61 = vld [vmem:[%s16633_s8 + $0x8] sm:$0xff]  }
 0x30b   : > { %v11350_v21 = vpop.eup %11349  ;;  %v3702_v46 = vadd.f32 1.0, %v11348_v48  ;;  %v3486_v6 = vadd.f32 %v3331_v10, %v17366_v16  ;;  %v10537_v25 = vpop.f32.mrb[94].mxu1  ;;  %10564 = vmatprep.subr.bf16.mxu0 %v11326_v61 }
 0x30c   : > { %v3700_v32 = vadd.f32 1.0, %v11350_v21  ;;  %v3489_v15 = vadd.f32 %v10537_v25, %v17367_v28  ;;  %v3334_v49 = vpop.f32.mrb[95].mxu1  ;;  %v11352_v39 = vpop.eup %11351  ;;  %v13984_v52 = vadd.f32 %v13938_v17, %v3488_v27  ;;  %v17369_v25 = vld [vmem:[#allocation42_spill] sm:$0xff]  ;;  %10565 = vmatpush3.bf16.msra.mxu0 %v11326_v61 }
 0x30d   : > { %11361 = vrcp.f32 %v3702_v46  ;;  %v3487_v62 = vadd.f32 %v3334_v49, %v17368_v60  ;;  %v3703_v36 = vadd.f32 1.0, %v11352_v39  ;;  %v11354_v48 = vpop.eup %11353  ;;  %v13988_v20 = vadd.f32 %v13938_v17, %v3486_v6 }
 0x30e   : > { %11363 = vrcp.f32 %v3700_v32  ;;  %v3701_v10 = vadd.f32 1.0, %v11354_v48  ;;  %v9670_v21 = vmul.f32 -1.442695, %v13984_v52  ;;  %v13997_v6 = vadd.f32 %v13938_v17, %v3489_v15  ;;  %v17370_v48 = vld [vmem:[#allocation29_spill] sm:$0xff] }
 0x30f   : > { %11365 = vpow2.f32 %v9665_v4  ;;  %v9668_v4 = vmul.f32 -1.442695, %v13988_v20 }
 0x310   : > { %11367 = vrcp.f32 %v3703_v36  ;;  %v9671_v15 = vmul.f32 -1.442695, %v13997_v6 }
 0x311   : > { %v10540_v46 = vpop.f32.mrb[96].mxu1  ;;  %11369 = vrcp.f32 %v3701_v10  ;;  %v14002_v10 = vadd.f32 %v13938_v17, %v3487_v62 }
 0x312   : > { %v11356_v27 = vpop.eup %11355  ;;  %v3492_v49 = vadd.f32 %v10540_v46, %v17369_v25  ;;  %v3347_v32 = vpop.f32.mrb[97].mxu1  ;;  %11371 = vpow2.f32 %v9670_v21  ;;  %v17372_v46 = vld [vmem:[#allocation38_spill] sm:$0xff] }
 0x313   : > { %v11358_v39 = vpop.eup %11357  ;;  %v3490_v18 = vadd.f32 %v3347_v32, %v17370_v48  ;;  %v10541_v8 = vpop.f32.mrb[98].mxu1  ;;  %v3706_v13 = vadd.f32 1.0, %v11356_v27 }
 0x314   : > { %v3704_v36 = vadd.f32 1.0, %v11358_v39  ;;  %v3493_v22 = vadd.f32 %v10541_v8, %v17371_v7  ;;  %v3350_v57 = vpop.f32.mrb[99].mxu1  ;;  %v11360_v42 = vpop.eup %11359  ;;  %v9669_v8 = vmul.f32 -1.442695, %v14002_v10  ;;  %v14009_v21 = vadd.f32 %v13938_v17, %v3492_v49  ;;  %v17374_v39 = vld [vmem:[#allocation68_spill] sm:$0xff]  ;;  %v17376_v49 = vld [vmem:[#allocation74_spill] sm:$0xff] }
 0x315   : > { %v3491_v1 = vadd.f32 %v3350_v57, %v17372_v46  ;;  %v14013_v27 = vadd.f32 %v13938_v17, %v3490_v18  ;;  %v3707_v5 = vadd.f32 1.0, %v11360_v42 }
 0x316   : > { %11373 = vrcp.f32 %v3704_v36  ;;  %17373 = vst [vmem:[#allocation62_spill] sm:$0xff] %v14009_v21  ;;  %v9674_v18 = vmul.f32 -1.442695, %v14009_v21 }
 0x317   : > { %v11362_v50 = vpop.eup %11361  ;;  %11375 = vpow2.f32 %v9668_v4 }
 0x318   : > { %v11364_v32 = vpop.eup %11363  ;;  %3848 = vrot.lane.b32.xlu1 %v11362_v50, %s12025_s24  ;;  %11377 = vrcp.f32 %v3706_v13  ;;  %v17375_v50 = vld [vmem:[#allocation56_spill] sm:$0xff] }
 0x319   : > { %v11366_v61 = vpop.eup %11365  ;;  %3844 = vrot.lane.b32.xlu0 %v11364_v32, %s12025_s24  ;;  %v10544_v57 = vpop.f32.mrb[100].mxu1  ;;  %11379 = vpow2.f32 %v9671_v15  ;;  %v17377_v32 = vld [vmem:[#allocation64_spill] sm:$0xff]  ;;  %v9672_v15 = vmul.f32 -1.442695, %v14013_v27 }
 0x31a   : > { %v3705_v62 = vadd.f32 1.0, %v11366_v61  ;;  %v3496_v4 = vadd.f32 %v10544_v57, %v17374_v39  ;;  %v3363_v36 = vpop.f32.mrb[101].mxu1  ;;  %v11368_v11 = vpop.eup %11367 }
 0x31b   : > { %v3494_v12 = vadd.f32 %v3363_v36, %v17375_v50  ;;  %v10545_v9 = vpop.f32.mrb[102].mxu1  ;;  %v11370_v2 = vpop.eup %11369  ;;  %v14024_v36 = vadd.f32 %v13938_v17, %v3493_v22  ;;  %v17381_v22 = vld [vmem:[#allocation78_spill] sm:$0xff] }
 0x31c   : > { %11381 = vrcp.f32 %v3705_v62  ;;  %v3497_v26 = vadd.f32 %v10545_v9, %v17376_v49  ;;  %3850 = vrot.lane.b32.xlu1 %v11368_v11, %s12025_s24  ;;  %v3366_v13 = vpop.f32.mrb[103].mxu1  ;;  %v11372_v57 = vpop.eup %11371  ;;  %v14027_v9 = vadd.f32 %v13938_v17, %v3491_v1 }
 0x31d   : > { %11383 = vpow2.f32 %v9669_v8  ;;  %v3495_v61 = vadd.f32 %v3366_v13, %v17377_v32  ;;  %3846 = vrot.lane.b32.xlu0 %v11370_v2, %s12025_s24  ;;  %17378 = vst [vmem:[#allocation61_spill] sm:$0xff] %v14024_v36  ;;  %v3710_v62 = vadd.f32 1.0, %v11372_v57  ;;  %v17380_v2 = vld [vmem:[#allocation90_spill] sm:$0xff]  ;;  %v9675_v37 = vmul.f32 -1.442695, %v14024_v36 }
 0x31e   : > { %11385 = vrcp.f32 %v3707_v5  ;;  %17379 = vst [vmem:[#allocation67_spill] sm:$0xff] %v14027_v9  ;;  %v9673_v1 = vmul.f32 -1.442695, %v14027_v9  ;;  %v14038_v57 = vadd.f32 %v13938_v17, %v3496_v4  ;;  %v17396_v9 = vld [vmem:[#allocation132_spill] sm:$0xff] }
 0x31f   : > { %11387 = vpow2.f32 %v9674_v18 }
 0x320   : > { %v11374_v42 = vpop.eup %11373  ;;  %11389 = vpow2.f32 %v9672_v15  ;;  %17383 = vst [vmem:[#allocation72_spill] sm:$0xff] %v14038_v57  ;;  %v17384_v15 = vld [vmem:[#allocation87_spill] sm:$0xff]  ;;  %v9678_v4 = vmul.f32 -1.442695, %v14038_v57 }
 0x321   : > { %v11376_v11 = vpop.eup %11375  ;;  %3852 = vrot.lane.b32.xlu0 %v11374_v42, %s12025_s24  ;;  %v10548_v8 = vpop.f32.mrb[104].mxu1 }
 0x322   : > { %v3708_v13 = vadd.f32 1.0, %v11376_v11  ;;  %v3500_v56 = vadd.f32 %v10548_v8, %v17380_v2  ;;  %v3379_v30 = vpop.f32.mrb[105].mxu1  ;;  %v11378_v5 = vpop.eup %11377  ;;  %v14054_v2 = vadd.f32 %v13938_v17, %v3497_v26 }
 0x323   : > { %v3498_v43 = vadd.f32 %v3379_v30, %v17381_v22  ;;  %v10549_v51 = vpop.f32.mrb[106].mxu1  ;;  %v11380_v38 = vpop.eup %11379  ;;  %v14045_v30 = vadd.f32 %v13938_v17, %v3494_v12 }
 0x324   : > { %11391 = vrcp.f32 %v3708_v13  ;;  %v14035_v18 = vadd.f32 %v10549_v51, %v17382_v14  ;;  %v3382_v42 = vpop.f32.mrb[107].mxu1  ;;  %v3711_v51 = vadd.f32 1.0, %v11380_v38  ;;  %17387 = vst [vmem:[#allocation82_spill] sm:$0xff] %v14054_v2  ;;  %v17388_v38 = vld [vmem:[#allocation101_spill] sm:$0xff] }
 0x325   : > { %v14041_v11 = vadd.f32 %v3382_v42, %v17384_v15  ;;  %3856 = vrot.lane.b32.xlu0 %v11378_v5, %s12025_s24  ;;  %11393 = vrcp.f32 %v3710_v62  ;;  %17385 = vst [vmem:[#allocation84_spill] sm:$0xff] %v14045_v30  ;;  %v9676_v42 = vmul.f32 -1.442695, %v14045_v30  ;;  %v17386_v5 = vld [vmem:[#allocation108_spill] sm:$0xff] }
 0x326   : > { %v11382_v8 = vpop.eup %11381  ;;  %11395 = vpow2.f32 %v9675_v37 }
 0x327   : > { %v11384_v13 = vpop.eup %11383  ;;  %3854 = vrot.lane.b32.xlu1 %v11382_v8, %s12025_s24  ;;  %11397 = vpow2.f32 %v9673_v1 }
 0x328   : > { %v3709_v14 = vadd.f32 1.0, %v11384_v13  ;;  %v11386_v21 = vpop.eup %11385  ;;  %v17390_v13 = vld [vmem:[#allocation114_spill] sm:$0xff] }
 0x329   : > { %v10552_v36 = vpop.f32.mrb[108].mxu1  ;;  %v11388_v12 = vpop.eup %11387 }
 0x32a   : > { %11399 = vrcp.f32 %v3709_v14  ;;  %v14051_v15 = vadd.f32 %v10552_v36, %v17386_v5  ;;  %v3395_v62 = vpop.f32.mrb[109].mxu1  ;;  %v11390_v8 = vpop.eup %11389  ;;  %v14061_v14 = vadd.f32 %v13938_v17, %v3495_v61  ;;  %v17391_v5 = vld [vmem:[#allocation106_spill] sm:$0xff] }
 0x32b   : > { %3858 = vrot.lane.b32.xlu1 %v11386_v21, %s12025_s24  ;;  %v14058_v37 = vadd.f32 %v3395_v62, %v17388_v38  ;;  %v10553_v1 = vpop.f32.mrb[110].mxu1  ;;  %11401 = vrcp.f32 %v3711_v51  ;;  %v3712_v30 = vadd.f32 1.0, %v11390_v8  ;;  %v3714_v21 = vadd.f32 1.0, %v11388_v12  ;;  %v17394_v12 = vld [vmem:[#allocation124_spill] sm:$0xff] }
 0x32c   : > { %17389 = vst [vmem:[#allocation94_spill] sm:$0xff] %v14061_v14  ;;  %v14064_v57 = vadd.f32 %v10553_v1, %v17390_v13  ;;  %v3398_v36 = vpop.f32.mrb[111].mxu1  ;;  %11403 = vpow2.f32 %v9678_v4  ;;  %v9679_v62 = vmul.f32 -1.442695, %v14054_v2  ;;  %v9677_v61 = vmul.f32 -1.442695, %v14061_v14 }
 0x32d   : > { %v14067_v26 = vadd.f32 %v3398_v36, %v17391_v5  ;;  %11405 = vpow2.f32 %v9676_v42  ;;  %v14073_v1 = vadd.f32 %v13938_v17, %v3500_v56  ;;  %v14076_v36 = vadd.f32 %v13938_v17, %v3498_v43 }
 0x32e   : > { %v11392_v49 = vpop.eup %11391  ;;  %11407 = vrcp.f32 %v3712_v30 }
 0x32f   : > { %3860 = vrot.lane.b32.xlu0 %v11392_v49, %s12025_s24  ;;  %v11394_v51 = vpop.eup %11393  ;;  %17392 = vst [vmem:[#allocation85_spill] sm:$0xff] %v14073_v1  ;;  %11409 = vrcp.f32 %v3714_v21  ;;  %17393 = vst [vmem:[#allocation96_spill] sm:$0xff] %v14076_v36  ;;  %v17395_v49 = vld [vmem:[#allocation116_spill] sm:$0xff] }
 0x330   : > { %v11396_v38 = vpop.eup %11395  ;;  %11411 = vpow2.f32 %v9679_v62 }
 0x331   : > { %v10556_v8 = vpop.f32.mrb[112].mxu1  ;;  %v11398_v4 = vpop.eup %11397  ;;  %v3715_v14 = vadd.f32 1.0, %v11396_v38  ;;  %11413 = vpow2.f32 %v9677_v61  ;;  %v14096_v38 = vadd.f32 %v13938_v17, %v14035_v18 }
 0x332   : > { %v14079_v42 = vadd.f32 %v10556_v8, %v17394_v12  ;;  %v3411_v30 = vpop.f32.mrb[113].mxu1  ;;  %v3713_v13 = vadd.f32 1.0, %v11398_v4  ;;  %v9682_v8 = vmul.f32 -1.442695, %v14073_v1  ;;  %v17397_v4 = vld [vmem:[#allocation122_spill] sm:$0xff] }
 0x333   : > { %3864 = vrot.lane.b32.xlu0 %v11394_v51, %s12025_s24  ;;  %v14083_v2 = vadd.f32 %v3411_v30, %v17395_v49  ;;  %v10557_v5 = vpop.f32.mrb[114].mxu1  ;;  %v9680_v30 = vmul.f32 -1.442695, %v14076_v36  ;;  %17398 = vst [vmem:[#allocation130_spill] sm:$0xff] %v14096_v38 }
 0x334   : > { %v11400_v56 = vpop.eup %11399  ;;  %v14086_v21 = vadd.f32 %v10557_v5, %v17396_v9  ;;  %v3414_v43 = vpop.f32.mrb[115].mxu1  ;;  %11415 = vrcp.f32 %v3713_v13  ;;  %v14100_v5 = vadd.f32 %v13938_v17, %v14041_v11 }
 0x335   : > { %3862 = vrot.lane.b32.xlu1 %v11400_v56, %s12025_s24  ;;  %v14091_v62 = vadd.f32 %v3414_v43, %v17397_v4  ;;  %v11402_v51 = vpop.eup %11401  ;;  %11417 = vrcp.f32 %v3715_v14  ;;  %v9683_v14 = vmul.f32 -1.442695, %v14096_v38 }
 0x336   : > { %v11404_v12 = vpop.eup %11403  ;;  %11419 = vpow2.f32 %v9682_v8  ;;  %v9681_v8 = vmul.f32 -1.442695, %v14100_v5 }
 0x337   : > { %v11406_v61 = vpop.eup %11405  ;;  %v3718_v43 = vadd.f32 1.0, %v11404_v12  ;;  %11421 = vpow2.f32 %v9680_v30 }
 0x338   : > { %v11408_v13 = vpop.eup %11407  ;;  %v3716_v1 = vadd.f32 1.0, %v11406_v61 }
 0x339   : > { %3866 = vrot.lane.b32.xlu1 %v11402_v51, %s12025_s24  ;;  %v10560_v56 = vpop.f32.mrb[116].mxu1  ;;  %3868 = vrot.lane.b32.xlu0 %v11408_v13, %s12025_s24  ;;  %v11410_v61 = vpop.eup %11409  ;;  %v14117_v13 = vadd.f32 %v13938_v17, %v14051_v15 }
 0x33a   : > { %v14105_v9 = vadd.f32 %v10560_v56, %v13811_v58  ;;  %v3427_v18 = vpop.f32.mrb[117].mxu1  ;;  %11423 = vrcp.f32 %v3716_v1  ;;  %v11412_v30 = vpop.eup %11411 }
 0x33b   : > { %v14109_v11 = vadd.f32 %v3427_v18, %v13688_v33  ;;  %v10561_v36 = vpop.f32.mrb[118].mxu1  ;;  %v11414_v56 = vpop.eup %11413  ;;  %11425 = vrcp.f32 %v3718_v43  ;;  %v14124_v18 = vadd.f32 %v13938_v17, %v14058_v37  ;;  %v9686_v15 = vmul.f32 -1.442695, %v14117_v13 }
 0x33c   : > { %v14113_v51 = vadd.f32 %v10561_v36, %v13817_v40  ;;  %v3430_v12 = vpop.f32.mrb[119].mxu1  ;;  %v3717_v36 = vadd.f32 1.0, %v11414_v56  ;;  %11427 = vpow2.f32 %v9683_v14  ;;  %v3719_v40 = vadd.f32 1.0, %v11412_v30 }
 0x33d   : > { %v14120_v1 = vadd.f32 %v3430_v12, %v13774_v53  ;;  %3872 = vrot.lane.b32.xlu0 %v11410_v61, %s12025_s24  ;;  %11429 = vpow2.f32 %v9681_v8  ;;  %v9684_v53 = vmul.f32 -1.442695, %v14124_v18  ;;  %v14132_v37 = vadd.f32 %v13938_v17, %v14064_v57 }
 0x33e   : > { %v11416_v38 = vpop.eup %11415  ;;  %11431 = vrcp.f32 %v3717_v36  ;;  %v14136_v14 = vadd.f32 %v13938_v17, %v14067_v26  ;;  %v14144_v26 = vadd.f32 %v13938_v17, %v14079_v42 }
 0x33f   : > { %3870 = vrot.lane.b32.xlu1 %v11416_v38, %s12025_s24  ;;  %v11418_v12 = vpop.eup %11417  ;;  %11433 = vrcp.f32 %v3719_v40  ;;  %v9687_v30 = vmul.f32 -1.442695, %v14132_v37 }
 0x340   : > { %v11420_v43 = vpop.eup %11419  ;;  %11435 = vpow2.f32 %v9686_v15  ;;  %v9685_v56 = vmul.f32 -1.442695, %v14136_v14 }
 0x341   : > { %v11422_v58 = vpop.eup %11421  ;;  %v3722_v8 = vadd.f32 1.0, %v11420_v43  ;;  %11437 = vpow2.f32 %v9684_v53  ;;  %v9690_v43 = vmul.f32 -1.442695, %v14144_v26 }
 0x342   : > { %v3720_v61 = vadd.f32 1.0, %v11422_v58  ;;  %v14148_v58 = vadd.f32 %v13938_v17, %v14083_v2  ;;  %v14156_v2 = vadd.f32 %v13938_v17, %v14086_v21 }
 0x343   : > { %3874 = vrot.lane.b32.xlu1 %v11418_v12, %s12025_s24 }
 0x344   : > { %v11424_v38 = vpop.eup %11423  ;;  %11439 = vrcp.f32 %v3720_v61 }
 0x345   : > { %3876 = vrot.lane.b32.xlu0 %v11424_v38, %s12025_s24  ;;  %v11426_v57 = vpop.eup %11425  ;;  %11441 = vrcp.f32 %v3722_v8  ;;  %v9688_v38 = vmul.f32 -1.442695, %v14148_v58 }
 0x346   : > { %v11428_v40 = vpop.eup %11427  ;;  %11443 = vpow2.f32 %v9687_v30  ;;  %v14160_v30 = vadd.f32 %v13938_v17, %v14091_v62  ;;  %v14168_v62 = vadd.f32 %v13938_v17, %v14105_v9 }
 0x347   : > { %v11430_v36 = vpop.eup %11429  ;;  %v3723_v12 = vadd.f32 1.0, %v11428_v40  ;;  %11445 = vpow2.f32 %v9685_v56 }
 0x348   : > { %v11432_v53 = vpop.eup %11431  ;;  %v3721_v15 = vadd.f32 1.0, %v11430_v36  ;;  %v9691_v36 = vmul.f32 -1.442695, %v14156_v2 }
 0x349   : > { %3880 = vrot.lane.b32.xlu0 %v11426_v57, %s12025_s24  ;;  %3878 = vrot.lane.b32.xlu1 %v11432_v53, %s12025_s24  ;;  %v11434_v42 = vpop.eup %11433  ;;  %v9689_v53 = vmul.f32 -1.442695, %v14160_v30 }
 0x34a   : > { %11447 = vrcp.f32 %v3721_v15  ;;  %v11436_v61 = vpop.eup %11435 }
 0x34b   : > { %v11438_v8 = vpop.eup %11437  ;;  %11449 = vrcp.f32 %v3723_v12  ;;  %v3726_v40 = vadd.f32 1.0, %v11436_v61 }
 0x34c   : > { %v3724_v56 = vadd.f32 1.0, %v11438_v8  ;;  %11451 = vpow2.f32 %v9690_v43  ;;  %v14172_v43 = vadd.f32 %v13938_v17, %v14109_v11  ;;  %v9694_v8 = vmul.f32 -1.442695, %v14168_v62 }
 0x34d   : > { %3882 = vrot.lane.b32.xlu1 %v11434_v42, %s12025_s24  ;;  %11453 = vpow2.f32 %v9688_v38  ;;  %v14180_v11 = vadd.f32 %v13938_v17, %v14113_v51 }
 0x34e   : > { %v11440_v57 = vpop.eup %11439  ;;  %11455 = vrcp.f32 %v3724_v56 }
 0x34f   : > { %3884 = vrot.lane.b32.xlu0 %v11440_v57, %s12025_s24  ;;  %v11442_v21 = vpop.eup %11441  ;;  %11457 = vrcp.f32 %v3726_v40  ;;  %v9692_v57 = vmul.f32 -1.442695, %v14172_v43 }
 0x350   : > { %v11444_v15 = vpop.eup %11443  ;;  %11459 = vpow2.f32 %v9691_v36  ;;  %v14184_v36 = vadd.f32 %v13938_v17, %v14120_v1 }
 0x351   : > { %v11446_v12 = vpop.eup %11445  ;;  %v3727_v61 = vadd.f32 1.0, %v11444_v15  ;;  %11461 = vpow2.f32 %v9689_v53 }
 0x352   : > { %v3725_v38 = vadd.f32 1.0, %v11446_v12  ;;  %v9695_v12 = vmul.f32 -1.442695, %v14180_v11 }
 0x353   : > { %3888 = vrot.lane.b32.xlu0 %v11442_v21, %s12025_s24 }
 0x354   : > { %v11448_v42 = vpop.eup %11447  ;;  %11463 = vrcp.f32 %v3725_v38 }
 0x355   : > { %3886 = vrot.lane.b32.xlu1 %v11448_v42, %s12025_s24  ;;  %v11450_v9 = vpop.eup %11449  ;;  %11465 = vrcp.f32 %v3727_v61  ;;  %v9693_v42 = vmul.f32 -1.442695, %v14184_v36 }
 0x356   : > { %v11452_v56 = vpop.eup %11451  ;;  %11467 = vpow2.f32 %v9694_v8 }
 0x357   : > { %v11454_v40 = vpop.eup %11453  ;;  %v3730_v15 = vadd.f32 1.0, %v11452_v56  ;;  %11469 = vpow2.f32 %v9692_v57 }
 0x358   : > { %v11456_v21 = vpop.eup %11455  ;;  %v3728_v53 = vadd.f32 1.0, %v11454_v40 }
 0x359   : > { %3890 = vrot.lane.b32.xlu1 %v11450_v9, %s12025_s24  ;;  %3892 = vrot.lane.b32.xlu0 %v11456_v21, %s12025_s24  ;;  %v11458_v51 = vpop.eup %11457 }
 0x35a   : > { %11471 = vrcp.f32 %v3728_v53  ;;  %v11460_v38 = vpop.eup %11459 }
 0x35b   : > { %v11462_v61 = vpop.eup %11461  ;;  %11473 = vrcp.f32 %v3730_v15  ;;  %v3731_v8 = vadd.f32 1.0, %v11460_v38 }
 0x35c   : > { %v3729_v1 = vadd.f32 1.0, %v11462_v61  ;;  %11475 = vpow2.f32 %v9695_v12 }
 0x35d   : > { %3896 = vrot.lane.b32.xlu0 %v11458_v51, %s12025_s24  ;;  %11477 = vpow2.f32 %v9693_v42 }
 0x35e   : > { %v11464_v17 = vpop.eup %11463  ;;  %11479 = vrcp.f32 %v3729_v1 }
 0x35f   : > { %3894 = vrot.lane.b32.xlu1 %v11464_v17, %s12025_s24  ;;  %v11466_v9 = vpop.eup %11465  ;;  %11481 = vrcp.f32 %v3731_v8 }
 0x360   : > { %v11468_v57 = vpop.eup %11467 }
 0x361   : > { %v11470_v56 = vpop.eup %11469  ;;  %v3734_v53 = vadd.f32 1.0, %v11468_v57 }
 0x362   : > { %v3732_v21 = vadd.f32 1.0, %v11470_v56 }
 0x363   : > { %3898 = vrot.lane.b32.xlu1 %v11466_v9, %s12025_s24 }
 0x364   : > { %v11472_v40 = vpop.eup %11471  ;;  %11483 = vrcp.f32 %v3732_v21 }
 0x365   : > { %3900 = vrot.lane.b32.xlu0 %v11472_v40, %s12025_s24  ;;  %v11474_v15 = vpop.eup %11473  ;;  %11485 = vrcp.f32 %v3734_v53 }
 0x366   : > { %v11476_v51 = vpop.eup %11475 }
 0x367   : > { %v11478_v12 = vpop.eup %11477  ;;  %v3735_v61 = vadd.f32 1.0, %v11476_v51 }
 0x368   : > { %v11480_v42 = vpop.eup %11479  ;;  %v3733_v38 = vadd.f32 1.0, %v11478_v12 }
 0x369   : > { %3904 = vrot.lane.b32.xlu0 %v11474_v15, %s12025_s24  ;;  %3902 = vrot.lane.b32.xlu1 %v11480_v42, %s12025_s24  ;;  %v11482_v17 = vpop.eup %11481 }
 0x36a   : > { %11487 = vrcp.f32 %v3733_v38  ;;  %v17401_v38 = vld [vmem:[#allocation90_spill] sm:$0xff] }
 0x36b   : > { %11489 = vrcp.f32 %v3735_v61 }
 0x36c   : > { %11491 = vtanh.f32 %v13943_v34 }
 0x36d   : > { %3906 = vrot.lane.b32.xlu1 %v11482_v17, %s12025_s24  ;;  %11493 = vtanh.f32 %v13947_v19  ;;  %v17402_v17 = vld [vmem:[#allocation62_spill] sm:$0xff] }
 0x36e   : > { %v11484_v1 = vpop.eup %11483  ;;  %11495 = vtanh.f32 %v13952_v44 }
 0x36f   : > { %3908 = vrot.lane.b32.xlu0 %v11484_v1, %s12025_s24  ;;  %v11486_v8 = vpop.eup %11485  ;;  %11497 = vtanh.f32 %v13956_v31  ;;  %v17403_v1 = vld [vmem:[#allocation61_spill] sm:$0xff] }
 0x370   : > { %11499 = vtanh.f32 %v13967_v23 }
 0x371   : > { %11501 = vtanh.f32 %v13976_v3 }
 0x372   : > { %11503 = vtanh.f32 %v13963_v55 }
 0x373   : > { %3912 = vrot.lane.b32.xlu0 %v11486_v8, %s12025_s24  ;;  %11505 = vtanh.f32 %v13972_v35 }
 0x374   : > { %v11488_v9 = vpop.eup %11487  ;;  %11507 = vtanh.f32 %v13988_v20 }
 0x375   : > { %3910 = vrot.lane.b32.xlu1 %v11488_v9, %s12025_s24  ;;  %v11490_v57 = vpop.eup %11489  ;;  %11509 = vtanh.f32 %v14002_v10 }
 0x376   : > { %v11492_v34 = vpop.eup %11491  ;;  %11511 = vtanh.f32 %v13984_v52 }
 0x377   : > { %5585 = vrot.lane.b32.xlu0 %v17358_v29, %s12026_s27  ;;  %v11494_v19 = vpop.eup %11493  ;;  %11513 = vtanh.f32 %v13997_v6  ;;  %v17400_v6 = vld [vmem:[#allocation74_spill] sm:$0xff] }
 0x378   : > { %v11496_v44 = vpop.eup %11495  ;;  %11515 = vtanh.f32 %v14013_v27  ;;  %v17404_v27 = vld [vmem:[#allocation87_spill] sm:$0xff] }
 0x379   : > { %3914 = vrot.lane.b32.xlu1 %v11490_v57, %s12025_s24  ;;  %v11498_v31 = vpop.eup %11497  ;;  %v17405_v57 = vld [vmem:[#allocation101_spill] sm:$0xff] }
 0x37b   : > { %5589 = vrot.lane.b32.xlu0 %v17357_v41, %s12026_s27 }
 0x37d   : > { %5587 = vrot.lane.b32.xlu1 %v17360_v45, %s12026_s27 }
 0x37f   : > { %5593 = vrot.lane.b32.xlu0 %v17362_v47, %s12026_s27 }
 0x381   : > { %5591 = vrot.lane.b32.xlu1 %v17359_v54, %s12026_s27 }
 0x383   : > { %5597 = vrot.lane.b32.xlu0 %v17361_v24, %s12026_s27 }
 0x385   : > { %5595 = vrot.lane.b32.xlu1 %v17364_v63, %s12026_s27 }
 0x387   : > { %5601 = vrot.lane.b32.xlu0 %v17366_v16, %s12026_s27 }
 0x389   : > { %5599 = vrot.lane.b32.xlu1 %v17363_v0, %s12026_s27  ;;  %v11500_v0 = vpop.eup %11499 }
 0x38a   : > { %v3849_v29 = vpop.permute.xlu1 %3848  ;;  %v11502_v55 = vpop.eup %11501 }
 0x38b   : > { %v3845_v41 = vpop.permute.xlu0 %3844  ;;  %v3954_v54 = vmul.f32 %v11492_v34, %v3849_v29  ;;  %5605 = vrot.lane.b32.xlu0 %v17365_v59, %s12026_s27  ;;  %v11504_v21 = vpop.eup %11503  ;;  %v17406_v34 = vld [vmem:[#allocation98_spill] sm:$0xff] }
 0x38c   : > { %v3952_v56 = vmul.f32 %v11494_v19, %v3845_v41 }
 0x38d   : > { %5603 = vrot.lane.b32.xlu1 %v17368_v60, %s12026_s27 }
 0x38e   : > { %v3851_v45 = vpop.permute.xlu1 %3850 }
 0x38f   : > { %v3955_v47 = vmul.f32 %v11496_v44, %v3851_v45  ;;  %v3847_v24 = vpop.permute.xlu0 %3846  ;;  %5609 = vrot.lane.b32.xlu0 %v17370_v48, %s12026_s27  ;;  %v11506_v48 = vpop.eup %11505  ;;  %v17407_v45 = vld [vmem:[#allocation108_spill] sm:$0xff] }
 0x390   : > { %v3953_v40 = vmul.f32 %v11498_v31, %v3847_v24  ;;  %v11508_v10 = vpop.eup %11507 }
 0x391   : > { %v3989_v63 = vpack.c.bf16 %v3955_v47, %v3954_v54  ;;  %5607 = vrot.lane.b32.xlu1 %v17367_v28, %s12026_s27  ;;  %v11510_v52 = vpop.eup %11509  ;;  %v17408_v54 = vld [vmem:[#allocation84_spill] sm:$0xff] }
 0x392   : > { %v3988_v23 = vpack.c.bf16 %v3953_v40, %v3952_v56  ;;  %v11512_v42 = vpop.eup %11511  ;;  %v17409_v56 = vld [vmem:[#allocation94_spill] sm:$0xff] }
 0x393   : > { %v3853_v3 = vpop.permute.xlu0 %3852  ;;  %5613 = vrot.lane.b32.xlu0 %v17369_v25, %s12026_s27  ;;  %v11514_v61 = vpop.eup %11513  ;;  %v17410_v40 = vld [vmem:[#allocation106_spill] sm:$0xff] }
 0x394   : > { %10566 = vmatprep.mubr.msk.bf16.mxu0 %vm2538_vm15, %v3988_v23  ;;  %v3956_v35 = vmul.f32 %v11500_v0, %v3853_v3  ;;  %v11516_v19 = vpop.eup %11515 }
 0x395   : > { %10567 = vmatmul.mubr.msk.bf16.vlgmr.msra.gmra.mrb[36].mxu0 %vm2538_vm15, %v3989_v63  ;;  %5611 = vrot.lane.b32.xlu1 %v17372_v46, %s12026_s27  ;;  %v17399_v46 = vld [vmem:[#allocation67_spill] sm:$0xff] }
 0x396   : > { %11517 = vtanh.f32 %v17399_v46  ;;  %v17416_v46 = vld [vmem:[#allocation132_spill] sm:$0xff] }
 0x397   : > { %v3857_v60 = vpop.permute.xlu0 %3856  ;;  %5617 = vrot.lane.b32.xlu0 %v17375_v50, %s12026_s27  ;;  %11519 = vtanh.f32 %v17402_v17 }
 0x398   : > { %v3958_v28 = vmul.f32 %v11504_v21, %v3857_v60  ;;  %11521 = vtanh.f32 %v17403_v1  ;;  %v17412_v60 = vld [vmem:[#allocation82_spill] sm:$0xff]  ;;  %v17421_v1 = vld [vmem:[#allocation139_spill] sm:$0xff] }
 0x399   : > { %v3855_v59 = vpop.permute.xlu1 %3854  ;;  %5615 = vrot.lane.b32.xlu1 %v17371_v7, %s12026_s27  ;;  %11523 = vtanh.f32 %v17408_v54  ;;  %v17413_v21 = vld [vmem:[#allocation114_spill] sm:$0xff] }
 0x39a   : > { %v3957_v16 = vmul.f32 %v11502_v55, %v3855_v59  ;;  %11525 = vtanh.f32 %v17409_v56  ;;  %v17411_v59 = vld [vmem:[#allocation72_spill] sm:$0xff] }
 0x39b   : > { %5621 = vrot.lane.b32.xlu0 %v17374_v39, %s12026_s27  ;;  %11527 = vtanh.f32 %v17411_v59 }
 0x39c   : > { %v3990_v53 = vpack.c.bf16 %v3957_v16, %v3956_v35  ;;  %11529 = vtanh.f32 %v17412_v60 }
 0x39d   : > { %v3859_v15 = vpop.permute.xlu1 %3858  ;;  %5619 = vrot.lane.b32.xlu1 %v17377_v32, %s12026_s27 }
 0x39e   : > { %v3959_v51 = vmul.f32 %v11506_v48, %v3859_v15  ;;  %10570 = vmatprep.mubr.msk.bf16.mxu0 %vm2538_vm15, %v3990_v53  ;;  %v17414_v48 = vld [vmem:[#allocation124_spill] sm:$0xff] }
 0x39f   : > { %5625 = vrot.lane.b32.xlu0 %v17381_v22, %s12026_s27 }
 0x3a0   : > { %v3991_v20 = vpack.c.bf16 %v3959_v51, %v3958_v28  ;;  %v11518_v44 = vpop.eup %11517  ;;  %v11328_v28 = vld [vmem:[%s16630_s5 + $0x38] sm:$0xff]  }
 0x3a1   : > { %v3861_v25 = vpop.permute.xlu0 %3860  ;;  %5623 = vrot.lane.b32.xlu1 %v17400_v6, %s12026_s27  ;;  %v11520_v23 = vpop.eup %11519 }
 0x3a2   : > { %10571 = vmatmul.mubr.msk.bf16.gmra.mrb[40].mxu0 %vm2538_vm15, %v3991_v20  ;;  %v3960_v39 = vmul.f32 %v11508_v10, %v3861_v25  ;;  %v11522_v0 = vpop.eup %11521  ;;  %v17415_v10 = vld [vmem:[#allocation96_spill] sm:$0xff] }
 0x3a3   : > { %5629 = vrot.lane.b32.xlu0 %v17401_v38, %s12026_s27  ;;  %v11524_v51 = vpop.eup %11523  ;;  %11531 = vtanh.f32 %v17415_v10 }
 0x3a4   : > { %v11526_v20 = vpop.eup %11525  ;;  %11533 = vtanh.f32 %v14100_v5  ;;  %v17420_v5 = vld [vmem:[#allocation135_spill] sm:$0xff] }
 0x3a5   : > { %v3865_v12 = vpop.permute.xlu0 %3864  ;;  %5627 = vrot.lane.b32.xlu1 %v17404_v27, %s12026_s27 }
 0x3a6   : > { %v3962_v8 = vmul.f32 %v11512_v42, %v3865_v12  ;;  %v17417_v12 = vld [vmem:[#allocation137_spill] sm:$0xff] }
 0x3a7   : > { %v3863_v7 = vpop.permute.xlu1 %3862  ;;  %5633 = vrot.lane.b32.xlu0 %v17405_v57, %s12026_s27  ;;  %v17418_v42 = vld [vmem:[#allocation85_spill] sm:$0xff] }
 0x3a8   : > { %v3961_v50 = vmul.f32 %v11510_v52, %v3863_v7  ;;  %11535 = vtanh.f32 %v17418_v42  ;;  %v14339_v42 = vld [vmem:[%s16634_s9] ss:$0 sm:$0xff] }
 0x3a9   : > { %5631 = vrot.lane.b32.xlu1 %v17406_v34, %s12026_s27 }
 0x3aa   : > { %v3992_v32 = vpack.c.bf16 %v3961_v50, %v3960_v39 }
 0x3ab   : > { %v3867_v22 = vpop.permute.xlu1 %3866  ;;  %v3869_v41 = vpop.permute.xlu0 %3868  ;;  %5637 = vrot.lane.b32.xlu0 %v17407_v45, %s12026_s27 }
 0x3ac   : > { %v3963_v9 = vmul.f32 %v11514_v61, %v3867_v22  ;;  %10574 = vmatprep.mubr.msk.bf16.mxu0 %vm2538_vm15, %v3992_v32  ;;  %v3964_v47 = vmul.f32 %v11516_v19, %v3869_v41  ;;  %v17419_v61 = vld [vmem:[#allocation130_spill] sm:$0xff] }
 0x3ad   : > { %5635 = vrot.lane.b32.xlu1 %v17410_v40, %s12026_s27  ;;  %11537 = vtanh.f32 %v17419_v61 }
 0x3ae   : > { %v3993_v29 = vpack.c.bf16 %v3963_v9, %v3962_v8  ;;  %11539 = vtanh.f32 %v14124_v18 }
 0x3af   : > { %v3873_v63 = vpop.permute.xlu0 %3872  ;;  %5641 = vrot.lane.b32.xlu0 %v17395_v49, %s12026_s27  ;;  %v11327_v49 = vld [vmem:[%s16630_s5 + $0x30] sm:$0xff]   ;;  %11541 = vtanh.f32 %v14136_v14 }
 0x3b0   : > { %10575 = vmatmul.mubr.msk.bf16.gmra.mrb[44].mxu0 %vm2538_vm15, %v3993_v29  ;;  %v3966_v35 = vmul.f32 %v11520_v23, %v3873_v63  ;;  %10602 = vmatprep.subr.bf16.mxu0 %v11327_v49  ;;  %11543 = vtanh.f32 %v14117_v13 }
 0x3b1   : > { %v3871_v31 = vpop.permute.xlu1 %3870  ;;  %5639 = vrot.lane.b32.xlu1 %v17413_v21, %s12026_s27  ;;  %10603 = vmatpush3.bf16.msra.mxu0 %v11327_v49  ;;  %11545 = vtanh.f32 %v14132_v37 }
 0x3b2   : > { %v3965_v24 = vmul.f32 %v11518_v44, %v3871_v31  ;;  %10604 = vmatprep.subr.bf16.mxu0 %v11328_v28  ;;  %11547 = vtanh.f32 %v14148_v58 }
 0x3b3   : > { %5645 = vrot.lane.b32.xlu0 %v17414_v48, %s12026_s27  ;;  %11549 = vtanh.f32 %v14160_v30 }
 0x3b4   : > { %v3994_v3 = vpack.c.bf16 %v3965_v24, %v3964_v47  ;;  %11551 = vtanh.f32 %v14144_v26 }
 0x3b5   : > { %v3875_v55 = vpop.permute.xlu1 %3874  ;;  %5643 = vrot.lane.b32.xlu1 %v17397_v4, %s12026_s27  ;;  %v11528_v4 = vpop.eup %11527  ;;  %10605 = vmatpush3.bf16.msra.mxu0 %v11328_v28  ;;  %11553 = vtanh.f32 %v14156_v2 }
 0x3b6   : > { %v3967_v16 = vmul.f32 %v11522_v0, %v3875_v55  ;;  %10578 = vmatprep.mubr.msk.bf16.mxu0 %vm2538_vm15, %v3994_v3  ;;  %v11530_v50 = vpop.eup %11529  ;;  %11555 = vtanh.f32 %v14172_v43 }
 0x3b7   : > { %v3877_v15 = vpop.permute.xlu0 %3876  ;;  %5649 = vrot.lane.b32.xlu0 %v13688_v33, %s12026_s27  ;;  %v11532_v27 = vpop.eup %11531  ;;  %11557 = vtanh.f32 %v14184_v36 }
 0x3b8   : > { %v3995_v53 = vpack.c.bf16 %v3967_v16, %v3966_v35  ;;  %v3968_v52 = vmul.f32 %v11524_v51, %v3877_v15  ;;  %v11534_v8 = vpop.eup %11533  ;;  %11559 = vtanh.f32 %v14168_v62 }
 0x3b9   : > { %5647 = vrot.lane.b32.xlu1 %v17416_v46, %s12026_s27  ;;  %v11536_v34 = vpop.eup %11535  ;;  %11561 = vtanh.f32 %v14180_v11  ;;  %v11329_v11 = vld [vmem:[%s16630_s5 + $0x40] sm:$0xff]  }
 0x3ba   : > { %10579 = vmatmul.mubr.msk.bf16.gmra.mrb[48].mxu0 %vm2538_vm15, %v3995_v53  ;;  %v11538_v44 = vpop.eup %11537  ;;  %10642 = vmatprep.subr.bf16.mxu0 %v11329_v11 }
 0x3bb   : > { %v3879_v25 = vpop.permute.xlu1 %3878  ;;  %v3881_v6 = vpop.permute.xlu0 %3880  ;;  %5653 = vrot.lane.b32.xlu0 %v17417_v12, %s12026_s27 }
 0x3bc   : > { %v3969_v7 = vmul.f32 %v11526_v20, %v3879_v25  ;;  %v3970_v38 = vmul.f32 %v11528_v4, %v3881_v6  ;;  %v11540_v18 = vpop.eup %11539 }
 0x3bd   : > { %5651 = vrot.lane.b32.xlu1 %v17420_v5, %s12026_s27  ;;  %v11542_v56 = vpop.eup %11541 }
 0x3be   : > { %v3996_v39 = vpack.c.bf16 %v3969_v7, %v3968_v52  ;;  %v11544_v23 = vpop.eup %11543 }
 0x3bf   : > { %v3883_v33 = vpop.permute.xlu1 %3882  ;;  %v11546_v0 = vpop.eup %11545 }
 0x3c0   : > { %v3971_v32 = vmul.f32 %v11530_v50, %v3883_v33  ;;  %10582 = vmatprep.mubr.msk.bf16.mxu0 %vm2538_vm15, %v3996_v39  ;;  %v11548_v58 = vpop.eup %11547 }
 0x3c1   : > { %v3885_v22 = vpop.permute.xlu0 %3884  ;;  %5655 = vrot.lane.b32.xlu1 %v17421_v1, %s12026_s27  ;;  %v11550_v60 = vpop.eup %11549  ;;  %s505_s27 = scalar_lea.vmem [#allocation2], %s16582_s23 }
 0x3c2   : > { %v3997_v17 = vpack.c.bf16 %v3971_v32, %v3970_v38  ;;  %v3972_v57 = vmul.f32 %v11532_v27, %v3885_v22  ;;  %v11552_v48 = vpop.eup %11551  ;;  %v17423_v22 = vld [vmem:[#allocation40_spill] sm:$0xff] }
 0x3c3   : > { %v11554_v49 = vpop.eup %11553 }
 0x3c4   : > { %10583 = vmatmul.mubr.msk.bf16.gmra.mrb[52].mxu0 %vm2538_vm15, %v3997_v17  ;;  %v11556_v43 = vpop.eup %11555 }
 0x3c5   : > { %v3889_v41 = vpop.permute.xlu0 %3888  ;;  %v11558_v10 = vpop.eup %11557 }
 0x3c6   : > { %v3974_v31 = vmul.f32 %v11536_v34, %v3889_v41  ;;  %v11560_v6 = vpop.eup %11559  ;;  %v17427_v34 = vld [vmem:[#allocation46_spill] sm:$0xff] }
 0x3c7   : > { %v3887_v9 = vpop.permute.xlu1 %3886  ;;  %v11562_v39 = vpop.eup %11561 }
 0x3c8   : > { %v3973_v29 = vmul.f32 %v11534_v8, %v3887_v9  ;;  %v17425_v9 = vld [vmem:[#allocation43_spill] sm:$0xff] }
 0x3ca   : > { %v3998_v19 = vpack.c.bf16 %v3973_v29, %v3972_v57 }
 0x3cb   : > { %v3891_v45 = vpop.permute.xlu1 %3890  ;;  %v3893_v24 = vpop.permute.xlu0 %3892 }
 0x3cc   : > { %v3975_v54 = vmul.f32 %v11538_v44, %v3891_v45  ;;  %10586 = vmatprep.mubr.msk.bf16.mxu0 %vm2538_vm15, %v3998_v19  ;;  %v3976_v40 = vmul.f32 %v11540_v18, %v3893_v24  ;;  %v17428_v45 = vld [vmem:[#allocation50_spill] sm:$0xff]  ;;  %v17430_v18 = vld [vmem:[#allocation31_spill] sm:$0xff] }
 0x3ce   : > { %v3999_v47 = vpack.c.bf16 %v3975_v54, %v3974_v31  ;;  %v17429_v54 = vld [vmem:[#allocation30_spill] sm:$0xff] }
 0x3cf   : > { %v3897_v13 = vpop.permute.xlu0 %3896 }
 0x3d0   : > { %10587 = vmatmul.mubr.msk.bf16.gmra.mrb[56].mxu0 %vm2538_vm15, %v3999_v47  ;;  %v3978_v37 = vmul.f32 %v11544_v23, %v3897_v13  ;;  %v17432_v23 = vld [vmem:[#allocation33_spill] sm:$0xff] }
 0x3d1   : > { %v3895_v14 = vpop.permute.xlu1 %3894 }
 0x3d2   : > { %v3977_v63 = vmul.f32 %v11542_v56, %v3895_v14 }
 0x3d4   : > { %v4000_v3 = vpack.c.bf16 %v3977_v63, %v3976_v40  ;;  %v17431_v40 = vld [vmem:[#allocation32_spill] sm:$0xff] }
 0x3d5   : > { %v3899_v55 = vpop.permute.xlu1 %3898 }
 0x3d6   : > { %v3979_v59 = vmul.f32 %v11546_v0, %v3899_v55  ;;  %10590 = vmatprep.mubr.msk.bf16.mxu0 %vm2538_vm15, %v4000_v3 }
 0x3d7   : > { %v3901_v16 = vpop.permute.xlu0 %3900 }
 0x3d8   : > { %v4001_v35 = vpack.c.bf16 %v3979_v59, %v3978_v37  ;;  %v3980_v21 = vmul.f32 %v11548_v58, %v3901_v16 }
 0x3da   : > { %10591 = vmatmul.mubr.msk.bf16.gmra.mrb[60].mxu0 %vm2538_vm15, %v4001_v35 }
 0x3db   : > { %v3903_v30 = vpop.permute.xlu1 %3902  ;;  %v3905_v26 = vpop.permute.xlu0 %3904 }
 0x3dc   : > { %v3981_v53 = vmul.f32 %v11550_v60, %v3903_v30  ;;  %v3982_v2 = vmul.f32 %v11552_v48, %v3905_v26 }
 0x3de   : > { %v4002_v15 = vpack.c.bf16 %v3981_v53, %v3980_v21 }
 0x3df   : > { %v3907_v28 = vpop.permute.xlu1 %3906 }
 0x3e0   : > { %v3983_v51 = vmul.f32 %v11554_v49, %v3907_v28  ;;  %10594 = vmatprep.mubr.msk.bf16.mxu0 %vm2538_vm15, %v4002_v15 }
 0x3e1   : > { %v3909_v25 = vpop.permute.xlu0 %3908 }
 0x3e2   : > { %v4003_v20 = vpack.c.bf16 %v3983_v51, %v3982_v2  ;;  %v3984_v52 = vmul.f32 %v11556_v43, %v3909_v25  ;;  %v17439_v51 = vld [vmem:[#allocation55_spill] sm:$0xff] }
 0x3e4   : > { %10595 = vmatmul.mubr.msk.bf16.gmra.mrb[64].mxu0 %vm2538_vm15, %v4003_v20 }
 0x3e5   : > { %v3913_v46 = vpop.permute.xlu0 %3912 }
 0x3e6   : > { %v3986_v50 = vmul.f32 %v11560_v6, %v3913_v46 }
 0x3e7   : > { %v3911_v36 = vpop.permute.xlu1 %3910 }
 0x3e8   : > { %v3985_v7 = vmul.f32 %v11558_v10, %v3911_v36  ;;  %v11330_v10 = vld [vmem:[%s16630_s5 + $0x48] sm:$0xff]  }
 0x3ea   : > { %v4004_v4 = vpack.c.bf16 %v3985_v7, %v3984_v52  ;;  %v17441_v52 = vld [vmem:[#allocation57_spill] sm:$0xff] }
 0x3eb   : > { %v3915_v62 = vpop.permute.xlu1 %3914 }
 0x3ec   : > { %v3987_v12 = vmul.f32 %v11562_v39, %v3915_v62  ;;  %10598 = vmatprep.mubr.msk.bf16.mxu0 %vm2538_vm15, %v4004_v4  ;;  %v17444_v39 = vld [vmem:[#allocation58_spill] sm:$0xff] }
 0x3ee   : > { %v4005_v33 = vpack.c.bf16 %v3987_v12, %v3986_v50 }
 0x3f0   : > { %10599 = vmatmul.mubr.msk.bf16.gmra.mrb[68].mxu0 %vm2538_vm15, %v4005_v33 }
 0x468   : > { %v10568_v38 = vpop.f32.mrb[36].mxu0 }
 0x469   : > { %v14342_v32 = vadd.f32 %v10568_v38, %v14339_v42  ;;  %v4106_v61 = vpop.f32.mrb[37].mxu0  ;;  %v17447_v38 = vld [vmem:[#allocation60_spill] sm:$0xff] }
 0x46a   : > { %v4255_v5 = vadd.f32 %v14339_v42, %v4106_v61  ;;  %v10569_v17 = vpop.f32.mrb[38].mxu0 }
 0x46b   : > { %17422 = vst [vmem:[#allocation129_spill] sm:$0xff] %v14342_v32  ;;  %v4293_v1 = vadd.f32 %v14342_v32, %v17423_v22  ;;  %v14348_v27 = vadd.f32 %v10569_v17, %v14339_v42  ;;  %v4109_v8 = vpop.f32.mrb[39].mxu0  ;;  %v17448_v17 = vld [vmem:[#allocation34_spill] sm:$0xff] }
 0x46c   : > { %v4291_v57 = vadd.f32 %v4255_v5, %v17425_v9  ;;  %v14352_v29 = vadd.f32 %v14339_v42, %v4109_v8  ;;  %v14420_v8 = vld [vmem:[%s16630_s5 + $0x50] sm:$0xff]   ;;  %v17449_v9 = vld [vmem:[#allocation35_spill] sm:$0xff] }
 0x46d   : > { %17424 = vst [vmem:[#allocation5_spill] sm:$0xff] %v14348_v27  ;;  %v4329_v41 = vmul.f32 0.70710677, %v4293_v1  ;;  %v4294_v19 = vadd.f32 %v14348_v27, %v17427_v34  ;;  %v17450_v34 = vld [vmem:[#allocation36_spill] sm:$0xff]  ;;  %v17483_v5 = vld [vmem:[#allocation79_spill] sm:$0xff] }
 0x46e   : > { %17426 = vst [vmem:[#allocation7_spill] sm:$0xff] %v14352_v29  ;;  %v4327_v44 = vmul.f32 0.70710677, %v4291_v57  ;;  %v4292_v31 = vadd.f32 %v14352_v29, %v17428_v45  ;;  %v17504_v27 = vld [vmem:[#allocation91_spill] sm:$0xff] }
 0x46f   : > { %v14359_v47 = vmul.f32 %v17429_v54, %v4329_v41  ;;  %v4330_v24 = vmul.f32 0.70710677, %v4294_v19 }
 0x470   : > { %v14362_v56 = vmul.f32 %v17430_v18, %v4327_v44  ;;  %v4328_v14 = vmul.f32 0.70710677, %v4292_v31  ;;  %v17451_v44 = vld [vmem:[#allocation41_spill] sm:$0xff] }
 0x471   : > { %v14365_v63 = vmul.f32 %v17431_v40, %v4330_v24  ;;  %v4470_v0 = vrot.slane %v14359_v47, 6 }
 0x472   : > { %v4467_v13 = vrot.slane %v14362_v56, 6  ;;  %v14369_v3 = vmul.f32 %v17432_v23, %v4328_v14 }
 0x473   : > { %v4472_v55 = vrot.slane %v14365_v63, 6 }
 0x474   : > { %v4468_v37 = vrot.slane %v14369_v3, 6  ;;  %v4575_v59 = vsel %vm17433_vm12, 0.0, %v4467_v13  ;;  %vm17502_vm12 = vmmov %vm17481_vm0 }
 0x475   : > { %v4473_v35 = vsel %vm17434_vm13, %v4470_v0, %v4472_v55  ;;  %v10572_v16 = vpop.f32.mrb[40].mxu0  ;;  %v5142_v58 = vrot.slane %v4575_v59, 4  ;;  %vm17503_vm13 = vmmov %vm17481_vm0 }
 0x476   : > { %v5147_v60 = vrot.slane %v4473_v35, 4  ;;  %v4471_v30 = vsel %vm17435_vm4, %v4468_v37, %v4470_v0  ;;  %v14378_v21 = vadd.f32 %v10572_v16, %v14339_v42  ;;  %v4122_v53 = vpop.f32.mrb[41].mxu0  ;;  %v4469_v26 = vsel %vm17437_vm11, %v4467_v13, %v4468_v37  ;;  %vm17519_vm4 = vmmov %vm17481_vm0 }
 0x477   : > { %v4580_v48 = vpack.c.bf16 %v4473_v35, %v4471_v30  ;;  %v14382_v15 = vadd.f32 %v14339_v42, %v4122_v53  ;;  %v10573_v49 = vpop.f32.mrb[42].mxu0  ;;  %v4579_v28 = vpack.c.bf16 %v4469_v26, %v4575_v59  ;;  %v5143_v2 = vrot.slane %v4469_v26, 4  ;;  %vm17521_vm11 = vmmov %vm17481_vm0 }
 0x478   : > { %17436 = vst [vmem:[#allocation16_spill] sm:$0xff] %v14378_v21  ;;  %v4297_v20 = vadd.f32 %v14378_v21, %v17439_v51  ;;  %v14387_v25 = vadd.f32 %v10573_v49, %v14339_v42  ;;  %v4125_v43 = vpop.f32.mrb[43].mxu0  ;;  %v5145_v36 = vrot.slane %v4471_v30, 4 }
 0x479   : > { %17438 = vst [vmem:[#allocation9_spill] sm:$0xff] %v14382_v15  ;;  %v4295_v7 = vadd.f32 %v14382_v15, %v17441_v52  ;;  %v14395_v46 = vadd.f32 %v14339_v42, %v4125_v43  ;;  %10606 = vmatprep.mubr.msk.bf16.mxu0 %vm2538_vm15, %v4579_v28  ;;  %v14399_v6 = vsel %vm5141_vm1, %v5142_v58, %v5143_v2  ;;  %v17459_v43 = vld [vmem:[#allocation66_spill] sm:$0xff] }
 0x47a   : > { %17440 = vst [vmem:[#allocation18_spill] sm:$0xff] %v14387_v25  ;;  %17443 = vst [vmem:[#allocation20_spill] sm:$0xff] %v14399_v6  ;;  %v4333_v4 = vmul.f32 0.70710677, %v4297_v20  ;;  %v4298_v62 = vadd.f32 %v14387_v25, %v17444_v39  ;;  %10607 = vmatmul.mubr.msk.bf16.vlgmr.msra.gmra.mrb[72].mxu0 %vm2538_vm15, %v4580_v48  ;;  %v14405_v50 = vsel %vm5141_vm1, %v5143_v2, %v5145_v36  ;;  %v17486_v25 = vld [vmem:[#allocation83_spill] sm:$0xff] }
 0x47b   : > { %17442 = vst [vmem:[#allocation13_spill] sm:$0xff] %v14395_v46  ;;  %17445 = vst [vmem:[#allocation15_spill] sm:$0xff] %v14405_v50  ;;  %v14408_v12 = vsel %vm5141_vm1, %v5145_v36, %v5147_v60  ;;  %v4331_v33 = vmul.f32 0.70710677, %v4295_v7  ;;  %v4296_v61 = vadd.f32 %v14395_v46, %v17447_v38  ;;  %10643 = vmatpush3.bf16.msra.mxu0 %v11329_v11  ;;  %v17462_v7 = vld [vmem:[#allocation69_spill] sm:$0xff]  ;;  %v17530_v50 = vld [vmem:[#allocation103_spill] sm:$0xff] }
 0x47c   : > { %17446 = vst [vmem:[#allocation25_spill] sm:$0xff] %v14408_v12  ;;  %v14415_v22 = vmul.f32 %v17448_v17, %v4333_v4  ;;  %v4334_v1 = vmul.f32 0.70710677, %v4298_v62  ;;  %10644 = vmatprep.subr.bf16.mxu0 %v11330_v10 }
 0x47d   : > { %v14423_v57 = vmul.f32 %v17449_v9, %v4331_v33  ;;  %v4332_v41 = vmul.f32 0.70710677, %v4296_v61  ;;  %v17466_v61 = vld [vmem:[#allocation70_spill] sm:$0xff] }
 0x47e   : > { %v14426_v19 = vmul.f32 %v17450_v34, %v4334_v1  ;;  %v4478_v31 = vrot.slane %v14415_v22, 6 }
 0x47f   : > { %v4474_v11 = vrot.slane %v14423_v57, 6  ;;  %v14430_v45 = vmul.f32 %v17451_v44, %v4332_v41  ;;  %10645 = vmatpush3.bf16.msra.mxu0 %v11330_v10 }
 0x480   : > { %v4480_v24 = vrot.slane %v14426_v19, 6  ;;  %10682 = vmatprep.subr.bf16.mxu0 %v14420_v8 }
 0x481   : > { %v4476_v14 = vrot.slane %v14430_v45, 6  ;;  %v4475_v13 = vsel %vm17452_vm6, %v4472_v55, %v4474_v11  ;;  %vm17522_vm6 = vmmov %vm17481_vm0 }
 0x482   : > { %v5149_v0 = vrot.slane %v4475_v13, 4  ;;  %v14438_v37 = vsel %vm17453_vm3, %v4478_v31, %v4480_v24  ;;  %vm17523_vm3 = vmmov %vm17481_vm0 }
 0x483   : > { %v10576_v59 = vpop.f32.mrb[44].mxu0  ;;  %v4477_v35 = vsel %vm17454_vm14, %v4474_v11, %v4476_v14  ;;  %v4479_v16 = vsel %vm17455_vm2, %v4476_v14, %v4478_v31  ;;  %v5155_v58 = vrot.slane %v14438_v37, 4  ;;  %v17467_v31 = vld [vmem:[#allocation71_spill] sm:$0xff]  ;;  %vm17525_vm14 = vmmov %vm17481_vm0 }
 0x484   : > { %v14444_v30 = vadd.f32 %v10576_v59, %v14339_v42  ;;  %v4138_v53 = vpop.f32.mrb[45].mxu0  ;;  %v4581_v26 = vpack.c.bf16 %v4477_v35, %v4475_v13  ;;  %v14447_v48 = vsel %vm5141_vm1, %v5147_v60, %v5149_v0  ;;  %v5151_v55 = vrot.slane %v4477_v35, 4  ;;  %v17468_v13 = vld [vmem:[#allocation44_spill] sm:$0xff]  ;;  %v17469_v59 = vld [vmem:[#allocation45_spill] sm:$0xff]  ;;  %vm17540_vm2 = vmmov %vm17481_vm0 }
 0x485   : > { %17457 = vst [vmem:[#allocation27_spill] sm:$0xff] %v14447_v48  ;;  %v14450_v49 = vadd.f32 %v14339_v42, %v4138_v53  ;;  %v10577_v28 = vpop.f32.mrb[46].mxu0  ;;  %v4582_v2 = vpack.c.bf16 %v14438_v37, %v4479_v16  ;;  %v5153_v51 = vrot.slane %v4479_v16, 4  ;;  %v17471_v53 = vld [vmem:[#allocation47_spill] sm:$0xff] }
 0x486   : > { %17456 = vst [vmem:[#allocation22_spill] sm:$0xff] %v14444_v30  ;;  %v4301_v10 = vadd.f32 %v14444_v30, %v17459_v43  ;;  %v14458_v36 = vadd.f32 %v10577_v28, %v14339_v42  ;;  %v4141_v52 = vpop.f32.mrb[47].mxu0  ;;  %10610 = vmatprep.mubr.msk.bf16.mxu0 %vm2538_vm15, %v4581_v26  ;;  %v14462_v60 = vsel %vm5141_vm1, %v5149_v0, %v5151_v55  ;;  %v17473_v28 = vld [vmem:[#allocation48_spill] sm:$0xff]  ;;  %v17485_v30 = vld [vmem:[#allocation81_spill] sm:$0xff] }
 0x487   : > { %17458 = vst [vmem:[#allocation23_spill] sm:$0xff] %v14450_v49  ;;  %17461 = vst [vmem:[#allocation29_spill] sm:$0xff] %v14462_v60  ;;  %v4299_v4 = vadd.f32 %v14450_v49, %v17462_v7  ;;  %v14467_v39 = vadd.f32 %v14339_v42, %v4141_v52  ;;  %10611 = vmatmul.mubr.msk.bf16.gmra.mrb[76].mxu0 %vm2538_vm15, %v4582_v2  ;;  %v14471_v62 = vsel %vm5141_vm1, %v5151_v55, %v5153_v51 }
 0x488   : > { %17460 = vst [vmem:[#allocation42_spill] sm:$0xff] %v14458_v36  ;;  %17464 = vst [vmem:[#allocation38_spill] sm:$0xff] %v14471_v62  ;;  %v14474_v33 = vsel %vm5141_vm1, %v5153_v51, %v5155_v58  ;;  %v4337_v38 = vmul.f32 0.70710677, %v4301_v10  ;;  %v4302_v1 = vadd.f32 %v14458_v36, %v17466_v61 }
 0x489   : > { %17463 = vst [vmem:[#allocation53_spill] sm:$0xff] %v14467_v39  ;;  %17465 = vst [vmem:[#allocation68_spill] sm:$0xff] %v14474_v33  ;;  %v4335_v11 = vmul.f32 0.70710677, %v4299_v4  ;;  %v4300_v14 = vadd.f32 %v14467_v39, %v17467_v31  ;;  %v17506_v33 = vld [vmem:[#allocation92_spill] sm:$0xff] }
 0x48a   : > { %v14483_v0 = vmul.f32 %v17468_v13, %v4337_v38  ;;  %v4338_v37 = vmul.f32 0.70710677, %v4302_v1 }
 0x48b   : > { %v14486_v35 = vmul.f32 %v17469_v59, %v4335_v11  ;;  %v4336_v16 = vmul.f32 0.70710677, %v4300_v14  ;;  %v17479_v14 = vld [vmem:[#allocation76_spill] sm:$0xff] }
 0x48c   : > { %v14489_v26 = vmul.f32 %v17471_v53, %v4338_v37  ;;  %v4486_v51 = vrot.slane %v14483_v0, 6 }
 0x48d   : > { %17470 = vst [vmem:[#allocation56_spill] sm:$0xff] %v14486_v35  ;;  %v4482_v55 = vrot.slane %v14486_v35, 6  ;;  %v14493_v2 = vmul.f32 %v17473_v28, %v4336_v16  ;;  %v10580_v10 = vpop.f32.mrb[48].mxu0 }
 0x48e   : > { %17472 = vst [vmem:[#allocation64_spill] sm:$0xff] %v14489_v26  ;;  %v4488_v43 = vrot.slane %v14489_v26, 6  ;;  %v14499_v7 = vadd.f32 %v10580_v10, %v14339_v42  ;;  %v4154_v4 = vpop.f32.mrb[49].mxu0 }
 0x48f   : > { %17474 = vst [vmem:[#allocation78_spill] sm:$0xff] %v14493_v2  ;;  %v4484_v52 = vrot.slane %v14493_v2, 6  ;;  %v4483_v38 = vsel %vm17476_vm8, %v4480_v24, %v4482_v55  ;;  %v14503_v61 = vadd.f32 %v14339_v42, %v4154_v4  ;;  %v10581_v1 = vpop.f32.mrb[50].mxu0  ;;  %vm17542_vm8 = vmmov %vm17481_vm0 }
 0x490   : > { %17475 = vst [vmem:[#allocation116_spill] sm:$0xff] %v14499_v7  ;;  %v5157_v11 = vrot.slane %v4483_v38, 4  ;;  %v4489_v31 = vsel %vm17478_vm5, %v4486_v51, %v4488_v43  ;;  %v4305_v37 = vadd.f32 %v14499_v7, %v17479_v14  ;;  %v14509_v16 = vadd.f32 %v10581_v1, %v14339_v42  ;;  %v4157_v41 = vpop.f32.mrb[51].mxu0  ;;  %vm17544_vm5 = vmmov %vm17481_vm0 }
 0x491   : > { %17477 = vst [vmem:[#allocation122_spill] sm:$0xff] %v14503_v61  ;;  %v4485_v10 = vsel %vm17481_vm0, %v4482_v55, %v4484_v52  ;;  %v4487_v20 = vsel %vm17482_vm10, %v4484_v52, %v4486_v51  ;;  %v4303_v24 = vadd.f32 %v14503_v61, %v17483_v5  ;;  %v14516_v4 = vadd.f32 %v14339_v42, %v4157_v41  ;;  %v17488_v41 = vld [vmem:[#allocation49_spill] sm:$0xff]  ;;  %vm17559_vm10 = vmmov %vm17481_vm0 }
 0x492   : > { %17480 = vst [vmem:[#allocation67_spill] sm:$0xff] %v14509_v16  ;;  %v4583_v39 = vpack.c.bf16 %v4485_v10, %v4483_v38  ;;  %v5159_v36 = vrot.slane %v4485_v10, 4  ;;  %v4341_v49 = vmul.f32 0.70710677, %v4305_v37  ;;  %v4306_v14 = vadd.f32 %v14509_v16, %v17485_v30  ;;  %v17491_v37 = vld [vmem:[#allocation51_spill] sm:$0xff] }
 0x493   : > { %17484 = vst [vmem:[#allocation74_spill] sm:$0xff] %v14516_v4  ;;  %v4584_v7 = vpack.c.bf16 %v4489_v31, %v4487_v20  ;;  %v5161_v1 = vrot.slane %v4487_v20, 4  ;;  %v4339_v46 = vmul.f32 0.70710677, %v4303_v24  ;;  %v4304_v55 = vadd.f32 %v14516_v4, %v17486_v25 }
 0x494   : > { %10614 = vmatprep.mubr.msk.bf16.mxu0 %vm2538_vm15, %v4583_v39  ;;  %v5163_v51 = vrot.slane %v4489_v31, 4  ;;  %v14524_v5 = vsel %vm5141_vm1, %v5155_v58, %v5157_v11  ;;  %v14527_v52 = vmul.f32 %v17488_v41, %v4341_v49  ;;  %v4342_v38 = vmul.f32 0.70710677, %v4306_v14  ;;  %v17495_v49 = vld [vmem:[#allocation59_spill] sm:$0xff] }
 0x495   : > { %17487 = vst [vmem:[#allocation90_spill] sm:$0xff] %v14524_v5  ;;  %10615 = vmatmul.mubr.msk.bf16.gmra.mrb[80].mxu0 %vm2538_vm15, %v4584_v7  ;;  %v14533_v20 = vsel %vm5141_vm1, %v5157_v11, %v5159_v36  ;;  %v14536_v25 = vmul.f32 %v17491_v37, %v4339_v46  ;;  %v4340_v39 = vmul.f32 0.70710677, %v4304_v55  ;;  %v14539_v31 = vsel %vm5141_vm1, %v5159_v36, %v5161_v1  ;;  %v17497_v11 = vld [vmem:[#allocation77_spill] sm:$0xff] }
 0x496   : > { %17489 = vst [vmem:[#allocation62_spill] sm:$0xff] %v14527_v52  ;;  %17490 = vst [vmem:[#allocation61_spill] sm:$0xff] %v14533_v20  ;;  %v14542_v58 = vsel %vm5141_vm1, %v5161_v1, %v5163_v51  ;;  %v14545_v10 = vmul.f32 %v17495_v49, %v4342_v38  ;;  %v4494_v46 = vrot.slane %v14527_v52, 6 }
 0x497   : > { %17492 = vst [vmem:[#allocation87_spill] sm:$0xff] %v14536_v25  ;;  %17493 = vst [vmem:[#allocation101_spill] sm:$0xff] %v14539_v31  ;;  %v4490_v24 = vrot.slane %v14536_v25, 6  ;;  %v14551_v14 = vmul.f32 %v17497_v11, %v4340_v39  ;;  %v10584_v30 = vpop.f32.mrb[52].mxu0 }
 0x498   : > { %17494 = vst [vmem:[#allocation98_spill] sm:$0xff] %v14542_v58  ;;  %17496 = vst [vmem:[#allocation108_spill] sm:$0xff] %v14545_v10  ;;  %v4496_v55 = vrot.slane %v14545_v10, 6  ;;  %v4273_v38 = vadd.f32 %v10584_v30, %v14339_v42  ;;  %v4170_v4 = vpop.f32.mrb[53].mxu0 }
 0x499   : > { %17498 = vst [vmem:[#allocation84_spill] sm:$0xff] %v14551_v14  ;;  %v4492_v36 = vrot.slane %v14551_v14, 6  ;;  %v4491_v1 = vsel %vm17499_vm7, %v4488_v43, %v4490_v24  ;;  %v14562_v61 = vadd.f32 %v14339_v42, %v4170_v4  ;;  %v10585_v39 = vpop.f32.mrb[54].mxu0  ;;  %vm17561_vm7 = vmmov %vm17481_vm0 }
 0x49a   : > { %v5165_v16 = vrot.slane %v4491_v1, 4  ;;  %v14559_v7 = vsel %vm17500_vm9, %v4494_v46, %v4496_v55  ;;  %v4309_v32 = vadd.f32 %v4273_v38, %v17504_v27  ;;  %v14569_v43 = vadd.f32 %v10585_v39, %v14339_v42  ;;  %v4173_v30 = vpop.f32.mrb[55].mxu0  ;;  %v17510_v38 = vld [vmem:[#allocation95_spill] sm:$0xff]  ;;  %vm17563_vm9 = vmmov %vm17481_vm0 }
 0x49b   : > { %17501 = vst [vmem:[#allocation94_spill] sm:$0xff] %v14562_v61  ;;  %v4493_v15 = vsel %vm17502_vm12, %v4490_v24, %v4492_v36  ;;  %v4495_v21 = vsel %vm17503_vm13, %v4492_v36, %v4494_v46  ;;  %v5171_v29 = vrot.slane %v14559_v7, 4  ;;  %v4307_v5 = vadd.f32 %v14562_v61, %v17506_v33  ;;  %v17507_v46 = vld [vmem:[#allocation93_spill] sm:$0xff]  ;;  %vm17564_vm12 = vmmov %vm17481_vm0 }
 0x49c   : > { %17505 = vst [vmem:[#allocation106_spill] sm:$0xff] %v14569_v43  ;;  %v4585_v20 = vpack.c.bf16 %v4493_v15, %v4491_v1  ;;  %v5167_v31 = vrot.slane %v4493_v15, 4  ;;  %v4272_v4 = vadd.f32 %v14339_v42, %v4173_v30  ;;  %v4586_v60 = vpack.c.bf16 %v14559_v7, %v4495_v21  ;;  %vm17578_vm13 = vmmov %vm17481_vm0 }
 0x49d   : > { %v5169_v24 = vrot.slane %v4495_v21, 4  ;;  %v4345_v62 = vmul.f32 0.70710677, %v4309_v32  ;;  %v4310_v36 = vadd.f32 %v14569_v43, %v17507_v46  ;;  %v14579_v27 = vsel %vm5141_vm1, %v5163_v51, %v5165_v16 }
 0x49e   : > { %10618 = vmatprep.mubr.msk.bf16.mxu0 %vm2538_vm15, %v4585_v20  ;;  %17508 = vst [vmem:[#allocation72_spill] sm:$0xff] %v14579_v27  ;;  %v14582_v1 = vsel %vm5141_vm1, %v5165_v16, %v5167_v31  ;;  %v4343_v15 = vmul.f32 0.70710677, %v4307_v5  ;;  %v4308_v33 = vadd.f32 %v4272_v4, %v17510_v38  ;;  %v17514_v5 = vld [vmem:[#allocation80_spill] sm:$0xff] }
 0x49f   : > { %17509 = vst [vmem:[#allocation82_spill] sm:$0xff] %v14582_v1  ;;  %10619 = vmatmul.mubr.msk.bf16.gmra.mrb[84].mxu0 %vm2538_vm15, %v4586_v60  ;;  %v14589_v32 = vsel %vm5141_vm1, %v5167_v31, %v5169_v24  ;;  %v14592_v7 = vmul.f32 %v17430_v18, %v4345_v62  ;;  %v4346_v20 = vmul.f32 0.70710677, %v4310_v36  ;;  %v14597_v16 = vsel %vm5141_vm1, %v5169_v24, %v5171_v29  ;;  %v17517_v62 = vld [vmem:[#allocation89_spill] sm:$0xff] }
 0x4a0   : > { %17511 = vst [vmem:[#allocation114_spill] sm:$0xff] %v14589_v32  ;;  %17513 = vst [vmem:[#allocation96_spill] sm:$0xff] %v14597_v16  ;;  %v14600_v39 = vmul.f32 %v17514_v5, %v4343_v15  ;;  %v4344_v60 = vmul.f32 0.70710677, %v4308_v33 }
 0x4a1   : > { %17512 = vst [vmem:[#allocation124_spill] sm:$0xff] %v14592_v7  ;;  %v4502_v30 = vrot.slane %v14592_v7, 6  ;;  %v14604_v4 = vmul.f32 %v17432_v23, %v4346_v20 }
 0x4a2   : > { %17515 = vst [vmem:[#allocation132_spill] sm:$0xff] %v14600_v39  ;;  %v4498_v31 = vrot.slane %v14600_v39, 6  ;;  %v14608_v46 = vmul.f32 %v17517_v62, %v4344_v60 }
 0x4a3   : > { %17516 = vst [vmem:[#allocation137_spill] sm:$0xff] %v14604_v4  ;;  %v4503_v36 = vrot.slane %v14604_v4, 6  ;;  %v10588_v24 = vpop.f32.mrb[56].mxu0  ;;  %v4576_v43 = vsel %vm17522_vm6, 0.0, %v4502_v30  ;;  %vm17583_vm6 = vmmov %vm17481_vm0 }
 0x4a4   : > { %17518 = vst [vmem:[#allocation85_spill] sm:$0xff] %v14608_v46  ;;  %v4500_v38 = vrot.slane %v14608_v46, 6  ;;  %v4499_v51 = vsel %vm17519_vm4, %v4496_v55, %v4498_v31  ;;  %v14614_v15 = vadd.f32 %v10588_v24, %v14339_v42  ;;  %v4186_v33 = vpop.f32.mrb[57].mxu0  ;;  %v17526_v24 = vld [vmem:[#allocation100_spill] sm:$0xff]  ;;  %vm17580_vm4 = vmmov %vm17481_vm0 }
 0x4a5   : > { %v5173_v21 = vrot.slane %v4499_v51, 4  ;;  %v14617_v20 = vsel %vm17521_vm11, %v4502_v30, %v4503_v36  ;;  %v14622_v61 = vadd.f32 %v14339_v42, %v4186_v33  ;;  %v10589_v23 = vpop.f32.mrb[58].mxu0  ;;  %v17528_v30 = vld [vmem:[#allocation102_spill] sm:$0xff]  ;;  %vm17582_vm11 = vmmov %vm17481_vm0 }
 0x4a6   : > { %17520 = vst [vmem:[#allocation130_spill] sm:$0xff] %v14614_v15  ;;  %v4577_v60 = vsel %vm17523_vm3, %v4500_v38, 0.0  ;;  %v4501_v18 = vsel %vm17525_vm14, %v4498_v31, %v4500_v38  ;;  %v4588_v55 = vpack.c.bf16 %v14617_v20, %v4576_v43  ;;  %v4313_v32 = vadd.f32 %v14614_v15, %v17526_v24  ;;  %v4189_v27 = vpop.f32.mrb[59].mxu0  ;;  %v17532_v15 = vld [vmem:[#allocation104_spill] sm:$0xff]  ;;  %vm17593_vm3 = vmmov %vm17481_vm0 }
 0x4a7   : > { %17524 = vst [vmem:[#allocation135_spill] sm:$0xff] %v14622_v61  ;;  %v5177_v1 = vrot.slane %v4577_v60, 4  ;;  %v14629_v58 = vadd.f32 %v10589_v23, %v14339_v42  ;;  %v4587_v12 = vpack.c.bf16 %v4501_v18, %v4499_v51  ;;  %v4311_v48 = vadd.f32 %v14622_v61, %v17528_v30  ;;  %vm17594_vm14 = vmmov %vm17481_vm0 }
 0x4a8   : > { %v14634_v33 = vadd.f32 %v14339_v42, %v4189_v27  ;;  %v5175_v6 = vrot.slane %v4501_v18, 4  ;;  %v5180_v31 = vrot.slane %v14617_v20, 4  ;;  %v4349_v38 = vmul.f32 0.70710677, %v4313_v32 }
 0x4a9   : > { %17527 = vst [vmem:[#allocation139_spill] sm:$0xff] %v14629_v58  ;;  %v4314_v60 = vadd.f32 %v14629_v58, %v17530_v50  ;;  %10622 = vmatprep.mubr.msk.bf16.mxu0 %vm2538_vm15, %v4587_v12  ;;  %v5179_v24 = vrot.slane %v4576_v43, 4  ;;  %v14641_v23 = vsel %vm5141_vm1, %v5171_v29, %v5173_v21  ;;  %v4347_v51 = vmul.f32 0.70710677, %v4311_v48 }
 0x4aa   : > { %17529 = vst [vmem:[#allocation40_spill] sm:$0xff] %v14634_v33  ;;  %17531 = vst [vmem:[#allocation43_spill] sm:$0xff] %v14641_v23  ;;  %v4312_v30 = vadd.f32 %v14634_v33, %v17532_v15  ;;  %10623 = vmatmul.mubr.msk.bf16.gmra.mrb[88].mxu0 %vm2538_vm15, %v4588_v55  ;;  %v14649_v27 = vsel %vm5141_vm1, %v5173_v21, %v5175_v6  ;;  %v14652_v50 = vmul.f32 %v17449_v9, %v4349_v38 }
 0x4ab   : > { %17533 = vst [vmem:[#allocation46_spill] sm:$0xff] %v14649_v27  ;;  %v4350_v12 = vmul.f32 0.70710677, %v4314_v60  ;;  %v14655_v43 = vsel %vm5141_vm1, %v5175_v6, %v5177_v1  ;;  %v14658_v29 = vsel %vm5141_vm1, %v5179_v24, %v5180_v31  ;;  %v14661_v48 = vmul.f32 %v17429_v54, %v4347_v51  ;;  %v17547_v27 = vld [vmem:[#allocation110_spill] sm:$0xff] }
 0x4ac   : > { %17534 = vst [vmem:[#allocation50_spill] sm:$0xff] %v14652_v50  ;;  %17535 = vst [vmem:[#allocation55_spill] sm:$0xff] %v14655_v43  ;;  %v4348_v32 = vmul.f32 0.70710677, %v4312_v30  ;;  %v4509_v6 = vrot.slane %v14652_v50, 6 }
 0x4ad   : > { %17536 = vst [vmem:[#allocation57_spill] sm:$0xff] %v14658_v29  ;;  %17537 = vst [vmem:[#allocation58_spill] sm:$0xff] %v14661_v48  ;;  %v14666_v21 = vmul.f32 %v17451_v44, %v4350_v12  ;;  %v4505_v20 = vrot.slane %v14661_v48, 6  ;;  %v10592_v60 = vpop.f32.mrb[60].mxu0  ;;  %v17545_v44 = vld [vmem:[#allocation109_spill] sm:$0xff] }
 0x4ae   : > { %v14670_v55 = vmul.f32 %v17431_v40, %v4348_v32  ;;  %v14677_v51 = vadd.f32 %v10592_v60, %v14339_v42  ;;  %v4202_v30 = vpop.f32.mrb[61].mxu0 }
 0x4af   : > { %17538 = vst [vmem:[#allocation60_spill] sm:$0xff] %v14666_v21  ;;  %v4511_v1 = vrot.slane %v14666_v21, 6  ;;  %v4506_v24 = vsel %vm17540_vm2, %v4503_v36, %v4505_v20  ;;  %v14681_v18 = vadd.f32 %v14339_v42, %v4202_v30  ;;  %v10593_v32 = vpop.f32.mrb[62].mxu0  ;;  %vm17595_vm2 = vmmov %vm17481_vm0 }
 0x4b0   : > { %17539 = vst [vmem:[#allocation66_spill] sm:$0xff] %v14670_v55  ;;  %v4507_v38 = vrot.slane %v14670_v55, 6  ;;  %17541 = vst [vmem:[#allocation69_spill] sm:$0xff] %v14677_v51  ;;  %v5182_v12 = vrot.slane %v4506_v24, 4  ;;  %v4317_v9 = vadd.f32 %v14677_v51, %v17545_v44  ;;  %v14688_v36 = vadd.f32 %v10593_v32, %v14339_v42  ;;  %v4205_v60 = vpop.f32.mrb[63].mxu0  ;;  %v17552_v32 = vld [vmem:[#allocation112_spill] sm:$0xff] }
 0x4b1   : > { %v4512_v15 = vsel %vm17542_vm8, %v4509_v6, %v4511_v1  ;;  %17543 = vst [vmem:[#allocation70_spill] sm:$0xff] %v14681_v18  ;;  %v4315_v43 = vadd.f32 %v14681_v18, %v17547_v27  ;;  %v14693_v30 = vadd.f32 %v14339_v42, %v4205_v60  ;;  %vm17596_vm8 = vmmov %vm17481_vm0 }
 0x4b2   : > { %v4508_v33 = vsel %vm17544_vm5, %v4505_v20, %v4507_v38  ;;  %v4510_v58 = vsel %vm17481_vm0, %v4507_v38, %v4509_v6  ;;  %v5188_v61 = vrot.slane %v4512_v15, 4  ;;  %17546 = vst [vmem:[#allocation71_spill] sm:$0xff] %v14688_v36  ;;  %v4353_v23 = vmul.f32 0.70710677, %v4317_v9  ;;  %v17549_v6 = vld [vmem:[#allocation111_spill] sm:$0xff]  ;;  %vm17597_vm5 = vmmov %vm17481_vm0 }
 0x4b3   : > { %v4589_v40 = vpack.c.bf16 %v4508_v33, %v4506_v24  ;;  %v5184_v54 = vrot.slane %v4508_v33, 4  ;;  %17548 = vst [vmem:[#allocation76_spill] sm:$0xff] %v14693_v30  ;;  %v4590_v16 = vpack.c.bf16 %v4512_v15, %v4510_v58  ;;  %v5186_v20 = vrot.slane %v4510_v58, 4 }
 0x4b4   : > { %v4318_v38 = vadd.f32 %v14688_v36, %v17549_v6  ;;  %v14699_v44 = vsel %vm5141_vm1, %v5180_v31, %v5182_v12  ;;  %v4351_v33 = vmul.f32 0.70710677, %v4315_v43  ;;  %v4316_v27 = vadd.f32 %v14693_v30, %v17552_v32 }
 0x4b5   : > { %10626 = vmatprep.mubr.msk.bf16.mxu0 %vm2538_vm15, %v4589_v40  ;;  %17550 = vst [vmem:[#allocation79_spill] sm:$0xff] %v14699_v44  ;;  %v14702_v24 = vsel %vm5141_vm1, %v5182_v12, %v5184_v54  ;;  %v14710_v58 = vsel %vm5141_vm1, %v5184_v54, %v5186_v20  ;;  %v14713_v40 = vmul.f32 %v17469_v59, %v4353_v23 }
 0x4b6   : > { %17551 = vst [vmem:[#allocation81_spill] sm:$0xff] %v14702_v24  ;;  %10627 = vmatmul.mubr.msk.bf16.gmra.mrb[92].mxu0 %vm2538_vm15, %v4590_v16  ;;  %17553 = vst [vmem:[#allocation83_spill] sm:$0xff] %v14710_v58  ;;  %v4354_v31 = vmul.f32 0.70710677, %v4318_v38  ;;  %v14718_v43 = vsel %vm5141_vm1, %v5186_v20, %v5188_v61  ;;  %v14721_v12 = vmul.f32 %v17448_v17, %v4351_v33  ;;  %v4352_v16 = vmul.f32 0.70710677, %v4316_v27 }
 0x4b7   : > { %17554 = vst [vmem:[#allocation91_spill] sm:$0xff] %v14713_v40  ;;  %17555 = vst [vmem:[#allocation92_spill] sm:$0xff] %v14718_v43  ;;  %v4517_v23 = vrot.slane %v14713_v40, 6  ;;  %v10596_v20 = vpop.f32.mrb[64].mxu0  ;;  %v17567_v24 = vld [vmem:[#allocation118_spill] sm:$0xff] }
 0x4b8   : > { %17556 = vst [vmem:[#allocation93_spill] sm:$0xff] %v14721_v12  ;;  %v14724_v60 = vmul.f32 %v17473_v28, %v4354_v31  ;;  %v4513_v54 = vrot.slane %v14721_v12, 6  ;;  %v14728_v6 = vmul.f32 %v17450_v34, %v4352_v16  ;;  %v14735_v33 = vadd.f32 %v10596_v20, %v14339_v42  ;;  %v4218_v27 = vpop.f32.mrb[65].mxu0  ;;  %v17565_v28 = vld [vmem:[#allocation117_spill] sm:$0xff] }
 0x4b9   : > { %v14739_v30 = vadd.f32 %v14339_v42, %v4218_v27  ;;  %v10597_v16 = vpop.f32.mrb[66].mxu0 }
 0x4ba   : > { %17557 = vst [vmem:[#allocation95_spill] sm:$0xff] %v14724_v60  ;;  %17558 = vst [vmem:[#allocation100_spill] sm:$0xff] %v14728_v6  ;;  %v4519_v38 = vrot.slane %v14724_v60, 6  ;;  %v4515_v32 = vrot.slane %v14728_v6, 6  ;;  %v4514_v15 = vsel %vm17559_vm10, %v4511_v1, %v4513_v54  ;;  %v4321_v59 = vadd.f32 %v14735_v33, %v17565_v28  ;;  %v4221_v20 = vpop.f32.mrb[67].mxu0 }
 0x4bb   : > { %17560 = vst [vmem:[#allocation102_spill] sm:$0xff] %v14735_v33  ;;  %v5190_v31 = vrot.slane %v4514_v15, 4  ;;  %17562 = vst [vmem:[#allocation103_spill] sm:$0xff] %v14739_v30  ;;  %v14746_v1 = vadd.f32 %v10597_v16, %v14339_v42  ;;  %v4319_v58 = vadd.f32 %v14739_v30, %v17567_v24  ;;  %v14751_v27 = vadd.f32 %v14339_v42, %v4221_v20  ;;  %v17572_v16 = vld [vmem:[#allocation120_spill] sm:$0xff] }
 0x4bc   : > { %v4520_v9 = vsel %vm17561_vm7, %v4517_v23, %v4519_v38  ;;  %v4516_v36 = vsel %vm17563_vm9, %v4513_v54, %v4515_v32  ;;  %v4518_v18 = vsel %vm17564_vm12, %v4515_v32, %v4517_v23  ;;  %v4357_v44 = vmul.f32 0.70710677, %v4321_v59  ;;  %v17569_v23 = vld [vmem:[#allocation119_spill] sm:$0xff] }
 0x4bd   : > { %v5196_v51 = vrot.slane %v4520_v9, 4  ;;  %17566 = vst [vmem:[#allocation104_spill] sm:$0xff] %v14746_v1  ;;  %v4591_v34 = vpack.c.bf16 %v4516_v36, %v4514_v15  ;;  %v5192_v17 = vrot.slane %v4516_v36, 4  ;;  %17568 = vst [vmem:[#allocation109_spill] sm:$0xff] %v14751_v27  ;;  %v4592_v29 = vpack.c.bf16 %v4520_v9, %v4518_v18 }
 0x4be   : > { %v5194_v54 = vrot.slane %v4518_v18, 4  ;;  %v4322_v32 = vadd.f32 %v14746_v1, %v17569_v23  ;;  %v14757_v28 = vsel %vm5141_vm1, %v5188_v61, %v5190_v31  ;;  %v4355_v36 = vmul.f32 0.70710677, %v4319_v58 }
 0x4bf   : > { %10630 = vmatprep.mubr.msk.bf16.mxu0 %vm2538_vm15, %v4591_v34  ;;  %17570 = vst [vmem:[#allocation110_spill] sm:$0xff] %v14757_v28  ;;  %v14760_v15 = vsel %vm5141_vm1, %v5190_v31, %v5192_v17  ;;  %v4320_v24 = vadd.f32 %v14751_v27, %v17572_v16  ;;  %v14771_v34 = vmul.f32 %v17491_v37, %v4357_v44 }
 0x4c0   : > { %17571 = vst [vmem:[#allocation111_spill] sm:$0xff] %v14760_v15  ;;  %10631 = vmatmul.mubr.msk.bf16.gmra.mrb[96].mxu0 %vm2538_vm15, %v4592_v29  ;;  %v14768_v18 = vsel %vm5141_vm1, %v5192_v17, %v5194_v54  ;;  %v4358_v61 = vmul.f32 0.70710677, %v4322_v32  ;;  %v14776_v58 = vsel %vm5141_vm1, %v5194_v54, %v5196_v51  ;;  %v14779_v31 = vmul.f32 %v17468_v13, %v4355_v36  ;;  %v17585_v15 = vld [vmem:[#allocation126_spill] sm:$0xff] }
 0x4c1   : > { %17573 = vst [vmem:[#allocation112_spill] sm:$0xff] %v14768_v18  ;;  %17574 = vst [vmem:[#allocation117_spill] sm:$0xff] %v14771_v34  ;;  %v4356_v29 = vmul.f32 0.70710677, %v4320_v24  ;;  %v4525_v44 = vrot.slane %v14771_v34, 6 }
 0x4c2   : > { %17575 = vst [vmem:[#allocation118_spill] sm:$0xff] %v14779_v31  ;;  %v14782_v20 = vmul.f32 %v17497_v11, %v4358_v61  ;;  %v4521_v17 = vrot.slane %v14779_v31, 6  ;;  %v17584_v11 = vld [vmem:[#allocation125_spill] sm:$0xff] }
 0x4c3   : > { %v14786_v23 = vmul.f32 %v17471_v53, %v4356_v29  ;;  %v10600_v54 = vpop.f32.mrb[68].mxu0 }
 0x4c4   : > { %17576 = vst [vmem:[#allocation119_spill] sm:$0xff] %v14782_v20  ;;  %v4527_v32 = vrot.slane %v14782_v20, 6  ;;  %v4522_v9 = vsel %vm17578_vm13, %v4519_v38, %v4521_v17  ;;  %v14793_v36 = vadd.f32 %v10600_v54, %v14339_v42  ;;  %v4234_v24 = vpop.f32.mrb[69].mxu0  ;;  %v17587_v20 = vld [vmem:[#allocation127_spill] sm:$0xff] }
 0x4c5   : > { %17577 = vst [vmem:[#allocation120_spill] sm:$0xff] %v14786_v23  ;;  %v4523_v16 = vrot.slane %v14786_v23, 6  ;;  %v5198_v61 = vrot.slane %v4522_v9, 4  ;;  %v14797_v27 = vadd.f32 %v14339_v42, %v4234_v24  ;;  %v10601_v29 = vpop.f32.mrb[70].mxu0 }
 0x4c6   : > { %17579 = vst [vmem:[#allocation141_spill] sm:$0xff] %v14793_v36  ;;  %v4528_v59 = vsel %vm17580_vm4, %v4525_v44, %v4527_v32  ;;  %v4325_v37 = vadd.f32 %v14793_v36, %v17584_v11  ;;  %v4290_v38 = vadd.f32 %v10601_v29, %v14339_v42  ;;  %v4237_v54 = vpop.f32.mrb[71].mxu0  ;;  %v4840_v36 = vpack.c.bf16 %v14369_v3, %v14362_v56 }
 0x4c7   : > { %17581 = vst [vmem:[#allocation142_spill] sm:$0xff] %v14797_v27  ;;  %v4524_v1 = vsel %vm17582_vm11, %v4521_v17, %v4523_v16  ;;  %v4526_v30 = vsel %vm17583_vm6, %v4523_v16, %v4525_v44  ;;  %v5204_v33 = vrot.slane %v4528_v59, 4  ;;  %v4323_v18 = vadd.f32 %v14797_v27, %v17585_v15 }
 0x4c8   : > { %v4593_v53 = vpack.c.bf16 %v4524_v1, %v4522_v9  ;;  %v5200_v13 = vrot.slane %v4524_v1, 4  ;;  %v14807_v24 = vadd.f32 %v14339_v42, %v4237_v54  ;;  %v4594_v43 = vpack.c.bf16 %v4528_v59, %v4526_v30  ;;  %v17588_v9 = vld [vmem:[#allocation128_spill] sm:$0xff] }
 0x4c9   : > { %v5202_v28 = vrot.slane %v4526_v30, 4  ;;  %v4361_v17 = vmul.f32 0.70710677, %v4325_v37  ;;  %v4326_v44 = vadd.f32 %v4290_v38, %v17587_v20  ;;  %v14812_v11 = vsel %vm5141_vm1, %v5196_v51, %v5198_v61 }
 0x4ca   : > { %17586 = vst [vmem:[#allocation125_spill] sm:$0xff] %v14807_v24  ;;  %10634 = vmatprep.mubr.msk.bf16.mxu0 %vm2538_vm15, %v4593_v53  ;;  %v14815_v16 = vsel %vm5141_vm1, %v5198_v61, %v5200_v13  ;;  %v4359_v1 = vmul.f32 0.70710677, %v4323_v18  ;;  %v4324_v15 = vadd.f32 %v14807_v24, %v17588_v9 }
 0x4cb   : > { %10635 = vmatmul.mubr.msk.bf16.gmra.mrb[100].mxu0 %vm2538_vm15, %v4594_v43  ;;  %v14823_v37 = vsel %vm5141_vm1, %v5200_v13, %v5202_v28  ;;  %v14826_v53 = vmul.f32 %v17514_v5, %v4361_v17  ;;  %v4362_v51 = vmul.f32 0.70710677, %v4326_v44  ;;  %v14831_v59 = vsel %vm5141_vm1, %v5202_v28, %v5204_v33 }
 0x4cc   : > { %v14834_v18 = vmul.f32 %v17488_v41, %v4359_v1  ;;  %v4360_v43 = vmul.f32 0.70710677, %v4324_v15 }
 0x4cd   : > { %17589 = vst [vmem:[#allocation126_spill] sm:$0xff] %v14826_v53  ;;  %v14837_v20 = vmul.f32 %v17517_v62, %v4362_v51  ;;  %v4533_v29 = vrot.slane %v14826_v53, 6 }
 0x4ce   : > { %17590 = vst [vmem:[#allocation127_spill] sm:$0xff] %v14834_v18  ;;  %v4529_v13 = vrot.slane %v14834_v18, 6  ;;  %v14841_v61 = vmul.f32 %v17495_v49, %v4360_v43 }
 0x4cf   : > { %17591 = vst [vmem:[#allocation128_spill] sm:$0xff] %v14837_v20  ;;  %v4535_v38 = vrot.slane %v14837_v20, 6 }
 0x4d0   : > { %17592 = vst [vmem:[#allocation143_spill] sm:$0xff] %v14841_v61  ;;  %v4531_v54 = vrot.slane %v14841_v61, 6  ;;  %v4530_v28 = vsel %vm17593_vm3, %v4527_v32, %v4529_v13 }
 0x4d1   : > { %v4578_v17 = vsel %vm17594_vm14, %v4535_v38, 0.0  ;;  %v5206_v44 = vrot.slane %v4530_v28, 4  ;;  %v4536_v1 = vsel %vm17595_vm2, %v4533_v29, %v4535_v38 }
 0x4d2   : > { %v5214_v9 = vrot.slane %v4578_v17, 4  ;;  %v4532_v15 = vsel %vm17596_vm8, %v4529_v13, %v4531_v54  ;;  %v4534_v51 = vsel %vm17597_vm5, %v4531_v54, %v4533_v29  ;;  %v5212_v43 = vrot.slane %v4536_v1, 4 }
 0x4d3   : > { %v4595_v30 = vpack.c.bf16 %v4532_v15, %v4530_v28  ;;  %v5208_v42 = vrot.slane %v4532_v15, 4  ;;  %v4596_v24 = vpack.c.bf16 %v4536_v1, %v4534_v51  ;;  %v5210_v27 = vrot.slane %v4534_v51, 4 }
 0x4d4   : > { %v14854_v32 = vsel %vm5141_vm1, %v5204_v33, %v5206_v44  ;;  %v14857_v62 = vsel %vm5141_vm1, %v5212_v43, %v5214_v9  ;;  %v4841_v17 = vpack.c.bf16 %v14365_v63, %v14359_v47  ;;  %v4850_v1 = vpack.c.bf16 %v14670_v55, %v14661_v48 }
 0x4d5   : > { %10638 = vmatprep.mubr.msk.bf16.mxu0 %vm2538_vm15, %v4595_v30  ;;  %v5267_v13 = vpack.c.bf16 %v14854_v32, %v14831_v59  ;;  %v5209_v29 = vsel %vm5141_vm1, %v5206_v44, %v5208_v42  ;;  %v5211_v38 = vsel %vm5141_vm1, %v5208_v42, %v5210_v27  ;;  %v5213_v54 = vsel %vm5141_vm1, %v5210_v27, %v5212_v43  ;;  %v11332_v30 = vld [vmem:[%s16630_s5 + $0x58] sm:$0xff]   ;;  %v17598_v32 = vld [vmem:[#allocation119_spill] sm:$0xff] }
 0x4d6   : > { %10639 = vmatmul.mubr.msk.bf16.gmra.mrb[104].mxu0 %vm2538_vm15, %v4596_v24  ;;  %v5268_v28 = vpack.c.bf16 %v5211_v38, %v5209_v29  ;;  %v5269_v33 = vpack.c.bf16 %v14857_v62, %v5213_v54  ;;  %v4842_v59 = vpack.c.bf16 %v14430_v45, %v14423_v57  ;;  %v4843_v62 = vpack.c.bf16 %v14426_v19, %v14415_v22 }
 0x4d7   : > { %10646 = vmatprep.mubr.msk.bf16.mxu0 %vm2538_vm15, %v4840_v36  ;;  %v4844_v27 = vpack.c.bf16 %v14493_v2, %v14486_v35  ;;  %v4845_v36 = vpack.c.bf16 %v14489_v26, %v14483_v0  ;;  %v4847_v24 = vpack.c.bf16 %v14545_v10, %v14527_v52  ;;  %v4848_v42 = vpack.c.bf16 %v14608_v46, %v14600_v39 }
 0x4d8   : > { %v4849_v44 = vpack.c.bf16 %v14604_v4, %v14592_v7  ;;  %v4851_v9 = vpack.c.bf16 %v14666_v21, %v14652_v50  ;;  %v4852_v15 = vpack.c.bf16 %v14728_v6, %v14721_v12  ;;  %v4853_v51 = vpack.c.bf16 %v14724_v60, %v14713_v40 }
 0x4d9   : > { %v4854_v43 = vpack.c.bf16 %v14786_v23, %v14779_v31  ;;  %v4855_v29 = vpack.c.bf16 %v17598_v32, %v14771_v34  ;;  %v4856_v38 = vpack.c.bf16 %v14841_v61, %v14834_v18  ;;  %v4857_v54 = vpack.c.bf16 %v14837_v20, %v14826_v53 }
 0x4de   : > { %10647 = vmatmul.mubr.msk.bf16.vlgmr.msra.gmra.mrb[72].mxu0 %vm2538_vm15, %v4841_v17  ;;  %v17599_v17 = vld [vmem:[#allocation15_spill] sm:$0xff] }
 0x4df   : > { %10683 = vmatpush3.bf16.msra.mxu0 %v14420_v8  ;;  %10650 = vmatprep.mubr.msk.bf16.mxu0 %vm2538_vm15, %v4842_v59  ;;  %v4846_v8 = vpack.c.bf16 %v14551_v14, %v14536_v25 }
 0x4e0   : > { %10684 = vmatprep.subr.bf16.mxu0 %v11332_v30 }
 0x4e3   : > { %10685 = vmatpush3.bf16.msra.mxu0 %v11332_v30  ;;  %v17600_v30 = vld [vmem:[#allocation20_spill] sm:$0xff] }
 0x4e4   : > { %v17601_v59 = vpack.c.bf16 %v17599_v17, %v17600_v30  ;;  %v17617_v17 = vld [vmem:[#allocation114_spill] sm:$0xff] }
 0x4e5   : > { %v17618_v30 = vld [vmem:[#allocation82_spill] sm:$0xff] }
 0x4e6   : > { %10651 = vmatmul.mubr.msk.bf16.gmra.mrb[76].mxu0 %vm2538_vm15, %v4843_v62  ;;  %v17602_v62 = vld [vmem:[#allocation27_spill] sm:$0xff] }
 0x4e7   : > { %10654 = vmatprep.mubr.msk.bf16.mxu0 %vm2538_vm15, %v4844_v27  ;;  %v17603_v27 = vld [vmem:[#allocation25_spill] sm:$0xff] }
 0x4ee   : > { %10655 = vmatmul.mubr.msk.bf16.gmra.mrb[80].mxu0 %vm2538_vm15, %v4845_v36  ;;  %v17604_v36 = vpack.c.bf16 %v17602_v62, %v17603_v27  ;;  %v17620_v62 = vld [vmem:[#allocation43_spill] sm:$0xff]  ;;  %v17621_v27 = vld [vmem:[#allocation96_spill] sm:$0xff] }
 0x4ef   : > { %10658 = vmatprep.mubr.msk.bf16.mxu0 %vm2538_vm15, %v4846_v8  ;;  %v17605_v8 = vld [vmem:[#allocation38_spill] sm:$0xff] }
 0x4f6   : > { %10659 = vmatmul.mubr.msk.bf16.gmra.mrb[84].mxu0 %vm2538_vm15, %v4847_v24  ;;  %v17606_v24 = vld [vmem:[#allocation29_spill] sm:$0xff] }
 0x4f7   : > { %10662 = vmatprep.mubr.msk.bf16.mxu0 %vm2538_vm15, %v4848_v42  ;;  %v17607_v42 = vpack.c.bf16 %v17605_v8, %v17606_v24  ;;  %v17623_v8 = vld [vmem:[#allocation55_spill] sm:$0xff]  ;;  %v17624_v24 = vld [vmem:[#allocation46_spill] sm:$0xff] }
 0x4fe   : > { %10663 = vmatmul.mubr.msk.bf16.gmra.mrb[88].mxu0 %vm2538_vm15, %v4849_v44  ;;  %v17608_v44 = vld [vmem:[#allocation90_spill] sm:$0xff] }
 0x4ff   : > { %10666 = vmatprep.mubr.msk.bf16.mxu0 %vm2538_vm15, %v4850_v1  ;;  %v17609_v1 = vld [vmem:[#allocation68_spill] sm:$0xff] }
 0x506   : > { %10667 = vmatmul.mubr.msk.bf16.gmra.mrb[92].mxu0 %vm2538_vm15, %v4851_v9  ;;  %v17610_v9 = vpack.c.bf16 %v17608_v44, %v17609_v1  ;;  %v17626_v44 = vld [vmem:[#allocation79_spill] sm:$0xff]  ;;  %v17627_v1 = vld [vmem:[#allocation57_spill] sm:$0xff] }
 0x507   : > { %10670 = vmatprep.mubr.msk.bf16.mxu0 %vm2538_vm15, %v4852_v15  ;;  %v17611_v15 = vld [vmem:[#allocation101_spill] sm:$0xff] }
 0x50e   : > { %10671 = vmatmul.mubr.msk.bf16.gmra.mrb[96].mxu0 %vm2538_vm15, %v4853_v51  ;;  %v17612_v51 = vld [vmem:[#allocation61_spill] sm:$0xff] }
 0x50f   : > { %10674 = vmatprep.mubr.msk.bf16.mxu0 %vm2538_vm15, %v4854_v43  ;;  %v17613_v43 = vpack.c.bf16 %v17611_v15, %v17612_v51  ;;  %v17629_v15 = vld [vmem:[#allocation83_spill] sm:$0xff]  ;;  %v17630_v51 = vld [vmem:[#allocation81_spill] sm:$0xff] }
 0x516   : > { %10675 = vmatmul.mubr.msk.bf16.gmra.mrb[100].mxu0 %vm2538_vm15, %v4855_v29  ;;  %v17614_v29 = vld [vmem:[#allocation72_spill] sm:$0xff] }
 0x517   : > { %10678 = vmatprep.mubr.msk.bf16.mxu0 %vm2538_vm15, %v4856_v38  ;;  %v17615_v38 = vld [vmem:[#allocation98_spill] sm:$0xff] }
 0x51e   : > { %10679 = vmatmul.mubr.msk.bf16.gmra.mrb[104].mxu0 %vm2538_vm15, %v4857_v54  ;;  %v17616_v54 = vpack.c.bf16 %v17614_v29, %v17615_v38  ;;  %v17632_v29 = vld [vmem:[#allocation110_spill] sm:$0xff]  ;;  %v17633_v38 = vld [vmem:[#allocation92_spill] sm:$0xff] }
 0x51f   : > { %10686 = vmatprep.mubr.msk.bf16.mxu0 %vm2538_vm15, %v17601_v59  ;;  %v17619_v59 = vpack.c.bf16 %v17617_v17, %v17618_v30  ;;  %v17635_v17 = vld [vmem:[#allocation112_spill] sm:$0xff]  ;;  %v17636_v30 = vld [vmem:[#allocation111_spill] sm:$0xff] }
 0x526   : > { %10687 = vmatmul.mubr.msk.bf16.vlgmr.msra.gmra.mrb[72].mxu0 %vm2538_vm15, %v17604_v36  ;;  %v17622_v36 = vpack.c.bf16 %v17620_v62, %v17621_v27  ;;  %v17638_v62 = vpack.c.bf16 %v14812_v11, %v14776_v58  ;;  %v17639_v27 = vpack.c.bf16 %v14823_v37, %v14815_v16  ;;  %v11333_v58 = vld [vmem:[%s16633_s8 + $0x10] sm:$0xff]   ;;  %v14992_v16 = vld [vmem:[%s16631_s6 + $0x1] ss:$0 sm:$0xff] }
 0x527   : > { %10690 = vmatprep.mubr.msk.bf16.mxu0 %vm2538_vm15, %v17607_v42  ;;  %v17625_v42 = vpack.c.bf16 %v17623_v8, %v17624_v24  ;;  %v5588_v24 = vpop.permute.xlu1 %5587  ;;  %10722 = vmatprep.subr.bf16.mxu1 %v11333_v58 }
 0x528   : > { %10723 = vmatpush3.bf16.msra.mxu1 %v11333_v58 }
 0x52e   : > { %10691 = vmatmul.mubr.msk.bf16.gmra.mrb[76].mxu0 %vm2538_vm15, %v17610_v9  ;;  %v17628_v9 = vpack.c.bf16 %v17626_v44, %v17627_v1 }
 0x52f   : > { %10694 = vmatprep.mubr.msk.bf16.mxu0 %vm2538_vm15, %v17613_v43  ;;  %v17631_v43 = vpack.c.bf16 %v17629_v15, %v17630_v51 }
 0x536   : > { %10695 = vmatmul.mubr.msk.bf16.gmra.mrb[80].mxu0 %vm2538_vm15, %v17616_v54  ;;  %v17634_v54 = vpack.c.bf16 %v17632_v29, %v17633_v38 }
 0x537   : > { %10698 = vmatprep.mubr.msk.bf16.mxu0 %vm2538_vm15, %v17619_v59  ;;  %v17637_v59 = vpack.c.bf16 %v17635_v17, %v17636_v30 }
 0x53e   : > { %10699 = vmatmul.mubr.msk.bf16.gmra.mrb[84].mxu0 %vm2538_vm15, %v17622_v36  ;;  %v5586_v36 = vpop.permute.xlu0 %5585 }
 0x53f   : > { %10702 = vmatprep.mubr.msk.bf16.mxu0 %vm2538_vm15, %v17625_v42  ;;  %v5592_v42 = vpop.permute.xlu1 %5591 }
 0x542   : > { %v5590_v8 = vpop.permute.xlu0 %5589 }
 0x546   : > { %10703 = vmatmul.mubr.msk.bf16.gmra.mrb[88].mxu0 %vm2538_vm15, %v17628_v9  ;;  %v5594_v11 = vpop.permute.xlu0 %5593  ;;  %v5596_v9 = vpop.permute.xlu1 %5595 }
 0x547   : > { %10706 = vmatprep.mubr.msk.bf16.mxu0 %vm2538_vm15, %v17631_v43 }
 0x54a   : > { %v5600_v58 = vpop.permute.xlu1 %5599 }
 0x54e   : > { %10707 = vmatmul.mubr.msk.bf16.gmra.mrb[92].mxu0 %vm2538_vm15, %v17634_v54 }
 0x54f   : > { %10710 = vmatprep.mubr.msk.bf16.mxu0 %vm2538_vm15, %v17637_v59 }
 0x556   : > { %10711 = vmatmul.mubr.msk.bf16.gmra.mrb[96].mxu0 %vm2538_vm15, %v17638_v62 }
 0x557   : > { %10714 = vmatprep.mubr.msk.bf16.mxu0 %vm2538_vm15, %v17639_v27  ;;  %v11334_v27 = vld [vmem:[%s16633_s8 + $0x18] sm:$0xff]  }
 0x558   : > { %10724 = vmatprep.subr.bf16.mxu1 %v11334_v27 }
 0x559   : > { %10725 = vmatpush3.bf16.msra.mxu1 %v11334_v27  ;;  %v5604_v27 = vpop.permute.xlu1 %5603 }
 0x55e   : > { %10715 = vmatmul.mubr.msk.bf16.gmra.mrb[100].mxu0 %vm2538_vm15, %v5267_v13 }
 0x55f   : > { %10718 = vmatprep.mubr.msk.bf16.mxu0 %vm2538_vm15, %v5268_v28 }
 0x566   : > { %10719 = vmatmul.mubr.msk.bf16.gmra.mrb[104].mxu0 %vm2538_vm15, %v5269_v33  ;;  %v5598_v33 = vpop.permute.xlu0 %5597 }
 0x5f9   : > { %v10688_v37 = vpop.f32.mrb[72].mxu0 }
 0x5fa   : > { %v5695_v13 = vadd.f32 %v10688_v37, %v5590_v8  ;;  %v5370_v28 = vpop.f32.mrb[73].mxu0 }
 0x5fb   : > { %v5693_v44 = vadd.f32 %v5586_v36, %v5370_v28  ;;  %v10689_v1 = vpop.f32.mrb[74].mxu0  ;;  %v5602_v36 = vpop.permute.xlu0 %5601 }
 0x5fc   : > { %v14995_v15 = vadd.f32 %v14992_v16, %v5695_v13  ;;  %v5696_v51 = vadd.f32 %v10689_v1, %v5592_v42  ;;  %v5373_v43 = vpop.f32.mrb[75].mxu0 }
 0x5fd   : > { %v14998_v29 = vadd.f32 %v14992_v16, %v5693_v44  ;;  %v5694_v38 = vadd.f32 %v5588_v24, %v5373_v43 }
 0x5fe   : > { %v9780_v54 = vmul.f32 -1.442695, %v14995_v15  ;;  %v15002_v17 = vadd.f32 %v14992_v16, %v5696_v51 }
 0x5ff   : > { %v9778_v30 = vmul.f32 -1.442695, %v14998_v29  ;;  %v15006_v59 = vadd.f32 %v14992_v16, %v5694_v38 }
 0x600   : > { %11563 = vpow2.f32 %v9780_v54  ;;  %v9781_v62 = vmul.f32 -1.442695, %v15002_v17 }
 0x601   : > { %11565 = vpow2.f32 %v9778_v30  ;;  %v9779_v8 = vmul.f32 -1.442695, %v15006_v59  ;;  %v10692_v24 = vpop.f32.mrb[76].mxu0  ;;  %v5606_v30 = vpop.permute.xlu0 %5605 }
 0x602   : > { %v5699_v42 = vadd.f32 %v10692_v24, %v5598_v33  ;;  %v5386_v37 = vpop.f32.mrb[77].mxu0  ;;  %11567 = vpow2.f32 %v9781_v62 }
 0x603   : > { %v5697_v13 = vadd.f32 %v5594_v11, %v5386_v37  ;;  %v10693_v28 = vpop.f32.mrb[78].mxu0  ;;  %11569 = vpow2.f32 %v9779_v8 }
 0x604   : > { %v15014_v44 = vadd.f32 %v14992_v16, %v5699_v42  ;;  %v5700_v1 = vadd.f32 %v10693_v28, %v5600_v58  ;;  %v5389_v51 = vpop.f32.mrb[79].mxu0 }
 0x605   : > { %v15017_v43 = vadd.f32 %v14992_v16, %v5697_v13  ;;  %v5698_v38 = vadd.f32 %v5596_v9, %v5389_v51  ;;  %v5610_v18 = vpop.permute.xlu0 %5609 }
 0x606   : > { %v9784_v54 = vmul.f32 -1.442695, %v15014_v44  ;;  %v15021_v33 = vadd.f32 %v14992_v16, %v5700_v1 }
 0x607   : > { %v9782_v11 = vmul.f32 -1.442695, %v15017_v43  ;;  %v15025_v62 = vadd.f32 %v14992_v16, %v5698_v38 }
 0x608   : > { %11571 = vpow2.f32 %v9784_v54  ;;  %v9785_v8 = vmul.f32 -1.442695, %v15021_v33 }
 0x609   : > { %11573 = vpow2.f32 %v9782_v11  ;;  %v10696_v24 = vpop.f32.mrb[80].mxu0  ;;  %v9783_v13 = vmul.f32 -1.442695, %v15025_v62  ;;  %v5608_v11 = vpop.permute.xlu1 %5607 }
 0x60a   : > { %v11564_v58 = vpop.eup %11563  ;;  %v5703_v42 = vadd.f32 %v10696_v24, %v5606_v30  ;;  %v5402_v9 = vpop.f32.mrb[81].mxu0  ;;  %11575 = vpow2.f32 %v9785_v8 }
 0x60b   : > { %v11566_v37 = vpop.eup %11565  ;;  %v5701_v28 = vadd.f32 %v5602_v36, %v5402_v9  ;;  %v10697_v1 = vpop.f32.mrb[82].mxu0  ;;  %v5917_v38 = vadd.f32 1.0, %v11564_v58 }
 0x60c   : > { %v5915_v51 = vadd.f32 1.0, %v11566_v37  ;;  %v5405_v61 = vpop.f32.mrb[83].mxu0  ;;  %v11568_v20 = vpop.eup %11567  ;;  %v15030_v54 = vadd.f32 %v14992_v16, %v5703_v42  ;;  %v5704_v24 = vadd.f32 %v10697_v1, %v5608_v11 }
 0x60d   : > { %v11570_v53 = vpop.eup %11569  ;;  %v15033_v30 = vadd.f32 %v14992_v16, %v5701_v28  ;;  %v5918_v23 = vadd.f32 1.0, %v11568_v20  ;;  %v5702_v37 = vadd.f32 %v5604_v27, %v5405_v61  ;;  %v5614_v31 = vpop.permute.xlu0 %5613 }
 0x60e   : > { %11577 = vrcp.f32 %v5915_v51  ;;  %v5916_v36 = vadd.f32 1.0, %v11570_v53  ;;  %v9788_v9 = vmul.f32 -1.442695, %v15030_v54  ;;  %v5612_v34 = vpop.permute.xlu1 %5611 }
 0x60f   : > { %11579 = vpow2.f32 %v9783_v13  ;;  %v9786_v51 = vmul.f32 -1.442695, %v15033_v30  ;;  %v15038_v13 = vadd.f32 %v14992_v16, %v5704_v24  ;;  %v15041_v1 = vadd.f32 %v14992_v16, %v5702_v37 }
 0x610   : > { %11581 = vrcp.f32 %v5917_v38 }
 0x611   : > { %v10700_v32 = vpop.f32.mrb[84].mxu0  ;;  %11583 = vrcp.f32 %v5916_v36  ;;  %v9789_v36 = vmul.f32 -1.442695, %v15038_v13  ;;  %v5618_v60 = vpop.permute.xlu0 %5617  ;;  %v9787_v12 = vmul.f32 -1.442695, %v15041_v1 }
 0x612   : > { %v11572_v58 = vpop.eup %11571  ;;  %v5418_v8 = vpop.f32.mrb[85].mxu0  ;;  %11585 = vrcp.f32 %v5918_v23  ;;  %v5707_v61 = vadd.f32 %v10700_v32, %v5614_v31 }
 0x613   : > { %v11574_v42 = vpop.eup %11573  ;;  %v10701_v28 = vpop.f32.mrb[86].mxu0  ;;  %11587 = vpow2.f32 %v9788_v9  ;;  %v5921_v27 = vadd.f32 1.0, %v11572_v58  ;;  %v5705_v38 = vadd.f32 %v5610_v18, %v5418_v8 }
 0x614   : > { %v5919_v20 = vadd.f32 1.0, %v11574_v42  ;;  %v5421_v53 = vpop.f32.mrb[87].mxu0  ;;  %v11576_v11 = vpop.eup %11575  ;;  %v15046_v23 = vadd.f32 %v14992_v16, %v5707_v61 }
 0x615   : > { %v5616_v37 = vpop.permute.xlu1 %5615  ;;  %v15050_v18 = vadd.f32 %v14992_v16, %v5705_v38  ;;  %v5706_v40 = vadd.f32 %v5612_v34, %v5421_v53  ;;  %v5622_v55 = vpop.permute.xlu0 %5621 }
 0x616   : > { %11589 = vrcp.f32 %v5919_v20  ;;  %v5708_v8 = vadd.f32 %v10701_v28, %v5616_v37  ;;  %v5922_v20 = vadd.f32 1.0, %v11576_v11 }
 0x617   : > { %11591 = vpow2.f32 %v9786_v51  ;;  %v9790_v38 = vmul.f32 -1.442695, %v15050_v18  ;;  %v15060_v34 = vadd.f32 %v14992_v16, %v5706_v40 }
 0x618   : > { %v11578_v6 = vpop.eup %11577  ;;  %11593 = vrcp.f32 %v5921_v27  ;;  %v15057_v28 = vadd.f32 %v14992_v16, %v5708_v8 }
 0x619   : > { %v11580_v24 = vpop.eup %11579  ;;  %6059 = vrot.lane.b32.xlu0 %v11578_v6, %s12025_s24  ;;  %v10704_v9 = vpop.f32.mrb[88].mxu0  ;;  %11595 = vpow2.f32 %v9789_v36  ;;  %v9792_v6 = vmul.f32 -1.442695, %v15046_v23  ;;  %v9791_v40 = vmul.f32 -1.442695, %v15060_v34 }
 0x61a   : > { %v5920_v31 = vadd.f32 1.0, %v11580_v24  ;;  %v5434_v32 = vpop.f32.mrb[89].mxu0  ;;  %v11582_v58 = vpop.eup %11581  ;;  %v5711_v53 = vadd.f32 %v10704_v9, %v5622_v55  ;;  %v9793_v21 = vmul.f32 -1.442695, %v15057_v28 }
 0x61b   : > { %v10705_v42 = vpop.f32.mrb[90].mxu0  ;;  %v11584_v51 = vpop.eup %11583 }
 0x61c   : > { %11597 = vrcp.f32 %v5920_v31  ;;  %v5437_v61 = vpop.f32.mrb[91].mxu0  ;;  %6061 = vrot.lane.b32.xlu1 %v11584_v51, %s12025_s24  ;;  %v11586_v27 = vpop.eup %11585  ;;  %v5709_v51 = vadd.f32 %v5618_v60, %v5434_v32  ;;  %v15067_v9 = vadd.f32 %v14992_v16, %v5711_v53 }
 0x61d   : > { %11599 = vpow2.f32 %v9787_v12  ;;  %6063 = vrot.lane.b32.xlu0 %v11582_v58, %s12025_s24  ;;  %v11588_v24 = vpop.eup %11587  ;;  %v5620_v11 = vpop.permute.xlu1 %5619 }
 0x61e   : > { %11601 = vrcp.f32 %v5922_v20  ;;  %v5925_v31 = vadd.f32 1.0, %v11588_v24  ;;  %v5626_v55 = vpop.permute.xlu0 %5625  ;;  %v15071_v60 = vadd.f32 %v14992_v16, %v5709_v51  ;;  %v9796_v53 = vmul.f32 -1.442695, %v15067_v9 }
 0x61f   : > { %11603 = vpow2.f32 %v9792_v6 }
 0x620   : > { %v11590_v36 = vpop.eup %11589  ;;  %6065 = vrot.lane.b32.xlu1 %v11586_v27, %s12025_s24  ;;  %11605 = vpow2.f32 %v9790_v38 }
 0x621   : > { %v11592_v12 = vpop.eup %11591  ;;  %6067 = vrot.lane.b32.xlu0 %v11590_v36, %s12025_s24  ;;  %v10708_v37 = vpop.f32.mrb[92].mxu0 }
 0x622   : > { %v5923_v58 = vadd.f32 1.0, %v11592_v12  ;;  %v5450_v8 = vpop.f32.mrb[93].mxu0  ;;  %v11594_v20 = vpop.eup %11593 }
 0x623   : > { %v10709_v48 = vpop.f32.mrb[94].mxu0  ;;  %v11596_v6 = vpop.eup %11595 }
 0x624   : > { %11607 = vrcp.f32 %v5923_v58  ;;  %v5453_v50 = vpop.f32.mrb[95].mxu0  ;;  %v5624_v24 = vpop.permute.xlu1 %5623  ;;  %v5926_v36 = vadd.f32 1.0, %v11596_v6  ;;  %v5710_v58 = vadd.f32 %v5620_v11, %v5437_v61 }
 0x625   : > { %6071 = vrot.lane.b32.xlu0 %v11594_v20, %s12025_s24  ;;  %11609 = vrcp.f32 %v5925_v31  ;;  %v5712_v38 = vadd.f32 %v10705_v42, %v5624_v24  ;;  %v9794_v20 = vmul.f32 -1.442695, %v15071_v60  ;;  %v5630_v51 = vpop.permute.xlu0 %5629 }
 0x626   : > { %v11598_v27 = vpop.eup %11597  ;;  %11611 = vpow2.f32 %v9793_v21  ;;  %v15083_v61 = vadd.f32 %v14992_v16, %v5710_v58 }
 0x627   : > { %v11600_v32 = vpop.eup %11599  ;;  %6069 = vrot.lane.b32.xlu1 %v11598_v27, %s12025_s24  ;;  %11613 = vpow2.f32 %v9791_v40  ;;  %v15077_v39 = vadd.f32 %v14992_v16, %v5712_v38  ;;  %v5715_v27 = vadd.f32 %v10708_v37, %v5630_v51  ;;  %v5713_v38 = vadd.f32 %v5626_v55, %v5450_v8 }
 0x628   : > { %v5924_v12 = vadd.f32 1.0, %v11600_v32  ;;  %v11602_v46 = vpop.eup %11601  ;;  %v5628_v40 = vpop.permute.xlu1 %5627 }
 0x629   : > { %v10712_v5 = vpop.f32.mrb[96].mxu0  ;;  %v11604_v4 = vpop.eup %11603  ;;  %v15091_v49 = vadd.f32 %v14992_v16, %v5715_v27 }
 0x62a   : > { %11615 = vrcp.f32 %v5924_v12  ;;  %v5466_v31 = vpop.f32.mrb[97].mxu0  ;;  %v11606_v42 = vpop.eup %11605  ;;  %v5929_v32 = vadd.f32 1.0, %v11604_v4  ;;  %v15096_v4 = vadd.f32 %v14992_v16, %v5713_v38 }
 0x62b   : > { %6073 = vrot.lane.b32.xlu1 %v11602_v46, %s12025_s24  ;;  %v15080_v21 = vpop.f32.mrb[98].mxu0  ;;  %11617 = vrcp.f32 %v5926_v36  ;;  %v5927_v6 = vadd.f32 1.0, %v11606_v42  ;;  %v9797_v46 = vmul.f32 -1.442695, %v15077_v39  ;;  %v9795_v36 = vmul.f32 -1.442695, %v15083_v61  ;;  %v5634_v58 = vpop.permute.xlu0 %5633 }
 0x62c   : > { %v15085_v11 = vpop.f32.mrb[99].mxu0  ;;  %11619 = vpow2.f32 %v9796_v53  ;;  %v5632_v53 = vpop.permute.xlu1 %5631  ;;  %v5717_v10 = vadd.f32 %v5634_v58, %v5466_v31 }
 0x62d   : > { %11621 = vpow2.f32 %v9794_v20  ;;  %v5716_v20 = vadd.f32 %v10709_v48, %v5632_v53 }
 0x62e   : > { %v11608_v24 = vpop.eup %11607  ;;  %11623 = vrcp.f32 %v5927_v6 }
 0x62f   : > { %6075 = vrot.lane.b32.xlu0 %v11608_v24, %s12025_s24  ;;  %v11610_v12 = vpop.eup %11609  ;;  %11625 = vrcp.f32 %v5929_v32  ;;  %v5714_v24 = vadd.f32 %v5628_v40, %v5453_v50  ;;  %v9800_v32 = vmul.f32 -1.442695, %v15091_v49  ;;  %v15109_v48 = vadd.f32 %v14992_v16, %v5716_v20  ;;  %v5638_v14 = vpop.permute.xlu0 %5637 }
 0x630   : > { %v11612_v7 = vpop.eup %11611  ;;  %11627 = vpow2.f32 %v9797_v46  ;;  %v5636_v53 = vpop.permute.xlu1 %5635 }
 0x631   : > { %v15093_v42 = vpop.f32.mrb[100].mxu0  ;;  %v11614_v37 = vpop.eup %11613  ;;  %v5930_v27 = vadd.f32 1.0, %v11612_v7  ;;  %11629 = vpow2.f32 %v9795_v36  ;;  %v15112_v7 = vadd.f32 %v14992_v16, %v5714_v24  ;;  %v5719_v36 = vadd.f32 %v10712_v5, %v5638_v14 }
 0x632   : > { %v15098_v8 = vpop.f32.mrb[101].mxu0  ;;  %v5928_v55 = vadd.f32 1.0, %v11614_v37  ;;  %v9798_v37 = vmul.f32 -1.442695, %v15096_v4  ;;  %v5718_v2 = vadd.f32 %v5636_v53, %v15085_v11 }
 0x633   : > { %6079 = vrot.lane.b32.xlu0 %v11610_v12, %s12025_s24  ;;  %v15101_v51 = vpop.f32.mrb[102].mxu0  ;;  %v5642_v58 = vpop.permute.xlu0 %5641 }
 0x634   : > { %v11616_v6 = vpop.eup %11615  ;;  %v15103_v41 = vpop.f32.mrb[103].mxu0  ;;  %11631 = vrcp.f32 %v5928_v55 }
 0x635   : > { %6077 = vrot.lane.b32.xlu1 %v11616_v6, %s12025_s24  ;;  %v11618_v38 = vpop.eup %11617  ;;  %11633 = vrcp.f32 %v5930_v27  ;;  %v9801_v27 = vmul.f32 -1.442695, %v15109_v48  ;;  %v5640_v31 = vpop.permute.xlu1 %5639 }
 0x636   : > { %v11620_v46 = vpop.eup %11619  ;;  %11635 = vpow2.f32 %v9800_v32  ;;  %v9799_v32 = vmul.f32 -1.442695, %v15112_v7 }
 0x637   : > { %v11622_v12 = vpop.eup %11621  ;;  %v5933_v6 = vadd.f32 1.0, %v11620_v46  ;;  %11637 = vpow2.f32 %v9798_v37  ;;  %v15130_v46 = vadd.f32 %v14992_v16, %v5717_v10  ;;  %v5646_v35 = vpop.permute.xlu0 %5645 }
 0x638   : > { %v11624_v50 = vpop.eup %11623  ;;  %v5931_v40 = vadd.f32 1.0, %v11622_v12 }
 0x639   : > { %6081 = vrot.lane.b32.xlu1 %v11618_v38, %s12025_s24  ;;  %v15115_v55 = vpop.f32.mrb[104].mxu0  ;;  %6083 = vrot.lane.b32.xlu0 %v11624_v50, %s12025_s24  ;;  %v11626_v25 = vpop.eup %11625  ;;  %v15127_v38 = vadd.f32 %v14992_v16, %v5719_v36  ;;  %v9802_v10 = vmul.f32 -1.442695, %v15130_v46 }
 0x63a   : > { %v15118_v20 = vpop.f32.mrb[105].mxu0  ;;  %11639 = vrcp.f32 %v5931_v40  ;;  %v11628_v5 = vpop.eup %11627  ;;  %v5720_v40 = vadd.f32 %v15080_v21, %v5640_v31  ;;  %v15142_v21 = vadd.f32 %v14992_v16, %v5718_v2  ;;  %v5721_v31 = vadd.f32 %v5642_v58, %v15098_v8 }
 0x63b   : > { %v15121_v24 = vpop.f32.mrb[106].mxu0  ;;  %v11630_v37 = vpop.eup %11629  ;;  %11641 = vrcp.f32 %v5933_v6  ;;  %v5934_v52 = vadd.f32 1.0, %v11628_v5  ;;  %v9804_v36 = vmul.f32 -1.442695, %v15127_v38 }
 0x63c   : > { %v15124_v14 = vpop.f32.mrb[107].mxu0  ;;  %v5932_v50 = vadd.f32 1.0, %v11630_v37  ;;  %11643 = vpow2.f32 %v9801_v27  ;;  %v5644_v27 = vpop.permute.xlu1 %5643  ;;  %v9803_v2 = vmul.f32 -1.442695, %v15142_v21 }
 0x63d   : > { %6087 = vrot.lane.b32.xlu0 %v11626_v25, %s12025_s24  ;;  %11645 = vpow2.f32 %v9799_v32  ;;  %v15139_v25 = vadd.f32 %v14992_v16, %v5720_v40  ;;  %v5723_v32 = vadd.f32 %v15093_v42, %v5646_v35  ;;  %v15154_v35 = vadd.f32 %v14992_v16, %v5721_v31 }
 0x63e   : > { %v11632_v12 = vpop.eup %11631  ;;  %11647 = vrcp.f32 %v5932_v50 }
 0x63f   : > { %6085 = vrot.lane.b32.xlu1 %v11632_v12, %s12025_s24  ;;  %v11634_v6 = vpop.eup %11633  ;;  %11649 = vrcp.f32 %v5934_v52  ;;  %v9805_v12 = vmul.f32 -1.442695, %v15139_v25  ;;  %v15151_v40 = vadd.f32 %v14992_v16, %v5723_v32  ;;  %v9806_v32 = vmul.f32 -1.442695, %v15154_v35 }
 0x640   : > { %v11636_v26 = vpop.eup %11635  ;;  %11651 = vpow2.f32 %v9804_v36  ;;  %v5648_v36 = vpop.permute.xlu1 %5647 }
 0x641   : > { %v11638_v37 = vpop.eup %11637  ;;  %v5937_v5 = vadd.f32 1.0, %v11636_v26  ;;  %11653 = vpow2.f32 %v9802_v10  ;;  %v5724_v8 = vadd.f32 %v15101_v51, %v5648_v36  ;;  %v5722_v10 = vadd.f32 %v5644_v27, %v15103_v41 }
 0x642   : > { %v5935_v53 = vadd.f32 1.0, %v11638_v37  ;;  %v5650_v37 = vpop.permute.xlu0 %5649 }
 0x643   : > { %6089 = vrot.lane.b32.xlu1 %v11634_v6, %s12025_s24  ;;  %v15163_v31 = vadd.f32 %v14992_v16, %v5724_v8  ;;  %v15166_v51 = vadd.f32 %v14992_v16, %v5722_v10  ;;  %v5725_v36 = vadd.f32 %v5650_v37, %v15118_v20 }
 0x644   : > { %v11640_v11 = vpop.eup %11639  ;;  %11655 = vrcp.f32 %v5935_v53 }
 0x645   : > { %6091 = vrot.lane.b32.xlu0 %v11640_v11, %s12025_s24  ;;  %v11642_v52 = vpop.eup %11641  ;;  %11657 = vrcp.f32 %v5937_v5  ;;  %v9808_v11 = vmul.f32 -1.442695, %v15151_v40  ;;  %v9807_v8 = vmul.f32 -1.442695, %v15166_v51 }
 0x646   : > { %v11644_v50 = vpop.eup %11643  ;;  %11659 = vpow2.f32 %v9805_v12  ;;  %v5652_v12 = vpop.permute.xlu1 %5651 }
 0x647   : > { %v11646_v6 = vpop.eup %11645  ;;  %v5938_v58 = vadd.f32 1.0, %v11644_v50  ;;  %11661 = vpow2.f32 %v9803_v2 }
 0x648   : > { %v11648_v26 = vpop.eup %11647  ;;  %v5936_v42 = vadd.f32 1.0, %v11646_v6  ;;  %v5654_v6 = vpop.permute.xlu0 %5653 }
 0x649   : > { %6095 = vrot.lane.b32.xlu0 %v11642_v52, %s12025_s24  ;;  %6093 = vrot.lane.b32.xlu1 %v11648_v26, %s12025_s24  ;;  %v11650_v53 = vpop.eup %11649  ;;  %v5727_v2 = vadd.f32 %v15115_v55, %v5654_v6  ;;  %v9809_v26 = vmul.f32 -1.442695, %v15163_v31  ;;  %v15178_v55 = vadd.f32 %v14992_v16, %v5725_v36 }
 0x64a   : > { %11663 = vrcp.f32 %v5936_v42  ;;  %v11652_v5 = vpop.eup %11651 }
 0x64b   : > { %v11654_v52 = vpop.eup %11653  ;;  %11665 = vrcp.f32 %v5938_v58  ;;  %v5941_v50 = vadd.f32 1.0, %v11652_v5  ;;  %v15175_v10 = vadd.f32 %v14992_v16, %v5727_v2 }
 0x64c   : > { %v5939_v27 = vadd.f32 1.0, %v11654_v52  ;;  %11667 = vpow2.f32 %v9808_v11  ;;  %v5656_v11 = vpop.permute.xlu1 %5655  ;;  %v5726_v52 = vadd.f32 %v5652_v12, %v15124_v14 }
 0x64d   : > { %6097 = vrot.lane.b32.xlu1 %v11650_v53, %s12025_s24  ;;  %11669 = vpow2.f32 %v9806_v32  ;;  %v5728_v32 = vadd.f32 %v15121_v24, %v5656_v11  ;;  %v9812_v6 = vmul.f32 -1.442695, %v15175_v10 }
 0x64e   : > { %v11656_v41 = vpop.eup %11655  ;;  %11671 = vrcp.f32 %v5939_v27  ;;  %v9810_v27 = vmul.f32 -1.442695, %v15178_v55  ;;  %v15190_v24 = vadd.f32 %v14992_v16, %v5726_v52 }
 0x64f   : > { %6099 = vrot.lane.b32.xlu0 %v11656_v41, %s12025_s24  ;;  %v11658_v42 = vpop.eup %11657  ;;  %11673 = vrcp.f32 %v5941_v50  ;;  %v15187_v50 = vadd.f32 %v14992_v16, %v5728_v32 }
 0x650   : > { %v11660_v58 = vpop.eup %11659  ;;  %11675 = vpow2.f32 %v9809_v26 }
 0x651   : > { %v11662_v53 = vpop.eup %11661  ;;  %v5942_v5 = vadd.f32 1.0, %v11660_v58  ;;  %11677 = vpow2.f32 %v9807_v8  ;;  %v9811_v58 = vmul.f32 -1.442695, %v15190_v24 }
 0x652   : > { %v5940_v37 = vadd.f32 1.0, %v11662_v53 }
 0x653   : > { %6103 = vrot.lane.b32.xlu0 %v11658_v42, %s12025_s24  ;;  %v9813_v42 = vmul.f32 -1.442695, %v15187_v50 }
 0x654   : > { %v11664_v20 = vpop.eup %11663  ;;  %11679 = vrcp.f32 %v5940_v37 }
 0x655   : > { %6101 = vrot.lane.b32.xlu1 %v11664_v20, %s12025_s24  ;;  %v11666_v41 = vpop.eup %11665  ;;  %11681 = vrcp.f32 %v5942_v5 }
 0x656   : > { %v11668_v2 = vpop.eup %11667  ;;  %11683 = vpow2.f32 %v9812_v6 }
 0x657   : > { %v11670_v36 = vpop.eup %11669  ;;  %v5945_v26 = vadd.f32 1.0, %v11668_v2  ;;  %11685 = vpow2.f32 %v9810_v27 }
 0x658   : > { %v11672_v14 = vpop.eup %11671  ;;  %v5943_v12 = vadd.f32 1.0, %v11670_v36 }
 0x659   : > { %6105 = vrot.lane.b32.xlu1 %v11666_v41, %s12025_s24  ;;  %6107 = vrot.lane.b32.xlu0 %v11672_v14, %s12025_s24  ;;  %v11674_v8 = vpop.eup %11673 }
 0x65a   : > { %11687 = vrcp.f32 %v5943_v12  ;;  %v11676_v53 = vpop.eup %11675 }
 0x65b   : > { %v11678_v11 = vpop.eup %11677  ;;  %11689 = vrcp.f32 %v5945_v26  ;;  %v5946_v37 = vadd.f32 1.0, %v11676_v53  ;;  %v11335_v53 = vld [vmem:[%s16630_s5 + $0x60] sm:$0xff]  }
 0x65c   : > { %v5944_v20 = vadd.f32 1.0, %v11678_v11  ;;  %11691 = vpow2.f32 %v9813_v42  ;;  %10762 = vmatprep.subr.bf16.mxu1 %v11335_v53 }
 0x65d   : > { %6111 = vrot.lane.b32.xlu0 %v11674_v8, %s12025_s24  ;;  %11693 = vpow2.f32 %v9811_v58 }
 0x65e   : > { %v11680_v16 = vpop.eup %11679  ;;  %11695 = vrcp.f32 %v5944_v20 }
 0x65f   : > { %6109 = vrot.lane.b32.xlu1 %v11680_v16, %s12025_s24  ;;  %v11682_v32 = vpop.eup %11681  ;;  %11697 = vrcp.f32 %v5946_v37 }
 0x660   : > { %v11684_v5 = vpop.eup %11683 }
 0x661   : > { %v11686_v52 = vpop.eup %11685  ;;  %v5949_v27 = vadd.f32 1.0, %v11684_v5 }
 0x662   : > { %v5947_v41 = vadd.f32 1.0, %v11686_v52 }
 0x663   : > { %6113 = vrot.lane.b32.xlu1 %v11682_v32, %s12025_s24 }
 0x664   : > { %v11688_v6 = vpop.eup %11687  ;;  %11699 = vrcp.f32 %v5947_v41 }
 0x665   : > { %6115 = vrot.lane.b32.xlu0 %v11688_v6, %s12025_s24  ;;  %v11690_v2 = vpop.eup %11689  ;;  %11701 = vrcp.f32 %v5949_v27 }
 0x666   : > { %v11692_v36 = vpop.eup %11691 }
 0x667   : > { %v11694_v14 = vpop.eup %11693  ;;  %v5950_v42 = vadd.f32 1.0, %v11692_v36 }
 0x668   : > { %v11696_v12 = vpop.eup %11695  ;;  %v5948_v26 = vadd.f32 1.0, %v11694_v14 }
 0x669   : > { %6119 = vrot.lane.b32.xlu0 %v11690_v2, %s12025_s24  ;;  %6117 = vrot.lane.b32.xlu1 %v11696_v12, %s12025_s24  ;;  %v11698_v8 = vpop.eup %11697 }
 0x66a   : > { %11703 = vrcp.f32 %v5948_v26 }
 0x66b   : > { %11705 = vrcp.f32 %v5950_v42 }
 0x66c   : > { %11707 = vtanh.f32 %v14998_v29 }
 0x66d   : > { %6121 = vrot.lane.b32.xlu1 %v11698_v8, %s12025_s24  ;;  %11709 = vtanh.f32 %v15006_v59 }
 0x66e   : > { %v11700_v58 = vpop.eup %11699  ;;  %11711 = vtanh.f32 %v14995_v15 }
 0x66f   : > { %6123 = vrot.lane.b32.xlu0 %v11700_v58, %s12025_s24  ;;  %v11702_v11 = vpop.eup %11701  ;;  %11713 = vtanh.f32 %v15002_v17 }
 0x670   : > { %11715 = vtanh.f32 %v15017_v43 }
 0x671   : > { %11717 = vtanh.f32 %v15025_v62  ;;  %v11336_v62 = vld [vmem:[%s16630_s5 + $0x68] sm:$0xff]  }
 0x672   : > { %11719 = vtanh.f32 %v15014_v44 }
 0x673   : > { %6127 = vrot.lane.b32.xlu0 %v11702_v11, %s12025_s24  ;;  %11721 = vtanh.f32 %v15021_v33 }
 0x674   : > { %v11704_v16 = vpop.eup %11703  ;;  %11723 = vtanh.f32 %v15033_v30 }
 0x675   : > { %6125 = vrot.lane.b32.xlu1 %v11704_v16, %s12025_s24  ;;  %v11706_v20 = vpop.eup %11705  ;;  %11725 = vtanh.f32 %v15041_v1 }
 0x676   : > { %v11708_v32 = vpop.eup %11707  ;;  %11727 = vtanh.f32 %v15030_v54 }
 0x677   : > { %v11710_v5 = vpop.eup %11709  ;;  %11729 = vtanh.f32 %v15038_v13 }
 0x678   : > { %v11712_v2 = vpop.eup %11711  ;;  %11731 = vtanh.f32 %v15050_v18 }
 0x679   : > { %6129 = vrot.lane.b32.xlu1 %v11706_v20, %s12025_s24  ;;  %v11714_v59 = vpop.eup %11713  ;;  %11733 = vtanh.f32 %v15060_v34 }
 0x67a   : > { %v11716_v12 = vpop.eup %11715  ;;  %11735 = vtanh.f32 %v15046_v23 }
 0x67b   : > { %v11718_v26 = vpop.eup %11717  ;;  %11737 = vtanh.f32 %v15057_v28 }
 0x67c   : > { %v11720_v58 = vpop.eup %11719  ;;  %11739 = vtanh.f32 %v15071_v60 }
 0x67d   : > { %v11722_v16 = vpop.eup %11721  ;;  %11741 = vtanh.f32 %v15083_v61 }
 0x67e   : > { %11743 = vtanh.f32 %v15067_v9 }
 0x67f   : > { %11745 = vtanh.f32 %v15077_v39 }
 0x680   : > { %11747 = vtanh.f32 %v15096_v4 }
 0x681   : > { %11749 = vtanh.f32 %v15112_v7 }
 0x682   : > { %11751 = vtanh.f32 %v15091_v49 }
 0x683   : > { %11753 = vtanh.f32 %v15109_v48 }
 0x68b   : > { %v6060_v37 = vpop.permute.xlu0 %6059 }
 0x68c   : > { %v6167_v41 = vmul.f32 %v11708_v32, %v6060_v37 }
 0x68e   : > { %v6062_v52 = vpop.permute.xlu1 %6061 }
 0x68f   : > { %v6064_v6 = vpop.permute.xlu0 %6063  ;;  %v6168_v27 = vmul.f32 %v11710_v5, %v6062_v52  ;;  %v11724_v52 = vpop.eup %11723  ;;  %11755 = vtanh.f32 %v15130_v46 }
 0x690   : > { %v6169_v17 = vmul.f32 %v11712_v2, %v6064_v6  ;;  %v11726_v30 = vpop.eup %11725  ;;  %11757 = vtanh.f32 %v15142_v21 }
 0x691   : > { %v6203_v29 = vpack.c.bf16 %v6168_v27, %v6167_v41  ;;  %v11728_v2 = vpop.eup %11727  ;;  %11759 = vtanh.f32 %v15127_v38 }
 0x692   : > { %v6066_v15 = vpop.permute.xlu1 %6065 }
 0x693   : > { %v6170_v36 = vmul.f32 %v11714_v59, %v6066_v15  ;;  %10726 = vmatprep.mubr.msk.bf16.mxu1 %vm2538_vm15, %v6203_v29  ;;  %v6068_v43 = vpop.permute.xlu0 %6067  ;;  %v11730_v59 = vpop.eup %11729  ;;  %11761 = vtanh.f32 %v15139_v25 }
 0x694   : > { %v6171_v42 = vmul.f32 %v11716_v12, %v6068_v43  ;;  %v11732_v34 = vpop.eup %11731  ;;  %11763 = vtanh.f32 %v15154_v35 }
 0x695   : > { %v6204_v14 = vpack.c.bf16 %v6170_v36, %v6169_v17  ;;  %v11734_v36 = vpop.eup %11733  ;;  %11765 = vtanh.f32 %v15166_v51 }
 0x696   : > { %v11736_v12 = vpop.eup %11735  ;;  %11767 = vtanh.f32 %v15151_v40 }
 0x697   : > { %10727 = vmatmul.mubr.msk.bf16.vlgmr.msra.gmra.mrb[120].mxu1 %vm2538_vm15, %v6204_v14  ;;  %v6072_v33 = vpop.permute.xlu0 %6071 }
 0x698   : > { %10763 = vmatpush3.bf16.msra.mxu1 %v11335_v53  ;;  %v6173_v37 = vmul.f32 %v11720_v58, %v6072_v33 }
 0x699   : > { %v6070_v44 = vpop.permute.xlu1 %6069  ;;  %10764 = vmatprep.subr.bf16.mxu1 %v11336_v62 }
 0x69a   : > { %v6172_v8 = vmul.f32 %v11718_v26, %v6070_v44  ;;  %v11738_v26 = vpop.eup %11737  ;;  %11769 = vtanh.f32 %v15163_v31 }
 0x69b   : > { %v11740_v60 = vpop.eup %11739  ;;  %11771 = vtanh.f32 %v15178_v55 }
 0x69c   : > { %v6205_v11 = vpack.c.bf16 %v6172_v8, %v6171_v42  ;;  %10765 = vmatpush3.bf16.msra.mxu1 %v11336_v62 }
 0x69d   : > { %v6074_v20 = vpop.permute.xlu1 %6073 }
 0x69e   : > { %v6174_v32 = vmul.f32 %v11722_v16, %v6074_v20  ;;  %10730 = vmatprep.mubr.msk.bf16.mxu1 %vm2538_vm15, %v6205_v11  ;;  %v11742_v11 = vpop.eup %11741  ;;  %11773 = vtanh.f32 %v15190_v24 }
 0x6a0   : > { %v6206_v53 = vpack.c.bf16 %v6174_v32, %v6173_v37  ;;  %v11744_v37 = vpop.eup %11743  ;;  %11775 = vtanh.f32 %v15175_v10 }
 0x6a1   : > { %v6076_v5 = vpop.permute.xlu0 %6075 }
 0x6a2   : > { %10731 = vmatmul.mubr.msk.bf16.gmra.mrb[124].mxu1 %vm2538_vm15, %v6206_v53  ;;  %v6175_v1 = vmul.f32 %v11724_v52, %v6076_v5  ;;  %v11746_v53 = vpop.eup %11745  ;;  %11777 = vtanh.f32 %v15187_v50  ;;  %v15270_v50 = vld [vmem:[%s16630_s5 + $0x70] sm:$0xff]  }
 0x6a3   : > { %v11748_v4 = vpop.eup %11747  ;;  %10802 = vmatprep.subr.bf16.mxu1 %v15270_v50 }
 0x6a5   : > { %v6080_v27 = vpop.permute.xlu0 %6079 }
 0x6a6   : > { %v6177_v13 = vmul.f32 %v11728_v2, %v6080_v27 }
 0x6a7   : > { %v6078_v6 = vpop.permute.xlu1 %6077 }
 0x6a8   : > { %v6176_v41 = vmul.f32 %v11726_v30, %v6078_v6 }
 0x6aa   : > { %v6207_v29 = vpack.c.bf16 %v6176_v41, %v6175_v1  ;;  %v11750_v1 = vpop.eup %11749 }
 0x6ab   : > { %v6082_v54 = vpop.permute.xlu1 %6081  ;;  %v6084_v18 = vpop.permute.xlu0 %6083 }
 0x6ac   : > { %v6178_v15 = vmul.f32 %v11730_v59, %v6082_v54  ;;  %10734 = vmatprep.mubr.msk.bf16.mxu1 %vm2538_vm15, %v6207_v29  ;;  %v6179_v14 = vmul.f32 %v11732_v34, %v6084_v18  ;;  %v11752_v2 = vpop.eup %11751 }
 0x6ad   : > { %v11754_v59 = vpop.eup %11753 }
 0x6ae   : > { %v6208_v17 = vpack.c.bf16 %v6178_v15, %v6177_v13  ;;  %v11756_v46 = vpop.eup %11755 }
 0x6af   : > { %v6088_v23 = vpop.permute.xlu0 %6087  ;;  %v11758_v18 = vpop.eup %11757 }
 0x6b0   : > { %10735 = vmatmul.mubr.msk.bf16.gmra.mrb[128].mxu1 %vm2538_vm15, %v6208_v17  ;;  %v6181_v42 = vmul.f32 %v11736_v12, %v6088_v23 }
 0x6b1   : > { %v6086_v43 = vpop.permute.xlu1 %6085 }
 0x6b2   : > { %v6180_v62 = vmul.f32 %v11734_v36, %v6086_v43  ;;  %v11760_v43 = vpop.eup %11759 }
 0x6b4   : > { %v6209_v28 = vpack.c.bf16 %v6180_v62, %v6179_v14  ;;  %v11762_v62 = vpop.eup %11761 }
 0x6b5   : > { %v6090_v44 = vpop.permute.xlu1 %6089  ;;  %v11764_v35 = vpop.eup %11763 }
 0x6b6   : > { %v6182_v8 = vmul.f32 %v11738_v26, %v6090_v44  ;;  %10738 = vmatprep.mubr.msk.bf16.mxu1 %vm2538_vm15, %v6209_v28  ;;  %v11766_v44 = vpop.eup %11765 }
 0x6b7   : > { %v6092_v58 = vpop.permute.xlu0 %6091 }
 0x6b8   : > { %v6210_v33 = vpack.c.bf16 %v6182_v8, %v6181_v42  ;;  %v6183_v16 = vmul.f32 %v11740_v60, %v6092_v58 }
 0x6ba   : > { %10739 = vmatmul.mubr.msk.bf16.gmra.mrb[132].mxu1 %vm2538_vm15, %v6210_v33  ;;  %v11768_v33 = vpop.eup %11767 }
 0x6bb   : > { %v6094_v61 = vpop.permute.xlu1 %6093  ;;  %v6096_v9 = vpop.permute.xlu0 %6095 }
 0x6bc   : > { %v6184_v20 = vmul.f32 %v11742_v11, %v6094_v61  ;;  %v6185_v39 = vmul.f32 %v11744_v37, %v6096_v9  ;;  %v11770_v60 = vpop.eup %11769 }
 0x6bd   : > { %v11772_v55 = vpop.eup %11771 }
 0x6be   : > { %v6211_v32 = vpack.c.bf16 %v6184_v20, %v6183_v16  ;;  %v11774_v9 = vpop.eup %11773 }
 0x6bf   : > { %v6098_v5 = vpop.permute.xlu1 %6097 }
 0x6c0   : > { %v6186_v52 = vmul.f32 %v11746_v53, %v6098_v5  ;;  %10742 = vmatprep.mubr.msk.bf16.mxu1 %vm2538_vm15, %v6211_v32  ;;  %v11776_v5 = vpop.eup %11775 }
 0x6c1   : > { %v6100_v6 = vpop.permute.xlu0 %6099 }
 0x6c2   : > { %v6212_v30 = vpack.c.bf16 %v6186_v52, %v6185_v39  ;;  %v6187_v41 = vmul.f32 %v11748_v4, %v6100_v6  ;;  %v11778_v52 = vpop.eup %11777 }
 0x6c4   : > { %10743 = vmatmul.mubr.msk.bf16.gmra.mrb[136].mxu1 %vm2538_vm15, %v6212_v30 }
 0x6c5   : > { %v6104_v49 = vpop.permute.xlu0 %6103 }
 0x6c6   : > { %v6189_v48 = vmul.f32 %v11752_v2, %v6104_v49 }
 0x6c7   : > { %v6102_v7 = vpop.permute.xlu1 %6101 }
 0x6c8   : > { %v6188_v27 = vmul.f32 %v11750_v1, %v6102_v7  ;;  %v15276_v1 = vld [vmem:[%s16634_s9 + $0x1] ss:$0 sm:$0xff] }
 0x6ca   : > { %v6213_v29 = vpack.c.bf16 %v6188_v27, %v6187_v41 }
 0x6cb   : > { %v6106_v54 = vpop.permute.xlu1 %6105  ;;  %v6108_v17 = vpop.permute.xlu0 %6107 }
 0x6cc   : > { %v6190_v13 = vmul.f32 %v11754_v59, %v6106_v54  ;;  %10746 = vmatprep.mubr.msk.bf16.mxu1 %vm2538_vm15, %v6213_v29  ;;  %v6191_v34 = vmul.f32 %v11756_v46, %v6108_v17 }
 0x6ce   : > { %v6214_v15 = vpack.c.bf16 %v6190_v13, %v6189_v48 }
 0x6cf   : > { %v6112_v38 = vpop.permute.xlu0 %6111 }
 0x6d0   : > { %10747 = vmatmul.mubr.msk.bf16.gmra.mrb[140].mxu1 %vm2538_vm15, %v6214_v15  ;;  %v6193_v25 = vmul.f32 %v11760_v43, %v6112_v38 }
 0x6d1   : > { %v6110_v21 = vpop.permute.xlu1 %6109 }
 0x6d2   : > { %v6192_v36 = vmul.f32 %v11758_v18, %v6110_v21  ;;  %v17643_v21 = vld [vmem:[#allocation30_spill] sm:$0xff] }
 0x6d4   : > { %v6215_v14 = vpack.c.bf16 %v6192_v36, %v6191_v34  ;;  %v17644_v36 = vld [vmem:[#allocation31_spill] sm:$0xff] }
 0x6d5   : > { %v6114_v23 = vpop.permute.xlu1 %6113 }
 0x6d6   : > { %v6194_v12 = vmul.f32 %v11762_v62, %v6114_v23  ;;  %10750 = vmatprep.mubr.msk.bf16.mxu1 %vm2538_vm15, %v6215_v14  ;;  %v17646_v62 = vld [vmem:[#allocation33_spill] sm:$0xff] }
 0x6d7   : > { %v6116_v26 = vpop.permute.xlu0 %6115 }
 0x6d8   : > { %v6216_v28 = vpack.c.bf16 %v6194_v12, %v6193_v25  ;;  %v6195_v42 = vmul.f32 %v11764_v35, %v6116_v26 }
 0x6da   : > { %10751 = vmatmul.mubr.msk.bf16.gmra.mrb[144].mxu1 %vm2538_vm15, %v6216_v28 }
 0x6db   : > { %v6118_v51 = vpop.permute.xlu1 %6117  ;;  %v6120_v40 = vpop.permute.xlu0 %6119 }
 0x6dc   : > { %v6196_v8 = vmul.f32 %v11766_v44, %v6118_v51  ;;  %v6197_v31 = vmul.f32 %v11768_v33, %v6120_v40  ;;  %v17677_v51 = vld [vmem:[#allocation108_spill] sm:$0xff] }
 0x6de   : > { %v6217_v58 = vpack.c.bf16 %v6196_v8, %v6195_v42 }
 0x6df   : > { %v6122_v11 = vpop.permute.xlu1 %6121 }
 0x6e0   : > { %v6198_v61 = vmul.f32 %v11770_v60, %v6122_v11  ;;  %10754 = vmatprep.mubr.msk.bf16.mxu1 %vm2538_vm15, %v6217_v58 }
 0x6e1   : > { %v6124_v20 = vpop.permute.xlu0 %6123 }
 0x6e2   : > { %v6218_v16 = vpack.c.bf16 %v6198_v61, %v6197_v31  ;;  %v6199_v37 = vmul.f32 %v11772_v55, %v6124_v20 }
 0x6e4   : > { %10755 = vmatmul.mubr.msk.bf16.gmra.mrb[148].mxu1 %vm2538_vm15, %v6218_v16 }
 0x6e5   : > { %v6128_v53 = vpop.permute.xlu0 %6127 }
 0x6e6   : > { %v6201_v30 = vmul.f32 %v11776_v5, %v6128_v53 }
 0x6e7   : > { %v6126_v24 = vpop.permute.xlu1 %6125 }
 0x6e8   : > { %v6200_v32 = vmul.f32 %v11774_v9, %v6126_v24 }
 0x6ea   : > { %v6219_v39 = vpack.c.bf16 %v6200_v32, %v6199_v37 }
 0x6eb   : > { %v6130_v10 = vpop.permute.xlu1 %6129 }
 0x6ec   : > { %v6202_v6 = vmul.f32 %v11778_v52, %v6130_v10  ;;  %10758 = vmatprep.mubr.msk.bf16.mxu1 %vm2538_vm15, %v6219_v39  ;;  %v17652_v52 = vld [vmem:[#allocation35_spill] sm:$0xff]  ;;  %v17672_v39 = vld [vmem:[#allocation62_spill] sm:$0xff] }
 0x6ee   : > { %v6220_v4 = vpack.c.bf16 %v6202_v6, %v6201_v30  ;;  %v17653_v30 = vld [vmem:[#allocation36_spill] sm:$0xff] }
 0x6f0   : > { %10759 = vmatmul.mubr.msk.bf16.gmra.mrb[152].mxu1 %vm2538_vm15, %v6220_v4 }
 0x76a   : > { %v10728_v7 = vpop.f32.mrb[120].mxu1 }
 0x76b   : > { %v15279_v41 = vadd.f32 %v10728_v7, %v15276_v1  ;;  %v6321_v27 = vpop.f32.mrb[121].mxu1  ;;  %v17654_v7 = vld [vmem:[#allocation41_spill] sm:$0xff] }
 0x76c   : > { %v6470_v49 = vadd.f32 %v15276_v1, %v6321_v27  ;;  %v10729_v2 = vpop.f32.mrb[122].mxu1 }
 0x76d   : > { %17640 = vst [vmem:[#allocation15_spill] sm:$0xff] %v15279_v41  ;;  %v6508_v29 = vadd.f32 %v15279_v41, %v14359_v47  ;;  %v15285_v59 = vadd.f32 %v10729_v2, %v15276_v1  ;;  %v6324_v54 = vpop.f32.mrb[123].mxu1 }
 0x76e   : > { %v6506_v48 = vadd.f32 %v6470_v49, %v14362_v56  ;;  %v15289_v13 = vadd.f32 %v15276_v1, %v6324_v54  ;;  %v17645_v56 = vld [vmem:[#allocation32_spill] sm:$0xff] }
 0x76f   : > { %17641 = vst [vmem:[#allocation20_spill] sm:$0xff] %v15285_v59  ;;  %v6544_v15 = vmul.f32 0.70710677, %v6508_v29  ;;  %v6509_v17 = vadd.f32 %v15285_v59, %v14365_v63  ;;  %v17675_v29 = vld [vmem:[#allocation87_spill] sm:$0xff] }
 0x770   : > { %17642 = vst [vmem:[#allocation27_spill] sm:$0xff] %v15289_v13  ;;  %v6542_v46 = vmul.f32 0.70710677, %v6506_v48  ;;  %v6507_v18 = vadd.f32 %v15289_v13, %v14369_v3 }
 0x771   : > { %v15296_v34 = vmul.f32 %v17643_v21, %v6544_v15  ;;  %v6545_v47 = vmul.f32 0.70710677, %v6509_v17  ;;  %v15382_v17 = vld [vmem:[%s16630_s5 + $0x80] sm:$0xff]  }
 0x772   : > { %v15299_v38 = vmul.f32 %v17644_v36, %v6542_v46  ;;  %v6543_v43 = vmul.f32 0.70710677, %v6507_v18 }
 0x773   : > { %v15302_v14 = vmul.f32 %v17645_v56, %v6545_v47  ;;  %v6685_v63 = vrot.slane %v15296_v34, 4 }
 0x774   : > { %v15305_v23 = vmul.f32 %v17646_v62, %v6543_v43  ;;  %v6682_v35 = vrot.slane %v15299_v38, 4 }
 0x775   : > { %v10732_v25 = vpop.f32.mrb[124].mxu1  ;;  %v6687_v12 = vrot.slane %v15302_v14, 4 }
 0x776   : > { %v15312_v28 = vadd.f32 %v10732_v25, %v15276_v1  ;;  %v6337_v26 = vpop.f32.mrb[125].mxu1  ;;  %v6683_v44 = vrot.slane %v15305_v23, 4  ;;  %v6790_v37 = vsel %vm5141_vm1, 0.0, %v6682_v35 }
 0x777   : > { %v15319_v42 = vadd.f32 %v15276_v1, %v6337_v26  ;;  %v10733_v8 = vpop.f32.mrb[126].mxu1  ;;  %v15322_v40 = vsel %vm5141_vm1, %v6685_v63, %v6687_v12 }
 0x778   : > { %17647 = vst [vmem:[#allocation25_spill] sm:$0xff] %v15312_v28  ;;  %v6512_v33 = vadd.f32 %v15312_v28, %v14415_v22  ;;  %v15327_v58 = vadd.f32 %v10733_v8, %v15276_v1  ;;  %v6340_v60 = vpop.f32.mrb[127].mxu1  ;;  %v15330_v11 = vsel %vm5141_vm1, %v6683_v44, %v6685_v63  ;;  %v15344_v24 = vsel %vm5141_vm1, %v6682_v35, %v6683_v44 }
 0x779   : > { %17648 = vst [vmem:[#allocation38_spill] sm:$0xff] %v15319_v42  ;;  %v6510_v31 = vadd.f32 %v15319_v42, %v14423_v57  ;;  %v15335_v61 = vadd.f32 %v15276_v1, %v6340_v60  ;;  %v6795_v16 = vpack.c.bf16 %v15322_v40, %v15330_v11  ;;  %v17651_v57 = vld [vmem:[#allocation34_spill] sm:$0xff]  ;;  %v6794_v5 = vpack.c.bf16 %v15344_v24, %v6790_v37 }
 0x77a   : > { %17649 = vst [vmem:[#allocation29_spill] sm:$0xff] %v15327_v58  ;;  %v6548_v20 = vmul.f32 0.70710677, %v6512_v33  ;;  %v6513_v22 = vadd.f32 %v15327_v58, %v14426_v19 }
 0x77b   : > { %17650 = vst [vmem:[#allocation90_spill] sm:$0xff] %v15335_v61  ;;  %v6546_v55 = vmul.f32 0.70710677, %v6510_v31  ;;  %v6511_v9 = vadd.f32 %v15335_v61, %v14430_v45  ;;  %v11338_v45 = vld [vmem:[%s16630_s5 + $0x78] sm:$0xff]   ;;  %10766 = vmatprep.mubr.msk.bf16.mxu1 %vm2538_vm15, %v6794_v5  ;;  %v17691_v61 = vld [vmem:[#allocation132_spill] sm:$0xff] }
 0x77c   : > { %v15348_v32 = vmul.f32 %v17651_v57, %v6548_v20  ;;  %v6549_v53 = vmul.f32 0.70710677, %v6513_v22  ;;  %10767 = vmatmul.mubr.msk.bf16.vlgmr.msra.gmra.mrb[156].mxu1 %vm2538_vm15, %v6795_v16  ;;  %v17660_v16 = vld [vmem:[#allocation56_spill] sm:$0xff] }
 0x77d   : > { %v15354_v19 = vmul.f32 %v17652_v52, %v6546_v55  ;;  %v6547_v10 = vmul.f32 0.70710677, %v6511_v9  ;;  %10803 = vmatpush3.bf16.msra.mxu1 %v15270_v50  ;;  %v17662_v9 = vld [vmem:[#allocation64_spill] sm:$0xff] }
 0x77e   : > { %v15360_v6 = vmul.f32 %v17653_v30, %v6549_v53  ;;  %v6693_v49 = vrot.slane %v15348_v32, 4  ;;  %10804 = vmatprep.subr.bf16.mxu1 %v11338_v45 }
 0x77f   : > { %v6689_v4 = vrot.slane %v15354_v19, 4  ;;  %v15365_v27 = vmul.f32 %v17654_v7, %v6547_v10  ;;  %v17664_v10 = vld [vmem:[#allocation44_spill] sm:$0xff] }
 0x780   : > { %v6695_v2 = vrot.slane %v15360_v6, 4 }
 0x781   : > { %v6691_v54 = vrot.slane %v15365_v27, 4  ;;  %v15377_v15 = vsel %vm5141_vm1, %v6687_v12, %v6689_v4  ;;  %10805 = vmatpush3.bf16.msra.mxu1 %v11338_v45 }
 0x782   : > { %v15387_v18 = vsel %vm5141_vm1, %v6693_v49, %v6695_v2  ;;  %10842 = vmatprep.subr.bf16.mxu1 %v15382_v17 }
 0x783   : > { %17655 = vst [vmem:[#allocation68_spill] sm:$0xff] %v15387_v18  ;;  %v10736_v50 = vpop.f32.mrb[128].mxu1  ;;  %v15390_v47 = vsel %vm5141_vm1, %v6689_v4, %v6691_v54  ;;  %v15393_v43 = vsel %vm5141_vm1, %v6691_v54, %v6693_v49  ;;  %v17665_v49 = vld [vmem:[#allocation45_spill] sm:$0xff] }
 0x784   : > { %17656 = vst [vmem:[#allocation101_spill] sm:$0xff] %v15390_v47  ;;  %v15396_v25 = vadd.f32 %v10736_v50, %v15276_v1  ;;  %v6353_v63 = vpop.f32.mrb[129].mxu1  ;;  %v6796_v12 = vpack.c.bf16 %v15390_v47, %v15377_v15  ;;  %v6797_v26 = vpack.c.bf16 %v15387_v18, %v15393_v43 }
 0x785   : > { %v15405_v44 = vadd.f32 %v15276_v1, %v6353_v63  ;;  %v10737_v8 = vpop.f32.mrb[130].mxu1  ;;  %v17666_v63 = vld [vmem:[#allocation47_spill] sm:$0xff] }
 0x786   : > { %17657 = vst [vmem:[#allocation61_spill] sm:$0xff] %v15396_v25  ;;  %v6516_v33 = vadd.f32 %v15396_v25, %v14483_v0  ;;  %v15411_v60 = vadd.f32 %v10737_v8, %v15276_v1  ;;  %v6356_v31 = vpop.f32.mrb[131].mxu1  ;;  %10770 = vmatprep.mubr.msk.bf16.mxu1 %vm2538_vm15, %v6796_v12  ;;  %v17663_v0 = vld [vmem:[#allocation78_spill] sm:$0xff]  ;;  %v17667_v8 = vld [vmem:[#allocation48_spill] sm:$0xff] }
 0x787   : > { %17658 = vst [vmem:[#allocation72_spill] sm:$0xff] %v15405_v44  ;;  %v6514_v20 = vadd.f32 %v15405_v44, %v17660_v16  ;;  %v15417_v22 = vadd.f32 %v15276_v1, %v6356_v31  ;;  %10771 = vmatmul.mubr.msk.bf16.gmra.mrb[160].mxu1 %vm2538_vm15, %v6797_v26 }
 0x788   : > { %17659 = vst [vmem:[#allocation98_spill] sm:$0xff] %v15411_v60  ;;  %v6552_v55 = vmul.f32 0.70710677, %v6516_v33  ;;  %v6517_v37 = vadd.f32 %v15411_v60, %v17662_v9 }
 0x789   : > { %17661 = vst [vmem:[#allocation114_spill] sm:$0xff] %v15417_v22  ;;  %v6550_v53 = vmul.f32 0.70710677, %v6514_v20  ;;  %v6515_v5 = vadd.f32 %v15417_v22, %v17663_v0  ;;  %v17679_v22 = vld [vmem:[#allocation84_spill] sm:$0xff] }
 0x78a   : > { %v15425_v45 = vmul.f32 %v17664_v10, %v6552_v55  ;;  %v6553_v4 = vmul.f32 0.70710677, %v6517_v37 }
 0x78b   : > { %v15428_v54 = vmul.f32 %v17665_v49, %v6550_v53  ;;  %v6551_v50 = vmul.f32 0.70710677, %v6515_v5 }
 0x78c   : > { %v15431_v12 = vmul.f32 %v17666_v63, %v6553_v4  ;;  %v6701_v31 = vrot.slane %v15425_v45, 4 }
 0x78d   : > { %v6697_v26 = vrot.slane %v15428_v54, 4  ;;  %v15435_v33 = vmul.f32 %v17667_v8, %v6551_v50  ;;  %v10740_v55 = vpop.f32.mrb[132].mxu1 }
 0x78e   : > { %v6703_v16 = vrot.slane %v15431_v12, 4  ;;  %v15445_v53 = vadd.f32 %v10740_v55, %v15276_v1  ;;  %v6369_v0 = vpop.f32.mrb[133].mxu1 }
 0x78f   : > { %v6699_v9 = vrot.slane %v15435_v33, 4  ;;  %v15448_v5 = vsel %vm5141_vm1, %v6695_v2, %v6697_v26  ;;  %v15451_v4 = vadd.f32 %v15276_v1, %v6369_v0  ;;  %v10741_v50 = vpop.f32.mrb[134].mxu1 }
 0x790   : > { %17668 = vst [vmem:[#allocation82_spill] sm:$0xff] %v15445_v53  ;;  %17669 = vst [vmem:[#allocation43_spill] sm:$0xff] %v15448_v5  ;;  %v15454_v35 = vsel %vm5141_vm1, %v6701_v31, %v6703_v16  ;;  %v6520_v20 = vadd.f32 %v15445_v53, %v17672_v39  ;;  %v15461_v55 = vadd.f32 %v10741_v50, %v15276_v1  ;;  %v6372_v37 = vpop.f32.mrb[135].mxu1 }
 0x791   : > { %17670 = vst [vmem:[#allocation96_spill] sm:$0xff] %v15451_v4  ;;  %17671 = vst [vmem:[#allocation55_spill] sm:$0xff] %v15454_v35  ;;  %v15464_v2 = vsel %vm5141_vm1, %v6697_v26, %v6699_v9  ;;  %v6518_v0 = vadd.f32 %v15451_v4, %v17675_v29  ;;  %v15469_v48 = vadd.f32 %v15276_v1, %v6372_v37  ;;  %v17680_v37 = vld [vmem:[#allocation49_spill] sm:$0xff] }
 0x792   : > { %17673 = vst [vmem:[#allocation46_spill] sm:$0xff] %v15461_v55  ;;  %17674 = vst [vmem:[#allocation79_spill] sm:$0xff] %v15464_v2  ;;  %v6798_v3 = vpack.c.bf16 %v15464_v2, %v15448_v5  ;;  %v6556_v46 = vmul.f32 0.70710677, %v6520_v20  ;;  %v6521_v39 = vadd.f32 %v15461_v55, %v17677_v51  ;;  %v15476_v50 = vsel %vm5141_vm1, %v6699_v9, %v6701_v31  ;;  %v17681_v51 = vld [vmem:[#allocation51_spill] sm:$0xff]  ;;  %v17706_v5 = vld [vmem:[#allocation60_spill] sm:$0xff] }
 0x793   : > { %17676 = vst [vmem:[#allocation57_spill] sm:$0xff] %v15469_v48  ;;  %17678 = vst [vmem:[#allocation83_spill] sm:$0xff] %v15476_v50  ;;  %v6554_v53 = vmul.f32 0.70710677, %v6518_v0  ;;  %v6519_v26 = vadd.f32 %v15469_v48, %v17679_v22  ;;  %v6799_v29 = vpack.c.bf16 %v15454_v35, %v15476_v50  ;;  %v17682_v9 = vld [vmem:[#allocation59_spill] sm:$0xff]  ;;  %v17683_v0 = vld [vmem:[#allocation77_spill] sm:$0xff] }
 0x794   : > { %10774 = vmatprep.mubr.msk.bf16.mxu1 %vm2538_vm15, %v6798_v3  ;;  %v15484_v4 = vmul.f32 %v17680_v37, %v6556_v46  ;;  %v6557_v60 = vmul.f32 0.70710677, %v6521_v39  ;;  %v17693_v35 = vld [vmem:[#allocation85_spill] sm:$0xff] }
 0x795   : > { %v15489_v55 = vmul.f32 %v17681_v51, %v6554_v53  ;;  %v6555_v31 = vmul.f32 0.70710677, %v6519_v26  ;;  %10775 = vmatmul.mubr.msk.bf16.gmra.mrb[164].mxu1 %vm2538_vm15, %v6799_v29 }
 0x796   : > { %v15493_v22 = vmul.f32 %v17682_v9, %v6557_v60  ;;  %v6709_v46 = vrot.slane %v15484_v4, 4 }
 0x797   : > { %v6705_v3 = vrot.slane %v15489_v55, 4  ;;  %v15497_v48 = vmul.f32 %v17683_v0, %v6555_v31  ;;  %v10744_v29 = vpop.f32.mrb[136].mxu1 }
 0x798   : > { %v6711_v39 = vrot.slane %v15493_v22, 4  ;;  %v6488_v44 = vadd.f32 %v10744_v29, %v15276_v1  ;;  %v6385_v31 = vpop.f32.mrb[137].mxu1 }
 0x799   : > { %v6707_v53 = vrot.slane %v15497_v48, 4  ;;  %v15507_v60 = vsel %vm5141_vm1, %v6703_v16, %v6705_v3  ;;  %v15516_v20 = vadd.f32 %v15276_v1, %v6385_v31  ;;  %v10745_v58 = vpop.f32.mrb[138].mxu1  ;;  %v17689_v16 = vld [vmem:[#allocation124_spill] sm:$0xff] }
 0x79a   : > { %17684 = vst [vmem:[#allocation81_spill] sm:$0xff] %v15507_v60  ;;  %v15511_v25 = vsel %vm5141_vm1, %v6709_v46, %v6711_v39  ;;  %v6524_v28 = vadd.f32 %v6488_v44, %v17689_v16  ;;  %v15526_v29 = vadd.f32 %v10745_v58, %v15276_v1  ;;  %v6388_v13 = vpop.f32.mrb[139].mxu1  ;;  %v17692_v44 = vld [vmem:[#allocation137_spill] sm:$0xff] }
 0x79b   : > { %17685 = vst [vmem:[#allocation110_spill] sm:$0xff] %v15511_v25  ;;  %17686 = vst [vmem:[#allocation92_spill] sm:$0xff] %v15516_v20  ;;  %v15519_v42 = vsel %vm5141_vm1, %v6705_v3, %v6707_v53  ;;  %v15522_v26 = vsel %vm5141_vm1, %v6707_v53, %v6709_v46  ;;  %v6522_v41 = vadd.f32 %v15516_v20, %v17691_v61  ;;  %v17694_v20 = vld [vmem:[#allocation80_spill] sm:$0xff] }
 0x79c   : > { %17687 = vst [vmem:[#allocation112_spill] sm:$0xff] %v15519_v42  ;;  %17688 = vst [vmem:[#allocation111_spill] sm:$0xff] %v15522_v26  ;;  %v6800_v59 = vpack.c.bf16 %v15519_v42, %v15507_v60  ;;  %v6801_v31 = vpack.c.bf16 %v15511_v25, %v15522_v26  ;;  %v6487_v3 = vadd.f32 %v15276_v1, %v6388_v13  ;;  %v6560_v53 = vmul.f32 0.70710677, %v6524_v28  ;;  %v17702_v42 = vld [vmem:[#allocation50_spill] sm:$0xff] }
 0x79d   : > { %17690 = vst [vmem:[#allocation31_spill] sm:$0xff] %v15526_v29  ;;  %v6525_v58 = vadd.f32 %v15526_v29, %v17692_v44  ;;  %v6558_v16 = vmul.f32 0.70710677, %v6522_v41  ;;  %v17695_v41 = vld [vmem:[#allocation89_spill] sm:$0xff] }
 0x79e   : > { %10778 = vmatprep.mubr.msk.bf16.mxu1 %vm2538_vm15, %v6800_v59  ;;  %v6523_v60 = vadd.f32 %v6487_v3, %v17693_v35  ;;  %v15543_v2 = vmul.f32 %v17644_v36, %v6560_v53  ;;  %v17704_v36 = vld [vmem:[#allocation58_spill] sm:$0xff] }
 0x79f   : > { %10779 = vmatmul.mubr.msk.bf16.gmra.mrb[168].mxu1 %vm2538_vm15, %v6801_v31  ;;  %v6561_v61 = vmul.f32 0.70710677, %v6525_v58  ;;  %v15546_v13 = vmul.f32 %v17694_v20, %v6558_v16 }
 0x7a0   : > { %v6559_v50 = vmul.f32 0.70710677, %v6523_v60  ;;  %v6717_v28 = vrot.slane %v15543_v2, 4 }
 0x7a1   : > { %v15550_v46 = vmul.f32 %v17646_v62, %v6561_v61  ;;  %v6713_v59 = vrot.slane %v15546_v13, 4 }
 0x7a2   : > { %v15554_v44 = vmul.f32 %v17695_v41, %v6559_v50  ;;  %v6791_v61 = vsel %vm5141_vm1, 0.0, %v6717_v28 }
 0x7a3   : > { %v6718_v35 = vrot.slane %v15550_v46, 4  ;;  %v10748_v3 = vpop.f32.mrb[140].mxu1  ;;  %v15563_v53 = vsel %vm5141_vm1, %v6711_v39, %v6713_v59 }
 0x7a4   : > { %v6715_v31 = vrot.slane %v15554_v44, 4  ;;  %17696 = vst [vmem:[#allocation56_spill] sm:$0xff] %v15563_v53  ;;  %v15566_v58 = vadd.f32 %v10748_v3, %v15276_v1  ;;  %v6401_v16 = vpop.f32.mrb[141].mxu1 }
 0x7a5   : > { %v15569_v50 = vsel %vm5141_vm1, %v6717_v28, %v6718_v35  ;;  %v15575_v62 = vadd.f32 %v15276_v1, %v6401_v16  ;;  %v10749_v60 = vpop.f32.mrb[142].mxu1 }
 0x7a6   : > { %17697 = vst [vmem:[#allocation64_spill] sm:$0xff] %v15566_v58  ;;  %17698 = vst [vmem:[#allocation78_spill] sm:$0xff] %v15569_v50  ;;  %v15578_v29 = vsel %vm5141_vm1, %v6713_v59, %v6715_v31  ;;  %v6803_v39 = vpack.c.bf16 %v15569_v50, %v6791_v61  ;;  %v15582_v3 = vsel %vm5141_vm1, %v6715_v31, 0.0  ;;  %v6528_v26 = vadd.f32 %v15566_v58, %v17702_v42  ;;  %v6404_v18 = vpop.f32.mrb[143].mxu1  ;;  %v17707_v58 = vld [vmem:[#allocation66_spill] sm:$0xff]  ;;  %v17716_v50 = vld [vmem:[#allocation93_spill] sm:$0xff] }
 0x7a7   : > { %17699 = vst [vmem:[#allocation62_spill] sm:$0xff] %v15575_v62  ;;  %17700 = vst [vmem:[#allocation87_spill] sm:$0xff] %v15578_v29  ;;  %v15587_v28 = vadd.f32 %v10749_v60, %v15276_v1  ;;  %v6802_v16 = vpack.c.bf16 %v15578_v29, %v15563_v53  ;;  %v6526_v25 = vadd.f32 %v15575_v62, %v17704_v36 }
 0x7a8   : > { %17701 = vst [vmem:[#allocation108_spill] sm:$0xff] %v15582_v3  ;;  %v15594_v59 = vadd.f32 %v15276_v1, %v6404_v18  ;;  %v6564_v61 = vmul.f32 0.70710677, %v6528_v26 }
 0x7a9   : > { %17703 = vst [vmem:[#allocation84_spill] sm:$0xff] %v15587_v28  ;;  %v6529_v42 = vadd.f32 %v15587_v28, %v17706_v5  ;;  %10782 = vmatprep.mubr.msk.bf16.mxu1 %vm2538_vm15, %v6802_v16  ;;  %v6562_v60 = vmul.f32 0.70710677, %v6526_v25 }
 0x7aa   : > { %17705 = vst [vmem:[#allocation49_spill] sm:$0xff] %v15594_v59  ;;  %v6527_v47 = vadd.f32 %v15594_v59, %v17707_v58  ;;  %10783 = vmatmul.mubr.msk.bf16.gmra.mrb[172].mxu1 %vm2538_vm15, %v6803_v39  ;;  %v15605_v36 = vmul.f32 %v17652_v52, %v6564_v61 }
 0x7ab   : > { %v6565_v18 = vmul.f32 0.70710677, %v6529_v42  ;;  %v15608_v62 = vmul.f32 %v17643_v21, %v6562_v60 }
 0x7ac   : > { %v6563_v31 = vmul.f32 0.70710677, %v6527_v47  ;;  %v6724_v58 = vrot.slane %v15605_v36, 4 }
 0x7ad   : > { %v15611_v26 = vmul.f32 %v17654_v7, %v6565_v18  ;;  %v6720_v5 = vrot.slane %v15608_v62, 4  ;;  %v10752_v42 = vpop.f32.mrb[144].mxu1 }
 0x7ae   : > { %v15615_v25 = vmul.f32 %v17645_v56, %v6563_v31  ;;  %v15628_v18 = vadd.f32 %v10752_v42, %v15276_v1  ;;  %v6417_v31 = vpop.f32.mrb[145].mxu1  ;;  %v17714_v56 = vld [vmem:[#allocation91_spill] sm:$0xff] }
 0x7af   : > { %v6726_v39 = vrot.slane %v15611_v26, 4  ;;  %v15625_v60 = vsel %vm5141_vm1, %v6718_v35, %v6720_v5  ;;  %v15636_v16 = vadd.f32 %v15276_v1, %v6417_v31  ;;  %v10753_v21 = vpop.f32.mrb[146].mxu1 }
 0x7b0   : > { %v6722_v61 = vrot.slane %v15615_v25, 4  ;;  %17708 = vst [vmem:[#allocation59_spill] sm:$0xff] %v15625_v60  ;;  %17709 = vst [vmem:[#allocation124_spill] sm:$0xff] %v15628_v18  ;;  %v6532_v42 = vadd.f32 %v15628_v18, %v17714_v56  ;;  %v15647_v59 = vadd.f32 %v10753_v21, %v15276_v1  ;;  %v6420_v28 = vpop.f32.mrb[147].mxu1 }
 0x7b1   : > { %v15631_v7 = vsel %vm5141_vm1, %v6724_v58, %v6726_v39  ;;  %17711 = vst [vmem:[#allocation137_spill] sm:$0xff] %v15636_v16  ;;  %v6530_v31 = vadd.f32 %v15636_v16, %v17716_v50  ;;  %v15654_v29 = vadd.f32 %v15276_v1, %v6420_v28 }
 0x7b2   : > { %17710 = vst [vmem:[#allocation132_spill] sm:$0xff] %v15631_v7  ;;  %v15639_v47 = vsel %vm5141_vm1, %v6720_v5, %v6722_v61  ;;  %v15642_v35 = vsel %vm5141_vm1, %v6722_v61, %v6724_v58  ;;  %17715 = vst [vmem:[#allocation50_spill] sm:$0xff] %v15647_v59  ;;  %v6568_v58 = vmul.f32 0.70710677, %v6532_v42  ;;  %v17718_v61 = vld [vmem:[#allocation95_spill] sm:$0xff] }
 0x7b3   : > { %17712 = vst [vmem:[#allocation85_spill] sm:$0xff] %v15639_v47  ;;  %17713 = vst [vmem:[#allocation89_spill] sm:$0xff] %v15642_v35  ;;  %v6804_v52 = vpack.c.bf16 %v15639_v47, %v15625_v60  ;;  %v6805_v5 = vpack.c.bf16 %v15631_v7, %v15642_v35  ;;  %v6533_v56 = vadd.f32 %v15647_v59, %v17718_v61  ;;  %v6566_v18 = vmul.f32 0.70710677, %v6530_v31  ;;  %v17719_v60 = vld [vmem:[#allocation100_spill] sm:$0xff]  ;;  %v17728_v7 = vld [vmem:[#allocation118_spill] sm:$0xff] }
 0x7b4   : > { %17717 = vst [vmem:[#allocation58_spill] sm:$0xff] %v15654_v29  ;;  %v6531_v3 = vadd.f32 %v15654_v29, %v17719_v60  ;;  %v15667_v50 = vmul.f32 %v17665_v49, %v6568_v58 }
 0x7b5   : > { %10786 = vmatprep.mubr.msk.bf16.mxu1 %vm2538_vm15, %v6804_v52  ;;  %v6569_v28 = vmul.f32 0.70710677, %v6533_v56  ;;  %v15670_v42 = vmul.f32 %v17651_v57, %v6566_v18 }
 0x7b6   : > { %10787 = vmatmul.mubr.msk.bf16.gmra.mrb[176].mxu1 %vm2538_vm15, %v6805_v5  ;;  %v6567_v16 = vmul.f32 0.70710677, %v6531_v3  ;;  %v6732_v60 = vrot.slane %v15667_v50, 4 }
 0x7b7   : > { %v15673_v61 = vmul.f32 %v17667_v8, %v6569_v28  ;;  %v6728_v52 = vrot.slane %v15670_v42, 4  ;;  %v10756_v18 = vpop.f32.mrb[148].mxu1 }
 0x7b8   : > { %v15677_v31 = vmul.f32 %v17653_v30, %v6567_v16  ;;  %v15690_v21 = vadd.f32 %v10756_v18, %v15276_v1  ;;  %v6433_v16 = vpop.f32.mrb[149].mxu1  ;;  %v17726_v30 = vld [vmem:[#allocation117_spill] sm:$0xff] }
 0x7b9   : > { %v6734_v5 = vrot.slane %v15673_v61, 4  ;;  %v15687_v28 = vsel %vm5141_vm1, %v6726_v39, %v6728_v52  ;;  %v15698_v58 = vadd.f32 %v15276_v1, %v6433_v16  ;;  %v10757_v57 = vpop.f32.mrb[150].mxu1 }
 0x7ba   : > { %v6730_v56 = vrot.slane %v15677_v31, 4  ;;  %17720 = vst [vmem:[#allocation60_spill] sm:$0xff] %v15687_v28  ;;  %17721 = vst [vmem:[#allocation66_spill] sm:$0xff] %v15690_v21  ;;  %v6536_v18 = vadd.f32 %v15690_v21, %v17726_v30  ;;  %v15709_v29 = vadd.f32 %v10757_v57, %v15276_v1  ;;  %v6436_v59 = vpop.f32.mrb[151].mxu1 }
 0x7bb   : > { %v15693_v8 = vsel %vm5141_vm1, %v6732_v60, %v6734_v5  ;;  %17723 = vst [vmem:[#allocation93_spill] sm:$0xff] %v15698_v58  ;;  %v6534_v16 = vadd.f32 %v15698_v58, %v17728_v7  ;;  %v15716_v47 = vadd.f32 %v15276_v1, %v6436_v59 }
 0x7bc   : > { %17722 = vst [vmem:[#allocation91_spill] sm:$0xff] %v15693_v8  ;;  %v15701_v3 = vsel %vm5141_vm1, %v6728_v52, %v6730_v56  ;;  %v15704_v39 = vsel %vm5141_vm1, %v6730_v56, %v6732_v60  ;;  %17727 = vst [vmem:[#allocation117_spill] sm:$0xff] %v15709_v29  ;;  %v6572_v60 = vmul.f32 0.70710677, %v6536_v18  ;;  %v17730_v56 = vld [vmem:[#allocation119_spill] sm:$0xff] }
 0x7bd   : > { %17724 = vst [vmem:[#allocation95_spill] sm:$0xff] %v15701_v3  ;;  %17725 = vst [vmem:[#allocation100_spill] sm:$0xff] %v15704_v39  ;;  %v6806_v49 = vpack.c.bf16 %v15701_v3, %v15687_v28  ;;  %v6807_v52 = vpack.c.bf16 %v15693_v8, %v15704_v39  ;;  %v6537_v30 = vadd.f32 %v15709_v29, %v17730_v56  ;;  %v6570_v21 = vmul.f32 0.70710677, %v6534_v16  ;;  %v17731_v28 = vld [vmem:[#allocation120_spill] sm:$0xff] }
 0x7be   : > { %17729 = vst [vmem:[#allocation118_spill] sm:$0xff] %v15716_v47  ;;  %v6535_v35 = vadd.f32 %v15716_v47, %v17731_v28  ;;  %v15729_v7 = vmul.f32 %v17681_v51, %v6572_v60  ;;  %v17737_v51 = vld [vmem:[#allocation127_spill] sm:$0xff] }
 0x7bf   : > { %10790 = vmatprep.mubr.msk.bf16.mxu1 %vm2538_vm15, %v6806_v49  ;;  %v6573_v59 = vmul.f32 0.70710677, %v6537_v30  ;;  %v15732_v18 = vmul.f32 %v17664_v10, %v6570_v21 }
 0x7c0   : > { %10791 = vmatmul.mubr.msk.bf16.gmra.mrb[180].mxu1 %vm2538_vm15, %v6807_v52  ;;  %v6571_v58 = vmul.f32 0.70710677, %v6535_v35  ;;  %v6740_v28 = vrot.slane %v15729_v7, 4 }
 0x7c1   : > { %v15735_v56 = vmul.f32 %v17683_v0, %v6573_v59  ;;  %v6736_v49 = vrot.slane %v15732_v18, 4 }
 0x7c2   : > { %v15739_v16 = vmul.f32 %v17666_v63, %v6571_v58  ;;  %v17736_v63 = vld [vmem:[#allocation126_spill] sm:$0xff] }
 0x7c3   : > { %v6742_v52 = vrot.slane %v15735_v56, 4  ;;  %v10760_v21 = vpop.f32.mrb[152].mxu1  ;;  %v15749_v59 = vsel %vm5141_vm1, %v6734_v5, %v6736_v49 }
 0x7c4   : > { %v6738_v30 = vrot.slane %v15739_v16, 4  ;;  %17732 = vst [vmem:[#allocation119_spill] sm:$0xff] %v15749_v59  ;;  %v15752_v57 = vadd.f32 %v10760_v21, %v15276_v1  ;;  %v6449_v58 = vpop.f32.mrb[153].mxu1 }
 0x7c5   : > { %v15755_v0 = vsel %vm5141_vm1, %v6740_v28, %v6742_v52  ;;  %v15760_v60 = vadd.f32 %v15276_v1, %v6449_v58  ;;  %v10761_v10 = vpop.f32.mrb[154].mxu1 }
 0x7c6   : > { %17733 = vst [vmem:[#allocation120_spill] sm:$0xff] %v15752_v57  ;;  %v15763_v35 = vsel %vm5141_vm1, %v6736_v49, %v6738_v30  ;;  %v15766_v5 = vsel %vm5141_vm1, %v6738_v30, %v6740_v28  ;;  %v6540_v21 = vadd.f32 %v15752_v57, %v17736_v63  ;;  %v6505_v47 = vadd.f32 %v10761_v10, %v15276_v1  ;;  %v6452_v29 = vpop.f32.mrb[155].mxu1  ;;  %v17738_v30 = vld [vmem:[#allocation128_spill] sm:$0xff]  ;;  %v17739_v57 = vld [vmem:[#allocation143_spill] sm:$0xff] }
 0x7c7   : > { %17734 = vst [vmem:[#allocation144_spill] sm:$0xff] %v15760_v60  ;;  %17735 = vst [vmem:[#allocation145_spill] sm:$0xff] %v15763_v35  ;;  %v6808_v3 = vpack.c.bf16 %v15763_v35, %v15749_v59  ;;  %v6538_v58 = vadd.f32 %v15760_v60, %v17737_v51  ;;  %v15776_v8 = vadd.f32 %v15276_v1, %v6452_v29 }
 0x7c8   : > { %v6809_v49 = vpack.c.bf16 %v15755_v0, %v15766_v5  ;;  %v6576_v28 = vmul.f32 0.70710677, %v6540_v21  ;;  %v6541_v39 = vadd.f32 %v6505_v47, %v17738_v30 }
 0x7c9   : > { %10794 = vmatprep.mubr.msk.bf16.mxu1 %vm2538_vm15, %v6808_v3  ;;  %v6574_v63 = vmul.f32 0.70710677, %v6538_v58  ;;  %v6539_v59 = vadd.f32 %v15776_v8, %v17739_v57 }
 0x7ca   : > { %10795 = vmatmul.mubr.msk.bf16.gmra.mrb[184].mxu1 %vm2538_vm15, %v6809_v49  ;;  %v6612_v1 = vmul.f32 %v17694_v20, %v6576_v28  ;;  %v6577_v51 = vmul.f32 0.70710677, %v6541_v39 }
 0x7cb   : > { %v6610_v29 = vmul.f32 %v17680_v37, %v6574_v63  ;;  %v6575_v60 = vmul.f32 0.70710677, %v6539_v59 }
 0x7cc   : > { %v6613_v21 = vmul.f32 %v17695_v41, %v6577_v51  ;;  %v6748_v30 = vrot.slane %v6612_v1, 4 }
 0x7cd   : > { %v6744_v47 = vrot.slane %v6610_v29, 4  ;;  %v6611_v3 = vmul.f32 %v17682_v9, %v6575_v60 }
 0x7ce   : > { %v6750_v53 = vrot.slane %v6613_v21, 4  ;;  %v7072_v10 = vpack.c.bf16 %v6613_v21, %v6612_v1  ;;  %v17742_v1 = vpack.c.bf16 %v15365_v27, %v15354_v19  ;;  %v17748_v19 = vpack.c.bf16 %v15554_v44, %v15546_v13  ;;  %v17763_v13 = vld [vmem:[#allocation83_spill] sm:$0xff]  ;;  %v17784_v21 = vld [vmem:[#allocation60_spill] sm:$0xff] }
 0x7cf   : > { %v6746_v58 = vrot.slane %v6611_v3, 4  ;;  %v7071_v35 = vpack.c.bf16 %v6611_v3, %v6610_v29  ;;  %v6745_v57 = vsel %vm5141_vm1, %v6742_v52, %v6744_v47  ;;  %v17740_v52 = vpack.c.bf16 %v15305_v23, %v15299_v38  ;;  %v17764_v44 = vld [vmem:[#allocation79_spill] sm:$0xff] }
 0x7d0   : > { %v6751_v49 = vsel %vm5141_vm1, %v6748_v30, %v6750_v53  ;;  %v7367_v28 = vpack.c.bf16 %v6745_v57, %v15755_v0  ;;  %v6793_v39 = vsel %vm5141_vm1, %v6750_v53, 0.0  ;;  %v11340_v0 = vld [vmem:[%s16630_s5 + $0x88] sm:$0xff]   ;;  %v17741_v53 = vpack.c.bf16 %v15302_v14, %v15296_v34 }
 0x7d1   : > { %v6747_v59 = vsel %vm5141_vm1, %v6744_v47, %v6746_v58  ;;  %v6749_v41 = vsel %vm5141_vm1, %v6746_v58, %v6748_v30  ;;  %v7369_v63 = vpack.c.bf16 %v6793_v39, %v6751_v49  ;;  %v17743_v38 = vpack.c.bf16 %v15360_v6, %v15348_v32  ;;  %v17785_v47 = vld [vmem:[#allocation132_spill] sm:$0xff]  ;;  %v17788_v58 = vld [vmem:[#allocation95_spill] sm:$0xff] }
 0x7d2   : > { %v6810_v51 = vpack.c.bf16 %v6747_v59, %v6745_v57  ;;  %v6811_v60 = vpack.c.bf16 %v6751_v49, %v6749_v41  ;;  %v7368_v20 = vpack.c.bf16 %v6749_v41, %v6747_v59  ;;  %v17744_v23 = vpack.c.bf16 %v15435_v33, %v15428_v54  ;;  %v17787_v30 = vld [vmem:[#allocation100_spill] sm:$0xff]  ;;  %v17790_v49 = vld [vmem:[#allocation119_spill] sm:$0xff]  ;;  %v17793_v41 = vld [vmem:[#allocation145_spill] sm:$0xff] }
 0x7d3   : > { %v17745_v34 = vpack.c.bf16 %v15431_v12, %v15425_v45  ;;  %v17746_v14 = vpack.c.bf16 %v15497_v48, %v15489_v55  ;;  %v17747_v32 = vpack.c.bf16 %v15493_v22, %v15484_v4  ;;  %v17749_v6 = vpack.c.bf16 %v15550_v46, %v15543_v2  ;;  %v17758_v4 = vld [vmem:[#allocation101_spill] sm:$0xff]  ;;  %v17760_v2 = vld [vmem:[#allocation43_spill] sm:$0xff]  ;;  %v17761_v22 = vld [vmem:[#allocation68_spill] sm:$0xff] }
 0x7d4   : > { %10798 = vmatprep.mubr.msk.bf16.mxu1 %vm2538_vm15, %v6810_v51  ;;  %v17750_v27 = vpack.c.bf16 %v15615_v25, %v15608_v62  ;;  %v17751_v48 = vpack.c.bf16 %v15611_v26, %v15605_v36  ;;  %v17753_v45 = vpack.c.bf16 %v15673_v61, %v15667_v50  ;;  %v17754_v62 = vpack.c.bf16 %v15739_v16, %v15732_v18  ;;  %v17767_v36 = vld [vmem:[#allocation55_spill] sm:$0xff]  ;;  %v17770_v26 = vld [vmem:[#allocation112_spill] sm:$0xff]  ;;  %v17773_v50 = vld [vmem:[#allocation110_spill] sm:$0xff] }
 0x7d5   : > { %10799 = vmatmul.mubr.msk.bf16.gmra.mrb[188].mxu1 %vm2538_vm15, %v6811_v60  ;;  %v17755_v54 = vpack.c.bf16 %v15735_v56, %v15729_v7  ;;  %v17756_v12 = vpack.c.bf16 %v15330_v11, %v15344_v24  ;;  %v17757_v33 = vpack.c.bf16 %v15377_v15, %v15322_v40  ;;  %v17759_v55 = vpack.c.bf16 %v15393_v43, %v17758_v4  ;;  %v17766_v24 = vld [vmem:[#allocation81_spill] sm:$0xff]  ;;  %v17769_v15 = vld [vmem:[#allocation111_spill] sm:$0xff]  ;;  %v17772_v25 = vld [vmem:[#allocation56_spill] sm:$0xff] }
 0x7d6   : > { %10806 = vmatprep.mubr.msk.bf16.mxu1 %vm2538_vm15, %v17740_v52  ;;  %v17762_v46 = vpack.c.bf16 %v17760_v2, %v17761_v22  ;;  %v17765_v11 = vpack.c.bf16 %v17763_v13, %v17764_v44  ;;  %v17768_v40 = vpack.c.bf16 %v17766_v24, %v17767_v36  ;;  %v17771_v43 = vpack.c.bf16 %v17769_v15, %v17770_v26  ;;  %v17775_v61 = vld [vmem:[#allocation108_spill] sm:$0xff]  ;;  %v17778_v18 = vld [vmem:[#allocation59_spill] sm:$0xff]  ;;  %v17779_v56 = vld [vmem:[#allocation78_spill] sm:$0xff] }
 0x7d7   : > { %v17780_v16 = vpack.c.bf16 %v17778_v18, %v17779_v56  ;;  %v17786_v3 = vpack.c.bf16 %v17784_v21, %v17785_v47  ;;  %v17789_v57 = vpack.c.bf16 %v17787_v30, %v17788_v58  ;;  %v17791_v39 = vld [vmem:[#allocation91_spill] sm:$0xff]  ;;  %v17794_v51 = vpack.c.bf16 %v15766_v5, %v17793_v41  ;;  %v17799_v4 = vld [vmem:[#allocation17_spill] sm:$0xff]  ;;  %v17800_v22 = vld [vmem:[#allocation12_spill] sm:$0xff] }
 0x7d8   : > { %v17792_v59 = vpack.c.bf16 %v17790_v49, %v17791_v39  ;;  %v11341_v60 = vld [vmem:[%s16633_s8 + $0x20] sm:$0xff]   ;;  %v17802_v15 = vld [vmem:[#allocation14_spill] sm:$0xff]  ;;  %v17805_v30 = vld [vmem:[#allocation28_spill] sm:$0xff] }
 0x7d9   : > { %10882 = vmatprep.subr.bf16.mxu0 %v11341_v60  ;;  %v15938_v52 = vld [vmem:[%s16631_s6 + $0x2] ss:$0 sm:$0xff]  ;;  %v17803_v18 = vld [vmem:[#allocation26_spill] sm:$0xff]  ;;  %v17806_v41 = vld [vmem:[#allocation24_spill] sm:$0xff] }
 0x7da   : > { %10883 = vmatpush3.bf16.msra.mxu0 %v11341_v60 }
 0x7dd   : > { %10807 = vmatmul.mubr.msk.bf16.vlgmr.msra.gmra.mrb[156].mxu1 %vm2538_vm15, %v17741_v53 }
 0x7de   : > { %10843 = vmatpush3.bf16.msra.mxu1 %v15382_v17  ;;  %10810 = vmatprep.mubr.msk.bf16.mxu1 %vm2538_vm15, %v17742_v1  ;;  %v17752_v17 = vpack.c.bf16 %v15677_v31, %v15670_v42  ;;  %v17774_v42 = vpack.c.bf16 %v17772_v25, %v17773_v50  ;;  %v17776_v31 = vld [vmem:[#allocation87_spill] sm:$0xff] }
 0x7df   : > { %10844 = vmatprep.subr.bf16.mxu1 %v11340_v0  ;;  %v17777_v7 = vpack.c.bf16 %v17775_v61, %v17776_v31 }
 0x7e2   : > { %10845 = vmatpush3.bf16.msra.mxu1 %v11340_v0  ;;  %v17795_v0 = vld [vmem:[#allocation10_spill] sm:$0xff] }
 0x7e5   : > { %10811 = vmatmul.mubr.msk.bf16.gmra.mrb[160].mxu1 %vm2538_vm15, %v17743_v38 }
 0x7e6   : > { %10814 = vmatprep.mubr.msk.bf16.mxu1 %vm2538_vm15, %v17744_v23  ;;  %v17797_v23 = vld [vmem:[#allocation11_spill] sm:$0xff] }
 0x7ed   : > { %10815 = vmatmul.mubr.msk.bf16.gmra.mrb[164].mxu1 %vm2538_vm15, %v17745_v34 }
 0x7ee   : > { %10818 = vmatprep.mubr.msk.bf16.mxu1 %vm2538_vm15, %v17746_v14 }
 0x7f5   : > { %10819 = vmatmul.mubr.msk.bf16.gmra.mrb[168].mxu1 %vm2538_vm15, %v17747_v32 }
 0x7f6   : > { %10822 = vmatprep.mubr.msk.bf16.mxu1 %vm2538_vm15, %v17748_v19  ;;  %v17798_v19 = vld [vmem:[#allocation6_spill] sm:$0xff] }
 0x7fd   : > { %10823 = vmatmul.mubr.msk.bf16.gmra.mrb[172].mxu1 %vm2538_vm15, %v17749_v6 }
 0x7fe   : > { %10826 = vmatprep.mubr.msk.bf16.mxu1 %vm2538_vm15, %v17750_v27 }
 0x805   : > { %10827 = vmatmul.mubr.msk.bf16.gmra.mrb[176].mxu1 %vm2538_vm15, %v17751_v48 }
 0x806   : > { %10830 = vmatprep.mubr.msk.bf16.mxu1 %vm2538_vm15, %v17752_v17 }
 0x80d   : > { %10831 = vmatmul.mubr.msk.bf16.gmra.mrb[180].mxu1 %vm2538_vm15, %v17753_v45 }
 0x80e   : > { %10834 = vmatprep.mubr.msk.bf16.mxu1 %vm2538_vm15, %v17754_v62 }
 0x815   : > { %10835 = vmatmul.mubr.msk.bf16.gmra.mrb[184].mxu1 %vm2538_vm15, %v17755_v54  ;;  %v11342_v54 = vld [vmem:[%s16633_s8 + $0x28] sm:$0xff]  }
 0x816   : > { %10838 = vmatprep.mubr.msk.bf16.mxu1 %vm2538_vm15, %v7071_v35  ;;  %v17781_v35 = vld [vmem:[#allocation89_spill] sm:$0xff]  ;;  %10884 = vmatprep.subr.bf16.mxu0 %v11342_v54 }
 0x817   : > { %10885 = vmatpush3.bf16.msra.mxu0 %v11342_v54 }
 0x81d   : > { %10839 = vmatmul.mubr.msk.bf16.gmra.mrb[188].mxu1 %vm2538_vm15, %v7072_v10  ;;  %v17782_v10 = vld [vmem:[#allocation85_spill] sm:$0xff] }
 0x81e   : > { %10846 = vmatprep.mubr.msk.bf16.mxu1 %vm2538_vm15, %v17756_v12  ;;  %v17783_v29 = vpack.c.bf16 %v17781_v35, %v17782_v10 }
 0x825   : > { %10847 = vmatmul.mubr.msk.bf16.vlgmr.msra.gmra.mrb[156].mxu1 %vm2538_vm15, %v17757_v33 }
 0x826   : > { %10850 = vmatprep.mubr.msk.bf16.mxu1 %vm2538_vm15, %v17759_v55 }
 0x82d   : > { %10851 = vmatmul.mubr.msk.bf16.gmra.mrb[160].mxu1 %vm2538_vm15, %v17762_v46 }
 0x82e   : > { %10854 = vmatprep.mubr.msk.bf16.mxu1 %vm2538_vm15, %v17765_v11  ;;  %v17801_v11 = vld [vmem:[#allocation19_spill] sm:$0xff] }
 0x835   : > { %10855 = vmatmul.mubr.msk.bf16.gmra.mrb[164].mxu1 %vm2538_vm15, %v17768_v40 }
 0x836   : > { %10858 = vmatprep.mubr.msk.bf16.mxu1 %vm2538_vm15, %v17771_v43 }
 0x83d   : > { %10859 = vmatmul.mubr.msk.bf16.gmra.mrb[168].mxu1 %vm2538_vm15, %v17774_v42 }
 0x83e   : > { %10862 = vmatprep.mubr.msk.bf16.mxu1 %vm2538_vm15, %v17777_v7 }
 0x845   : > { %10863 = vmatmul.mubr.msk.bf16.gmra.mrb[172].mxu1 %vm2538_vm15, %v17780_v16 }
 0x846   : > { %10866 = vmatprep.mubr.msk.bf16.mxu1 %vm2538_vm15, %v17783_v29  ;;  %v17804_v29 = vld [vmem:[#allocation21_spill] sm:$0xff] }
 0x84d   : > { %10867 = vmatmul.mubr.msk.bf16.gmra.mrb[176].mxu1 %vm2538_vm15, %v17786_v3 }
 0x84e   : > { %10870 = vmatprep.mubr.msk.bf16.mxu1 %vm2538_vm15, %v17789_v57 }
 0x855   : > { %10871 = vmatmul.mubr.msk.bf16.gmra.mrb[180].mxu1 %vm2538_vm15, %v17792_v59 }
 0x856   : > { %10874 = vmatprep.mubr.msk.bf16.mxu1 %vm2538_vm15, %v17794_v51 }
 0x85d   : > { %10875 = vmatmul.mubr.msk.bf16.gmra.mrb[184].mxu1 %vm2538_vm15, %v7367_v28  ;;  %v17796_v28 = vld [vmem:[#allocation8_spill] sm:$0xff] }
 0x85e   : > { %10878 = vmatprep.mubr.msk.bf16.mxu1 %vm2538_vm15, %v7368_v20 }
 0x865   : > { %10879 = vmatmul.mubr.msk.bf16.gmra.mrb[188].mxu1 %vm2538_vm15, %v7369_v63 }
 0x8f8   : > { %v10848_v5 = vpop.f32.mrb[156].mxu1 }
 0x8f9   : > { %v7651_v53 = vadd.f32 %v10848_v5, %v17795_v0  ;;  %v7470_v1 = vpop.f32.mrb[157].mxu1 }
 0x8fa   : > { %v7649_v38 = vadd.f32 %v7470_v1, %v17796_v28  ;;  %v10849_v20 = vpop.f32.mrb[158].mxu1 }
 0x8fb   : > { %v15943_v63 = vadd.f32 %v15938_v52, %v7651_v53  ;;  %v7652_v34 = vadd.f32 %v10849_v20, %v17797_v23  ;;  %v7473_v14 = vpop.f32.mrb[159].mxu1  ;;  %v17807_v20 = vld [vmem:[#allocation52_spill] sm:$0xff] }
 0x8fc   : > { %v15947_v32 = vadd.f32 %v15938_v52, %v7649_v38  ;;  %v7650_v6 = vadd.f32 %v7473_v14, %v17798_v19 }
 0x8fd   : > { %v9898_v27 = vmul.f32 -1.442695, %v15943_v63  ;;  %v15952_v48 = vadd.f32 %v15938_v52, %v7652_v34 }
 0x8fe   : > { %v9896_v17 = vmul.f32 -1.442695, %v15947_v32  ;;  %v15956_v45 = vadd.f32 %v15938_v52, %v7650_v6 }
 0x8ff   : > { %11779 = vpow2.f32 %v9898_v27  ;;  %v9899_v62 = vmul.f32 -1.442695, %v15952_v48  ;;  %v17808_v27 = vld [vmem:[#allocation37_spill] sm:$0xff] }
 0x900   : > { %11781 = vpow2.f32 %v9896_v17  ;;  %v9897_v12 = vmul.f32 -1.442695, %v15956_v45  ;;  %v10852_v33 = vpop.f32.mrb[160].mxu1 }
 0x901   : > { %v7655_v55 = vadd.f32 %v10852_v33, %v17799_v4  ;;  %v7486_v2 = vpop.f32.mrb[161].mxu1  ;;  %11783 = vpow2.f32 %v9899_v62 }
 0x902   : > { %v7653_v46 = vadd.f32 %v7486_v2, %v17800_v22  ;;  %v10853_v13 = vpop.f32.mrb[162].mxu1  ;;  %11785 = vpow2.f32 %v9897_v12  ;;  %v17809_v12 = vld [vmem:[#allocation54_spill] sm:$0xff]  ;;  %v17810_v2 = vld [vmem:[#allocation39_spill] sm:$0xff] }
 0x903   : > { %v15966_v44 = vadd.f32 %v15938_v52, %v7655_v55  ;;  %v7656_v24 = vadd.f32 %v10853_v13, %v17801_v11  ;;  %v7489_v36 = vpop.f32.mrb[163].mxu1 }
 0x904   : > { %v15970_v40 = vadd.f32 %v15938_v52, %v7653_v46  ;;  %v7654_v26 = vadd.f32 %v7489_v36, %v17802_v15 }
 0x905   : > { %v9902_v43 = vmul.f32 -1.442695, %v15966_v44  ;;  %v15975_v25 = vadd.f32 %v15938_v52, %v7656_v24 }
 0x906   : > { %v9900_v50 = vmul.f32 -1.442695, %v15970_v40  ;;  %v15979_v42 = vadd.f32 %v15938_v52, %v7654_v26 }
 0x907   : > { %11787 = vpow2.f32 %v9902_v43  ;;  %v9903_v61 = vmul.f32 -1.442695, %v15975_v25 }
 0x908   : > { %11789 = vpow2.f32 %v9900_v50  ;;  %v10856_v31 = vpop.f32.mrb[164].mxu1  ;;  %v9901_v10 = vmul.f32 -1.442695, %v15979_v42 }
 0x909   : > { %v11780_v7 = vpop.eup %11779  ;;  %v7659_v56 = vadd.f32 %v10856_v31, %v17803_v18  ;;  %v7502_v16 = vpop.f32.mrb[165].mxu1  ;;  %11791 = vpow2.f32 %v9903_v61  ;;  %v17811_v31 = vld [vmem:[#allocation73_spill] sm:$0xff] }
 0x90a   : > { %v11782_v35 = vpop.eup %11781  ;;  %v7657_v21 = vadd.f32 %v7502_v16, %v17804_v29  ;;  %v10857_v47 = vpop.f32.mrb[166].mxu1  ;;  %v7873_v39 = vadd.f32 1.0, %v11780_v7  ;;  %v17812_v16 = vld [vmem:[#allocation63_spill] sm:$0xff] }
 0x90b   : > { %v7871_v3 = vadd.f32 1.0, %v11782_v35  ;;  %v7660_v58 = vadd.f32 %v10857_v47, %v17805_v30  ;;  %v7505_v57 = vpop.f32.mrb[167].mxu1  ;;  %v11784_v49 = vpop.eup %11783  ;;  %v15987_v59 = vadd.f32 %v15938_v52, %v7659_v56  ;;  %v17813_v47 = vld [vmem:[#allocation75_spill] sm:$0xff] }
 0x90c   : > { %v7658_v51 = vadd.f32 %v7505_v57, %v17806_v41  ;;  %v11786_v60 = vpop.eup %11785  ;;  %v15991_v5 = vadd.f32 %v15938_v52, %v7657_v21  ;;  %v7874_v0 = vadd.f32 1.0, %v11784_v49  ;;  %v17814_v57 = vld [vmem:[#allocation65_spill] sm:$0xff] }
 0x90d   : > { %11793 = vrcp.f32 %v7871_v3  ;;  %v7872_v53 = vadd.f32 1.0, %v11786_v60  ;;  %v9906_v1 = vmul.f32 -1.442695, %v15987_v59  ;;  %v15997_v6 = vadd.f32 %v15938_v52, %v7660_v58 }
 0x90e   : > { %11795 = vpow2.f32 %v9901_v10  ;;  %v9904_v19 = vmul.f32 -1.442695, %v15991_v5  ;;  %v16002_v55 = vadd.f32 %v15938_v52, %v7658_v51 }
 0x90f   : > { %11797 = vrcp.f32 %v7873_v39  ;;  %v9907_v11 = vmul.f32 -1.442695, %v15997_v6 }
 0x910   : > { %v10860_v28 = vpop.f32.mrb[168].mxu1  ;;  %11799 = vrcp.f32 %v7872_v53  ;;  %v9905_v15 = vmul.f32 -1.442695, %v16002_v55 }
 0x911   : > { %v11788_v38 = vpop.eup %11787  ;;  %v7663_v23 = vadd.f32 %v10860_v28, %v17807_v20  ;;  %v7518_v34 = vpop.f32.mrb[169].mxu1  ;;  %11801 = vrcp.f32 %v7874_v0 }
 0x912   : > { %v11790_v14 = vpop.eup %11789  ;;  %v7661_v17 = vadd.f32 %v7518_v34, %v17808_v27  ;;  %v10861_v62 = vpop.f32.mrb[170].mxu1  ;;  %11803 = vpow2.f32 %v9906_v1  ;;  %v7877_v46 = vadd.f32 1.0, %v11788_v38  ;;  %v17816_v27 = vld [vmem:[#allocation86_spill] sm:$0xff] }
 0x913   : > { %v7875_v54 = vadd.f32 1.0, %v11790_v14  ;;  %v7664_v33 = vadd.f32 %v10861_v62, %v17809_v12  ;;  %v7521_v4 = vpop.f32.mrb[171].mxu1  ;;  %v11792_v13 = vpop.eup %11791  ;;  %v16008_v26 = vadd.f32 %v15938_v52, %v7663_v23  ;;  %v17815_v23 = vld [vmem:[#allocation97_spill] sm:$0xff] }
 0x914   : > { %v7662_v22 = vadd.f32 %v7521_v4, %v17810_v2  ;;  %v16012_v61 = vadd.f32 %v15938_v52, %v7661_v17  ;;  %v7878_v21 = vadd.f32 1.0, %v11792_v13  ;;  %v17818_v13 = vld [vmem:[#allocation88_spill] sm:$0xff] }
 0x915   : > { %11805 = vrcp.f32 %v7875_v54  ;;  %v9910_v58 = vmul.f32 -1.442695, %v16008_v26  ;;  %v16023_v60 = vadd.f32 %v15938_v52, %v7664_v33  ;;  %v17817_v33 = vld [vmem:[#allocation99_spill] sm:$0xff] }
 0x916   : > { %11807 = vpow2.f32 %v9904_v19  ;;  %v9908_v41 = vmul.f32 -1.442695, %v16012_v61  ;;  %v16026_v53 = vadd.f32 %v15938_v52, %v7662_v22 }
 0x917   : > { %v11794_v24 = vpop.eup %11793  ;;  %11809 = vrcp.f32 %v7877_v46  ;;  %v9911_v19 = vmul.f32 -1.442695, %v16023_v60 }
 0x918   : > { %v11796_v36 = vpop.eup %11795  ;;  %8015 = vrot.lane.b32.xlu0 %v11794_v24, %s12025_s24  ;;  %v10864_v43 = vpop.f32.mrb[172].mxu1  ;;  %11811 = vpow2.f32 %v9907_v11  ;;  %v9909_v12 = vmul.f32 -1.442695, %v16026_v53 }
 0x919   : > { %v7876_v50 = vadd.f32 1.0, %v11796_v36  ;;  %v7667_v7 = vadd.f32 %v10864_v43, %v17811_v31  ;;  %v7534_v18 = vpop.f32.mrb[173].mxu1  ;;  %v11798_v56 = vpop.eup %11797 }
 0x91a   : > { %v7665_v35 = vadd.f32 %v7534_v18, %v17812_v16  ;;  %v10865_v10 = vpop.f32.mrb[174].mxu1  ;;  %v11800_v29 = vpop.eup %11799  ;;  %v17819_v16 = vld [vmem:[#allocation113_spill] sm:$0xff] }
 0x91b   : > { %11813 = vrcp.f32 %v7876_v50  ;;  %v7668_v3 = vadd.f32 %v10865_v10, %v17813_v47  ;;  %v7537_v30 = vpop.f32.mrb[175].mxu1  ;;  %8017 = vrot.lane.b32.xlu1 %v11800_v29, %s12025_s24  ;;  %v11802_v39 = vpop.eup %11801  ;;  %v16038_v46 = vadd.f32 %v15938_v52, %v7667_v7  ;;  %v17820_v47 = vld [vmem:[#allocation105_spill] sm:$0xff] }
 0x91c   : > { %11815 = vpow2.f32 %v9905_v15  ;;  %v7666_v49 = vadd.f32 %v7537_v30, %v17814_v57  ;;  %8019 = vrot.lane.b32.xlu0 %v11798_v56, %s12025_s24  ;;  %v11804_v51 = vpop.eup %11803  ;;  %v16045_v36 = vadd.f32 %v15938_v52, %v7665_v35 }
 0x91d   : > { %11817 = vrcp.f32 %v7878_v21  ;;  %v7881_v38 = vadd.f32 1.0, %v11804_v51  ;;  %v9914_v31 = vmul.f32 -1.442695, %v16038_v46  ;;  %v16054_v21 = vadd.f32 %v15938_v52, %v7668_v3 }
 0x91e   : > { %11819 = vpow2.f32 %v9910_v58  ;;  %v9912_v56 = vmul.f32 -1.442695, %v16045_v36 }
 0x91f   : > { %v11806_v0 = vpop.eup %11805  ;;  %8021 = vrot.lane.b32.xlu1 %v11802_v39, %s12025_s24  ;;  %11821 = vpow2.f32 %v9908_v41  ;;  %v16061_v39 = vadd.f32 %v15938_v52, %v7666_v49  ;;  %v17821_v41 = vld [vmem:[#allocation115_spill] sm:$0xff] }
 0x920   : > { %v11808_v1 = vpop.eup %11807  ;;  %8023 = vrot.lane.b32.xlu0 %v11806_v0, %s12025_s24  ;;  %v10868_v28 = vpop.f32.mrb[176].mxu1 }
 0x921   : > { %v7879_v20 = vadd.f32 1.0, %v11808_v1  ;;  %v7671_v34 = vadd.f32 %v10868_v28, %v17815_v23  ;;  %v7550_v14 = vpop.f32.mrb[177].mxu1  ;;  %v11810_v54 = vpop.eup %11809  ;;  %v17822_v28 = vld [vmem:[#allocation107_spill] sm:$0xff]  ;;  %v9915_v23 = vmul.f32 -1.442695, %v16054_v21 }
 0x922   : > { %v7669_v17 = vadd.f32 %v7550_v14, %v17816_v27  ;;  %v10869_v62 = vpop.f32.mrb[178].mxu1  ;;  %v11812_v22 = vpop.eup %11811  ;;  %v9913_v49 = vmul.f32 -1.442695, %v16061_v39 }
 0x923   : > { %11823 = vrcp.f32 %v7879_v20  ;;  %v16035_v4 = vadd.f32 %v10869_v62, %v17817_v33  ;;  %v7553_v2 = vpop.f32.mrb[179].mxu1  ;;  %v7882_v43 = vadd.f32 1.0, %v11812_v22  ;;  %v16073_v27 = vadd.f32 %v15938_v52, %v7671_v34  ;;  %v17823_v33 = vld [vmem:[#allocation131_spill] sm:$0xff] }
 0x924   : > { %v16041_v11 = vadd.f32 %v7553_v2, %v17818_v13  ;;  %8027 = vrot.lane.b32.xlu0 %v11810_v54, %s12025_s24  ;;  %11825 = vrcp.f32 %v7881_v38 }
 0x925   : > { %v11814_v24 = vpop.eup %11813  ;;  %11827 = vpow2.f32 %v9911_v19 }
 0x926   : > { %v11816_v15 = vpop.eup %11815  ;;  %8025 = vrot.lane.b32.xlu1 %v11814_v24, %s12025_s24  ;;  %11829 = vpow2.f32 %v9909_v12  ;;  %v16076_v12 = vadd.f32 %v15938_v52, %v7669_v17  ;;  %v17824_v24 = vld [vmem:[#allocation121_spill] sm:$0xff] }
 0x927   : > { %v7880_v50 = vadd.f32 1.0, %v11816_v15  ;;  %v11818_v18 = vpop.eup %11817 }
 0x928   : > { %v10872_v7 = vpop.f32.mrb[180].mxu1  ;;  %v11820_v35 = vpop.eup %11819 }
 0x929   : > { %11831 = vrcp.f32 %v7880_v50  ;;  %v16051_v10 = vadd.f32 %v10872_v7, %v17819_v16  ;;  %v7566_v29 = vpop.f32.mrb[181].mxu1  ;;  %v11822_v57 = vpop.eup %11821  ;;  %v7885_v20 = vadd.f32 1.0, %v11820_v35  ;;  %v9916_v35 = vmul.f32 -1.442695, %v16076_v12 }
 0x92a   : > { %8029 = vrot.lane.b32.xlu1 %v11818_v18, %s12025_s24  ;;  %v16058_v30 = vadd.f32 %v7566_v29, %v17820_v47  ;;  %v10873_v58 = vpop.f32.mrb[182].mxu1  ;;  %11833 = vrcp.f32 %v7882_v43  ;;  %v7883_v1 = vadd.f32 1.0, %v11822_v57  ;;  %v9918_v18 = vmul.f32 -1.442695, %v16073_v27 }
 0x92b   : > { %v16064_v51 = vadd.f32 %v10873_v58, %v17821_v41  ;;  %v7569_v0 = vpop.f32.mrb[183].mxu1  ;;  %11835 = vpow2.f32 %v9914_v31  ;;  %v17825_v31 = vld [vmem:[#allocation133_spill] sm:$0xff]  ;;  %v16096_v58 = vadd.f32 %v15938_v52, %v16035_v4  ;;  %v16100_v41 = vadd.f32 %v15938_v52, %v16041_v11 }
 0x92c   : > { %v16067_v3 = vadd.f32 %v7569_v0, %v17822_v28  ;;  %11837 = vpow2.f32 %v9912_v56  ;;  %v17826_v56 = vld [vmem:[#allocation123_spill] sm:$0xff] }
 0x92d   : > { %v11824_v38 = vpop.eup %11823  ;;  %11839 = vrcp.f32 %v7883_v1 }
 0x92e   : > { %8031 = vrot.lane.b32.xlu0 %v11824_v38, %s12025_s24  ;;  %v11826_v14 = vpop.eup %11825  ;;  %11841 = vrcp.f32 %v7885_v20  ;;  %v17827_v20 = vld [vmem:[#allocation138_spill] sm:$0xff] }
 0x92f   : > { %v11828_v19 = vpop.eup %11827  ;;  %11843 = vpow2.f32 %v9915_v23 }
 0x930   : > { %v10876_v62 = vpop.f32.mrb[184].mxu1  ;;  %v11830_v54 = vpop.eup %11829  ;;  %v7886_v50 = vadd.f32 1.0, %v11828_v19  ;;  %11845 = vpow2.f32 %v9913_v49  ;;  %v17828_v49 = vld [vmem:[#allocation134_spill] sm:$0xff] }
 0x931   : > { %v16079_v2 = vadd.f32 %v10876_v62, %v17823_v33  ;;  %v7582_v22 = vpop.f32.mrb[185].mxu1  ;;  %v7884_v13 = vadd.f32 1.0, %v11830_v54  ;;  %v9917_v54 = vmul.f32 -1.442695, %v16100_v41  ;;  %v17829_v33 = vld [vmem:[#allocation140_spill] sm:$0xff] }
 0x932   : > { %8035 = vrot.lane.b32.xlu0 %v11826_v14, %s12025_s24  ;;  %v16083_v15 = vadd.f32 %v7582_v22, %v17824_v24  ;;  %v10877_v43 = vpop.f32.mrb[186].mxu1  ;;  %v9919_v14 = vmul.f32 -1.442695, %v16096_v58 }
 0x933   : > { %v11832_v34 = vpop.eup %11831  ;;  %v16086_v7 = vadd.f32 %v10877_v43, %v17825_v31  ;;  %v7585_v17 = vpop.f32.mrb[187].mxu1  ;;  %11847 = vrcp.f32 %v7884_v13  ;;  %v16117_v43 = vadd.f32 %v15938_v52, %v16051_v10 }
 0x934   : > { %8033 = vrot.lane.b32.xlu1 %v11832_v34, %s12025_s24  ;;  %v16091_v16 = vadd.f32 %v7585_v17, %v17826_v56  ;;  %v11834_v29 = vpop.eup %11833  ;;  %11849 = vrcp.f32 %v7886_v50  ;;  %v17830_v34 = vld [vmem:[#allocation136_spill] sm:$0xff]  ;;  %v16124_v17 = vadd.f32 %v15938_v52, %v16058_v30  ;;  %v16132_v30 = vadd.f32 %v15938_v52, %v16064_v51 }
 0x935   : > { %v11836_v47 = vpop.eup %11835  ;;  %11851 = vpow2.f32 %v9918_v18  ;;  %v9922_v10 = vmul.f32 -1.442695, %v16117_v43 }
 0x936   : > { %v11838_v57 = vpop.eup %11837  ;;  %v7889_v38 = vadd.f32 1.0, %v11836_v47  ;;  %11853 = vpow2.f32 %v9916_v35  ;;  %v9920_v47 = vmul.f32 -1.442695, %v16124_v17 }
 0x937   : > { %v11840_v0 = vpop.eup %11839  ;;  %v7887_v1 = vadd.f32 1.0, %v11838_v57 }
 0x938   : > { %8037 = vrot.lane.b32.xlu1 %v11834_v29, %s12025_s24  ;;  %v10880_v28 = vpop.f32.mrb[188].mxu1  ;;  %8039 = vrot.lane.b32.xlu0 %v11840_v0, %s12025_s24  ;;  %v11842_v62 = vpop.eup %11841 }
 0x939   : > { %v16105_v23 = vadd.f32 %v10880_v28, %v17827_v20  ;;  %v7598_v4 = vpop.f32.mrb[189].mxu1  ;;  %11855 = vrcp.f32 %v7887_v1  ;;  %v11844_v24 = vpop.eup %11843  ;;  %v16136_v1 = vadd.f32 %v15938_v52, %v16067_v3  ;;  %v16144_v3 = vadd.f32 %v15938_v52, %v16079_v2 }
 0x93a   : > { %v16109_v11 = vadd.f32 %v7598_v4, %v17828_v49  ;;  %v10881_v19 = vpop.f32.mrb[190].mxu1  ;;  %v11846_v31 = vpop.eup %11845  ;;  %11857 = vrcp.f32 %v7889_v38  ;;  %v7890_v29 = vadd.f32 1.0, %v11844_v24  ;;  %v9923_v4 = vmul.f32 -1.442695, %v16132_v30 }
 0x93b   : > { %v16113_v22 = vadd.f32 %v10881_v19, %v17829_v33  ;;  %v7601_v13 = vpop.f32.mrb[191].mxu1  ;;  %v7888_v56 = vadd.f32 1.0, %v11846_v31  ;;  %11859 = vpow2.f32 %v9919_v14  ;;  %v9921_v14 = vmul.f32 -1.442695, %v16136_v1 }
 0x93c   : > { %v16120_v50 = vadd.f32 %v7601_v13, %v17830_v34  ;;  %8043 = vrot.lane.b32.xlu0 %v11842_v62, %s12025_s24  ;;  %11861 = vpow2.f32 %v9917_v54  ;;  %v16148_v62 = vadd.f32 %v15938_v52, %v16083_v15  ;;  %v9926_v24 = vmul.f32 -1.442695, %v16144_v3 }
 0x93d   : > { %v11848_v18 = vpop.eup %11847  ;;  %11863 = vrcp.f32 %v7888_v56  ;;  %v16156_v15 = vadd.f32 %v15938_v52, %v16086_v7  ;;  %v16160_v56 = vadd.f32 %v15938_v52, %v16091_v16  ;;  %v16168_v16 = vadd.f32 %v15938_v52, %v16105_v23 }
 0x93e   : > { %8041 = vrot.lane.b32.xlu1 %v11848_v18, %s12025_s24  ;;  %v11850_v35 = vpop.eup %11849  ;;  %11865 = vrcp.f32 %v7890_v29  ;;  %v9924_v34 = vmul.f32 -1.442695, %v16148_v62 }
 0x93f   : > { %v11852_v57 = vpop.eup %11851  ;;  %11867 = vpow2.f32 %v9922_v10 }
 0x940   : > { %v11854_v0 = vpop.eup %11853  ;;  %v7893_v20 = vadd.f32 1.0, %v11852_v57  ;;  %11869 = vpow2.f32 %v9920_v47  ;;  %v9927_v47 = vmul.f32 -1.442695, %v16156_v15  ;;  %v9925_v57 = vmul.f32 -1.442695, %v16160_v56 }
 0x941   : > { %v7891_v38 = vadd.f32 1.0, %v11854_v0 }
 0x942   : > { %8045 = vrot.lane.b32.xlu1 %v11850_v35, %s12025_s24 }
 0x943   : > { %v11856_v28 = vpop.eup %11855  ;;  %11871 = vrcp.f32 %v7891_v38  ;;  %v16172_v38 = vadd.f32 %v15938_v52, %v16109_v11  ;;  %v16180_v11 = vadd.f32 %v15938_v52, %v16113_v22 }
 0x944   : > { %8047 = vrot.lane.b32.xlu0 %v11856_v28, %s12025_s24  ;;  %v11858_v51 = vpop.eup %11857  ;;  %11873 = vrcp.f32 %v7893_v20 }
 0x945   : > { %v11860_v49 = vpop.eup %11859  ;;  %11875 = vpow2.f32 %v9923_v4 }
 0x946   : > { %v11862_v19 = vpop.eup %11861  ;;  %v7894_v13 = vadd.f32 1.0, %v11860_v49  ;;  %11877 = vpow2.f32 %v9921_v14  ;;  %v9930_v14 = vmul.f32 -1.442695, %v16168_v16  ;;  %v9928_v49 = vmul.f32 -1.442695, %v16172_v38 }
 0x947   : > { %v11864_v54 = vpop.eup %11863  ;;  %v7892_v33 = vadd.f32 1.0, %v11862_v19 }
 0x948   : > { %8051 = vrot.lane.b32.xlu0 %v11858_v51, %s12025_s24  ;;  %8049 = vrot.lane.b32.xlu1 %v11864_v54, %s12025_s24  ;;  %v11866_v2 = vpop.eup %11865 }
 0x949   : > { %11879 = vrcp.f32 %v7892_v33  ;;  %v11868_v31 = vpop.eup %11867  ;;  %v16184_v33 = vadd.f32 %v15938_v52, %v16120_v50 }
 0x94a   : > { %v11870_v18 = vpop.eup %11869  ;;  %11881 = vrcp.f32 %v7894_v13  ;;  %v7897_v35 = vadd.f32 1.0, %v11868_v31 }
 0x94b   : > { %v7895_v10 = vadd.f32 1.0, %v11870_v18  ;;  %11883 = vpow2.f32 %v9926_v24  ;;  %v9929_v31 = vmul.f32 -1.442695, %v16184_v33 }
 0x94c   : > { %8053 = vrot.lane.b32.xlu1 %v11866_v2, %s12025_s24  ;;  %11885 = vpow2.f32 %v9924_v34  ;;  %v9931_v34 = vmul.f32 -1.442695, %v16180_v11 }
 0x94d   : > { %v11872_v29 = vpop.eup %11871  ;;  %11887 = vrcp.f32 %v7895_v10 }
 0x94e   : > { %8055 = vrot.lane.b32.xlu0 %v11872_v29, %s12025_s24  ;;  %v11874_v7 = vpop.eup %11873  ;;  %11889 = vrcp.f32 %v7897_v35 }
 0x94f   : > { %v11876_v0 = vpop.eup %11875  ;;  %11891 = vpow2.f32 %v9927_v47 }
 0x950   : > { %v11878_v28 = vpop.eup %11877  ;;  %v7898_v51 = vadd.f32 1.0, %v11876_v0  ;;  %11893 = vpow2.f32 %v9925_v57 }
 0x951   : > { %v7896_v4 = vadd.f32 1.0, %v11878_v28 }
 0x952   : > { %8059 = vrot.lane.b32.xlu0 %v11874_v7, %s12025_s24 }
 0x953   : > { %v11880_v20 = vpop.eup %11879  ;;  %11895 = vrcp.f32 %v7896_v4 }
 0x954   : > { %8057 = vrot.lane.b32.xlu1 %v11880_v20, %s12025_s24  ;;  %v11882_v23 = vpop.eup %11881  ;;  %11897 = vrcp.f32 %v7898_v51 }
 0x955   : > { %v11884_v19 = vpop.eup %11883  ;;  %11899 = vpow2.f32 %v9930_v14 }
 0x956   : > { %v11886_v54 = vpop.eup %11885  ;;  %v7901_v2 = vadd.f32 1.0, %v11884_v19  ;;  %11901 = vpow2.f32 %v9928_v49 }
 0x957   : > { %v11888_v13 = vpop.eup %11887  ;;  %v7899_v24 = vadd.f32 1.0, %v11886_v54 }
 0x958   : > { %8061 = vrot.lane.b32.xlu1 %v11882_v23, %s12025_s24  ;;  %8063 = vrot.lane.b32.xlu0 %v11888_v13, %s12025_s24  ;;  %v11890_v22 = vpop.eup %11889 }
 0x959   : > { %11903 = vrcp.f32 %v7899_v24  ;;  %v11892_v18 = vpop.eup %11891 }
 0x95a   : > { %v11894_v29 = vpop.eup %11893  ;;  %11905 = vrcp.f32 %v7901_v2  ;;  %v7902_v10 = vadd.f32 1.0, %v11892_v18 }
 0x95b   : > { %v7900_v50 = vadd.f32 1.0, %v11894_v29  ;;  %11907 = vpow2.f32 %v9931_v34 }
 0x95c   : > { %8067 = vrot.lane.b32.xlu0 %v11890_v22, %s12025_s24  ;;  %11909 = vpow2.f32 %v9929_v31 }
 0x95d   : > { %v11896_v52 = vpop.eup %11895  ;;  %11911 = vrcp.f32 %v7900_v50 }
 0x95e   : > { %8065 = vrot.lane.b32.xlu1 %v11896_v52, %s12025_s24  ;;  %v11898_v35 = vpop.eup %11897  ;;  %11913 = vrcp.f32 %v7902_v10 }
 0x95f   : > { %v11900_v47 = vpop.eup %11899 }
 0x960   : > { %v11902_v7 = vpop.eup %11901  ;;  %v7905_v28 = vadd.f32 1.0, %v11900_v47 }
 0x961   : > { %v7903_v0 = vadd.f32 1.0, %v11902_v7 }
 0x962   : > { %8069 = vrot.lane.b32.xlu1 %v11898_v35, %s12025_s24 }
 0x963   : > { %v11904_v57 = vpop.eup %11903  ;;  %11915 = vrcp.f32 %v7903_v0 }
 0x964   : > { %8071 = vrot.lane.b32.xlu0 %v11904_v57, %s12025_s24  ;;  %v11906_v20 = vpop.eup %11905  ;;  %11917 = vrcp.f32 %v7905_v28 }
 0x965   : > { %v11908_v4 = vpop.eup %11907 }
 0x966   : > { %v11910_v51 = vpop.eup %11909  ;;  %v7906_v49 = vadd.f32 1.0, %v11908_v4 }
 0x967   : > { %v11912_v14 = vpop.eup %11911  ;;  %v7904_v23 = vadd.f32 1.0, %v11910_v51 }
 0x968   : > { %8075 = vrot.lane.b32.xlu0 %v11906_v20, %s12025_s24  ;;  %8073 = vrot.lane.b32.xlu1 %v11912_v14, %s12025_s24  ;;  %v11914_v19 = vpop.eup %11913 }
 0x969   : > { %11919 = vrcp.f32 %v7904_v23 }
 0x96a   : > { %11921 = vrcp.f32 %v7906_v49 }
 0x96b   : > { %11923 = vtanh.f32 %v15947_v32 }
 0x96c   : > { %8077 = vrot.lane.b32.xlu1 %v11914_v19, %s12025_s24  ;;  %11925 = vtanh.f32 %v15956_v45 }
 0x96d   : > { %v11916_v54 = vpop.eup %11915  ;;  %11927 = vtanh.f32 %v15943_v63 }
 0x96e   : > { %8079 = vrot.lane.b32.xlu0 %v11916_v54, %s12025_s24  ;;  %v11918_v13 = vpop.eup %11917  ;;  %11929 = vtanh.f32 %v15952_v48 }
 0x96f   : > { %11931 = vtanh.f32 %v15970_v40 }
 0x970   : > { %11933 = vtanh.f32 %v15979_v42 }
 0x971   : > { %11935 = vtanh.f32 %v15966_v44 }
 0x972   : > { %8083 = vrot.lane.b32.xlu0 %v11918_v13, %s12025_s24  ;;  %11937 = vtanh.f32 %v15975_v25 }
 0x973   : > { %v11920_v24 = vpop.eup %11919  ;;  %11939 = vtanh.f32 %v15991_v5 }
 0x974   : > { %8081 = vrot.lane.b32.xlu1 %v11920_v24, %s12025_s24  ;;  %v11922_v2 = vpop.eup %11921  ;;  %11941 = vtanh.f32 %v16002_v55 }
 0x975   : > { %v11924_v22 = vpop.eup %11923  ;;  %11943 = vtanh.f32 %v15987_v59 }
 0x976   : > { %v11926_v31 = vpop.eup %11925  ;;  %11945 = vtanh.f32 %v15997_v6 }
 0x977   : > { %v11928_v10 = vpop.eup %11927  ;;  %11947 = vtanh.f32 %v16012_v61 }
 0x978   : > { %8085 = vrot.lane.b32.xlu1 %v11922_v2, %s12025_s24  ;;  %v11930_v45 = vpop.eup %11929  ;;  %11949 = vtanh.f32 %v16026_v53 }
 0x979   : > { %v11932_v7 = vpop.eup %11931  ;;  %11951 = vtanh.f32 %v16008_v26 }
 0x97a   : > { %v11934_v42 = vpop.eup %11933  ;;  %11953 = vtanh.f32 %v16023_v60 }
 0x97b   : > { %v11936_v44 = vpop.eup %11935  ;;  %11955 = vtanh.f32 %v16045_v36 }
 0x97c   : > { %v11938_v25 = vpop.eup %11937  ;;  %11957 = vtanh.f32 %v16061_v39 }
 0x97d   : > { %v11940_v54 = vpop.eup %11939  ;;  %11959 = vtanh.f32 %v16038_v46 }
 0x97e   : > { %v11942_v13 = vpop.eup %11941  ;;  %11961 = vtanh.f32 %v16054_v21 }
 0x97f   : > { %11963 = vtanh.f32 %v16076_v12 }
 0x980   : > { %11965 = vtanh.f32 %v16100_v41 }
 0x981   : > { %11967 = vtanh.f32 %v16073_v27 }
 0x982   : > { %11969 = vtanh.f32 %v16096_v58 }
 0x983   : > { %11971 = vtanh.f32 %v16124_v17 }
 0x984   : > { %11973 = vtanh.f32 %v16136_v1 }
 0x98a   : > { %v8016_v34 = vpop.permute.xlu0 %8015 }
 0x98b   : > { %v8123_v52 = vmul.f32 %v11924_v22, %v8016_v34  ;;  %v11944_v34 = vpop.eup %11943  ;;  %11975 = vtanh.f32 %v16117_v43 }
 0x98d   : > { %v8018_v18 = vpop.permute.xlu1 %8017 }
 0x98e   : > { %v8020_v29 = vpop.permute.xlu0 %8019  ;;  %v8124_v50 = vmul.f32 %v11926_v31, %v8018_v18  ;;  %v11946_v31 = vpop.eup %11945  ;;  %11977 = vtanh.f32 %v16132_v30 }
 0x98f   : > { %v8125_v48 = vmul.f32 %v11928_v10, %v8020_v29  ;;  %v11948_v53 = vpop.eup %11947  ;;  %11979 = vtanh.f32 %v16148_v62 }
 0x990   : > { %v8159_v32 = vpack.c.bf16 %v8124_v50, %v8123_v52  ;;  %v11950_v52 = vpop.eup %11949  ;;  %11981 = vtanh.f32 %v16160_v56 }
 0x991   : > { %v8022_v63 = vpop.permute.xlu1 %8021 }
 0x992   : > { %v8126_v35 = vmul.f32 %v11930_v45, %v8022_v63  ;;  %10886 = vmatprep.mubr.msk.bf16.mxu0 %vm2538_vm15, %v8159_v32  ;;  %v8024_v40 = vpop.permute.xlu0 %8023  ;;  %v11952_v45 = vpop.eup %11951  ;;  %11983 = vtanh.f32 %v16144_v3 }
 0x993   : > { %v8127_v0 = vmul.f32 %v11932_v7, %v8024_v40  ;;  %v11954_v63 = vpop.eup %11953  ;;  %11985 = vtanh.f32 %v16156_v15 }
 0x994   : > { %v8160_v47 = vpack.c.bf16 %v8126_v35, %v8125_v48  ;;  %v11956_v36 = vpop.eup %11955  ;;  %11987 = vtanh.f32 %v16172_v38 }
 0x996   : > { %10887 = vmatmul.mubr.msk.bf16.vlgmr.msra.gmra.mrb[108].mxu0 %vm2538_vm15, %v8160_v47  ;;  %v8028_v20 = vpop.permute.xlu0 %8027 }
 0x997   : > { %v8129_v14 = vmul.f32 %v11936_v44, %v8028_v20 }
 0x998   : > { %v8026_v57 = vpop.permute.xlu1 %8025 }
 0x999   : > { %v8128_v28 = vmul.f32 %v11934_v42, %v8026_v57  ;;  %v11958_v42 = vpop.eup %11957  ;;  %11989 = vtanh.f32 %v16184_v33 }
 0x99b   : > { %v8161_v4 = vpack.c.bf16 %v8128_v28, %v8127_v0  ;;  %v11960_v28 = vpop.eup %11959  ;;  %11991 = vtanh.f32 %v16168_v16 }
 0x99c   : > { %v8030_v51 = vpop.permute.xlu1 %8029  ;;  %v11962_v44 = vpop.eup %11961  ;;  %11993 = vtanh.f32 %v16180_v11  ;;  %v11343_v11 = vld [vmem:[%s16635_s10] sm:$0xff]  }
 0x99d   : > { %v8130_v23 = vmul.f32 %v11938_v25, %v8030_v51  ;;  %10890 = vmatprep.mubr.msk.bf16.mxu0 %vm2538_vm15, %v8161_v4  ;;  %v11964_v12 = vpop.eup %11963  ;;  %10922 = vmatprep.subr.bf16.mxu0 %v11343_v11 }
 0x99e   : > { %10923 = vmatpush3.bf16.msra.mxu0 %v11343_v11  ;;  %v17847_v11 = vld [vmem:[#allocation23_spill] sm:$0xff] }
 0x99f   : > { %v8162_v49 = vpack.c.bf16 %v8130_v23, %v8129_v14  ;;  %v11966_v23 = vpop.eup %11965 }
 0x9a0   : > { %v8032_v19 = vpop.permute.xlu0 %8031 }
 0x9a1   : > { %10891 = vmatmul.mubr.msk.bf16.gmra.mrb[112].mxu0 %vm2538_vm15, %v8162_v49  ;;  %v8131_v55 = vmul.f32 %v11940_v54, %v8032_v19  ;;  %v11968_v54 = vpop.eup %11967 }
 0x9a4   : > { %v8036_v2 = vpop.permute.xlu0 %8035 }
 0x9a5   : > { %v8133_v6 = vmul.f32 %v11944_v34, %v8036_v2 }
 0x9a6   : > { %v8034_v5 = vpop.permute.xlu1 %8033 }
 0x9a7   : > { %v8132_v24 = vmul.f32 %v11942_v13, %v8034_v5  ;;  %v11970_v5 = vpop.eup %11969 }
 0x9a8   : > { %v11972_v17 = vpop.eup %11971 }
 0x9a9   : > { %v8163_v22 = vpack.c.bf16 %v8132_v24, %v8131_v55 }
 0x9aa   : > { %v8038_v59 = vpop.permute.xlu1 %8037  ;;  %v8040_v61 = vpop.permute.xlu0 %8039 }
 0x9ab   : > { %v8134_v18 = vmul.f32 %v11946_v31, %v8038_v59  ;;  %10894 = vmatprep.mubr.msk.bf16.mxu0 %vm2538_vm15, %v8163_v22  ;;  %v8135_v10 = vmul.f32 %v11948_v53, %v8040_v61  ;;  %v11974_v22 = vpop.eup %11973 }
 0x9ad   : > { %v8164_v29 = vpack.c.bf16 %v8134_v18, %v8133_v6  ;;  %v11976_v6 = vpop.eup %11975 }
 0x9ae   : > { %v8044_v26 = vpop.permute.xlu0 %8043 }
 0x9af   : > { %10895 = vmatmul.mubr.msk.bf16.gmra.mrb[116].mxu0 %vm2538_vm15, %v8164_v29  ;;  %v8137_v35 = vmul.f32 %v11952_v45, %v8044_v26  ;;  %v11978_v29 = vpop.eup %11977 }
 0x9b0   : > { %v8042_v50 = vpop.permute.xlu1 %8041  ;;  %v11980_v62 = vpop.eup %11979 }
 0x9b1   : > { %v8136_v32 = vmul.f32 %v11950_v52, %v8042_v50 }
 0x9b3   : > { %v8165_v60 = vpack.c.bf16 %v8136_v32, %v8135_v10  ;;  %v11982_v10 = vpop.eup %11981 }
 0x9b4   : > { %v8046_v48 = vpop.permute.xlu1 %8045  ;;  %v11984_v45 = vpop.eup %11983 }
 0x9b5   : > { %v8138_v40 = vmul.f32 %v11954_v63, %v8046_v48  ;;  %10898 = vmatprep.mubr.msk.bf16.mxu0 %vm2538_vm15, %v8165_v60  ;;  %v11986_v63 = vpop.eup %11985 }
 0x9b6   : > { %v8048_v7 = vpop.permute.xlu0 %8047  ;;  %v11988_v38 = vpop.eup %11987 }
 0x9b7   : > { %v8166_v47 = vpack.c.bf16 %v8138_v40, %v8137_v35  ;;  %v8139_v57 = vmul.f32 %v11956_v36, %v8048_v7  ;;  %v11990_v7 = vpop.eup %11989 }
 0x9b9   : > { %10899 = vmatmul.mubr.msk.bf16.gmra.mrb[120].mxu0 %vm2538_vm15, %v8166_v47 }
 0x9ba   : > { %v8050_v39 = vpop.permute.xlu1 %8049  ;;  %v8052_v46 = vpop.permute.xlu0 %8051 }
 0x9bb   : > { %v8140_v0 = vmul.f32 %v11958_v42, %v8050_v39  ;;  %v8141_v21 = vmul.f32 %v11960_v28, %v8052_v46 }
 0x9bd   : > { %v8167_v20 = vpack.c.bf16 %v8140_v0, %v8139_v57  ;;  %v11992_v57 = vpop.eup %11991 }
 0x9be   : > { %v8054_v4 = vpop.permute.xlu1 %8053  ;;  %v11994_v46 = vpop.eup %11993 }
 0x9bf   : > { %v8142_v25 = vmul.f32 %v11962_v44, %v8054_v4  ;;  %10902 = vmatprep.mubr.msk.bf16.mxu0 %vm2538_vm15, %v8167_v20  ;;  %v11344_v4 = vld [vmem:[%s16635_s10 + $0x8] sm:$0xff]  }
 0x9c0   : > { %v8056_v14 = vpop.permute.xlu0 %8055  ;;  %10924 = vmatprep.subr.bf16.mxu0 %v11344_v4 }
 0x9c1   : > { %v8168_v51 = vpack.c.bf16 %v8142_v25, %v8141_v21  ;;  %v8143_v49 = vmul.f32 %v11964_v12, %v8056_v14  ;;  %10925 = vmatpush3.bf16.msra.mxu0 %v11344_v4  ;;  %v16264_v21 = vld [vmem:[%s16634_s9 + $0x2] ss:$0 sm:$0xff]  ;;  %v17848_v4 = vld [vmem:[#allocation72_spill] sm:$0xff] }
 0x9c2   : > { %v17832_v14 = vld [vmem:[#allocation15_spill] sm:$0xff] }
 0x9c3   : > { %10903 = vmatmul.mubr.msk.bf16.gmra.mrb[124].mxu0 %vm2538_vm15, %v8168_v51  ;;  %v17831_v51 = vld [vmem:[#allocation129_spill] sm:$0xff] }
 0x9c4   : > { %v8060_v27 = vpop.permute.xlu0 %8059  ;;  %v6615_v12 = vadd.f32 %v17832_v14, %v17831_v51 }
 0x9c5   : > { %v8145_v58 = vmul.f32 %v11968_v54, %v8060_v27  ;;  %v17834_v27 = vld [vmem:[#allocation20_spill] sm:$0xff] }
 0x9c6   : > { %v8058_v41 = vpop.permute.xlu1 %8057 }
 0x9c7   : > { %v8144_v19 = vmul.f32 %v11966_v23, %v8058_v41 }
 0x9c9   : > { %v8169_v13 = vpack.c.bf16 %v8144_v19, %v8143_v49  ;;  %v17833_v19 = vld [vmem:[#allocation5_spill] sm:$0xff] }
 0x9ca   : > { %v8062_v55 = vpop.permute.xlu1 %8061  ;;  %v8064_v34 = vpop.permute.xlu0 %8063  ;;  %v6616_v54 = vadd.f32 %v17834_v27, %v17833_v19 }
 0x9cb   : > { %v8146_v24 = vmul.f32 %v11970_v5, %v8062_v55  ;;  %10906 = vmatprep.mubr.msk.bf16.mxu0 %vm2538_vm15, %v8169_v13  ;;  %v8147_v31 = vmul.f32 %v11972_v17, %v8064_v34 }
 0x9cd   : > { %v8170_v2 = vpack.c.bf16 %v8146_v24, %v8145_v58  ;;  %v17835_v58 = vld [vmem:[#allocation7_spill] sm:$0xff] }
 0x9ce   : > { %v8068_v43 = vpop.permute.xlu0 %8067  ;;  %v17836_v24 = vld [vmem:[#allocation27_spill] sm:$0xff] }
 0x9cf   : > { %10907 = vmatmul.mubr.msk.bf16.gmra.mrb[128].mxu0 %vm2538_vm15, %v8170_v2  ;;  %v8149_v30 = vmul.f32 %v11976_v6, %v8068_v43  ;;  %v6614_v2 = vadd.f32 %v17836_v24, %v17835_v58  ;;  %v17837_v6 = vld [vmem:[#allocation16_spill] sm:$0xff] }
 0x9d0   : > { %v8066_v1 = vpop.permute.xlu1 %8065 }
 0x9d1   : > { %v8148_v59 = vmul.f32 %v11974_v22, %v8066_v1 }
 0x9d3   : > { %v8171_v18 = vpack.c.bf16 %v8148_v59, %v8147_v31 }
 0x9d4   : > { %v8070_v61 = vpop.permute.xlu1 %8069 }
 0x9d5   : > { %v8150_v53 = vmul.f32 %v11978_v29, %v8070_v61  ;;  %10910 = vmatprep.mubr.msk.bf16.mxu0 %vm2538_vm15, %v8171_v18  ;;  %v17838_v18 = vld [vmem:[#allocation25_spill] sm:$0xff] }
 0x9d6   : > { %v8072_v50 = vpop.permute.xlu0 %8071  ;;  %v6619_v29 = vadd.f32 %v17838_v18, %v17837_v6  ;;  %v17853_v6 = vld [vmem:[#allocation116_spill] sm:$0xff]  ;;  %v17854_v18 = vld [vmem:[#allocation82_spill] sm:$0xff] }
 0x9d7   : > { %v8172_v52 = vpack.c.bf16 %v8150_v53, %v8149_v30  ;;  %v8151_v32 = vmul.f32 %v11980_v62, %v8072_v50  ;;  %v17839_v53 = vld [vmem:[#allocation9_spill] sm:$0xff] }
 0x9d9   : > { %10911 = vmatmul.mubr.msk.bf16.gmra.mrb[132].mxu0 %vm2538_vm15, %v8172_v52  ;;  %v17840_v52 = vld [vmem:[#allocation38_spill] sm:$0xff] }
 0x9da   : > { %v8074_v56 = vpop.permute.xlu1 %8073  ;;  %v8076_v3 = vpop.permute.xlu0 %8075  ;;  %v6617_v50 = vadd.f32 %v17840_v52, %v17839_v53  ;;  %v17855_v53 = vld [vmem:[#allocation122_spill] sm:$0xff]  ;;  %v17856_v52 = vld [vmem:[#allocation96_spill] sm:$0xff] }
 0x9db   : > { %v8152_v26 = vmul.f32 %v11982_v10, %v8074_v56  ;;  %v8153_v15 = vmul.f32 %v11984_v45, %v8076_v3  ;;  %v17841_v56 = vld [vmem:[#allocation18_spill] sm:$0xff] }
 0x9dd   : > { %v8173_v60 = vpack.c.bf16 %v8152_v26, %v8151_v32  ;;  %v17842_v32 = vld [vmem:[#allocation29_spill] sm:$0xff] }
 0x9de   : > { %v8078_v48 = vpop.permute.xlu1 %8077  ;;  %v6620_v26 = vadd.f32 %v17842_v32, %v17841_v56  ;;  %v17857_v56 = vld [vmem:[#allocation67_spill] sm:$0xff]  ;;  %v17858_v32 = vld [vmem:[#allocation46_spill] sm:$0xff] }
 0x9df   : > { %v8154_v35 = vmul.f32 %v11986_v63, %v8078_v48  ;;  %10914 = vmatprep.mubr.msk.bf16.mxu0 %vm2538_vm15, %v8173_v60  ;;  %v17843_v63 = vld [vmem:[#allocation13_spill] sm:$0xff]  ;;  %v17844_v48 = vld [vmem:[#allocation90_spill] sm:$0xff] }
 0x9e0   : > { %v8080_v47 = vpop.permute.xlu0 %8079 }
 0x9e1   : > { %v8174_v40 = vpack.c.bf16 %v8154_v35, %v8153_v15  ;;  %v8155_v36 = vmul.f32 %v11988_v38, %v8080_v47  ;;  %v6618_v15 = vadd.f32 %v17844_v48, %v17843_v63  ;;  %v17859_v63 = vld [vmem:[#allocation74_spill] sm:$0xff]  ;;  %v17860_v48 = vld [vmem:[#allocation57_spill] sm:$0xff] }
 0x9e3   : > { %10915 = vmatmul.mubr.msk.bf16.gmra.mrb[136].mxu0 %vm2538_vm15, %v8174_v40 }
 0x9e4   : > { %v8084_v39 = vpop.permute.xlu0 %8083 }
 0x9e5   : > { %v8157_v28 = vmul.f32 %v11992_v57, %v8084_v39 }
 0x9e6   : > { %v8082_v33 = vpop.permute.xlu1 %8081 }
 0x9e7   : > { %v8156_v42 = vmul.f32 %v11990_v7, %v8082_v33 }
 0x9e9   : > { %v8175_v0 = vpack.c.bf16 %v8156_v42, %v8155_v36 }
 0x9ea   : > { %v8086_v16 = vpop.permute.xlu1 %8085 }
 0x9eb   : > { %v8158_v20 = vmul.f32 %v11994_v46, %v8086_v16  ;;  %10918 = vmatprep.mubr.msk.bf16.mxu0 %vm2538_vm15, %v8175_v0  ;;  %v17845_v46 = vld [vmem:[#allocation22_spill] sm:$0xff]  ;;  %v17846_v16 = vld [vmem:[#allocation61_spill] sm:$0xff] }
 0x9ed   : > { %v8176_v44 = vpack.c.bf16 %v8158_v20, %v8157_v28  ;;  %v6623_v28 = vadd.f32 %v17846_v16, %v17845_v46  ;;  %v17861_v16 = vld [vmem:[#allocation94_spill] sm:$0xff] }
 0x9ef   : > { %10919 = vmatmul.mubr.msk.bf16.gmra.mrb[140].mxu0 %vm2538_vm15, %v8176_v44 }
 0xa69   : > { %v10888_v25 = vpop.f32.mrb[108].mxu0 }
 0xa6a   : > { %v8423_v23 = vadd.f32 %v10888_v25, %v16264_v21  ;;  %v8277_v41 = vpop.f32.mrb[109].mxu0  ;;  %v6621_v25 = vadd.f32 %v17848_v4, %v17847_v11  ;;  %v17863_v4 = vld [vmem:[#allocation106_spill] sm:$0xff] }
 0xa6b   : > { %v10889_v49 = vpop.f32.mrb[110].mxu0 }
 0xa6c   : > { %v8455_v13 = vadd.f32 %v8423_v23, %v6615_v12  ;;  %v8424_v5 = vadd.f32 %v10889_v49, %v16264_v21  ;;  %v8279_v55 = vpop.f32.mrb[111].mxu0  ;;  %v17849_v12 = vld [vmem:[#allocation42_spill] sm:$0xff] }
 0xa6d   : > { %v8422_v34 = vadd.f32 %v16264_v21, %v8279_v55  ;;  %v17850_v23 = vld [vmem:[#allocation98_spill] sm:$0xff] }
 0xa6e   : > { %v8456_v17 = vadd.f32 %v8424_v5, %v6616_v54  ;;  %v8487_v1 = vmax.f32 %v8455_v13, 0.0  ;;  %v6624_v41 = vadd.f32 %v17850_v23, %v17849_v12  ;;  %v17851_v54 = vld [vmem:[#allocation53_spill] sm:$0xff]  ;;  %v17852_v13 = vld [vmem:[#allocation114_spill] sm:$0xff] }
 0xa6f   : > { %v8454_v22 = vadd.f32 %v8422_v34, %v6614_v2  ;;  %v6622_v5 = vadd.f32 %v17852_v13, %v17851_v54  ;;  %v17865_v13 = vld [vmem:[#allocation130_spill] sm:$0xff] }
 0xa70   : > { %v8488_v38 = vmax.f32 %v8456_v17, 0.0 }
 0xa71   : > { %v8486_v31 = vmax.f32 %v8454_v22, 0.0 }
 0xa73   : > { %v8518_v59 = vpack.c.bf16 %v8487_v1, %v8486_v31 }
 0xa74   : > { %v10892_v43 = vpop.f32.mrb[112].mxu0 }
 0xa75   : > { %v8427_v61 = vadd.f32 %v10892_v43, %v16264_v21  ;;  %v8292_v30 = vpop.f32.mrb[113].mxu0  ;;  %8550 = vrot.lane.b32.xlu0 %v8518_v59, %s12025_s24 }
 0xa76   : > { %v8425_v62 = vadd.f32 %v16264_v21, %v8292_v30  ;;  %v10893_v10 = vpop.f32.mrb[114].mxu0 }
 0xa77   : > { %v8459_v3 = vadd.f32 %v8427_v61, %v6619_v29  ;;  %v8428_v45 = vadd.f32 %v10893_v10, %v16264_v21  ;;  %v8295_v60 = vpop.f32.mrb[115].mxu0  ;;  %v6627_v29 = vadd.f32 %v17854_v18, %v17853_v6 }
 0xa78   : > { %v8457_v35 = vadd.f32 %v8425_v62, %v6617_v50  ;;  %v8426_v40 = vadd.f32 %v16264_v21, %v8295_v60  ;;  %v6625_v50 = vadd.f32 %v17856_v52, %v17855_v53 }
 0xa79   : > { %v8460_v47 = vadd.f32 %v8428_v45, %v6620_v26  ;;  %v8491_v36 = vmax.f32 %v8459_v3, 0.0  ;;  %v6628_v26 = vadd.f32 %v17858_v32, %v17857_v56 }
 0xa7a   : > { %v8489_v7 = vmax.f32 %v8457_v35, 0.0  ;;  %v8458_v33 = vadd.f32 %v8426_v40, %v6618_v15  ;;  %v6626_v15 = vadd.f32 %v17860_v48, %v17859_v63  ;;  %v17873_v48 = vld [vmem:[#allocation69_spill] sm:$0xff] }
 0xa7b   : > { %v8492_v2 = vmax.f32 %v8460_v47, 0.0 }
 0xa7c   : > { %v8519_v42 = vpack.c.bf16 %v8489_v7, %v8488_v38  ;;  %v8490_v39 = vmax.f32 %v8458_v33, 0.0 }
 0xa7e   : > { %v8520_v57 = vpack.c.bf16 %v8491_v36, %v8490_v39  ;;  %8552 = vrot.lane.b32.xlu1 %v8519_v42, %s12025_s24 }
 0xa80   : > { %8554 = vrot.lane.b32.xlu0 %v8520_v57, %s12025_s24 }
 0xa82   : > { %v10896_v0 = vpop.f32.mrb[116].mxu0 }
 0xa83   : > { %v8431_v20 = vadd.f32 %v10896_v0, %v16264_v21  ;;  %v8308_v44 = vpop.f32.mrb[117].mxu0 }
 0xa84   : > { %v8429_v51 = vadd.f32 %v16264_v21, %v8308_v44  ;;  %v10897_v14 = vpop.f32.mrb[118].mxu0 }
 0xa85   : > { %v8463_v49 = vadd.f32 %v8431_v20, %v6623_v28  ;;  %v8432_v19 = vadd.f32 %v10897_v14, %v16264_v21  ;;  %v8311_v27 = vpop.f32.mrb[119].mxu0  ;;  %v17862_v28 = vld [vmem:[#allocation92_spill] sm:$0xff] }
 0xa86   : > { %v8461_v55 = vadd.f32 %v8429_v51, %v6621_v25  ;;  %v8430_v58 = vadd.f32 %v16264_v21, %v8311_v27  ;;  %v6629_v20 = vadd.f32 %v17862_v28, %v17861_v16  ;;  %v17864_v25 = vld [vmem:[#allocation31_spill] sm:$0xff] }
 0xa87   : > { %v8464_v24 = vadd.f32 %v8432_v19, %v6624_v41  ;;  %v8495_v22 = vmax.f32 %v8463_v49, 0.0  ;;  %v6630_v51 = vadd.f32 %v17864_v25, %v17863_v4 }
 0xa88   : > { %v8493_v34 = vmax.f32 %v8461_v55, 0.0  ;;  %v8462_v17 = vadd.f32 %v8430_v58, %v6622_v5  ;;  %v17866_v5 = vld [vmem:[#allocation64_spill] sm:$0xff] }
 0xa89   : > { %v8496_v38 = vmax.f32 %v8464_v24, 0.0  ;;  %v6633_v55 = vadd.f32 %v17866_v5, %v17865_v13  ;;  %v17881_v13 = vld [vmem:[#allocation102_spill] sm:$0xff] }
 0xa8a   : > { %v8521_v1 = vpack.c.bf16 %v8493_v34, %v8492_v2  ;;  %v8494_v31 = vmax.f32 %v8462_v17, 0.0  ;;  %v17867_v2 = vld [vmem:[#allocation135_spill] sm:$0xff]  ;;  %v17868_v34 = vld [vmem:[#allocation62_spill] sm:$0xff] }
 0xa8b   : > { %v6631_v17 = vadd.f32 %v17868_v34, %v17867_v2  ;;  %v17882_v5 = vld [vmem:[#allocation66_spill] sm:$0xff]  ;;  %v17883_v2 = vld [vmem:[#allocation103_spill] sm:$0xff]  ;;  %v17884_v34 = vld [vmem:[#allocation93_spill] sm:$0xff] }
 0xa8c   : > { %v8522_v59 = vpack.c.bf16 %v8495_v22, %v8494_v31  ;;  %8556 = vrot.lane.b32.xlu1 %v8521_v1, %s12025_s24  ;;  %v10900_v43 = vpop.f32.mrb[120].mxu0  ;;  %v17869_v31 = vld [vmem:[#allocation139_spill] sm:$0xff] }
 0xa8d   : > { %v8435_v61 = vadd.f32 %v10900_v43, %v16264_v21  ;;  %v8324_v30 = vpop.f32.mrb[121].mxu0 }
 0xa8e   : > { %8558 = vrot.lane.b32.xlu0 %v8522_v59, %s12025_s24  ;;  %v8433_v62 = vadd.f32 %v16264_v21, %v8324_v30  ;;  %v10901_v10 = vpop.f32.mrb[122].mxu0  ;;  %v17870_v59 = vld [vmem:[#allocation84_spill] sm:$0xff]  ;;  %v17872_v30 = vld [vmem:[#allocation49_spill] sm:$0xff] }
 0xa8f   : > { %v8467_v3 = vadd.f32 %v8435_v61, %v6627_v29  ;;  %v8436_v45 = vadd.f32 %v10901_v10, %v16264_v21  ;;  %v8327_v60 = vpop.f32.mrb[123].mxu0  ;;  %v6634_v43 = vadd.f32 %v17870_v59, %v17869_v31  ;;  %v17871_v61 = vld [vmem:[#allocation40_spill] sm:$0xff]  ;;  %v17886_v59 = vld [vmem:[#allocation117_spill] sm:$0xff] }
 0xa90   : > { %v8465_v35 = vadd.f32 %v8433_v62, %v6625_v50  ;;  %v8434_v40 = vadd.f32 %v16264_v21, %v8327_v60  ;;  %v6632_v53 = vadd.f32 %v17872_v30, %v17871_v61  ;;  %v17885_v31 = vld [vmem:[#allocation104_spill] sm:$0xff]  ;;  %v17887_v61 = vld [vmem:[#allocation109_spill] sm:$0xff]  ;;  %v17888_v30 = vld [vmem:[#allocation118_spill] sm:$0xff] }
 0xa91   : > { %v8468_v47 = vadd.f32 %v8436_v45, %v6628_v26  ;;  %v8499_v36 = vmax.f32 %v8467_v3, 0.0 }
 0xa92   : > { %v8497_v7 = vmax.f32 %v8465_v35, 0.0  ;;  %v8466_v33 = vadd.f32 %v8434_v40, %v6626_v15  ;;  %v17874_v15 = vld [vmem:[#allocation124_spill] sm:$0xff] }
 0xa93   : > { %v8500_v49 = vmax.f32 %v8468_v47, 0.0  ;;  %v6637_v35 = vadd.f32 %v17874_v15, %v17873_v48  ;;  %v17889_v15 = vld [vmem:[#allocation141_spill] sm:$0xff] }
 0xa94   : > { %v8523_v42 = vpack.c.bf16 %v8497_v7, %v8496_v38  ;;  %v8498_v39 = vmax.f32 %v8466_v33, 0.0  ;;  %v17875_v38 = vld [vmem:[#allocation70_spill] sm:$0xff]  ;;  %v17876_v7 = vld [vmem:[#allocation137_spill] sm:$0xff] }
 0xa95   : > { %v6635_v33 = vadd.f32 %v17876_v7, %v17875_v38  ;;  %v17891_v7 = vld [vmem:[#allocation142_spill] sm:$0xff] }
 0xa96   : > { %v8524_v57 = vpack.c.bf16 %v8499_v36, %v8498_v39  ;;  %8560 = vrot.lane.b32.xlu1 %v8523_v42, %s12025_s24  ;;  %v10904_v0 = vpop.f32.mrb[124].mxu0  ;;  %v17877_v39 = vld [vmem:[#allocation71_spill] sm:$0xff] }
 0xa97   : > { %v8340_v46 = vpop.f32.mrb[125].mxu0 }
 0xa98   : > { %8562 = vrot.lane.b32.xlu0 %v8524_v57, %s12025_s24  ;;  %v8437_v44 = vadd.f32 %v16264_v21, %v8340_v46  ;;  %v10905_v11 = vpop.f32.mrb[126].mxu0  ;;  %v17878_v57 = vld [vmem:[#allocation50_spill] sm:$0xff] }
 0xa99   : > { %v8438_v14 = vadd.f32 %v10905_v11, %v16264_v21  ;;  %v8343_v12 = vpop.f32.mrb[127].mxu0  ;;  %v6638_v0 = vadd.f32 %v17878_v57, %v17877_v39 }
 0xa9a   : > { %v8469_v23 = vadd.f32 %v8437_v44, %v6629_v20  ;;  %v17879_v20 = vld [vmem:[#allocation76_spill] sm:$0xff]  ;;  %v17880_v44 = vld [vmem:[#allocation58_spill] sm:$0xff] }
 0xa9b   : > { %v8470_v41 = vadd.f32 %v8438_v14, %v6630_v51  ;;  %v6636_v11 = vadd.f32 %v17880_v44, %v17879_v20 }
 0xa9c   : > { %v8501_v19 = vmax.f32 %v8469_v23, 0.0 }
 0xa9d   : > { %v8502_v10 = vmax.f32 %v8470_v41, 0.0 }
 0xa9e   : > { %v8525_v27 = vpack.c.bf16 %v8501_v19, %v8500_v49 }
 0xaa0   : > { %8564 = vrot.lane.b32.xlu1 %v8525_v27, %s12025_s24 }
 0xaa2   : > { %v10908_v54 = vpop.f32.mrb[128].mxu0 }
 0xaa3   : > { %v8441_v58 = vadd.f32 %v10908_v54, %v16264_v21  ;;  %v8354_v24 = vpop.f32.mrb[129].mxu0 }
 0xaa4   : > { %v8439_v22 = vadd.f32 %v16264_v21, %v8354_v24  ;;  %v10909_v1 = vpop.f32.mrb[130].mxu0 }
 0xaa5   : > { %v8473_v6 = vadd.f32 %v8441_v58, %v6633_v55  ;;  %v8442_v18 = vadd.f32 %v10909_v1, %v16264_v21  ;;  %v8357_v29 = vpop.f32.mrb[131].mxu0  ;;  %v6641_v55 = vadd.f32 %v17882_v5, %v17881_v13 }
 0xaa6   : > { %v8471_v52 = vadd.f32 %v8439_v22, %v6631_v17  ;;  %v8440_v50 = vadd.f32 %v16264_v21, %v8357_v29  ;;  %v6639_v17 = vadd.f32 %v17884_v34, %v17883_v2 }
 0xaa7   : > { %v8474_v62 = vadd.f32 %v8442_v18, %v6634_v43  ;;  %v8505_v26 = vmax.f32 %v8473_v6, 0.0  ;;  %v6642_v43 = vadd.f32 %v17886_v59, %v17885_v31 }
 0xaa8   : > { %v8503_v56 = vmax.f32 %v8471_v52, 0.0  ;;  %v8472_v32 = vadd.f32 %v8440_v50, %v6632_v53  ;;  %v6640_v53 = vadd.f32 %v17888_v30, %v17887_v61 }
 0xaa9   : > { %v8506_v14 = vmax.f32 %v8474_v62, 0.0 }
 0xaaa   : > { %v8526_v3 = vpack.c.bf16 %v8503_v56, %v8502_v10  ;;  %v8504_v45 = vmax.f32 %v8472_v32, 0.0 }
 0xaac   : > { %v8527_v60 = vpack.c.bf16 %v8505_v26, %v8504_v45  ;;  %8566 = vrot.lane.b32.xlu0 %v8526_v3, %s12025_s24  ;;  %v10912_v63 = vpop.f32.mrb[132].mxu0 }
 0xaad   : > { %v8445_v40 = vadd.f32 %v10912_v63, %v16264_v21  ;;  %v8370_v47 = vpop.f32.mrb[133].mxu0  ;;  %v11345_v63 = vld [vmem:[%s16637_s12] sm:$0xff]  }
 0xaae   : > { %8568 = vrot.lane.b32.xlu1 %v8527_v60, %s12025_s24  ;;  %v8443_v36 = vadd.f32 %v16264_v21, %v8370_v47  ;;  %v10913_v42 = vpop.f32.mrb[134].mxu0  ;;  %10958 = vmatprep.subr.bf16.mxu0 %v11345_v63 }
 0xaaf   : > { %v8477_v46 = vadd.f32 %v8445_v40, %v6637_v35  ;;  %v8446_v16 = vadd.f32 %v10913_v42, %v16264_v21  ;;  %v8373_v28 = vpop.f32.mrb[135].mxu0  ;;  %v17890_v35 = vld [vmem:[#allocation120_spill] sm:$0xff] }
 0xab0   : > { %v8475_v4 = vadd.f32 %v8443_v36, %v6635_v33  ;;  %v8444_v25 = vadd.f32 %v16264_v21, %v8373_v28  ;;  %v6645_v40 = vadd.f32 %v17890_v35, %v17889_v15  ;;  %v17892_v33 = vld [vmem:[#allocation144_spill] sm:$0xff] }
 0xab1   : > { %v8478_v51 = vadd.f32 %v8446_v16, %v6638_v0  ;;  %v8509_v41 = vmax.f32 %v8477_v46, 0.0  ;;  %v6643_v36 = vadd.f32 %v17892_v33, %v17891_v7  ;;  %v17893_v46 = vld [vmem:[#allocation125_spill] sm:$0xff] }
 0xab2   : > { %v8507_v12 = vmax.f32 %v8475_v4, 0.0  ;;  %v8476_v23 = vadd.f32 %v8444_v25, %v6636_v11  ;;  %v6644_v16 = vadd.f32 %v15776_v8, %v17893_v46  ;;  %v11346_v8 = vld [vmem:[%s16637_s12 + $0x8] sm:$0xff]  }
 0xab3   : > { %v8510_v10 = vmax.f32 %v8478_v51, 0.0 }
 0xab4   : > { %v8528_v49 = vpack.c.bf16 %v8507_v12, %v8506_v14  ;;  %v8508_v19 = vmax.f32 %v8476_v23, 0.0 }
 0xab6   : > { %v8529_v27 = vpack.c.bf16 %v8509_v41, %v8508_v19  ;;  %8570 = vrot.lane.b32.xlu0 %v8528_v49, %s12025_s24  ;;  %v10916_v54 = vpop.f32.mrb[136].mxu0 }
 0xab7   : > { %v8449_v58 = vadd.f32 %v10916_v54, %v16264_v21  ;;  %v8386_v24 = vpop.f32.mrb[137].mxu0 }
 0xab8   : > { %8572 = vrot.lane.b32.xlu1 %v8529_v27, %s12025_s24  ;;  %v8447_v22 = vadd.f32 %v16264_v21, %v8386_v24  ;;  %v10917_v1 = vpop.f32.mrb[138].mxu0 }
 0xab9   : > { %v8481_v6 = vadd.f32 %v8449_v58, %v6641_v55  ;;  %v8450_v18 = vadd.f32 %v10917_v1, %v16264_v21  ;;  %v8389_v29 = vpop.f32.mrb[139].mxu0  ;;  %v16403_v1 = vld [vmem:[%s16636_s11] ss:$0 sm:$0xff] }
 0xaba   : > { %v8479_v52 = vadd.f32 %v8447_v22, %v6639_v17  ;;  %v8448_v50 = vadd.f32 %v16264_v21, %v8389_v29 }
 0xabb   : > { %v8482_v62 = vadd.f32 %v8450_v18, %v6642_v43  ;;  %v8513_v26 = vmax.f32 %v8481_v6, 0.0 }
 0xabc   : > { %v8511_v56 = vmax.f32 %v8479_v52, 0.0  ;;  %v8480_v32 = vadd.f32 %v8448_v50, %v6640_v53 }
 0xabd   : > { %v8514_v44 = vmax.f32 %v8482_v62, 0.0 }
 0xabe   : > { %v8530_v3 = vpack.c.bf16 %v8511_v56, %v8510_v10  ;;  %v8512_v45 = vmax.f32 %v8480_v32, 0.0 }
 0xac0   : > { %v8531_v60 = vpack.c.bf16 %v8513_v26, %v8512_v45  ;;  %8574 = vrot.lane.b32.xlu0 %v8530_v3, %s12025_s24 }
 0xac2   : > { %v10920_v48 = vpop.f32.mrb[140].mxu0  ;;  %8576 = vrot.lane.b32.xlu1 %v8531_v60, %s12025_s24 }
 0xac3   : > { %v8453_v47 = vadd.f32 %v10920_v48, %v16264_v21  ;;  %v8402_v38 = vpop.f32.mrb[141].mxu0 }
 0xac4   : > { %v8451_v42 = vadd.f32 %v16264_v21, %v8402_v38  ;;  %v10921_v39 = vpop.f32.mrb[142].mxu0 }
 0xac5   : > { %v8485_v57 = vadd.f32 %v8453_v47, %v6645_v40  ;;  %v8405_v0 = vpop.f32.mrb[143].mxu0 }
 0xac6   : > { %v8483_v28 = vadd.f32 %v8451_v42, %v6643_v36  ;;  %v8452_v20 = vadd.f32 %v16264_v21, %v8405_v0 }
 0xac7   : > { %v8517_v25 = vmax.f32 %v8485_v57, 0.0 }
 0xac8   : > { %v8515_v11 = vmax.f32 %v8483_v28, 0.0  ;;  %v8484_v4 = vadd.f32 %v8452_v20, %v6644_v16 }
 0xaca   : > { %v8532_v51 = vpack.c.bf16 %v8515_v11, %v8514_v44  ;;  %v8516_v14 = vmax.f32 %v8484_v4, 0.0 }
 0xacc   : > { %v8533_v12 = vpack.c.bf16 %v8517_v25, %v8516_v14  ;;  %8578 = vrot.lane.b32.xlu0 %v8532_v51, %s12025_s24 }
 0xace   : > { %8580 = vrot.lane.b32.xlu1 %v8533_v12, %s12025_s24 }
 0xae7   : > { %v8551_v23 = vpop.permute.xlu0 %8550 }
 0xae8   : > { %10926 = vmatprep.mubr.msk.bf16.mxu0 %vm2538_vm15, %v8551_v23 }
 0xaf0   : > { %v8553_v41 = vpop.permute.xlu1 %8552 }
 0xaf1   : > { %10927 = vmatmul.mubr.msk.bf16.vlgmr.msra.gmra.mrb[144].mxu0 %vm2538_vm15, %v8553_v41 }
 0xaf2   : > { %v8555_v21 = vpop.permute.xlu0 %8554  ;;  %10959 = vmatpush3.bf16.msra.mxu0 %v11345_v63 }
 0xaf3   : > { %10930 = vmatprep.mubr.msk.bf16.mxu0 %vm2538_vm15, %v8555_v21  ;;  %10960 = vmatprep.subr.bf16.mxu0 %v11346_v8 }
 0xaf6   : > { %10961 = vmatpush3.bf16.msra.mxu0 %v11346_v8 }
 0xafe   : > { %v8557_v49 = vpop.permute.xlu1 %8556 }
 0xaff   : > { %10931 = vmatmul.mubr.msk.bf16.gmra.mrb[148].mxu0 %vm2538_vm15, %v8557_v49 }
 0xb00   : > { %v8559_v19 = vpop.permute.xlu0 %8558 }
 0xb01   : > { %10934 = vmatprep.mubr.msk.bf16.mxu0 %vm2538_vm15, %v8559_v19 }
 0xb08   : > { %v8561_v27 = vpop.permute.xlu1 %8560 }
 0xb09   : > { %10935 = vmatmul.mubr.msk.bf16.gmra.mrb[152].mxu0 %vm2538_vm15, %v8561_v27 }
 0xb0a   : > { %v8563_v54 = vpop.permute.xlu0 %8562 }
 0xb0b   : > { %10938 = vmatprep.mubr.msk.bf16.mxu0 %vm2538_vm15, %v8563_v54 }
 0xb12   : > { %v8565_v13 = vpop.permute.xlu1 %8564 }
 0xb13   : > { %10939 = vmatmul.mubr.msk.bf16.gmra.mrb[156].mxu0 %vm2538_vm15, %v8565_v13 }
 0xb1e   : > { %v8567_v5 = vpop.permute.xlu0 %8566 }
 0xb1f   : > { %10942 = vmatprep.mubr.msk.bf16.mxu0 %vm2538_vm15, %v8567_v5 }
 0xb20   : > { %v8569_v55 = vpop.permute.xlu1 %8568 }
 0xb21   : > { %10943 = vmatmul.mubr.msk.bf16.gmra.mrb[160].mxu0 %vm2538_vm15, %v8569_v55 }
 0xb28   : > { %v8571_v58 = vpop.permute.xlu0 %8570 }
 0xb29   : > { %10946 = vmatprep.mubr.msk.bf16.mxu0 %vm2538_vm15, %v8571_v58 }
 0xb2a   : > { %v8573_v24 = vpop.permute.xlu1 %8572 }
 0xb2b   : > { %10947 = vmatmul.mubr.msk.bf16.gmra.mrb[164].mxu0 %vm2538_vm15, %v8573_v24 }
 0xb32   : > { %v8575_v2 = vpop.permute.xlu0 %8574 }
 0xb33   : > { %10950 = vmatprep.mubr.msk.bf16.mxu0 %vm2538_vm15, %v8575_v2 }
 0xb34   : > { %v8577_v34 = vpop.permute.xlu1 %8576 }
 0xb35   : > { %10951 = vmatmul.mubr.msk.bf16.gmra.mrb[168].mxu0 %vm2538_vm15, %v8577_v34 }
 0xb3e   : > { %v8579_v17 = vpop.permute.xlu0 %8578 }
 0xb3f   : > { %10954 = vmatprep.mubr.msk.bf16.mxu0 %vm2538_vm15, %v8579_v17 }
 0xb40   : > { %v8581_v22 = vpop.permute.xlu1 %8580 }
 0xb41   : > { %10955 = vmatmul.mubr.msk.bf16.gmra.mrb[172].mxu0 %vm2538_vm15, %v8581_v22 }
 0xbc4   : > { %v10928_v31 = vpop.f32.mrb[144].mxu0 }
 0xbc5   : > { %v8811_v59 = vadd.f32 %v10928_v31, %v16403_v1  ;;  %v8676_v43 = vpop.f32.mrb[145].mxu0 }
 0xbc6   : > { %v8809_v6 = vadd.f32 %v16403_v1, %v8676_v43  ;;  %v10929_v18 = vpop.f32.mrb[146].mxu0 }
 0xbc7   : > { %v8812_v29 = vadd.f32 %v10929_v18, %v16403_v1  ;;  %v8679_v61 = vpop.f32.mrb[147].mxu0  ;;  %v8843_v53 = vmax.f32 %v8811_v59, 0.0 }
 0xbc8   : > { %v8810_v30 = vadd.f32 %v16403_v1, %v8679_v61  ;;  %v8841_v50 = vmax.f32 %v8809_v6, 0.0 }
 0xbc9   : > { %v8844_v52 = vmax.f32 %v8812_v29, 0.0 }
 0xbca   : > { %v8842_v62 = vmax.f32 %v8810_v30, 0.0 }
 0xbcb   : > { %v8874_v10 = vpack.c.bf16 %v8844_v52, %v8843_v53 }
 0xbcc   : > { %v8873_v56 = vpack.c.bf16 %v8842_v62, %v8841_v50 }
 0xbce   : > { %10962 = vmatprep.mubr.msk.bf16.mxu0 %vm2538_vm15, %v8873_v56 }
 0xbcf   : > { %10963 = vmatmul.mubr.msk.bf16.vlgmr.msra.gmra.mrb[176].mxu0 %vm2538_vm15, %v8874_v10 }
 0xbd2   : > { %v10932_v32 = vpop.f32.mrb[148].mxu0 }
 0xbd3   : > { %v8815_v26 = vadd.f32 %v10932_v32, %v16403_v1  ;;  %v8692_v3 = vpop.f32.mrb[149].mxu0 }
 0xbd4   : > { %v8813_v45 = vadd.f32 %v16403_v1, %v8692_v3  ;;  %v10933_v60 = vpop.f32.mrb[150].mxu0 }
 0xbd5   : > { %v8816_v63 = vadd.f32 %v10933_v60, %v16403_v1  ;;  %v8695_v48 = vpop.f32.mrb[151].mxu0  ;;  %v8847_v35 = vmax.f32 %v8815_v26, 0.0 }
 0xbd6   : > { %v8814_v15 = vadd.f32 %v16403_v1, %v8695_v48  ;;  %v8845_v47 = vmax.f32 %v8813_v45, 0.0 }
 0xbd7   : > { %v8848_v40 = vmax.f32 %v8816_v63, 0.0 }
 0xbd8   : > { %v8846_v38 = vmax.f32 %v8814_v15, 0.0 }
 0xbd9   : > { %v8876_v7 = vpack.c.bf16 %v8848_v40, %v8847_v35 }
 0xbda   : > { %v8875_v33 = vpack.c.bf16 %v8846_v38, %v8845_v47 }
 0xbdc   : > { %10966 = vmatprep.mubr.msk.bf16.mxu0 %vm2538_vm15, %v8875_v33  ;;  %v10936_v36 = vpop.f32.mrb[152].mxu0 }
 0xbdd   : > { %10967 = vmatmul.mubr.msk.bf16.gmra.mrb[180].mxu0 %vm2538_vm15, %v8876_v7  ;;  %v8819_v42 = vadd.f32 %v10936_v36, %v16403_v1  ;;  %v8708_v39 = vpop.f32.mrb[153].mxu0 }
 0xbde   : > { %v8817_v57 = vadd.f32 %v16403_v1, %v8708_v39  ;;  %v10937_v0 = vpop.f32.mrb[154].mxu0 }
 0xbdf   : > { %v8820_v46 = vadd.f32 %v10937_v0, %v16403_v1  ;;  %v8711_v16 = vpop.f32.mrb[155].mxu0  ;;  %v8851_v20 = vmax.f32 %v8819_v42, 0.0 }
 0xbe0   : > { %v8818_v28 = vadd.f32 %v16403_v1, %v8711_v16  ;;  %v8849_v11 = vmax.f32 %v8817_v57, 0.0 }
 0xbe1   : > { %v8852_v44 = vmax.f32 %v8820_v46, 0.0 }
 0xbe2   : > { %v8850_v4 = vmax.f32 %v8818_v28, 0.0 }
 0xbe3   : > { %v8878_v25 = vpack.c.bf16 %v8852_v44, %v8851_v20 }
 0xbe4   : > { %v8877_v51 = vpack.c.bf16 %v8850_v4, %v8849_v11 }
 0xbe6   : > { %10970 = vmatprep.mubr.msk.bf16.mxu0 %vm2538_vm15, %v8877_v51  ;;  %v10940_v14 = vpop.f32.mrb[156].mxu0 }
 0xbe7   : > { %10971 = vmatmul.mubr.msk.bf16.gmra.mrb[184].mxu0 %vm2538_vm15, %v8878_v25  ;;  %v8823_v12 = vadd.f32 %v10940_v14, %v16403_v1  ;;  %v8724_v23 = vpop.f32.mrb[157].mxu0 }
 0xbe8   : > { %v8821_v8 = vadd.f32 %v16403_v1, %v8724_v23  ;;  %v10941_v41 = vpop.f32.mrb[158].mxu0 }
 0xbe9   : > { %v8824_v21 = vadd.f32 %v10941_v41, %v16403_v1  ;;  %v8727_v49 = vpop.f32.mrb[159].mxu0  ;;  %v8855_v27 = vmax.f32 %v8823_v12, 0.0 }
 0xbea   : > { %v8822_v19 = vadd.f32 %v16403_v1, %v8727_v49  ;;  %v8853_v13 = vmax.f32 %v8821_v8, 0.0 }
 0xbeb   : > { %v8856_v54 = vmax.f32 %v8824_v21, 0.0 }
 0xbec   : > { %v8854_v5 = vmax.f32 %v8822_v19, 0.0 }
 0xbed   : > { %v8880_v55 = vpack.c.bf16 %v8856_v54, %v8855_v27  ;;  %v16456_v54 = vld [vmem:[%s16638_s13] ss:$0 sm:$0xff] }
 0xbee   : > { %v8879_v58 = vpack.c.bf16 %v8854_v5, %v8853_v13 }
 0xbf0   : > { %10974 = vmatprep.mubr.msk.bf16.mxu0 %vm2538_vm15, %v8879_v58 }
 0xbf1   : > { %10975 = vmatmul.mubr.msk.bf16.gmra.mrb[188].mxu0 %vm2538_vm15, %v8880_v55 }
 0xbf4   : > { %v10944_v24 = vpop.f32.mrb[160].mxu0 }
 0xbf5   : > { %v8827_v2 = vadd.f32 %v10944_v24, %v16403_v1  ;;  %v8740_v34 = vpop.f32.mrb[161].mxu0 }
 0xbf6   : > { %v8825_v17 = vadd.f32 %v16403_v1, %v8740_v34  ;;  %v10945_v22 = vpop.f32.mrb[162].mxu0 }
 0xbf7   : > { %v8828_v31 = vadd.f32 %v10945_v22, %v16403_v1  ;;  %v8743_v59 = vpop.f32.mrb[163].mxu0  ;;  %v8859_v6 = vmax.f32 %v8827_v2, 0.0  ;;  %v17894_v2 = vld [vmem:[#allocation33_spill] sm:$0xff] }
 0xbf8   : > { %v8826_v43 = vadd.f32 %v16403_v1, %v8743_v59  ;;  %v8857_v29 = vmax.f32 %v8825_v17, 0.0 }
 0xbf9   : > { %v8860_v18 = vmax.f32 %v8828_v31, 0.0  ;;  %v17895_v31 = vld [vmem:[#allocation32_spill] sm:$0xff] }
 0xbfa   : > { %v8858_v61 = vmax.f32 %v8826_v43, 0.0  ;;  %v17896_v43 = vld [vmem:[#allocation30_spill] sm:$0xff] }
 0xbfb   : > { %v8882_v30 = vpack.c.bf16 %v8860_v18, %v8859_v6 }
 0xbfc   : > { %v8881_v53 = vpack.c.bf16 %v8858_v61, %v8857_v29  ;;  %v17898_v29 = vld [vmem:[#allocation35_spill] sm:$0xff] }
 0xbfe   : > { %10978 = vmatprep.mubr.msk.bf16.mxu0 %vm2538_vm15, %v8881_v53  ;;  %v10948_v52 = vpop.f32.mrb[164].mxu0 }
 0xbff   : > { %10979 = vmatmul.mubr.msk.bf16.gmra.mrb[192].mxu0 %vm2538_vm15, %v8882_v30  ;;  %v8831_v50 = vadd.f32 %v10948_v52, %v16403_v1  ;;  %v8756_v62 = vpop.f32.mrb[165].mxu0 }
 0xc00   : > { %v8829_v10 = vadd.f32 %v16403_v1, %v8756_v62  ;;  %v10949_v56 = vpop.f32.mrb[166].mxu0 }
 0xc01   : > { %v8832_v32 = vadd.f32 %v10949_v56, %v16403_v1  ;;  %v8759_v26 = vpop.f32.mrb[167].mxu0  ;;  %v8863_v45 = vmax.f32 %v8831_v50, 0.0 }
 0xc02   : > { %v8830_v3 = vadd.f32 %v16403_v1, %v8759_v26  ;;  %v8861_v63 = vmax.f32 %v8829_v10, 0.0 }
 0xc03   : > { %v8864_v60 = vmax.f32 %v8832_v32, 0.0 }
 0xc04   : > { %v8862_v48 = vmax.f32 %v8830_v3, 0.0 }
 0xc05   : > { %v8884_v15 = vpack.c.bf16 %v8864_v60, %v8863_v45 }
 0xc06   : > { %v8883_v35 = vpack.c.bf16 %v8862_v48, %v8861_v63  ;;  %v17902_v63 = vld [vmem:[#allocation41_spill] sm:$0xff] }
 0xc08   : > { %10982 = vmatprep.mubr.msk.bf16.mxu0 %vm2538_vm15, %v8883_v35  ;;  %v10952_v40 = vpop.f32.mrb[168].mxu0 }
 0xc09   : > { %10983 = vmatmul.mubr.msk.bf16.gmra.mrb[196].mxu0 %vm2538_vm15, %v8884_v15  ;;  %v8835_v47 = vadd.f32 %v10952_v40, %v16403_v1  ;;  %v8772_v38 = vpop.f32.mrb[169].mxu0  ;;  %v17903_v40 = vld [vmem:[#allocation36_spill] sm:$0xff] }
 0xc0a   : > { %v8833_v7 = vadd.f32 %v16403_v1, %v8772_v38  ;;  %v10953_v33 = vpop.f32.mrb[170].mxu0 }
 0xc0b   : > { %v8836_v36 = vadd.f32 %v10953_v33, %v16403_v1  ;;  %v8775_v42 = vpop.f32.mrb[171].mxu0  ;;  %v8867_v57 = vmax.f32 %v8835_v47, 0.0 }
 0xc0c   : > { %v8834_v39 = vadd.f32 %v16403_v1, %v8775_v42  ;;  %v8865_v46 = vmax.f32 %v8833_v7, 0.0  ;;  %v17905_v7 = vld [vmem:[#allocation34_spill] sm:$0xff]  ;;  %v17906_v42 = vld [vmem:[#allocation45_spill] sm:$0xff] }
 0xc0d   : > { %v8868_v0 = vmax.f32 %v8836_v36, 0.0 }
 0xc0e   : > { %v8866_v16 = vmax.f32 %v8834_v39, 0.0 }
 0xc0f   : > { %v8886_v28 = vpack.c.bf16 %v8868_v0, %v8867_v57 }
 0xc10   : > { %v8885_v20 = vpack.c.bf16 %v8866_v16, %v8865_v46 }
 0xc12   : > { %10986 = vmatprep.mubr.msk.bf16.mxu0 %vm2538_vm15, %v8885_v20 }
 0xc13   : > { %10987 = vmatmul.mubr.msk.bf16.gmra.mrb[200].mxu0 %vm2538_vm15, %v8886_v28 }
 0xc14   : > { %v10956_v44 = vpop.f32.mrb[172].mxu0 }
 0xc15   : > { %v8839_v11 = vadd.f32 %v10956_v44, %v16403_v1  ;;  %v8788_v4 = vpop.f32.mrb[173].mxu0 }
 0xc16   : > { %v8837_v25 = vadd.f32 %v16403_v1, %v8788_v4  ;;  %v10957_v51 = vpop.f32.mrb[174].mxu0 }
 0xc17   : > { %v8840_v14 = vadd.f32 %v10957_v51, %v16403_v1  ;;  %v8791_v12 = vpop.f32.mrb[175].mxu0  ;;  %v8871_v8 = vmax.f32 %v8839_v11, 0.0 }
 0xc18   : > { %v8838_v23 = vadd.f32 %v16403_v1, %v8791_v12  ;;  %v8869_v21 = vmax.f32 %v8837_v25, 0.0  ;;  %v17910_v12 = vld [vmem:[#allocation48_spill] sm:$0xff] }
 0xc19   : > { %v8872_v41 = vmax.f32 %v8840_v14, 0.0 }
 0xc1a   : > { %v8870_v49 = vmax.f32 %v8838_v23, 0.0 }
 0xc1b   : > { %v8888_v19 = vpack.c.bf16 %v8872_v41, %v8871_v8 }
 0xc1c   : > { %v8887_v27 = vpack.c.bf16 %v8870_v49, %v8869_v21  ;;  %v17911_v21 = vld [vmem:[#allocation47_spill] sm:$0xff] }
 0xc1e   : > { %10990 = vmatprep.mubr.msk.bf16.mxu0 %vm2538_vm15, %v8887_v27  ;;  %v17913_v27 = vld [vmem:[#allocation44_spill] sm:$0xff] }
 0xc1f   : > { %10991 = vmatmul.mubr.msk.bf16.gmra.mrb[204].mxu0 %vm2538_vm15, %v8888_v19  ;;  %vm17897_vm15 = vcmask 15360  }
 0xc20   : > { %vm17899_vm1 = vmmov %vm17897_vm15 }
 0xc21   : > { %vm17900_vm0 = vmmov %vm17899_vm1 }
 0xc22   : > { %vm17901_vm10 = vmmov %vm17900_vm0 }
 0xc23   : > { %vm17904_vm7 = vmmov %vm17900_vm0 }
 0xc24   : > { %vm17907_vm9 = vmmov %vm17900_vm0 }
 0xc25   : > { %vm17908_vm12 = vmmov %vm17900_vm0 }
 0xc26   : > { %vm17909_vm13 = vmmov %vm17900_vm0 }
 0xc27   : > { %vm17912_vm4 = vmmov %vm17900_vm0 }
 0xc28   : > { %vm17915_vm11 = vmmov %vm17900_vm0 }
 0xc29   : > { %vm17916_vm6 = vmmov %vm17900_vm0 }
 0xc2a   : > { %vm17917_vm3 = vmmov %vm17900_vm0 }
 0xc2b   : > { %vm17919_vm14 = vmmov %vm17900_vm0 }
 0xc2c   : > { %vm17921_vm2 = vmmov %vm17900_vm0 }
 0xc2d   : > { %vm17922_vm8 = vmmov %vm17900_vm0 }
 0xc2e   : > { %vm17923_vm5 = vmmov %vm17900_vm0 }
 0xca2   : > { %v10964_v13 = vpop.f32.mrb[176].mxu0 }
 0xca3   : > { %v8983_v5 = vpop.f32.mrb[177].mxu0  ;;  %v9118_v55 = vadd.f32 %v10964_v13, %v16456_v54 }
 0xca4   : > { %v9116_v1 = vadd.f32 %v16456_v54, %v8983_v5  ;;  %v10965_v58 = vpop.f32.mrb[178].mxu0 }
 0xca5   : > { %v8986_v24 = vpop.f32.mrb[179].mxu0  ;;  %v9119_v17 = vadd.f32 %v10965_v58, %v16456_v54  ;;  %v9232_v59 = vmul.f32 %v17895_v31, %v9118_v55 }
 0xca6   : > { %v9230_v34 = vmul.f32 %v17894_v2, %v9116_v1  ;;  %v9117_v22 = vadd.f32 %v16456_v54, %v8986_v24  ;;  %9148 = vxpose.xlu1.b32.start [1/16] (narrow) %v9116_v1, 8 }
 0xca7   : > { %v9233_v61 = vmul.f32 %v17898_v29, %v9119_v17  ;;  %v9265_v52 = vsel %vm17900_vm0, %v9232_v59, 0.0 }
 0xca8   : > { %v9231_v6 = vmul.f32 %v17896_v43, %v9117_v22  ;;  %v9262_v18 = vsel %vm17897_vm15, %v9230_v34, 0.0  ;;  %vm17924_vm15 = vmmov %vm17900_vm0 }
 0xca9   : > { %v9267_v62 = vsel %vm17901_vm10, %v9233_v61, 0.0  ;;  %vm17926_vm10 = vmmov %vm17900_vm0 }
 0xcaa   : > { %v9263_v30 = vsel %vm17899_vm1, %v9231_v6, 0.0  ;;  %9149 = vxpose.xlu1.b32.cont [2/16] (narrow) %v9117_v22, 8  ;;  %vm17925_vm1 = vmmov %vm17900_vm0 }
 0xcab   : > { %v9264_v53 = vadd.f32 %v9263_v30, %v9262_v18 }
 0xcad   : > { %v9266_v50 = vadd.f32 %v9265_v52, %v9264_v53 }
 0xcae   : > { %9150 = vxpose.xlu1.b32.cont [3/16] (narrow) %v9118_v55, 8  ;;  %v17914_v55 = vld [vmem:[#allocation51_spill] sm:$0xff] }
 0xcaf   : > { %v9268_v10 = vadd.f32 %v9267_v62, %v9266_v50  ;;  %v17918_v50 = vld [vmem:[#allocation77_spill] sm:$0xff] }
 0xcb0   : > { %v10968_v56 = vpop.f32.mrb[180].mxu0 }
 0xcb1   : > { %v8999_v32 = vpop.f32.mrb[181].mxu0  ;;  %v9122_v26 = vadd.f32 %v10968_v56, %v16456_v54 }
 0xcb2   : > { %v9120_v3 = vadd.f32 %v16456_v54, %v8999_v32  ;;  %v10969_v45 = vpop.f32.mrb[182].mxu0  ;;  %9151 = vxpose.xlu1.b32.cont [4/16] (narrow) %v9119_v17, 8 }
 0xcb3   : > { %v9002_v60 = vpop.f32.mrb[183].mxu0  ;;  %v9123_v15 = vadd.f32 %v10969_v45, %v16456_v54  ;;  %v9236_v47 = vmul.f32 %v17903_v40, %v9122_v26 }
 0xcb4   : > { %v9234_v48 = vmul.f32 %v17902_v63, %v9120_v3  ;;  %v9121_v35 = vadd.f32 %v16456_v54, %v9002_v60  ;;  %v17920_v60 = vld [vmem:[#allocation80_spill] sm:$0xff] }
 0xcb5   : > { %v9237_v39 = vmul.f32 %v17906_v42, %v9123_v15  ;;  %v9273_v46 = vsel %vm17908_vm12, %v9236_v47, 0.0  ;;  %vm17929_vm12 = vmmov %vm17900_vm0 }
 0xcb6   : > { %v9269_v38 = vsel %vm17904_vm7, %v9234_v48, 0.0  ;;  %v9235_v33 = vmul.f32 %v17905_v7, %v9121_v35  ;;  %9152 = vxpose.xlu1.b32.cont [5/16] (narrow) %v9120_v3, 8  ;;  %vm17927_vm7 = vmmov %vm17900_vm0 }
 0xcb7   : > { %v9270_v36 = vadd.f32 %v9269_v38, %v9268_v10  ;;  %v9275_v20 = vsel %vm17909_vm13, %v9237_v39, 0.0  ;;  %vm17930_vm13 = vmmov %vm17900_vm0 }
 0xcb8   : > { %v9271_v57 = vsel %vm17907_vm9, %v9235_v33, 0.0  ;;  %vm17928_vm9 = vmmov %vm17900_vm0 }
 0xcb9   : > { %v9272_v0 = vadd.f32 %v9271_v57, %v9270_v36 }
 0xcba   : > { %9153 = vxpose.xlu1.b32.cont [6/16] (narrow) %v9121_v35, 8  ;;  %v10972_v28 = vpop.f32.mrb[184].mxu0 }
 0xcbb   : > { %v9274_v16 = vadd.f32 %v9273_v46, %v9272_v0  ;;  %v9015_v44 = vpop.f32.mrb[185].mxu0  ;;  %v9126_v11 = vadd.f32 %v10972_v28, %v16456_v54 }
 0xcbc   : > { %v9124_v4 = vadd.f32 %v16456_v54, %v9015_v44  ;;  %v10973_v51 = vpop.f32.mrb[186].mxu0 }
 0xcbd   : > { %v9276_v25 = vadd.f32 %v9275_v20, %v9274_v16  ;;  %v9018_v14 = vpop.f32.mrb[187].mxu0  ;;  %v9127_v8 = vadd.f32 %v10973_v51, %v16456_v54  ;;  %v9240_v49 = vmul.f32 %v17911_v21, %v9126_v11 }
 0xcbe   : > { %9154 = vxpose.xlu1.b32.cont [7/16] (narrow) %v9122_v26, 8  ;;  %v9238_v23 = vmul.f32 %v17910_v12, %v9124_v4  ;;  %v9125_v41 = vadd.f32 %v16456_v54, %v9018_v14 }
 0xcbf   : > { %v9241_v1 = vmul.f32 %v17914_v55, %v9127_v8  ;;  %v9281_v34 = vsel %vm17916_vm6, %v9240_v49, 0.0  ;;  %vm17933_vm6 = vmmov %vm17900_vm0 }
 0xcc0   : > { %v9277_v19 = vsel %vm17912_vm4, %v9238_v23, 0.0  ;;  %v9239_v13 = vmul.f32 %v17913_v27, %v9125_v41  ;;  %vm17931_vm4 = vmmov %vm17900_vm0 }
 0xcc1   : > { %v9278_v5 = vadd.f32 %v9277_v19, %v9276_v25  ;;  %v9283_v22 = vsel %vm17917_vm3, %v9241_v1, 0.0  ;;  %vm17934_vm3 = vmmov %vm17900_vm0 }
 0xcc2   : > { %9155 = vxpose.xlu1.b32.cont [8/16] (narrow) %v9123_v15, 8  ;;  %v9279_v58 = vsel %vm17915_vm11, %v9239_v13, 0.0  ;;  %vm17932_vm11 = vmmov %vm17900_vm0 }
 0xcc3   : > { %v9280_v24 = vadd.f32 %v9279_v58, %v9278_v5 }
 0xcc4   : > { %v10976_v59 = vpop.f32.mrb[188].mxu0 }
 0xcc5   : > { %v9282_v17 = vadd.f32 %v9281_v34, %v9280_v24  ;;  %v9031_v6 = vpop.f32.mrb[189].mxu0  ;;  %v9130_v61 = vadd.f32 %v10976_v59, %v16456_v54 }
 0xcc6   : > { %9156 = vxpose.xlu1.b32.cont [9/16] (narrow) %v9124_v4, 8  ;;  %v9128_v30 = vadd.f32 %v16456_v54, %v9031_v6  ;;  %v10977_v53 = vpop.f32.mrb[190].mxu0 }
 0xcc7   : > { %v9284_v18 = vadd.f32 %v9283_v22, %v9282_v17  ;;  %v9034_v52 = vpop.f32.mrb[191].mxu0  ;;  %v9131_v10 = vadd.f32 %v10977_v53, %v16456_v54  ;;  %v9244_v32 = vmul.f32 %v17682_v9, %v9130_v61 }
 0xcc8   : > { %v9242_v62 = vmul.f32 %v17918_v50, %v9128_v30  ;;  %v9129_v56 = vadd.f32 %v16456_v54, %v9034_v52 }
 0xcc9   : > { %v9245_v48 = vmul.f32 %v17920_v60, %v9131_v10  ;;  %v9289_v47 = vsel %vm17922_vm8, %v9244_v32, 0.0  ;;  %vm17937_vm8 = vmmov %vm17900_vm0 }
 0xcca   : > { %9157 = vxpose.xlu1.b32.cont [10/16] (narrow) %v9125_v41, 8  ;;  %v9285_v26 = vsel %vm17919_vm14, %v9242_v62, 0.0  ;;  %v9243_v3 = vmul.f32 %v17680_v37, %v9129_v56  ;;  %vm17935_vm14 = vmmov %vm17900_vm0 }
 0xccb   : > { %v9286_v45 = vadd.f32 %v9285_v26, %v9284_v18  ;;  %v9291_v33 = vsel %vm17923_vm5, %v9245_v48, 0.0  ;;  %vm17938_vm5 = vmmov %vm17900_vm0 }
 0xccc   : > { %v9287_v15 = vsel %vm17921_vm2, %v9243_v3, 0.0  ;;  %vm17936_vm2 = vmmov %vm17900_vm0 }
 0xccd   : > { %v9288_v35 = vadd.f32 %v9287_v15, %v9286_v45 }
 0xcce   : > { %9158 = vxpose.xlu1.b32.cont [11/16] (narrow) %v9126_v11, 8 }
 0xccf   : > { %v9290_v38 = vadd.f32 %v9289_v47, %v9288_v35 }
 0xcd1   : > { %v9292_v36 = vadd.f32 %v9291_v33, %v9290_v38 }
 0xcd2   : > { %9159 = vxpose.xlu1.b32.cont [12/16] (narrow) %v9127_v8, 8  ;;  %v10980_v39 = vpop.f32.mrb[192].mxu0 }
 0xcd3   : > { %v9047_v57 = vpop.f32.mrb[193].mxu0  ;;  %v16507_v0 = vadd.f32 %v10980_v39, %v16456_v54 }
 0xcd4   : > { %v16510_v46 = vadd.f32 %v16456_v54, %v9047_v57  ;;  %v10981_v16 = vpop.f32.mrb[194].mxu0 }
 0xcd5   : > { %v9050_v28 = vpop.f32.mrb[195].mxu0  ;;  %v9248_v11 = vmul.f32 %v17895_v31, %v16507_v0  ;;  %v16521_v25 = vadd.f32 %v10981_v16, %v16456_v54 }
 0xcd6   : > { %9160 = vxpose.xlu1.b32.cont [13/16] (narrow) %v9128_v30, 8  ;;  %v9246_v20 = vmul.f32 %v17894_v2, %v16510_v46  ;;  %v16515_v44 = vadd.f32 %v16456_v54, %v9050_v28 }
 0xcd7   : > { %v9297_v2 = vsel %vm17900_vm0, %v9248_v11, 0.0  ;;  %v9249_v41 = vmul.f32 %v17898_v29, %v16521_v25 }
 0xcd8   : > { %v9293_v4 = vsel %vm17924_vm15, %v9246_v20, 0.0  ;;  %v9247_v51 = vmul.f32 %v17896_v43, %v16515_v44 }
 0xcd9   : > { %v9294_v14 = vadd.f32 %v9293_v4, %v9292_v36  ;;  %v9299_v13 = vsel %vm17926_vm10, %v9249_v41, 0.0 }
 0xcda   : > { %9161 = vxpose.xlu1.b32.cont [14/16] (narrow) %v9129_v56, 8  ;;  %v9295_v23 = vsel %vm17925_vm1, %v9247_v51, 0.0 }
 0xcdb   : > { %v9296_v8 = vadd.f32 %v9295_v23, %v9294_v14 }
 0xcdc   : > { %v10984_v31 = vpop.f32.mrb[196].mxu0 }
 0xcdd   : > { %v9298_v49 = vadd.f32 %v9297_v2, %v9296_v8  ;;  %v9063_v19 = vpop.f32.mrb[197].mxu0  ;;  %v16531_v5 = vadd.f32 %v10984_v31, %v16456_v54 }
 0xcde   : > { %9162 = vxpose.xlu1.b32.cont [15/16] (narrow) %v9130_v61, 8  ;;  %v16534_v43 = vadd.f32 %v16456_v54, %v9063_v19  ;;  %v10985_v1 = vpop.f32.mrb[198].mxu0 }
 0xcdf   : > { %v9300_v58 = vadd.f32 %v9299_v13, %v9298_v49  ;;  %v9066_v24 = vpop.f32.mrb[199].mxu0  ;;  %v9252_v17 = vmul.f32 %v17903_v40, %v16531_v5  ;;  %v16545_v59 = vadd.f32 %v10985_v1, %v16456_v54 }
 0xce0   : > { %v9250_v34 = vmul.f32 %v17902_v63, %v16534_v43  ;;  %v16539_v29 = vadd.f32 %v16456_v54, %v9066_v24 }
 0xce1   : > { %v9305_v63 = vsel %vm17929_vm12, %v9252_v17, 0.0  ;;  %v9253_v53 = vmul.f32 %v17906_v42, %v16545_v59 }
 0xce2   : > { %9163 = vxpose.xlu1.b32.end [16/16] (narrow) %v9131_v10, 8  ;;  %v9301_v22 = vsel %vm17927_vm7, %v9250_v34, 0.0  ;;  %v9251_v6 = vmul.f32 %v17905_v7, %v16539_v29  ;;  %v650_v34 = vld [vmem:[%s505_s27] sm:$0x3] }
 0xce3   : > { %v9302_v18 = vadd.f32 %v9301_v22, %v9300_v58  ;;  %v9307_v10 = vsel %vm17930_vm13, %v9253_v53, 0.0 }
 0xce4   : > { %v9303_v61 = vsel %vm17928_vm9, %v9251_v6, 0.0 }
 0xce5   : > { %v9304_v30 = vadd.f32 %v9303_v61, %v9302_v18 }
 0xce6   : > { %v10988_v62 = vpop.f32.mrb[200].mxu0 }
 0xce7   : > { %v9306_v52 = vadd.f32 %v9305_v63, %v9304_v30  ;;  %v9079_v40 = vpop.f32.mrb[201].mxu0  ;;  %v16555_v56 = vadd.f32 %v10988_v62, %v16456_v54  ;;  %v651_v63 = vld [vmem:[%s505_s27 + $0x2] sm:$0x3] }
 0xce8   : > { %v9140_v32 = vadd.f32 %v16456_v54, %v9079_v40  ;;  %v10989_v7 = vpop.f32.mrb[202].mxu0 }
 0xce9   : > { %v9308_v26 = vadd.f32 %v9307_v10, %v9306_v52  ;;  %v9082_v3 = vpop.f32.mrb[203].mxu0  ;;  %v9256_v42 = vmul.f32 %v17911_v21, %v16555_v56  ;;  %v9143_v35 = vadd.f32 %v10989_v7, %v16456_v54 }
 0xcea   : > { %v9254_v45 = vmul.f32 %v17910_v12, %v9140_v32  ;;  %v9141_v48 = vadd.f32 %v16456_v54, %v9082_v3 }
 0xceb   : > { %v9313_v39 = vsel %vm17933_vm6, %v9256_v42, 0.0  ;;  %v9257_v57 = vmul.f32 %v17914_v55, %v9143_v35 }
 0xcec   : > { %v9309_v15 = vsel %vm17931_vm4, %v9254_v45, 0.0  ;;  %v9255_v47 = vmul.f32 %v17913_v27, %v9141_v48 }
 0xced   : > { %v9310_v38 = vadd.f32 %v9309_v15, %v9308_v26  ;;  %v9315_v20 = vsel %vm17934_vm3, %v9257_v57, 0.0 }
 0xcee   : > { %v9311_v33 = vsel %vm17932_vm11, %v9255_v47, 0.0 }
 0xcef   : > { %v9312_v36 = vadd.f32 %v9311_v33, %v9310_v38 }
 0xcf1   : > { %v9314_v12 = vadd.f32 %v9313_v39, %v9312_v36 }
 0xcf2   : > { %v10992_v16 = vpop.f32.mrb[204].mxu0 }
 0xcf3   : > { %v9095_v28 = vpop.f32.mrb[205].mxu0  ;;  %v9146_v21 = vadd.f32 %v10992_v16, %v16456_v54  ;;  %v9316_v51 = vadd.f32 %v9315_v20, %v9314_v12 }
 0xcf4   : > { %v9144_v11 = vadd.f32 %v16456_v54, %v9095_v28  ;;  %v10993_v4 = vpop.f32.mrb[206].mxu0 }
 0xcf5   : > { %v9098_v27 = vpop.f32.mrb[207].mxu0  ;;  %v9147_v23 = vadd.f32 %v10993_v4, %v16456_v54  ;;  %v9260_v55 = vmul.f32 %v17682_v9, %v9146_v21 }
 0xcf6   : > { %v9258_v14 = vmul.f32 %v17918_v50, %v9144_v11  ;;  %v9145_v8 = vadd.f32 %v16456_v54, %v9098_v27 }
 0xcf7   : > { %v9261_v31 = vmul.f32 %v17920_v60, %v9147_v23  ;;  %v9321_v1 = vsel %vm17937_vm8, %v9260_v55, 0.0 }
 0xcf8   : > { %v9317_v2 = vsel %vm17935_vm14, %v9258_v14, 0.0  ;;  %v9259_v41 = vmul.f32 %v17680_v37, %v9145_v8 }
 0xcf9   : > { %v9318_v49 = vadd.f32 %v9317_v2, %v9316_v51  ;;  %v9323_v58 = vsel %vm17938_vm5, %v9261_v31, 0.0 }
 0xcfa   : > { %v9319_v19 = vsel %vm17936_vm2, %v9259_v41, 0.0 }
 0xcfb   : > { %v9320_v13 = vadd.f32 %v9319_v19, %v9318_v49 }
 0xcfd   : > { %v9322_v50 = vadd.f32 %v9321_v1, %v9320_v13 }
 0xcff   : > { %v9324_v24 = vadd.f32 %v9323_v58, %v9322_v50 }
 0xd01   : > { %9325 = vadd.xlane.f32.xlu0 %v9324_v24 }
 0xd26   : > { %v9164_v54 = vpop.trf.xlu1 }
 0xd27   : > { %v9220_v9 = vsub.f32 0.0, %v9164_v54  ;;  %v9214_v60 = vrot.slane %v9164_v54, 2 }
 0xd29   : > { %v9222_v37 = vmul.f32 1.442695, %v9220_v9  ;;  %v9218_v17 = vsub.f32 %v650_v34, %v9214_v60 }
 0xd2b   : > { %11995 = vpow2.f32 %v9222_v37 }
 0xd2e   : > { %9180 = vxpose.xlu0.b32.start [1/16] (narrow) %v16510_v46, 8 }
 0xd32   : > { %9181 = vxpose.xlu0.b32.cont [2/16] (narrow) %v16515_v44, 8 }
 0xd35   : > { %v11996_v22 = vpop.eup %11995 }
 0xd36   : > { %v9226_v6 = vmul.f32 %v11996_v22, %v9218_v17  ;;  %9182 = vxpose.xlu0.b32.cont [3/16] (narrow) %v16507_v0, 8 }
 0xd38   : > { %9228 = vst [vmem:[%s16589_s28] sm:$0x3] %v9226_v6 }
 0xd3a   : > { %9183 = vxpose.xlu0.b32.cont [4/16] (narrow) %v16521_v25, 8 }
 0xd3e   : > { %9184 = vxpose.xlu0.b32.cont [5/16] (narrow) %v16534_v43, 8 }
 0xd3f   : > { %v9365_v10 = vld [vmem:[%s16589_s28] sm:$0x3] (%p12132_p5) }
 0xd40   : > { %9366 = vst [vmem:[%s9349_s20] sm:$0x3] (%p12132_p5), %v9365_v10 }
 0xd42   : > { %9185 = vxpose.xlu0.b32.cont [6/16] (narrow) %v16539_v29, 8 }
 0xd46   : > { %9186 = vxpose.xlu0.b32.cont [7/16] (narrow) %v16531_v5, 8 }
 0xd4a   : > { %9187 = vxpose.xlu0.b32.cont [8/16] (narrow) %v16545_v59, 8 }
 0xd4e   : > { %9188 = vxpose.xlu0.b32.cont [9/16] (narrow) %v9140_v32, 8 }
 0xd52   : > { %9189 = vxpose.xlu0.b32.cont [10/16] (narrow) %v9141_v48, 8 }
 0xd56   : > { %9190 = vxpose.xlu0.b32.cont [11/16] (narrow) %v16555_v56, 8 }
 0xd5a   : > { %9191 = vxpose.xlu0.b32.cont [12/16] (narrow) %v9143_v35, 8 }
 0xd5e   : > { %9192 = vxpose.xlu0.b32.cont [13/16] (narrow) %v9144_v11, 8 }
 0xd62   : > { %9193 = vxpose.xlu0.b32.cont [14/16] (narrow) %v9145_v8, 8 }
 0xd66   : > { %9194 = vxpose.xlu0.b32.cont [15/16] (narrow) %v9146_v21, 8 }
 0xd6a   : > { %9195 = vxpose.xlu0.b32.end [16/16] (narrow) %v9147_v23, 8 }
 0xd8e   : > { %v9326_v0 = vpop.xlane.xlu0 %9325 }
 0xd8f   : > { %v9327_v46 = vrot.slane %v9326_v0, 4 }
 0xd91   : > { %v9328_v44 = vadd.f32 %v9327_v46, %v9326_v0 }
 0xd93   : > { %v9329_v25 = vrot.slane %v9328_v44, 2 }
 0xd95   : > { %v9330_v43 = vadd.f32 %v9329_v25, %v9328_v44 }
 0xd97   : > { %v9331_v5 = vrot.slane %v9330_v43, 1 }
 0xd99   : > { %v9332_v29 = vadd.f32 %v9331_v5, %v9330_v43 }
 0xd9b   : > { %11289 = vpush %v9332_v29 }
 0xdae   : > { %v9196_v59 = vpop.trf.xlu0 }
 0xdaf   : > { %v9221_v18 = vsub.f32 0.0, %v9196_v59  ;;  %v9215_v30 = vrot.slane %v9196_v59, 2 }
 0xdb1   : > { %v9224_v61 = vmul.f32 1.442695, %v9221_v18  ;;  %v9219_v53 = vsub.f32 %v651_v63, %v9215_v30 }
 0xdb3   : > { %11997 = vpow2.f32 %v9224_v61 }
 0xdbd   : > { %v11998_v52 = vpop.eup %11997 }
 0xdbe   : > { %v9227_v62 = vmul.f32 %v11998_v52, %v9219_v53 }
 0xdc0   : > { %9229 = vst [vmem:[%s16589_s28 + $0x2] sm:$0x3] %v9227_v62 }
 0xdc7   : > { %v9367_v56 = vld [vmem:[%s16589_s28 + $0x2] sm:$0x3] (%p12132_p5) }
 0xdc8   : > { %9368 = vst [vmem:[%s9349_s20 + $0x8] sm:$0x3] (%p12132_p5), %v9367_v56 }
 0xdca   : > { %9347 = sbr.rel (!%p12132_p5) target bundleno = 3537 (0xdd1), region = 114 }
 0xdcc   : > { %s11290_s29 = spop %11289 }
 0xdcd   : > { %s9334_s16 = ssub.f32 0.0, %s11290_s29 }
 0xdcf   : > { %v9335_v40 = vstv %s9334_s16 }
 0xdd0   : > { %9336 = vst [vmem:[%s576_s25] sm:$0xff] %v9335_v40 }
 0xdd1 PF: > { %s17939_s29 = sld [smem:[#allocation4_spill]]  ;;  %p23_p11 = scmp.ge.s32.totalorder %s12122_s22, 6  }
 0xdd2   : > { %s17940_s18 = smov %s12017_s19  ;;  %s17942_s20 = smov %s12122_s22 }
 0xdd3   :  { %25 = sbr.rel (!%p23_p11) target bundleno = 2 (0x2), region = 197 }
 0xdd7   : > { %s17941_s19 = smov %s17939_s29 }

</bundles_post_ra>
